<compile_context>
chip_gen: v6e
topology: v6e:2x2x1
jax: 0.10.0
libtpu: 0.0.40
codegen_flags: <defaults>
</compile_context>

<pallas_src>
import functools

import numpy as np

import jax
import jax.numpy as jnp
from jax.experimental import pallas as pl
from jax.experimental.pallas import tpu as pltpu

_EPS = 1e-5
_LANES = 128
_STEM_K = 10          # stem conv kernel width (1, 10)
_POOL_K = 10          # maxpool window (1, 10), stride 1 (module sets stride=1)
_NUM_BLOCKS = 4
_BLOCK_CH = (32, 64, 128, 256, 512)   # stem-out followed by per-block out chans

_VMEM = pl.BlockSpec(memory_space=pltpu.MemorySpace.VMEM)
_ANY = pl.BlockSpec(memory_space=pl.ANY)


def _round_up(x, m):
    return (x + m - 1) // m * m


def _bn_pack_layout():
    """(offset, channels) for every BN layer inside the packed gamma/beta rows."""
    chans = [_BLOCK_CH[0]]
    for c in _BLOCK_CH[1:]:
        chans += [c, c, c]                       # bn1, bn2, bn3 per block
    offs, off = [], 0
    for c in chans:
        offs.append(off)
        off += _round_up(c, _LANES)              # lane-aligned segments
    return tuple(zip(offs, chans)), off


# ----------------------------------------------------------------------------
# In-kernel helpers (traced once inside the single fused kernel).
# ----------------------------------------------------------------------------
def _bn(acc, gamma, beta):
    """Train-mode BatchNorm over the row axis, single pass, f32 accumulation."""
    mu = jnp.mean(acc, axis=0, keepdims=True)
    ex2 = jnp.mean(acc * acc, axis=0, keepdims=True)
    var = jnp.maximum(ex2 - mu * mu, 0.0)
    scale = gamma * jax.lax.rsqrt(var + _EPS)
    return acc * scale + (beta - mu * scale)


def _residual_block(h, sel1, mask2, w1r, w2r, w3, g1, b1, g2, b2, g3, b3):
    """Downsampling ResidualBlock on flattened (B*L_in, Cin) bf16 rows.

    sel1:  (3*M, B*L_in) 0/1 gather for the three stride-2 conv taps.
    mask2: (M, 2) 0/1 per-batch boundary masks for the stride-1 conv shifts.
    w1r/w2r: (3*Cin, Cout)/(3*Cout, Cout) tap-concatenated conv weights.
    """
    m = sel1.shape[0] // 3
    # conv1: (1,3) stride (1,2) pad (0,1).  One 0/1 gather matmul fetches all
    # three taps; they are lane-concatenated so the weight matmul has K=3*Cin.
    taps = jnp.dot(sel1, h, preferred_element_type=jnp.float32).astype(jnp.bfloat16)
    t_m1, t_0, t_p1 = taps[0:m], taps[m:2 * m], taps[2 * m:3 * m]
    x1 = jnp.concatenate([t_m1, t_0, t_p1], axis=1)            # (m, 3*Cin)
    acc1 = jnp.dot(x1, w1r, preferred_element_type=jnp.float32)
    h1f = jnp.maximum(_bn(acc1, g1, b1), 0.0)                  # (m, Cout) f32
    h1 = h1f.astype(jnp.bfloat16)
    # conv2: (1,3) stride 1 pad (0,1).  +-1 taps are row shifts of h1, zeroed
    # at per-batch boundaries by precomputed masks, then K-concatenated.
    # TODO(synk): pltpu.roll would keep the shift on the XLU slot; jnp.roll
    # (static shift -> slice+concat) is used for guaranteed roll semantics.
    u_m1 = (jnp.roll(h1f, 1, axis=0) * mask2[:, 0:1]).astype(jnp.bfloat16)
    u_p1 = (jnp.roll(h1f, -1, axis=0) * mask2[:, 1:2]).astype(jnp.bfloat16)
    x2 = jnp.concatenate([u_m1, h1, u_p1], axis=1)             # (m, 3*Cout)
    main = _bn(jnp.dot(x2, w2r, preferred_element_type=jnp.float32), g2, b2)
    # shortcut: (1,1) stride (1,2) conv + BN; its input is conv1's centre tap.
    sc = _bn(jnp.dot(t_0, w3, preferred_element_type=jnp.float32), g3, b3)
    return jnp.maximum(main + sc, 0.0).astype(jnp.bfloat16)


def _mini_resnet_kernel(*refs, bn_offs):
    """Whole-network fused kernel.

    refs = 28 inputs (patches, stem_w, gamma/beta packs, pool/avg gather
    matrices, fc weights, and per block [sel1, mask2, w1, w2, w3]) + 1 output
    + scratch (6 VMEM weight buffers for blk3/blk4 + DMA semaphores).
    """
    n_in = 8 + 5 * _NUM_BLOCKS
    in_refs, out_ref, scratch = refs[:n_in], refs[n_in], refs[n_in + 1:]
    (patch_ref, stem_w_ref, gam_ref, bet_ref, pool_ref, avg_ref,
     fcw_ref, fcb_ref) = in_refs[:8]
    blk_refs = in_refs[8:]
    wbuf, dma_sem = scratch[:6], scratch[6]

    # ---- kick off blk3/blk4 weight DMAs (HBM -> VMEM scratch) so the ~2.9MiB
    # transfer overlaps stem / maxpool / blk1 / blk2 compute -------------------
    hbm_w = [blk_refs[5 * b + 2 + j] for b in (2, 3) for j in range(3)]
    copies = []
    for i, (src, dst) in enumerate(zip(hbm_w, wbuf)):
        cp = pltpu.make_async_copy(src, dst, dma_sem.at[i])
        cp.start()
        copies.append(cp)

    def bn_params(idx):
        off, c = bn_offs[idx]
        return gam_ref[:, off:off + c], bet_ref[:, off:off + c]

    # ---- stem: (1,10) conv (im2col patches) + BN(batch stats) + ReLU --------
    g0, b0 = bn_params(0)
    acc = jnp.dot(patch_ref[...], stem_w_ref[...],
                  preferred_element_type=jnp.float32)          # (B*l_stem, 32)
    h = jnp.maximum(_bn(acc, g0, b0), 0.0).astype(jnp.bfloat16)

    # ---- maxpool (1,10), stride 1: one 0/1 gather matmul fetches all 10
    # window taps (row block t holds tap t), then a 9-op running max ----------
    taps = jnp.dot(pool_ref[...], h, preferred_element_type=jnp.float32)
    r = taps.shape[0] // _POOL_K                               # B*l_pool rows
    m = taps[0:r]
    for t in range(1, _POOL_K):
        m = jnp.maximum(m, taps[t * r:(t + 1) * r])
    h = m.astype(jnp.bfloat16)                                 # (B*l_pool, 32)

    # ---- residual blocks (all downsample, width halves each time) -----------
    for blk in range(_NUM_BLOCKS):
        sel_ref, mask_ref, w1_ref, w2_ref, w3_ref = blk_refs[5 * blk:5 * blk + 5]
        if blk >= 2:                     # weights were prefetched into scratch
            base = 3 * (blk - 2)
            for j in range(3):
                copies[base + j].wait()
            w1 = wbuf[base][...]
            w2 = wbuf[base + 1][...]
            w3 = wbuf[base + 2][...]
        else:
            w1, w2, w3 = w1_ref[...], w2_ref[...], w3_ref[...]
        g1, b1 = bn_params(1 + 3 * blk)
        g2, b2 = bn_params(2 + 3 * blk)
        g3, b3 = bn_params(3 + 3 * blk)
        h = _residual_block(h, sel_ref[...], mask_ref[...], w1, w2, w3,
                            g1, b1, g2, b2, g3, b3)

    # ---- head: adaptive avgpool (averaging matmul) + fc ---------------------
    pooled = jnp.dot(avg_ref[...], h, preferred_element_type=jnp.float32)
    logits = jnp.dot(pooled.astype(jnp.bfloat16), fcw_ref[...],
                     preferred_element_type=jnp.float32) + fcb_ref[...]
    out_ref[...] = logits                                      # (B, 128) lane-dense


# ----------------------------------------------------------------------------
# One-time preparation (outside the jitted per-call path).
# ----------------------------------------------------------------------------
def prepare_params(params):
    """Cast/reshape/pad parameters to kernel layouts ONCE and reuse them."""
    layout, total = _bn_pack_layout()
    gam = np.zeros((1, total), np.float32)
    bet = np.zeros((1, total), np.float32)
    gammas = [params["stem_g"]] + [params[f"blk{i}"][k]
                                   for i in range(1, 5) for k in ("g1", "g2", "g3")]
    betas = [params["stem_b"]] + [params[f"blk{i}"][k]
                                  for i in range(1, 5) for k in ("b1", "b2", "b3")]
    for (off, c), g, b in zip(layout, gammas, betas):
        gam[0, off:off + c] = np.asarray(g)
        bet[0, off:off + c] = np.asarray(b)

    blocks = []
    for i in range(1, 5):
        p = params[f"blk{i}"]
        cin, cout = p["w1"].shape[1], p["w1"].shape[2]
        blocks.append((
            jnp.asarray(np.asarray(p["w1"]).reshape(3 * cin, cout), jnp.bfloat16),
            jnp.asarray(np.asarray(p["w2"]).reshape(3 * cout, cout), jnp.bfloat16),
            jnp.asarray(np.asarray(p["w3"]).reshape(cin, cout), jnp.bfloat16),
        ))

    num_classes = params["fc_w"].shape[1]
    fcw = np.zeros((params["fc_w"].shape[0], _LANES), np.float32)
    fcw[:, :num_classes] = np.asarray(params["fc_w"])
    fcb = np.zeros((1, _LANES), np.float32)
    fcb[0, :num_classes] = np.asarray(params["fc_b"])

    return {
        "stem_w": jnp.asarray(np.asarray(params["stem_w"]).reshape(_STEM_K, -1),
                              jnp.bfloat16),
        "gamma": jnp.asarray(gam),
        "beta": jnp.asarray(bet),
        "blocks": blocks,
        "fc_w": jnp.asarray(fcw, jnp.bfloat16),
        "fc_b": jnp.asarray(fcb),
    }


def prepare_constants(batch, width):
    """Static 0/1 gather matrices and boundary masks (tiny, built once)."""
    l_stem = width - _STEM_K + 1
    l_pool = l_stem - _POOL_K + 1
    assert l_pool % (1 << _NUM_BLOCKS) == 0, "pooled width must survive 4 halvings"

    # maxpool: row block t gathers within-batch window tap t for every out row.
    r = batch * l_pool
    P = np.zeros((_POOL_K * r, batch * l_stem), np.float32)
    for t in range(_POOL_K):
        for b in range(batch):
            for i in range(l_pool):
                P[t * r + b * l_pool + i, b * l_stem + i + t] = 1.0

    sels, masks = [], []
    l_in = l_pool
    for _ in range(_NUM_BLOCKS):
        l_out = l_in // 2
        m = batch * l_out
        S = np.zeros((3 * m, batch * l_in), np.float32)
        for t, off in enumerate((-1, 0, 1)):
            for b in range(batch):
                for p in range(l_out):
                    src = 2 * p + off
                    if 0 <= src < l_in:
                        S[t * m + b * l_out + p, b * l_in + src] = 1.0
        mk = np.ones((m, 2), np.float32)
        for b in range(batch):
            mk[b * l_out, 0] = 0.0                   # no row above the first
            mk[b * l_out + l_out - 1, 1] = 0.0       # no row below the last
        sels.append(jnp.asarray(S, jnp.bfloat16))
        masks.append(jnp.asarray(mk, jnp.bfloat16))
        l_in = l_out

    A = np.zeros((batch, batch * l_in), np.float32)
    for b in range(batch):
        A[b, b * l_in:(b + 1) * l_in] = 1.0 / l_in
    return {"pool": jnp.asarray(P, jnp.bfloat16),
            "sels": sels, "masks": masks,
            "avg": jnp.asarray(A, jnp.bfloat16)}


@functools.partial(jax.jit, static_argnames=("num_classes",))
def mini_resnet_forward(x_nchw, prep, consts, *, num_classes):
    B, C, H, W = x_nchw.shape
    assert C == 1 and H == 1, "MiniResNet expects (N, 1, 1, W) input"
    l_stem = W - _STEM_K + 1

    # Tiny stem im2col (input is only B*W f32); everything else is in-kernel.
    x2 = x_nchw.reshape(B, W)
    patches = jnp.stack([x2[:, t:t + l_stem] for t in range(_STEM_K)], axis=-1)
    patches = patches.reshape(B * l_stem, _STEM_K).astype(jnp.bfloat16)

    inputs = [patches, prep["stem_w"], prep["gamma"], prep["beta"],
              consts["pool"], consts["avg"], prep["fc_w"], prep["fc_b"]]
    in_specs = [_VMEM] * 8
    for blk in range(_NUM_BLOCKS):
        w1, w2, w3 = prep["blocks"][blk]
        inputs += [consts["sels"][blk], consts["masks"][blk], w1, w2, w3]
        wspec = _ANY if blk >= 2 else _VMEM          # blk3/blk4: manual prefetch
        in_specs += [_VMEM, _VMEM, wspec, wspec, wspec]

    scratch = [pltpu.VMEM(w.shape, jnp.bfloat16)
               for blk in (2, 3) for w in prep["blocks"][blk]]
    scratch.append(pltpu.SemaphoreType.DMA((6,)))

    bn_layout, _ = _bn_pack_layout()
    kernel = functools.partial(_mini_resnet_kernel, bn_offs=bn_layout)
    out = pl.pallas_call(
        kernel,
        out_shape=jax.ShapeDtypeStruct((B, _LANES), jnp.float32),
        in_specs=in_specs,
        out_specs=_VMEM,
        scratch_shapes=scratch,
    )(*inputs)
    return out[:, :num_classes]


# ----------------------------------------------------------------------------
# Plain-JAX (XLA, f32) reference with identical semantics, for self-check.
# ----------------------------------------------------------------------------
def _bn_ref(h, gamma, beta):
    mu = jnp.mean(h, axis=(0, 1), keepdims=True)
    var = jnp.mean(jnp.square(h - mu), axis=(0, 1), keepdims=True)
    return ((h - mu) * jax.lax.rsqrt(var + _EPS) * gamma.reshape(1, 1, -1)
            + beta.reshape(1, 1, -1))


def _conv1d_ref(h, w, stride, pad):
    K = w.shape[0]
    if pad:
        h = jnp.pad(h, ((0, 0), (pad, pad), (0, 0)))
    L = h.shape[1]
    l_out = (L - K) // stride + 1
    out = 0.0
    for t in range(K):
        tap = h[:, t:t + stride * (l_out - 1) + 1:stride, :]
        out = out + jnp.einsum("blc,cd->bld", tap, w[t])
    return out


def _block_ref(h, p):
    c1 = jnp.maximum(_bn_ref(_conv1d_ref(h, p["w1"], 2, 1), p["g1"], p["b1"]), 0.0)
    c2 = _bn_ref(_conv1d_ref(c1, p["w2"], 1, 1), p["g2"], p["b2"])
    sc = _bn_ref(_conv1d_ref(h, p["w3"], 2, 0), p["g3"], p["b3"])
    return jnp.maximum(c2 + sc, 0.0)


def _reference_forward(x_nchw, params):
    B, _, _, W = x_nchw.shape
    x = x_nchw.reshape(B, W)
    l1 = W - _STEM_K + 1
    patches = jnp.stack([x[:, t:t + l1] for t in range(_STEM_K)], axis=-1)
    c_stem = params["stem_w"].shape[-1]
    h = jnp.einsum("blk,kc->blc", patches, params["stem_w"].reshape(_STEM_K, c_stem))
    h = jnp.maximum(_bn_ref(h, params["stem_g"], params["stem_b"]), 0.0)
    l2 = l1 - _POOL_K + 1
    h = jnp.max(jnp.stack([h[:, t:t + l2, :] for t in range(_POOL_K)], 0), 0)
    for name in ("blk1", "blk2", "blk3", "blk4"):
        h = _block_ref(h, params[name])
    pooled = jnp.mean(h, axis=1)
    return pooled @ params["fc_w"] + params["fc_b"]


# ----------------------------------------------------------------------------
# Deterministic parameter init (shapes from the PyTorch module __init__).
# ----------------------------------------------------------------------------
def _init_block(key, cin, cout):
    ks = jax.random.split(key, 9)
    s = 0.1
    return dict(
        w1=s * jax.random.normal(ks[0], (3, cin, cout), jnp.float32),
        g1=1.0 + 0.1 * jax.random.normal(ks[1], (cout,), jnp.float32),
        b1=0.1 * jax.random.normal(ks[2], (cout,), jnp.float32),
        w2=s * jax.random.normal(ks[3], (3, cout, cout), jnp.float32),
        g2=1.0 + 0.1 * jax.random.normal(ks[4], (cout,), jnp.float32),
        b2=0.1 * jax.random.normal(ks[5], (cout,), jnp.float32),
        w3=s * jax.random.normal(ks[6], (1, cin, cout), jnp.float32),
        g3=1.0 + 0.1 * jax.random.normal(ks[7], (cout,), jnp.float32),
        b3=0.1 * jax.random.normal(ks[8], (cout,), jnp.float32),
    )


def init_params(key):
    k = jax.random.split(key, 8)
    return dict(
        stem_w=0.1 * jax.random.normal(k[0], (10, 1, 32), jnp.float32),
        stem_g=1.0 + 0.1 * jax.random.normal(k[1], (32,), jnp.float32),
        stem_b=0.1 * jax.random.normal(k[2], (32,), jnp.float32),
        blk1=_init_block(k[3], 32, 64),
        blk2=_init_block(k[4], 64, 128),
        blk3=_init_block(k[5], 128, 256),
        blk4=_init_block(k[6], 256, 512),
        fc_w=0.05 * jax.random.normal(k[7], (512, 4), jnp.float32),
        fc_b=jnp.zeros((4,), jnp.float32),
    )


if __name__ == "__main__":
    params = init_params(jax.random.PRNGKey(0))
    # (N, C, H, W) = (2, 1, 1, 82): width 82 ->73(stem) ->64(pool) ->32->16->8->4
    B, W = 2, 82
    x = jax.random.normal(jax.random.PRNGKey(0), (B, 1, 1, W), jnp.float32)
    num_classes = params["fc_w"].shape[1]

    prep = prepare_params(params)          # one-time param layout/cast (cached)
    consts = prepare_constants(B, W)       # one-time static 0/1 gather matrices

    logits = mini_resnet_forward(x, prep, consts, num_classes=num_classes)
    jax.block_until_ready(logits)
    assert logits.shape == (B, num_classes) and logits.dtype == jnp.float32

    # Numerical self-check against the f32 XLA reference (bf16-MXU tolerance).
    ref = jax.jit(_reference_forward)(x, params)
    assert jnp.allclose(logits, ref, rtol=5e-2, atol=5e-2), (logits, ref)
    print("KERNEL_OK")
</pallas_src>

<mosaic_0001>
module attributes {stable_mosaic.version = 11 : i64} {
  func.func @_mini_resnet_kernel(%arg0: memref<146x10xbf16, #tpu.memory_space<vmem>>, %arg1: memref<10x32xbf16, #tpu.memory_space<vmem>>, %arg2: memref<1x3200xf32, #tpu.memory_space<vmem>>, %arg3: memref<1x3200xf32, #tpu.memory_space<vmem>>, %arg4: memref<1280x146xbf16, #tpu.memory_space<vmem>>, %arg5: memref<2x8xbf16, #tpu.memory_space<vmem>>, %arg6: memref<512x128xbf16, #tpu.memory_space<vmem>>, %arg7: memref<1x128xf32, #tpu.memory_space<vmem>>, %arg8: memref<192x128xbf16, #tpu.memory_space<vmem>>, %arg9: memref<64x2xbf16, #tpu.memory_space<vmem>>, %arg10: memref<96x64xbf16, #tpu.memory_space<vmem>>, %arg11: memref<192x64xbf16, #tpu.memory_space<vmem>>, %arg12: memref<32x64xbf16, #tpu.memory_space<vmem>>, %arg13: memref<96x64xbf16, #tpu.memory_space<vmem>>, %arg14: memref<32x2xbf16, #tpu.memory_space<vmem>>, %arg15: memref<192x128xbf16, #tpu.memory_space<vmem>>, %arg16: memref<384x128xbf16, #tpu.memory_space<vmem>>, %arg17: memref<64x128xbf16, #tpu.memory_space<vmem>>, %arg18: memref<48x32xbf16, #tpu.memory_space<vmem>>, %arg19: memref<16x2xbf16, #tpu.memory_space<vmem>>, %arg20: memref<384x256xbf16, #tpu.memory_space<any>>, %arg21: memref<768x256xbf16, #tpu.memory_space<any>>, %arg22: memref<128x256xbf16, #tpu.memory_space<any>>, %arg23: memref<24x16xbf16, #tpu.memory_space<vmem>>, %arg24: memref<8x2xbf16, #tpu.memory_space<vmem>>, %arg25: memref<768x512xbf16, #tpu.memory_space<any>>, %arg26: memref<1536x512xbf16, #tpu.memory_space<any>>, %arg27: memref<256x512xbf16, #tpu.memory_space<any>>, %arg28: memref<2x128xf32, #tpu.memory_space<vmem>>, %arg29: memref<384x256xbf16, #tpu.memory_space<vmem>>, %arg30: memref<768x256xbf16, #tpu.memory_space<vmem>>, %arg31: memref<128x256xbf16, #tpu.memory_space<vmem>>, %arg32: memref<768x512xbf16, #tpu.memory_space<vmem>>, %arg33: memref<1536x512xbf16, #tpu.memory_space<vmem>>, %arg34: memref<256x512xbf16, #tpu.memory_space<vmem>>, %arg35: memref<6x!tpu.dma_semaphore, #tpu.memory_space<semaphore_mem>>) attributes {dimension_semantics = [], scalar_prefetch = 0 : i64, scratch_operands = 7 : i64, tpu.core_type = #tpu.core_type<tc>} {
    %c0_i32 = arith.constant 0 : i32
    %0 = tpu.memref_slice %arg35[%c0_i32] : memref<6x!tpu.dma_semaphore, #tpu.memory_space<semaphore_mem>> -> memref<1x!tpu.dma_semaphore, #tpu.memory_space<semaphore_mem>>
    %1 = tpu.memref_squeeze %0 : memref<1x!tpu.dma_semaphore, #tpu.memory_space<semaphore_mem>> -> memref<!tpu.dma_semaphore, #tpu.memory_space<semaphore_mem>>
    tpu.enqueue_dma source(%arg20 : memref<384x256xbf16, #tpu.memory_space<any>>) target(%arg29 : memref<384x256xbf16, #tpu.memory_space<vmem>>) target_semaphore(%1 : memref<!tpu.dma_semaphore, #tpu.memory_space<semaphore_mem>>)
    %c1_i32 = arith.constant 1 : i32
    %2 = tpu.memref_slice %arg35[%c1_i32] : memref<6x!tpu.dma_semaphore, #tpu.memory_space<semaphore_mem>> -> memref<1x!tpu.dma_semaphore, #tpu.memory_space<semaphore_mem>>
    %3 = tpu.memref_squeeze %2 : memref<1x!tpu.dma_semaphore, #tpu.memory_space<semaphore_mem>> -> memref<!tpu.dma_semaphore, #tpu.memory_space<semaphore_mem>>
    tpu.enqueue_dma source(%arg21 : memref<768x256xbf16, #tpu.memory_space<any>>) target(%arg30 : memref<768x256xbf16, #tpu.memory_space<vmem>>) target_semaphore(%3 : memref<!tpu.dma_semaphore, #tpu.memory_space<semaphore_mem>>)
    %c2_i32 = arith.constant 2 : i32
    %4 = tpu.memref_slice %arg35[%c2_i32] : memref<6x!tpu.dma_semaphore, #tpu.memory_space<semaphore_mem>> -> memref<1x!tpu.dma_semaphore, #tpu.memory_space<semaphore_mem>>
    %5 = tpu.memref_squeeze %4 : memref<1x!tpu.dma_semaphore, #tpu.memory_space<semaphore_mem>> -> memref<!tpu.dma_semaphore, #tpu.memory_space<semaphore_mem>>
    tpu.enqueue_dma source(%arg22 : memref<128x256xbf16, #tpu.memory_space<any>>) target(%arg31 : memref<128x256xbf16, #tpu.memory_space<vmem>>) target_semaphore(%5 : memref<!tpu.dma_semaphore, #tpu.memory_space<semaphore_mem>>)
    %c3_i32 = arith.constant 3 : i32
    %6 = tpu.memref_slice %arg35[%c3_i32] : memref<6x!tpu.dma_semaphore, #tpu.memory_space<semaphore_mem>> -> memref<1x!tpu.dma_semaphore, #tpu.memory_space<semaphore_mem>>
    %7 = tpu.memref_squeeze %6 : memref<1x!tpu.dma_semaphore, #tpu.memory_space<semaphore_mem>> -> memref<!tpu.dma_semaphore, #tpu.memory_space<semaphore_mem>>
    tpu.enqueue_dma source(%arg25 : memref<768x512xbf16, #tpu.memory_space<any>>) target(%arg32 : memref<768x512xbf16, #tpu.memory_space<vmem>>) target_semaphore(%7 : memref<!tpu.dma_semaphore, #tpu.memory_space<semaphore_mem>>)
    %c4_i32 = arith.constant 4 : i32
    %8 = tpu.memref_slice %arg35[%c4_i32] : memref<6x!tpu.dma_semaphore, #tpu.memory_space<semaphore_mem>> -> memref<1x!tpu.dma_semaphore, #tpu.memory_space<semaphore_mem>>
    %9 = tpu.memref_squeeze %8 : memref<1x!tpu.dma_semaphore, #tpu.memory_space<semaphore_mem>> -> memref<!tpu.dma_semaphore, #tpu.memory_space<semaphore_mem>>
    tpu.enqueue_dma source(%arg26 : memref<1536x512xbf16, #tpu.memory_space<any>>) target(%arg33 : memref<1536x512xbf16, #tpu.memory_space<vmem>>) target_semaphore(%9 : memref<!tpu.dma_semaphore, #tpu.memory_space<semaphore_mem>>)
    %c5_i32 = arith.constant 5 : i32
    %10 = tpu.memref_slice %arg35[%c5_i32] : memref<6x!tpu.dma_semaphore, #tpu.memory_space<semaphore_mem>> -> memref<1x!tpu.dma_semaphore, #tpu.memory_space<semaphore_mem>>
    %11 = tpu.memref_squeeze %10 : memref<1x!tpu.dma_semaphore, #tpu.memory_space<semaphore_mem>> -> memref<!tpu.dma_semaphore, #tpu.memory_space<semaphore_mem>>
    tpu.enqueue_dma source(%arg27 : memref<256x512xbf16, #tpu.memory_space<any>>) target(%arg34 : memref<256x512xbf16, #tpu.memory_space<vmem>>) target_semaphore(%11 : memref<!tpu.dma_semaphore, #tpu.memory_space<semaphore_mem>>)
    %c0 = arith.constant 0 : index
    %c0_0 = arith.constant 0 : index
    %12 = vector.load %arg2[%c0, %c0_0] : memref<1x3200xf32, #tpu.memory_space<vmem>>, vector<1x32xf32>
    %c0_1 = arith.constant 0 : index
    %c0_2 = arith.constant 0 : index
    %13 = vector.load %arg3[%c0_1, %c0_2] : memref<1x3200xf32, #tpu.memory_space<vmem>>, vector<1x32xf32>
    %c0_3 = arith.constant 0 : index
    %c0_4 = arith.constant 0 : index
    %14 = vector.load %arg0[%c0_3, %c0_4] : memref<146x10xbf16, #tpu.memory_space<vmem>>, vector<146x10xbf16>
    %c0_5 = arith.constant 0 : index
    %c0_6 = arith.constant 0 : index
    %15 = vector.load %arg1[%c0_5, %c0_6] : memref<10x32xbf16, #tpu.memory_space<vmem>>, vector<10x32xbf16>
    %cst = arith.constant dense<0.000000e+00> : vector<146x32xf32>
    %16 = tpu.matmul %14, %15, %cst {dimension_numbers = #tpu.dot_dimension_numbers<[1], [0], [0], [1], [0, 0, 1, 1], [], []>} : vector<146x10xbf16>, vector<10x32xbf16>, vector<146x32xf32> -> vector<146x32xf32>
    %cst_7 = arith.constant dense<0.000000e+00> : vector<32xf32>
    %17 = vector.multi_reduction <add>, %16, %cst_7 [0] : vector<146x32xf32> to vector<32xf32>
    %18 = vector.shape_cast %17 : vector<32xf32> to vector<1x32xf32>
    %cst_8 = arith.constant 1.460000e+02 : f32
    %19 = vector.broadcast %cst_8 : f32 to vector<1x32xf32>
    %20 = arith.divf %18, %19 : vector<1x32xf32>
    %21 = arith.mulf %16, %16 : vector<146x32xf32>
    %cst_9 = arith.constant dense<0.000000e+00> : vector<32xf32>
    %22 = vector.multi_reduction <add>, %21, %cst_9 [0] : vector<146x32xf32> to vector<32xf32>
    %23 = vector.shape_cast %22 : vector<32xf32> to vector<1x32xf32>
    %cst_10 = arith.constant 1.460000e+02 : f32
    %24 = vector.broadcast %cst_10 : f32 to vector<1x32xf32>
    %25 = arith.divf %23, %24 : vector<1x32xf32>
    %26 = arith.mulf %20, %20 : vector<1x32xf32>
    %27 = arith.subf %25, %26 : vector<1x32xf32>
    %cst_11 = arith.constant 0.000000e+00 : f32
    %28 = vector.broadcast %cst_11 : f32 to vector<1x32xf32>
    %29 = arith.maximumf %27, %28 : vector<1x32xf32>
    %cst_12 = arith.constant 9.99999974E-6 : f32
    %30 = vector.broadcast %cst_12 : f32 to vector<1x32xf32>
    %31 = arith.addf %29, %30 : vector<1x32xf32>
    %32 = math.rsqrt %31 : vector<1x32xf32>
    %33 = arith.mulf %12, %32 : vector<1x32xf32>
    %34 = vector.broadcast %33 : vector<1x32xf32> to vector<146x32xf32>
    %35 = arith.mulf %16, %34 : vector<146x32xf32>
    %36 = arith.mulf %20, %33 : vector<1x32xf32>
    %37 = arith.subf %13, %36 : vector<1x32xf32>
    %38 = vector.broadcast %37 : vector<1x32xf32> to vector<146x32xf32>
    %39 = arith.addf %35, %38 : vector<146x32xf32>
    %cst_13 = arith.constant 0.000000e+00 : f32
    %40 = vector.broadcast %cst_13 : f32 to vector<146x32xf32>
    %41 = arith.maximumf %39, %40 : vector<146x32xf32>
    %42 = arith.truncf %41 : vector<146x32xf32> to vector<146x32xbf16>
    %c0_14 = arith.constant 0 : index
    %c0_15 = arith.constant 0 : index
    %43 = vector.load %arg4[%c0_14, %c0_15] : memref<1280x146xbf16, #tpu.memory_space<vmem>>, vector<1280x146xbf16>
    %cst_16 = arith.constant dense<0.000000e+00> : vector<1280x32xf32>
    %44 = tpu.matmul %43, %42, %cst_16 {dimension_numbers = #tpu.dot_dimension_numbers<[1], [0], [0], [1], [0, 0, 1, 1], [], []>} : vector<1280x146xbf16>, vector<146x32xbf16>, vector<1280x32xf32> -> vector<1280x32xf32>
    %45 = vector.extract_strided_slice %44 {offsets = [0, 0], sizes = [128, 32], strides = [1, 1]} : vector<1280x32xf32> to vector<128x32xf32>
    %46 = vector.extract_strided_slice %44 {offsets = [128, 0], sizes = [128, 32], strides = [1, 1]} : vector<1280x32xf32> to vector<128x32xf32>
    %47 = arith.maximumf %45, %46 : vector<128x32xf32>
    %48 = vector.extract_strided_slice %44 {offsets = [256, 0], sizes = [128, 32], strides = [1, 1]} : vector<1280x32xf32> to vector<128x32xf32>
    %49 = arith.maximumf %47, %48 : vector<128x32xf32>
    %50 = vector.extract_strided_slice %44 {offsets = [384, 0], sizes = [128, 32], strides = [1, 1]} : vector<1280x32xf32> to vector<128x32xf32>
    %51 = arith.maximumf %49, %50 : vector<128x32xf32>
    %52 = vector.extract_strided_slice %44 {offsets = [512, 0], sizes = [128, 32], strides = [1, 1]} : vector<1280x32xf32> to vector<128x32xf32>
    %53 = arith.maximumf %51, %52 : vector<128x32xf32>
    %54 = vector.extract_strided_slice %44 {offsets = [640, 0], sizes = [128, 32], strides = [1, 1]} : vector<1280x32xf32> to vector<128x32xf32>
    %55 = arith.maximumf %53, %54 : vector<128x32xf32>
    %56 = vector.extract_strided_slice %44 {offsets = [768, 0], sizes = [128, 32], strides = [1, 1]} : vector<1280x32xf32> to vector<128x32xf32>
    %57 = arith.maximumf %55, %56 : vector<128x32xf32>
    %58 = vector.extract_strided_slice %44 {offsets = [896, 0], sizes = [128, 32], strides = [1, 1]} : vector<1280x32xf32> to vector<128x32xf32>
    %59 = arith.maximumf %57, %58 : vector<128x32xf32>
    %60 = vector.extract_strided_slice %44 {offsets = [1024, 0], sizes = [128, 32], strides = [1, 1]} : vector<1280x32xf32> to vector<128x32xf32>
    %61 = arith.maximumf %59, %60 : vector<128x32xf32>
    %62 = vector.extract_strided_slice %44 {offsets = [1152, 0], sizes = [128, 32], strides = [1, 1]} : vector<1280x32xf32> to vector<128x32xf32>
    %63 = arith.maximumf %61, %62 : vector<128x32xf32>
    %64 = arith.truncf %63 : vector<128x32xf32> to vector<128x32xbf16>
    %c0_17 = arith.constant 0 : index
    %c0_18 = arith.constant 0 : index
    %65 = vector.load %arg10[%c0_17, %c0_18] : memref<96x64xbf16, #tpu.memory_space<vmem>>, vector<96x64xbf16>
    %c0_19 = arith.constant 0 : index
    %c0_20 = arith.constant 0 : index
    %66 = vector.load %arg11[%c0_19, %c0_20] : memref<192x64xbf16, #tpu.memory_space<vmem>>, vector<192x64xbf16>
    %c0_21 = arith.constant 0 : index
    %c0_22 = arith.constant 0 : index
    %67 = vector.load %arg12[%c0_21, %c0_22] : memref<32x64xbf16, #tpu.memory_space<vmem>>, vector<32x64xbf16>
    %c0_23 = arith.constant 0 : index
    %c128 = arith.constant 128 : index
    %68 = vector.load %arg2[%c0_23, %c128] : memref<1x3200xf32, #tpu.memory_space<vmem>>, vector<1x64xf32>
    %c0_24 = arith.constant 0 : index
    %c128_25 = arith.constant 128 : index
    %69 = vector.load %arg3[%c0_24, %c128_25] : memref<1x3200xf32, #tpu.memory_space<vmem>>, vector<1x64xf32>
    %c0_26 = arith.constant 0 : index
    %c256 = arith.constant 256 : index
    %70 = vector.load %arg2[%c0_26, %c256] : memref<1x3200xf32, #tpu.memory_space<vmem>>, vector<1x64xf32>
    %c0_27 = arith.constant 0 : index
    %c256_28 = arith.constant 256 : index
    %71 = vector.load %arg3[%c0_27, %c256_28] : memref<1x3200xf32, #tpu.memory_space<vmem>>, vector<1x64xf32>
    %c0_29 = arith.constant 0 : index
    %c384 = arith.constant 384 : index
    %72 = vector.load %arg2[%c0_29, %c384] : memref<1x3200xf32, #tpu.memory_space<vmem>>, vector<1x64xf32>
    %c0_30 = arith.constant 0 : index
    %c384_31 = arith.constant 384 : index
    %73 = vector.load %arg3[%c0_30, %c384_31] : memref<1x3200xf32, #tpu.memory_space<vmem>>, vector<1x64xf32>
    %c0_32 = arith.constant 0 : index
    %c0_33 = arith.constant 0 : index
    %74 = vector.load %arg8[%c0_32, %c0_33] : memref<192x128xbf16, #tpu.memory_space<vmem>>, vector<192x128xbf16>
    %c0_34 = arith.constant 0 : index
    %c0_35 = arith.constant 0 : index
    %75 = vector.load %arg9[%c0_34, %c0_35] : memref<64x2xbf16, #tpu.memory_space<vmem>>, vector<64x2xbf16>
    %cst_36 = arith.constant dense<0.000000e+00> : vector<192x32xf32>
    %76 = tpu.matmul %74, %64, %cst_36 {dimension_numbers = #tpu.dot_dimension_numbers<[1], [0], [0], [1], [0, 0, 1, 1], [], []>} : vector<192x128xbf16>, vector<128x32xbf16>, vector<192x32xf32> -> vector<192x32xf32>
    %77 = arith.truncf %76 : vector<192x32xf32> to vector<192x32xbf16>
    %78 = vector.extract_strided_slice %77 {offsets = [0, 0], sizes = [64, 32], strides = [1, 1]} : vector<192x32xbf16> to vector<64x32xbf16>
    %79 = vector.extract_strided_slice %77 {offsets = [64, 0], sizes = [64, 32], strides = [1, 1]} : vector<192x32xbf16> to vector<64x32xbf16>
    %80 = vector.extract_strided_slice %77 {offsets = [128, 0], sizes = [64, 32], strides = [1, 1]} : vector<192x32xbf16> to vector<64x32xbf16>
    %81 = tpu.concatenate %78, %79, %80 in 1 : vector<64x32xbf16>, vector<64x32xbf16>, vector<64x32xbf16> -> vector<64x96xbf16>
    %cst_37 = arith.constant dense<0.000000e+00> : vector<64x64xf32>
    %82 = tpu.matmul %81, %65, %cst_37 {dimension_numbers = #tpu.dot_dimension_numbers<[1], [0], [0], [1], [0, 0, 1, 1], [], []>} : vector<64x96xbf16>, vector<96x64xbf16>, vector<64x64xf32> -> vector<64x64xf32>
    %cst_38 = arith.constant dense<0.000000e+00> : vector<64xf32>
    %83 = vector.multi_reduction <add>, %82, %cst_38 [0] : vector<64x64xf32> to vector<64xf32>
    %84 = vector.shape_cast %83 : vector<64xf32> to vector<1x64xf32>
    %cst_39 = arith.constant 6.400000e+01 : f32
    %85 = vector.broadcast %cst_39 : f32 to vector<1x64xf32>
    %86 = arith.divf %84, %85 : vector<1x64xf32>
    %87 = arith.mulf %82, %82 : vector<64x64xf32>
    %cst_40 = arith.constant dense<0.000000e+00> : vector<64xf32>
    %88 = vector.multi_reduction <add>, %87, %cst_40 [0] : vector<64x64xf32> to vector<64xf32>
    %89 = vector.shape_cast %88 : vector<64xf32> to vector<1x64xf32>
    %cst_41 = arith.constant 6.400000e+01 : f32
    %90 = vector.broadcast %cst_41 : f32 to vector<1x64xf32>
    %91 = arith.divf %89, %90 : vector<1x64xf32>
    %92 = arith.mulf %86, %86 : vector<1x64xf32>
    %93 = arith.subf %91, %92 : vector<1x64xf32>
    %cst_42 = arith.constant 0.000000e+00 : f32
    %94 = vector.broadcast %cst_42 : f32 to vector<1x64xf32>
    %95 = arith.maximumf %93, %94 : vector<1x64xf32>
    %cst_43 = arith.constant 9.99999974E-6 : f32
    %96 = vector.broadcast %cst_43 : f32 to vector<1x64xf32>
    %97 = arith.addf %95, %96 : vector<1x64xf32>
    %98 = math.rsqrt %97 : vector<1x64xf32>
    %99 = arith.mulf %68, %98 : vector<1x64xf32>
    %100 = vector.broadcast %99 : vector<1x64xf32> to vector<64x64xf32>
    %101 = arith.mulf %82, %100 : vector<64x64xf32>
    %102 = arith.mulf %86, %99 : vector<1x64xf32>
    %103 = arith.subf %69, %102 : vector<1x64xf32>
    %104 = vector.broadcast %103 : vector<1x64xf32> to vector<64x64xf32>
    %105 = arith.addf %101, %104 : vector<64x64xf32>
    %cst_44 = arith.constant 0.000000e+00 : f32
    %106 = vector.broadcast %cst_44 : f32 to vector<64x64xf32>
    %107 = arith.maximumf %105, %106 : vector<64x64xf32>
    %108 = arith.truncf %107 : vector<64x64xf32> to vector<64x64xbf16>
    %109 = vector.extract_strided_slice %107 {offsets = [63, 0], sizes = [1, 64], strides = [1, 1]} : vector<64x64xf32> to vector<1x64xf32>
    %110 = vector.extract_strided_slice %107 {offsets = [0, 0], sizes = [63, 64], strides = [1, 1]} : vector<64x64xf32> to vector<63x64xf32>
    %111 = tpu.concatenate %109, %110 in 0 : vector<1x64xf32>, vector<63x64xf32> -> vector<64x64xf32>
    %112 = vector.extract_strided_slice %75 {offsets = [0, 0], sizes = [64, 1], strides = [1, 1]} : vector<64x2xbf16> to vector<64x1xbf16>
    %113 = arith.extf %112 : vector<64x1xbf16> to vector<64x1xf32>
    %114 = vector.broadcast %113 : vector<64x1xf32> to vector<64x64xf32>
    %115 = arith.mulf %111, %114 : vector<64x64xf32>
    %116 = arith.truncf %115 : vector<64x64xf32> to vector<64x64xbf16>
    %117 = vector.extract_strided_slice %107 {offsets = [1, 0], sizes = [63, 64], strides = [1, 1]} : vector<64x64xf32> to vector<63x64xf32>
    %118 = vector.extract_strided_slice %107 {offsets = [0, 0], sizes = [1, 64], strides = [1, 1]} : vector<64x64xf32> to vector<1x64xf32>
    %119 = tpu.concatenate %117, %118 in 0 : vector<63x64xf32>, vector<1x64xf32> -> vector<64x64xf32>
    %120 = vector.extract_strided_slice %75 {offsets = [0, 1], sizes = [64, 1], strides = [1, 1]} : vector<64x2xbf16> to vector<64x1xbf16>
    %121 = arith.extf %120 : vector<64x1xbf16> to vector<64x1xf32>
    %122 = vector.broadcast %121 : vector<64x1xf32> to vector<64x64xf32>
    %123 = arith.mulf %119, %122 : vector<64x64xf32>
    %124 = arith.truncf %123 : vector<64x64xf32> to vector<64x64xbf16>
    %125 = tpu.concatenate %116, %108, %124 in 1 : vector<64x64xbf16>, vector<64x64xbf16>, vector<64x64xbf16> -> vector<64x192xbf16>
    %cst_45 = arith.constant dense<0.000000e+00> : vector<64x64xf32>
    %126 = tpu.matmul %125, %66, %cst_45 {dimension_numbers = #tpu.dot_dimension_numbers<[1], [0], [0], [1], [0, 0, 1, 1], [], []>} : vector<64x192xbf16>, vector<192x64xbf16>, vector<64x64xf32> -> vector<64x64xf32>
    %cst_46 = arith.constant dense<0.000000e+00> : vector<64xf32>
    %127 = vector.multi_reduction <add>, %126, %cst_46 [0] : vector<64x64xf32> to vector<64xf32>
    %128 = vector.shape_cast %127 : vector<64xf32> to vector<1x64xf32>
    %cst_47 = arith.constant 6.400000e+01 : f32
    %129 = vector.broadcast %cst_47 : f32 to vector<1x64xf32>
    %130 = arith.divf %128, %129 : vector<1x64xf32>
    %131 = arith.mulf %126, %126 : vector<64x64xf32>
    %cst_48 = arith.constant dense<0.000000e+00> : vector<64xf32>
    %132 = vector.multi_reduction <add>, %131, %cst_48 [0] : vector<64x64xf32> to vector<64xf32>
    %133 = vector.shape_cast %132 : vector<64xf32> to vector<1x64xf32>
    %cst_49 = arith.constant 6.400000e+01 : f32
    %134 = vector.broadcast %cst_49 : f32 to vector<1x64xf32>
    %135 = arith.divf %133, %134 : vector<1x64xf32>
    %136 = arith.mulf %130, %130 : vector<1x64xf32>
    %137 = arith.subf %135, %136 : vector<1x64xf32>
    %cst_50 = arith.constant 0.000000e+00 : f32
    %138 = vector.broadcast %cst_50 : f32 to vector<1x64xf32>
    %139 = arith.maximumf %137, %138 : vector<1x64xf32>
    %cst_51 = arith.constant 9.99999974E-6 : f32
    %140 = vector.broadcast %cst_51 : f32 to vector<1x64xf32>
    %141 = arith.addf %139, %140 : vector<1x64xf32>
    %142 = math.rsqrt %141 : vector<1x64xf32>
    %143 = arith.mulf %70, %142 : vector<1x64xf32>
    %144 = vector.broadcast %143 : vector<1x64xf32> to vector<64x64xf32>
    %145 = arith.mulf %126, %144 : vector<64x64xf32>
    %146 = arith.mulf %130, %143 : vector<1x64xf32>
    %147 = arith.subf %71, %146 : vector<1x64xf32>
    %148 = vector.broadcast %147 : vector<1x64xf32> to vector<64x64xf32>
    %149 = arith.addf %145, %148 : vector<64x64xf32>
    %cst_52 = arith.constant dense<0.000000e+00> : vector<64x64xf32>
    %150 = tpu.matmul %79, %67, %cst_52 {dimension_numbers = #tpu.dot_dimension_numbers<[1], [0], [0], [1], [0, 0, 1, 1], [], []>} : vector<64x32xbf16>, vector<32x64xbf16>, vector<64x64xf32> -> vector<64x64xf32>
    %cst_53 = arith.constant dense<0.000000e+00> : vector<64xf32>
    %151 = vector.multi_reduction <add>, %150, %cst_53 [0] : vector<64x64xf32> to vector<64xf32>
    %152 = vector.shape_cast %151 : vector<64xf32> to vector<1x64xf32>
    %cst_54 = arith.constant 6.400000e+01 : f32
    %153 = vector.broadcast %cst_54 : f32 to vector<1x64xf32>
    %154 = arith.divf %152, %153 : vector<1x64xf32>
    %155 = arith.mulf %150, %150 : vector<64x64xf32>
    %cst_55 = arith.constant dense<0.000000e+00> : vector<64xf32>
    %156 = vector.multi_reduction <add>, %155, %cst_55 [0] : vector<64x64xf32> to vector<64xf32>
    %157 = vector.shape_cast %156 : vector<64xf32> to vector<1x64xf32>
    %cst_56 = arith.constant 6.400000e+01 : f32
    %158 = vector.broadcast %cst_56 : f32 to vector<1x64xf32>
    %159 = arith.divf %157, %158 : vector<1x64xf32>
    %160 = arith.mulf %154, %154 : vector<1x64xf32>
    %161 = arith.subf %159, %160 : vector<1x64xf32>
    %cst_57 = arith.constant 0.000000e+00 : f32
    %162 = vector.broadcast %cst_57 : f32 to vector<1x64xf32>
    %163 = arith.maximumf %161, %162 : vector<1x64xf32>
    %cst_58 = arith.constant 9.99999974E-6 : f32
    %164 = vector.broadcast %cst_58 : f32 to vector<1x64xf32>
    %165 = arith.addf %163, %164 : vector<1x64xf32>
    %166 = math.rsqrt %165 : vector<1x64xf32>
    %167 = arith.mulf %72, %166 : vector<1x64xf32>
    %168 = vector.broadcast %167 : vector<1x64xf32> to vector<64x64xf32>
    %169 = arith.mulf %150, %168 : vector<64x64xf32>
    %170 = arith.mulf %154, %167 : vector<1x64xf32>
    %171 = arith.subf %73, %170 : vector<1x64xf32>
    %172 = vector.broadcast %171 : vector<1x64xf32> to vector<64x64xf32>
    %173 = arith.addf %169, %172 : vector<64x64xf32>
    %174 = arith.addf %149, %173 : vector<64x64xf32>
    %cst_59 = arith.constant 0.000000e+00 : f32
    %175 = vector.broadcast %cst_59 : f32 to vector<64x64xf32>
    %176 = arith.maximumf %174, %175 : vector<64x64xf32>
    %177 = arith.truncf %176 : vector<64x64xf32> to vector<64x64xbf16>
    %c0_60 = arith.constant 0 : index
    %c0_61 = arith.constant 0 : index
    %178 = vector.load %arg15[%c0_60, %c0_61] : memref<192x128xbf16, #tpu.memory_space<vmem>>, vector<192x128xbf16>
    %c0_62 = arith.constant 0 : index
    %c0_63 = arith.constant 0 : index
    %179 = vector.load %arg16[%c0_62, %c0_63] : memref<384x128xbf16, #tpu.memory_space<vmem>>, vector<384x128xbf16>
    %c0_64 = arith.constant 0 : index
    %c0_65 = arith.constant 0 : index
    %180 = vector.load %arg17[%c0_64, %c0_65] : memref<64x128xbf16, #tpu.memory_space<vmem>>, vector<64x128xbf16>
    %c0_66 = arith.constant 0 : index
    %c512 = arith.constant 512 : index
    %181 = vector.load %arg2[%c0_66, %c512] : memref<1x3200xf32, #tpu.memory_space<vmem>>, vector<1x128xf32>
    %c0_67 = arith.constant 0 : index
    %c512_68 = arith.constant 512 : index
    %182 = vector.load %arg3[%c0_67, %c512_68] : memref<1x3200xf32, #tpu.memory_space<vmem>>, vector<1x128xf32>
    %c0_69 = arith.constant 0 : index
    %c640 = arith.constant 640 : index
    %183 = vector.load %arg2[%c0_69, %c640] : memref<1x3200xf32, #tpu.memory_space<vmem>>, vector<1x128xf32>
    %c0_70 = arith.constant 0 : index
    %c640_71 = arith.constant 640 : index
    %184 = vector.load %arg3[%c0_70, %c640_71] : memref<1x3200xf32, #tpu.memory_space<vmem>>, vector<1x128xf32>
    %c0_72 = arith.constant 0 : index
    %c768 = arith.constant 768 : index
    %185 = vector.load %arg2[%c0_72, %c768] : memref<1x3200xf32, #tpu.memory_space<vmem>>, vector<1x128xf32>
    %c0_73 = arith.constant 0 : index
    %c768_74 = arith.constant 768 : index
    %186 = vector.load %arg3[%c0_73, %c768_74] : memref<1x3200xf32, #tpu.memory_space<vmem>>, vector<1x128xf32>
    %c0_75 = arith.constant 0 : index
    %c0_76 = arith.constant 0 : index
    %187 = vector.load %arg13[%c0_75, %c0_76] : memref<96x64xbf16, #tpu.memory_space<vmem>>, vector<96x64xbf16>
    %c0_77 = arith.constant 0 : index
    %c0_78 = arith.constant 0 : index
    %188 = vector.load %arg14[%c0_77, %c0_78] : memref<32x2xbf16, #tpu.memory_space<vmem>>, vector<32x2xbf16>
    %cst_79 = arith.constant dense<0.000000e+00> : vector<96x64xf32>
    %189 = tpu.matmul %187, %177, %cst_79 {dimension_numbers = #tpu.dot_dimension_numbers<[1], [0], [0], [1], [0, 0, 1, 1], [], []>} : vector<96x64xbf16>, vector<64x64xbf16>, vector<96x64xf32> -> vector<96x64xf32>
    %190 = arith.truncf %189 : vector<96x64xf32> to vector<96x64xbf16>
    %191 = vector.extract_strided_slice %190 {offsets = [0, 0], sizes = [32, 64], strides = [1, 1]} : vector<96x64xbf16> to vector<32x64xbf16>
    %192 = vector.extract_strided_slice %190 {offsets = [32, 0], sizes = [32, 64], strides = [1, 1]} : vector<96x64xbf16> to vector<32x64xbf16>
    %193 = vector.extract_strided_slice %190 {offsets = [64, 0], sizes = [32, 64], strides = [1, 1]} : vector<96x64xbf16> to vector<32x64xbf16>
    %194 = tpu.concatenate %191, %192, %193 in 1 : vector<32x64xbf16>, vector<32x64xbf16>, vector<32x64xbf16> -> vector<32x192xbf16>
    %cst_80 = arith.constant dense<0.000000e+00> : vector<32x128xf32>
    %195 = tpu.matmul %194, %178, %cst_80 {dimension_numbers = #tpu.dot_dimension_numbers<[1], [0], [0], [1], [0, 0, 1, 1], [], []>} : vector<32x192xbf16>, vector<192x128xbf16>, vector<32x128xf32> -> vector<32x128xf32>
    %cst_81 = arith.constant dense<0.000000e+00> : vector<128xf32>
    %196 = vector.multi_reduction <add>, %195, %cst_81 [0] : vector<32x128xf32> to vector<128xf32>
    %197 = vector.shape_cast %196 : vector<128xf32> to vector<1x128xf32>
    %cst_82 = arith.constant 3.200000e+01 : f32
    %198 = vector.broadcast %cst_82 : f32 to vector<1x128xf32>
    %199 = arith.divf %197, %198 : vector<1x128xf32>
    %200 = arith.mulf %195, %195 : vector<32x128xf32>
    %cst_83 = arith.constant dense<0.000000e+00> : vector<128xf32>
    %201 = vector.multi_reduction <add>, %200, %cst_83 [0] : vector<32x128xf32> to vector<128xf32>
    %202 = vector.shape_cast %201 : vector<128xf32> to vector<1x128xf32>
    %cst_84 = arith.constant 3.200000e+01 : f32
    %203 = vector.broadcast %cst_84 : f32 to vector<1x128xf32>
    %204 = arith.divf %202, %203 : vector<1x128xf32>
    %205 = arith.mulf %199, %199 : vector<1x128xf32>
    %206 = arith.subf %204, %205 : vector<1x128xf32>
    %cst_85 = arith.constant 0.000000e+00 : f32
    %207 = vector.broadcast %cst_85 : f32 to vector<1x128xf32>
    %208 = arith.maximumf %206, %207 : vector<1x128xf32>
    %cst_86 = arith.constant 9.99999974E-6 : f32
    %209 = vector.broadcast %cst_86 : f32 to vector<1x128xf32>
    %210 = arith.addf %208, %209 : vector<1x128xf32>
    %211 = math.rsqrt %210 : vector<1x128xf32>
    %212 = arith.mulf %181, %211 : vector<1x128xf32>
    %213 = vector.broadcast %212 : vector<1x128xf32> to vector<32x128xf32>
    %214 = arith.mulf %195, %213 : vector<32x128xf32>
    %215 = arith.mulf %199, %212 : vector<1x128xf32>
    %216 = arith.subf %182, %215 : vector<1x128xf32>
    %217 = vector.broadcast %216 : vector<1x128xf32> to vector<32x128xf32>
    %218 = arith.addf %214, %217 : vector<32x128xf32>
    %cst_87 = arith.constant 0.000000e+00 : f32
    %219 = vector.broadcast %cst_87 : f32 to vector<32x128xf32>
    %220 = arith.maximumf %218, %219 : vector<32x128xf32>
    %221 = arith.truncf %220 : vector<32x128xf32> to vector<32x128xbf16>
    %222 = vector.extract_strided_slice %220 {offsets = [31, 0], sizes = [1, 128], strides = [1, 1]} : vector<32x128xf32> to vector<1x128xf32>
    %223 = vector.extract_strided_slice %220 {offsets = [0, 0], sizes = [31, 128], strides = [1, 1]} : vector<32x128xf32> to vector<31x128xf32>
    %224 = tpu.concatenate %222, %223 in 0 : vector<1x128xf32>, vector<31x128xf32> -> vector<32x128xf32>
    %225 = vector.extract_strided_slice %188 {offsets = [0, 0], sizes = [32, 1], strides = [1, 1]} : vector<32x2xbf16> to vector<32x1xbf16>
    %226 = arith.extf %225 : vector<32x1xbf16> to vector<32x1xf32>
    %227 = vector.broadcast %226 : vector<32x1xf32> to vector<32x128xf32>
    %228 = arith.mulf %224, %227 : vector<32x128xf32>
    %229 = arith.truncf %228 : vector<32x128xf32> to vector<32x128xbf16>
    %230 = vector.extract_strided_slice %220 {offsets = [1, 0], sizes = [31, 128], strides = [1, 1]} : vector<32x128xf32> to vector<31x128xf32>
    %231 = vector.extract_strided_slice %220 {offsets = [0, 0], sizes = [1, 128], strides = [1, 1]} : vector<32x128xf32> to vector<1x128xf32>
    %232 = tpu.concatenate %230, %231 in 0 : vector<31x128xf32>, vector<1x128xf32> -> vector<32x128xf32>
    %233 = vector.extract_strided_slice %188 {offsets = [0, 1], sizes = [32, 1], strides = [1, 1]} : vector<32x2xbf16> to vector<32x1xbf16>
    %234 = arith.extf %233 : vector<32x1xbf16> to vector<32x1xf32>
    %235 = vector.broadcast %234 : vector<32x1xf32> to vector<32x128xf32>
    %236 = arith.mulf %232, %235 : vector<32x128xf32>
    %237 = arith.truncf %236 : vector<32x128xf32> to vector<32x128xbf16>
    %238 = tpu.concatenate %229, %221, %237 in 1 : vector<32x128xbf16>, vector<32x128xbf16>, vector<32x128xbf16> -> vector<32x384xbf16>
    %cst_88 = arith.constant dense<0.000000e+00> : vector<32x128xf32>
    %239 = tpu.matmul %238, %179, %cst_88 {dimension_numbers = #tpu.dot_dimension_numbers<[1], [0], [0], [1], [0, 0, 1, 1], [], []>} : vector<32x384xbf16>, vector<384x128xbf16>, vector<32x128xf32> -> vector<32x128xf32>
    %cst_89 = arith.constant dense<0.000000e+00> : vector<128xf32>
    %240 = vector.multi_reduction <add>, %239, %cst_89 [0] : vector<32x128xf32> to vector<128xf32>
    %241 = vector.shape_cast %240 : vector<128xf32> to vector<1x128xf32>
    %cst_90 = arith.constant 3.200000e+01 : f32
    %242 = vector.broadcast %cst_90 : f32 to vector<1x128xf32>
    %243 = arith.divf %241, %242 : vector<1x128xf32>
    %244 = arith.mulf %239, %239 : vector<32x128xf32>
    %cst_91 = arith.constant dense<0.000000e+00> : vector<128xf32>
    %245 = vector.multi_reduction <add>, %244, %cst_91 [0] : vector<32x128xf32> to vector<128xf32>
    %246 = vector.shape_cast %245 : vector<128xf32> to vector<1x128xf32>
    %cst_92 = arith.constant 3.200000e+01 : f32
    %247 = vector.broadcast %cst_92 : f32 to vector<1x128xf32>
    %248 = arith.divf %246, %247 : vector<1x128xf32>
    %249 = arith.mulf %243, %243 : vector<1x128xf32>
    %250 = arith.subf %248, %249 : vector<1x128xf32>
    %cst_93 = arith.constant 0.000000e+00 : f32
    %251 = vector.broadcast %cst_93 : f32 to vector<1x128xf32>
    %252 = arith.maximumf %250, %251 : vector<1x128xf32>
    %cst_94 = arith.constant 9.99999974E-6 : f32
    %253 = vector.broadcast %cst_94 : f32 to vector<1x128xf32>
    %254 = arith.addf %252, %253 : vector<1x128xf32>
    %255 = math.rsqrt %254 : vector<1x128xf32>
    %256 = arith.mulf %183, %255 : vector<1x128xf32>
    %257 = vector.broadcast %256 : vector<1x128xf32> to vector<32x128xf32>
    %258 = arith.mulf %239, %257 : vector<32x128xf32>
    %259 = arith.mulf %243, %256 : vector<1x128xf32>
    %260 = arith.subf %184, %259 : vector<1x128xf32>
    %261 = vector.broadcast %260 : vector<1x128xf32> to vector<32x128xf32>
    %262 = arith.addf %258, %261 : vector<32x128xf32>
    %cst_95 = arith.constant dense<0.000000e+00> : vector<32x128xf32>
    %263 = tpu.matmul %192, %180, %cst_95 {dimension_numbers = #tpu.dot_dimension_numbers<[1], [0], [0], [1], [0, 0, 1, 1], [], []>} : vector<32x64xbf16>, vector<64x128xbf16>, vector<32x128xf32> -> vector<32x128xf32>
    %cst_96 = arith.constant dense<0.000000e+00> : vector<128xf32>
    %264 = vector.multi_reduction <add>, %263, %cst_96 [0] : vector<32x128xf32> to vector<128xf32>
    %265 = vector.shape_cast %264 : vector<128xf32> to vector<1x128xf32>
    %cst_97 = arith.constant 3.200000e+01 : f32
    %266 = vector.broadcast %cst_97 : f32 to vector<1x128xf32>
    %267 = arith.divf %265, %266 : vector<1x128xf32>
    %268 = arith.mulf %263, %263 : vector<32x128xf32>
    %cst_98 = arith.constant dense<0.000000e+00> : vector<128xf32>
    %269 = vector.multi_reduction <add>, %268, %cst_98 [0] : vector<32x128xf32> to vector<128xf32>
    %270 = vector.shape_cast %269 : vector<128xf32> to vector<1x128xf32>
    %cst_99 = arith.constant 3.200000e+01 : f32
    %271 = vector.broadcast %cst_99 : f32 to vector<1x128xf32>
    %272 = arith.divf %270, %271 : vector<1x128xf32>
    %273 = arith.mulf %267, %267 : vector<1x128xf32>
    %274 = arith.subf %272, %273 : vector<1x128xf32>
    %cst_100 = arith.constant 0.000000e+00 : f32
    %275 = vector.broadcast %cst_100 : f32 to vector<1x128xf32>
    %276 = arith.maximumf %274, %275 : vector<1x128xf32>
    %cst_101 = arith.constant 9.99999974E-6 : f32
    %277 = vector.broadcast %cst_101 : f32 to vector<1x128xf32>
    %278 = arith.addf %276, %277 : vector<1x128xf32>
    %279 = math.rsqrt %278 : vector<1x128xf32>
    %280 = arith.mulf %185, %279 : vector<1x128xf32>
    %281 = vector.broadcast %280 : vector<1x128xf32> to vector<32x128xf32>
    %282 = arith.mulf %263, %281 : vector<32x128xf32>
    %283 = arith.mulf %267, %280 : vector<1x128xf32>
    %284 = arith.subf %186, %283 : vector<1x128xf32>
    %285 = vector.broadcast %284 : vector<1x128xf32> to vector<32x128xf32>
    %286 = arith.addf %282, %285 : vector<32x128xf32>
    %287 = arith.addf %262, %286 : vector<32x128xf32>
    %cst_102 = arith.constant 0.000000e+00 : f32
    %288 = vector.broadcast %cst_102 : f32 to vector<32x128xf32>
    %289 = arith.maximumf %287, %288 : vector<32x128xf32>
    %290 = arith.truncf %289 : vector<32x128xf32> to vector<32x128xbf16>
    %c0_i32_103 = arith.constant 0 : i32
    %291 = tpu.memref_slice %arg35[%c0_i32_103] : memref<6x!tpu.dma_semaphore, #tpu.memory_space<semaphore_mem>> -> memref<1x!tpu.dma_semaphore, #tpu.memory_space<semaphore_mem>>
    %292 = tpu.memref_squeeze %291 : memref<1x!tpu.dma_semaphore, #tpu.memory_space<semaphore_mem>> -> memref<!tpu.dma_semaphore, #tpu.memory_space<semaphore_mem>>
    tpu.wait_dma2 semaphore(%292 : memref<!tpu.dma_semaphore, #tpu.memory_space<semaphore_mem>>) src(%arg20 : memref<384x256xbf16, #tpu.memory_space<any>>) dst(%arg29 : memref<384x256xbf16, #tpu.memory_space<vmem>>)
    %c1_i32_104 = arith.constant 1 : i32
    %293 = tpu.memref_slice %arg35[%c1_i32_104] : memref<6x!tpu.dma_semaphore, #tpu.memory_space<semaphore_mem>> -> memref<1x!tpu.dma_semaphore, #tpu.memory_space<semaphore_mem>>
    %294 = tpu.memref_squeeze %293 : memref<1x!tpu.dma_semaphore, #tpu.memory_space<semaphore_mem>> -> memref<!tpu.dma_semaphore, #tpu.memory_space<semaphore_mem>>
    tpu.wait_dma2 semaphore(%294 : memref<!tpu.dma_semaphore, #tpu.memory_space<semaphore_mem>>) src(%arg21 : memref<768x256xbf16, #tpu.memory_space<any>>) dst(%arg30 : memref<768x256xbf16, #tpu.memory_space<vmem>>)
    %c2_i32_105 = arith.constant 2 : i32
    %295 = tpu.memref_slice %arg35[%c2_i32_105] : memref<6x!tpu.dma_semaphore, #tpu.memory_space<semaphore_mem>> -> memref<1x!tpu.dma_semaphore, #tpu.memory_space<semaphore_mem>>
    %296 = tpu.memref_squeeze %295 : memref<1x!tpu.dma_semaphore, #tpu.memory_space<semaphore_mem>> -> memref<!tpu.dma_semaphore, #tpu.memory_space<semaphore_mem>>
    tpu.wait_dma2 semaphore(%296 : memref<!tpu.dma_semaphore, #tpu.memory_space<semaphore_mem>>) src(%arg22 : memref<128x256xbf16, #tpu.memory_space<any>>) dst(%arg31 : memref<128x256xbf16, #tpu.memory_space<vmem>>)
    %c0_106 = arith.constant 0 : index
    %c0_107 = arith.constant 0 : index
    %297 = vector.load %arg29[%c0_106, %c0_107] : memref<384x256xbf16, #tpu.memory_space<vmem>>, vector<384x256xbf16>
    %c0_108 = arith.constant 0 : index
    %c0_109 = arith.constant 0 : index
    %298 = vector.load %arg30[%c0_108, %c0_109] : memref<768x256xbf16, #tpu.memory_space<vmem>>, vector<768x256xbf16>
    %c0_110 = arith.constant 0 : index
    %c0_111 = arith.constant 0 : index
    %299 = vector.load %arg31[%c0_110, %c0_111] : memref<128x256xbf16, #tpu.memory_space<vmem>>, vector<128x256xbf16>
    %c0_112 = arith.constant 0 : index
    %c896 = arith.constant 896 : index
    %300 = vector.load %arg2[%c0_112, %c896] : memref<1x3200xf32, #tpu.memory_space<vmem>>, vector<1x256xf32>
    %c0_113 = arith.constant 0 : index
    %c896_114 = arith.constant 896 : index
    %301 = vector.load %arg3[%c0_113, %c896_114] : memref<1x3200xf32, #tpu.memory_space<vmem>>, vector<1x256xf32>
    %c0_115 = arith.constant 0 : index
    %c1152 = arith.constant 1152 : index
    %302 = vector.load %arg2[%c0_115, %c1152] : memref<1x3200xf32, #tpu.memory_space<vmem>>, vector<1x256xf32>
    %c0_116 = arith.constant 0 : index
    %c1152_117 = arith.constant 1152 : index
    %303 = vector.load %arg3[%c0_116, %c1152_117] : memref<1x3200xf32, #tpu.memory_space<vmem>>, vector<1x256xf32>
    %c0_118 = arith.constant 0 : index
    %c1408 = arith.constant 1408 : index
    %304 = vector.load %arg2[%c0_118, %c1408] : memref<1x3200xf32, #tpu.memory_space<vmem>>, vector<1x256xf32>
    %c0_119 = arith.constant 0 : index
    %c1408_120 = arith.constant 1408 : index
    %305 = vector.load %arg3[%c0_119, %c1408_120] : memref<1x3200xf32, #tpu.memory_space<vmem>>, vector<1x256xf32>
    %c0_121 = arith.constant 0 : index
    %c0_122 = arith.constant 0 : index
    %306 = vector.load %arg18[%c0_121, %c0_122] : memref<48x32xbf16, #tpu.memory_space<vmem>>, vector<48x32xbf16>
    %c0_123 = arith.constant 0 : index
    %c0_124 = arith.constant 0 : index
    %307 = vector.load %arg19[%c0_123, %c0_124] : memref<16x2xbf16, #tpu.memory_space<vmem>>, vector<16x2xbf16>
    %cst_125 = arith.constant dense<0.000000e+00> : vector<48x128xf32>
    %308 = tpu.matmul %306, %290, %cst_125 {dimension_numbers = #tpu.dot_dimension_numbers<[1], [0], [0], [1], [0, 0, 1, 1], [], []>} : vector<48x32xbf16>, vector<32x128xbf16>, vector<48x128xf32> -> vector<48x128xf32>
    %309 = arith.truncf %308 : vector<48x128xf32> to vector<48x128xbf16>
    %310 = vector.extract_strided_slice %309 {offsets = [0, 0], sizes = [16, 128], strides = [1, 1]} : vector<48x128xbf16> to vector<16x128xbf16>
    %311 = vector.extract_strided_slice %309 {offsets = [16, 0], sizes = [16, 128], strides = [1, 1]} : vector<48x128xbf16> to vector<16x128xbf16>
    %312 = vector.extract_strided_slice %309 {offsets = [32, 0], sizes = [16, 128], strides = [1, 1]} : vector<48x128xbf16> to vector<16x128xbf16>
    %313 = tpu.concatenate %310, %311, %312 in 1 : vector<16x128xbf16>, vector<16x128xbf16>, vector<16x128xbf16> -> vector<16x384xbf16>
    %cst_126 = arith.constant dense<0.000000e+00> : vector<16x256xf32>
    %314 = tpu.matmul %313, %297, %cst_126 {dimension_numbers = #tpu.dot_dimension_numbers<[1], [0], [0], [1], [0, 0, 1, 1], [], []>} : vector<16x384xbf16>, vector<384x256xbf16>, vector<16x256xf32> -> vector<16x256xf32>
    %cst_127 = arith.constant dense<0.000000e+00> : vector<256xf32>
    %315 = vector.multi_reduction <add>, %314, %cst_127 [0] : vector<16x256xf32> to vector<256xf32>
    %316 = vector.shape_cast %315 : vector<256xf32> to vector<1x256xf32>
    %cst_128 = arith.constant 1.600000e+01 : f32
    %317 = vector.broadcast %cst_128 : f32 to vector<1x256xf32>
    %318 = arith.divf %316, %317 : vector<1x256xf32>
    %319 = arith.mulf %314, %314 : vector<16x256xf32>
    %cst_129 = arith.constant dense<0.000000e+00> : vector<256xf32>
    %320 = vector.multi_reduction <add>, %319, %cst_129 [0] : vector<16x256xf32> to vector<256xf32>
    %321 = vector.shape_cast %320 : vector<256xf32> to vector<1x256xf32>
    %cst_130 = arith.constant 1.600000e+01 : f32
    %322 = vector.broadcast %cst_130 : f32 to vector<1x256xf32>
    %323 = arith.divf %321, %322 : vector<1x256xf32>
    %324 = arith.mulf %318, %318 : vector<1x256xf32>
    %325 = arith.subf %323, %324 : vector<1x256xf32>
    %cst_131 = arith.constant 0.000000e+00 : f32
    %326 = vector.broadcast %cst_131 : f32 to vector<1x256xf32>
    %327 = arith.maximumf %325, %326 : vector<1x256xf32>
    %cst_132 = arith.constant 9.99999974E-6 : f32
    %328 = vector.broadcast %cst_132 : f32 to vector<1x256xf32>
    %329 = arith.addf %327, %328 : vector<1x256xf32>
    %330 = math.rsqrt %329 : vector<1x256xf32>
    %331 = arith.mulf %300, %330 : vector<1x256xf32>
    %332 = vector.broadcast %331 : vector<1x256xf32> to vector<16x256xf32>
    %333 = arith.mulf %314, %332 : vector<16x256xf32>
    %334 = arith.mulf %318, %331 : vector<1x256xf32>
    %335 = arith.subf %301, %334 : vector<1x256xf32>
    %336 = vector.broadcast %335 : vector<1x256xf32> to vector<16x256xf32>
    %337 = arith.addf %333, %336 : vector<16x256xf32>
    %cst_133 = arith.constant 0.000000e+00 : f32
    %338 = vector.broadcast %cst_133 : f32 to vector<16x256xf32>
    %339 = arith.maximumf %337, %338 : vector<16x256xf32>
    %340 = arith.truncf %339 : vector<16x256xf32> to vector<16x256xbf16>
    %341 = vector.extract_strided_slice %339 {offsets = [15, 0], sizes = [1, 256], strides = [1, 1]} : vector<16x256xf32> to vector<1x256xf32>
    %342 = vector.extract_strided_slice %339 {offsets = [0, 0], sizes = [15, 256], strides = [1, 1]} : vector<16x256xf32> to vector<15x256xf32>
    %343 = tpu.concatenate %341, %342 in 0 : vector<1x256xf32>, vector<15x256xf32> -> vector<16x256xf32>
    %344 = vector.extract_strided_slice %307 {offsets = [0, 0], sizes = [16, 1], strides = [1, 1]} : vector<16x2xbf16> to vector<16x1xbf16>
    %345 = arith.extf %344 : vector<16x1xbf16> to vector<16x1xf32>
    %346 = vector.broadcast %345 : vector<16x1xf32> to vector<16x256xf32>
    %347 = arith.mulf %343, %346 : vector<16x256xf32>
    %348 = arith.truncf %347 : vector<16x256xf32> to vector<16x256xbf16>
    %349 = vector.extract_strided_slice %339 {offsets = [1, 0], sizes = [15, 256], strides = [1, 1]} : vector<16x256xf32> to vector<15x256xf32>
    %350 = vector.extract_strided_slice %339 {offsets = [0, 0], sizes = [1, 256], strides = [1, 1]} : vector<16x256xf32> to vector<1x256xf32>
    %351 = tpu.concatenate %349, %350 in 0 : vector<15x256xf32>, vector<1x256xf32> -> vector<16x256xf32>
    %352 = vector.extract_strided_slice %307 {offsets = [0, 1], sizes = [16, 1], strides = [1, 1]} : vector<16x2xbf16> to vector<16x1xbf16>
    %353 = arith.extf %352 : vector<16x1xbf16> to vector<16x1xf32>
    %354 = vector.broadcast %353 : vector<16x1xf32> to vector<16x256xf32>
    %355 = arith.mulf %351, %354 : vector<16x256xf32>
    %356 = arith.truncf %355 : vector<16x256xf32> to vector<16x256xbf16>
    %357 = tpu.concatenate %348, %340, %356 in 1 : vector<16x256xbf16>, vector<16x256xbf16>, vector<16x256xbf16> -> vector<16x768xbf16>
    %cst_134 = arith.constant dense<0.000000e+00> : vector<16x256xf32>
    %358 = tpu.matmul %357, %298, %cst_134 {dimension_numbers = #tpu.dot_dimension_numbers<[1], [0], [0], [1], [0, 0, 1, 1], [], []>} : vector<16x768xbf16>, vector<768x256xbf16>, vector<16x256xf32> -> vector<16x256xf32>
    %cst_135 = arith.constant dense<0.000000e+00> : vector<256xf32>
    %359 = vector.multi_reduction <add>, %358, %cst_135 [0] : vector<16x256xf32> to vector<256xf32>
    %360 = vector.shape_cast %359 : vector<256xf32> to vector<1x256xf32>
    %cst_136 = arith.constant 1.600000e+01 : f32
    %361 = vector.broadcast %cst_136 : f32 to vector<1x256xf32>
    %362 = arith.divf %360, %361 : vector<1x256xf32>
    %363 = arith.mulf %358, %358 : vector<16x256xf32>
    %cst_137 = arith.constant dense<0.000000e+00> : vector<256xf32>
    %364 = vector.multi_reduction <add>, %363, %cst_137 [0] : vector<16x256xf32> to vector<256xf32>
    %365 = vector.shape_cast %364 : vector<256xf32> to vector<1x256xf32>
    %cst_138 = arith.constant 1.600000e+01 : f32
    %366 = vector.broadcast %cst_138 : f32 to vector<1x256xf32>
    %367 = arith.divf %365, %366 : vector<1x256xf32>
    %368 = arith.mulf %362, %362 : vector<1x256xf32>
    %369 = arith.subf %367, %368 : vector<1x256xf32>
    %cst_139 = arith.constant 0.000000e+00 : f32
    %370 = vector.broadcast %cst_139 : f32 to vector<1x256xf32>
    %371 = arith.maximumf %369, %370 : vector<1x256xf32>
    %cst_140 = arith.constant 9.99999974E-6 : f32
    %372 = vector.broadcast %cst_140 : f32 to vector<1x256xf32>
    %373 = arith.addf %371, %372 : vector<1x256xf32>
    %374 = math.rsqrt %373 : vector<1x256xf32>
    %375 = arith.mulf %302, %374 : vector<1x256xf32>
    %376 = vector.broadcast %375 : vector<1x256xf32> to vector<16x256xf32>
    %377 = arith.mulf %358, %376 : vector<16x256xf32>
    %378 = arith.mulf %362, %375 : vector<1x256xf32>
    %379 = arith.subf %303, %378 : vector<1x256xf32>
    %380 = vector.broadcast %379 : vector<1x256xf32> to vector<16x256xf32>
    %381 = arith.addf %377, %380 : vector<16x256xf32>
    %cst_141 = arith.constant dense<0.000000e+00> : vector<16x256xf32>
    %382 = tpu.matmul %311, %299, %cst_141 {dimension_numbers = #tpu.dot_dimension_numbers<[1], [0], [0], [1], [0, 0, 1, 1], [], []>} : vector<16x128xbf16>, vector<128x256xbf16>, vector<16x256xf32> -> vector<16x256xf32>
    %cst_142 = arith.constant dense<0.000000e+00> : vector<256xf32>
    %383 = vector.multi_reduction <add>, %382, %cst_142 [0] : vector<16x256xf32> to vector<256xf32>
    %384 = vector.shape_cast %383 : vector<256xf32> to vector<1x256xf32>
    %cst_143 = arith.constant 1.600000e+01 : f32
    %385 = vector.broadcast %cst_143 : f32 to vector<1x256xf32>
    %386 = arith.divf %384, %385 : vector<1x256xf32>
    %387 = arith.mulf %382, %382 : vector<16x256xf32>
    %cst_144 = arith.constant dense<0.000000e+00> : vector<256xf32>
    %388 = vector.multi_reduction <add>, %387, %cst_144 [0] : vector<16x256xf32> to vector<256xf32>
    %389 = vector.shape_cast %388 : vector<256xf32> to vector<1x256xf32>
    %cst_145 = arith.constant 1.600000e+01 : f32
    %390 = vector.broadcast %cst_145 : f32 to vector<1x256xf32>
    %391 = arith.divf %389, %390 : vector<1x256xf32>
    %392 = arith.mulf %386, %386 : vector<1x256xf32>
    %393 = arith.subf %391, %392 : vector<1x256xf32>
    %cst_146 = arith.constant 0.000000e+00 : f32
    %394 = vector.broadcast %cst_146 : f32 to vector<1x256xf32>
    %395 = arith.maximumf %393, %394 : vector<1x256xf32>
    %cst_147 = arith.constant 9.99999974E-6 : f32
    %396 = vector.broadcast %cst_147 : f32 to vector<1x256xf32>
    %397 = arith.addf %395, %396 : vector<1x256xf32>
    %398 = math.rsqrt %397 : vector<1x256xf32>
    %399 = arith.mulf %304, %398 : vector<1x256xf32>
    %400 = vector.broadcast %399 : vector<1x256xf32> to vector<16x256xf32>
    %401 = arith.mulf %382, %400 : vector<16x256xf32>
    %402 = arith.mulf %386, %399 : vector<1x256xf32>
    %403 = arith.subf %305, %402 : vector<1x256xf32>
    %404 = vector.broadcast %403 : vector<1x256xf32> to vector<16x256xf32>
    %405 = arith.addf %401, %404 : vector<16x256xf32>
    %406 = arith.addf %381, %405 : vector<16x256xf32>
    %cst_148 = arith.constant 0.000000e+00 : f32
    %407 = vector.broadcast %cst_148 : f32 to vector<16x256xf32>
    %408 = arith.maximumf %406, %407 : vector<16x256xf32>
    %409 = arith.truncf %408 : vector<16x256xf32> to vector<16x256xbf16>
    %c3_i32_149 = arith.constant 3 : i32
    %410 = tpu.memref_slice %arg35[%c3_i32_149] : memref<6x!tpu.dma_semaphore, #tpu.memory_space<semaphore_mem>> -> memref<1x!tpu.dma_semaphore, #tpu.memory_space<semaphore_mem>>
    %411 = tpu.memref_squeeze %410 : memref<1x!tpu.dma_semaphore, #tpu.memory_space<semaphore_mem>> -> memref<!tpu.dma_semaphore, #tpu.memory_space<semaphore_mem>>
    tpu.wait_dma2 semaphore(%411 : memref<!tpu.dma_semaphore, #tpu.memory_space<semaphore_mem>>) src(%arg25 : memref<768x512xbf16, #tpu.memory_space<any>>) dst(%arg32 : memref<768x512xbf16, #tpu.memory_space<vmem>>)
    %c4_i32_150 = arith.constant 4 : i32
    %412 = tpu.memref_slice %arg35[%c4_i32_150] : memref<6x!tpu.dma_semaphore, #tpu.memory_space<semaphore_mem>> -> memref<1x!tpu.dma_semaphore, #tpu.memory_space<semaphore_mem>>
    %413 = tpu.memref_squeeze %412 : memref<1x!tpu.dma_semaphore, #tpu.memory_space<semaphore_mem>> -> memref<!tpu.dma_semaphore, #tpu.memory_space<semaphore_mem>>
    tpu.wait_dma2 semaphore(%413 : memref<!tpu.dma_semaphore, #tpu.memory_space<semaphore_mem>>) src(%arg26 : memref<1536x512xbf16, #tpu.memory_space<any>>) dst(%arg33 : memref<1536x512xbf16, #tpu.memory_space<vmem>>)
    %c5_i32_151 = arith.constant 5 : i32
    %414 = tpu.memref_slice %arg35[%c5_i32_151] : memref<6x!tpu.dma_semaphore, #tpu.memory_space<semaphore_mem>> -> memref<1x!tpu.dma_semaphore, #tpu.memory_space<semaphore_mem>>
    %415 = tpu.memref_squeeze %414 : memref<1x!tpu.dma_semaphore, #tpu.memory_space<semaphore_mem>> -> memref<!tpu.dma_semaphore, #tpu.memory_space<semaphore_mem>>
    tpu.wait_dma2 semaphore(%415 : memref<!tpu.dma_semaphore, #tpu.memory_space<semaphore_mem>>) src(%arg27 : memref<256x512xbf16, #tpu.memory_space<any>>) dst(%arg34 : memref<256x512xbf16, #tpu.memory_space<vmem>>)
    %c0_152 = arith.constant 0 : index
    %c0_153 = arith.constant 0 : index
    %416 = vector.load %arg32[%c0_152, %c0_153] : memref<768x512xbf16, #tpu.memory_space<vmem>>, vector<768x512xbf16>
    %c0_154 = arith.constant 0 : index
    %c0_155 = arith.constant 0 : index
    %417 = vector.load %arg33[%c0_154, %c0_155] : memref<1536x512xbf16, #tpu.memory_space<vmem>>, vector<1536x512xbf16>
    %c0_156 = arith.constant 0 : index
    %c0_157 = arith.constant 0 : index
    %418 = vector.load %arg34[%c0_156, %c0_157] : memref<256x512xbf16, #tpu.memory_space<vmem>>, vector<256x512xbf16>
    %c0_158 = arith.constant 0 : index
    %c1664 = arith.constant 1664 : index
    %419 = vector.load %arg2[%c0_158, %c1664] : memref<1x3200xf32, #tpu.memory_space<vmem>>, vector<1x512xf32>
    %c0_159 = arith.constant 0 : index
    %c1664_160 = arith.constant 1664 : index
    %420 = vector.load %arg3[%c0_159, %c1664_160] : memref<1x3200xf32, #tpu.memory_space<vmem>>, vector<1x512xf32>
    %c0_161 = arith.constant 0 : index
    %c2176 = arith.constant 2176 : index
    %421 = vector.load %arg2[%c0_161, %c2176] : memref<1x3200xf32, #tpu.memory_space<vmem>>, vector<1x512xf32>
    %c0_162 = arith.constant 0 : index
    %c2176_163 = arith.constant 2176 : index
    %422 = vector.load %arg3[%c0_162, %c2176_163] : memref<1x3200xf32, #tpu.memory_space<vmem>>, vector<1x512xf32>
    %c0_164 = arith.constant 0 : index
    %c2688 = arith.constant 2688 : index
    %423 = vector.load %arg2[%c0_164, %c2688] : memref<1x3200xf32, #tpu.memory_space<vmem>>, vector<1x512xf32>
    %c0_165 = arith.constant 0 : index
    %c2688_166 = arith.constant 2688 : index
    %424 = vector.load %arg3[%c0_165, %c2688_166] : memref<1x3200xf32, #tpu.memory_space<vmem>>, vector<1x512xf32>
    %c0_167 = arith.constant 0 : index
    %c0_168 = arith.constant 0 : index
    %425 = vector.load %arg23[%c0_167, %c0_168] : memref<24x16xbf16, #tpu.memory_space<vmem>>, vector<24x16xbf16>
    %c0_169 = arith.constant 0 : index
    %c0_170 = arith.constant 0 : index
    %426 = vector.load %arg24[%c0_169, %c0_170] : memref<8x2xbf16, #tpu.memory_space<vmem>>, vector<8x2xbf16>
    %cst_171 = arith.constant dense<0.000000e+00> : vector<24x256xf32>
    %427 = tpu.matmul %425, %409, %cst_171 {dimension_numbers = #tpu.dot_dimension_numbers<[1], [0], [0], [1], [0, 0, 1, 1], [], []>} : vector<24x16xbf16>, vector<16x256xbf16>, vector<24x256xf32> -> vector<24x256xf32>
    %428 = arith.truncf %427 : vector<24x256xf32> to vector<24x256xbf16>
    %429 = vector.extract_strided_slice %428 {offsets = [0, 0], sizes = [8, 256], strides = [1, 1]} : vector<24x256xbf16> to vector<8x256xbf16>
    %430 = vector.extract_strided_slice %428 {offsets = [8, 0], sizes = [8, 256], strides = [1, 1]} : vector<24x256xbf16> to vector<8x256xbf16>
    %431 = vector.extract_strided_slice %428 {offsets = [16, 0], sizes = [8, 256], strides = [1, 1]} : vector<24x256xbf16> to vector<8x256xbf16>
    %432 = tpu.concatenate %429, %430, %431 in 1 : vector<8x256xbf16>, vector<8x256xbf16>, vector<8x256xbf16> -> vector<8x768xbf16>
    %cst_172 = arith.constant dense<0.000000e+00> : vector<8x512xf32>
    %433 = tpu.matmul %432, %416, %cst_172 {dimension_numbers = #tpu.dot_dimension_numbers<[1], [0], [0], [1], [0, 0, 1, 1], [], []>} : vector<8x768xbf16>, vector<768x512xbf16>, vector<8x512xf32> -> vector<8x512xf32>
    %cst_173 = arith.constant dense<0.000000e+00> : vector<512xf32>
    %434 = vector.multi_reduction <add>, %433, %cst_173 [0] : vector<8x512xf32> to vector<512xf32>
    %435 = vector.shape_cast %434 : vector<512xf32> to vector<1x512xf32>
    %cst_174 = arith.constant 8.000000e+00 : f32
    %436 = vector.broadcast %cst_174 : f32 to vector<1x512xf32>
    %437 = arith.divf %435, %436 : vector<1x512xf32>
    %438 = arith.mulf %433, %433 : vector<8x512xf32>
    %cst_175 = arith.constant dense<0.000000e+00> : vector<512xf32>
    %439 = vector.multi_reduction <add>, %438, %cst_175 [0] : vector<8x512xf32> to vector<512xf32>
    %440 = vector.shape_cast %439 : vector<512xf32> to vector<1x512xf32>
    %cst_176 = arith.constant 8.000000e+00 : f32
    %441 = vector.broadcast %cst_176 : f32 to vector<1x512xf32>
    %442 = arith.divf %440, %441 : vector<1x512xf32>
    %443 = arith.mulf %437, %437 : vector<1x512xf32>
    %444 = arith.subf %442, %443 : vector<1x512xf32>
    %cst_177 = arith.constant 0.000000e+00 : f32
    %445 = vector.broadcast %cst_177 : f32 to vector<1x512xf32>
    %446 = arith.maximumf %444, %445 : vector<1x512xf32>
    %cst_178 = arith.constant 9.99999974E-6 : f32
    %447 = vector.broadcast %cst_178 : f32 to vector<1x512xf32>
    %448 = arith.addf %446, %447 : vector<1x512xf32>
    %449 = math.rsqrt %448 : vector<1x512xf32>
    %450 = arith.mulf %419, %449 : vector<1x512xf32>
    %451 = vector.broadcast %450 : vector<1x512xf32> to vector<8x512xf32>
    %452 = arith.mulf %433, %451 : vector<8x512xf32>
    %453 = arith.mulf %437, %450 : vector<1x512xf32>
    %454 = arith.subf %420, %453 : vector<1x512xf32>
    %455 = vector.broadcast %454 : vector<1x512xf32> to vector<8x512xf32>
    %456 = arith.addf %452, %455 : vector<8x512xf32>
    %cst_179 = arith.constant 0.000000e+00 : f32
    %457 = vector.broadcast %cst_179 : f32 to vector<8x512xf32>
    %458 = arith.maximumf %456, %457 : vector<8x512xf32>
    %459 = arith.truncf %458 : vector<8x512xf32> to vector<8x512xbf16>
    %460 = vector.extract_strided_slice %458 {offsets = [7, 0], sizes = [1, 512], strides = [1, 1]} : vector<8x512xf32> to vector<1x512xf32>
    %461 = vector.extract_strided_slice %458 {offsets = [0, 0], sizes = [7, 512], strides = [1, 1]} : vector<8x512xf32> to vector<7x512xf32>
    %462 = tpu.concatenate %460, %461 in 0 : vector<1x512xf32>, vector<7x512xf32> -> vector<8x512xf32>
    %463 = vector.extract_strided_slice %426 {offsets = [0, 0], sizes = [8, 1], strides = [1, 1]} : vector<8x2xbf16> to vector<8x1xbf16>
    %464 = arith.extf %463 : vector<8x1xbf16> to vector<8x1xf32>
    %465 = vector.broadcast %464 : vector<8x1xf32> to vector<8x512xf32>
    %466 = arith.mulf %462, %465 : vector<8x512xf32>
    %467 = arith.truncf %466 : vector<8x512xf32> to vector<8x512xbf16>
    %468 = vector.extract_strided_slice %458 {offsets = [1, 0], sizes = [7, 512], strides = [1, 1]} : vector<8x512xf32> to vector<7x512xf32>
    %469 = vector.extract_strided_slice %458 {offsets = [0, 0], sizes = [1, 512], strides = [1, 1]} : vector<8x512xf32> to vector<1x512xf32>
    %470 = tpu.concatenate %468, %469 in 0 : vector<7x512xf32>, vector<1x512xf32> -> vector<8x512xf32>
    %471 = vector.extract_strided_slice %426 {offsets = [0, 1], sizes = [8, 1], strides = [1, 1]} : vector<8x2xbf16> to vector<8x1xbf16>
    %472 = arith.extf %471 : vector<8x1xbf16> to vector<8x1xf32>
    %473 = vector.broadcast %472 : vector<8x1xf32> to vector<8x512xf32>
    %474 = arith.mulf %470, %473 : vector<8x512xf32>
    %475 = arith.truncf %474 : vector<8x512xf32> to vector<8x512xbf16>
    %476 = tpu.concatenate %467, %459, %475 in 1 : vector<8x512xbf16>, vector<8x512xbf16>, vector<8x512xbf16> -> vector<8x1536xbf16>
    %cst_180 = arith.constant dense<0.000000e+00> : vector<8x512xf32>
    %477 = tpu.matmul %476, %417, %cst_180 {dimension_numbers = #tpu.dot_dimension_numbers<[1], [0], [0], [1], [0, 0, 1, 1], [], []>} : vector<8x1536xbf16>, vector<1536x512xbf16>, vector<8x512xf32> -> vector<8x512xf32>
    %cst_181 = arith.constant dense<0.000000e+00> : vector<512xf32>
    %478 = vector.multi_reduction <add>, %477, %cst_181 [0] : vector<8x512xf32> to vector<512xf32>
    %479 = vector.shape_cast %478 : vector<512xf32> to vector<1x512xf32>
    %cst_182 = arith.constant 8.000000e+00 : f32
    %480 = vector.broadcast %cst_182 : f32 to vector<1x512xf32>
    %481 = arith.divf %479, %480 : vector<1x512xf32>
    %482 = arith.mulf %477, %477 : vector<8x512xf32>
    %cst_183 = arith.constant dense<0.000000e+00> : vector<512xf32>
    %483 = vector.multi_reduction <add>, %482, %cst_183 [0] : vector<8x512xf32> to vector<512xf32>
    %484 = vector.shape_cast %483 : vector<512xf32> to vector<1x512xf32>
    %cst_184 = arith.constant 8.000000e+00 : f32
    %485 = vector.broadcast %cst_184 : f32 to vector<1x512xf32>
    %486 = arith.divf %484, %485 : vector<1x512xf32>
    %487 = arith.mulf %481, %481 : vector<1x512xf32>
    %488 = arith.subf %486, %487 : vector<1x512xf32>
    %cst_185 = arith.constant 0.000000e+00 : f32
    %489 = vector.broadcast %cst_185 : f32 to vector<1x512xf32>
    %490 = arith.maximumf %488, %489 : vector<1x512xf32>
    %cst_186 = arith.constant 9.99999974E-6 : f32
    %491 = vector.broadcast %cst_186 : f32 to vector<1x512xf32>
    %492 = arith.addf %490, %491 : vector<1x512xf32>
    %493 = math.rsqrt %492 : vector<1x512xf32>
    %494 = arith.mulf %421, %493 : vector<1x512xf32>
    %495 = vector.broadcast %494 : vector<1x512xf32> to vector<8x512xf32>
    %496 = arith.mulf %477, %495 : vector<8x512xf32>
    %497 = arith.mulf %481, %494 : vector<1x512xf32>
    %498 = arith.subf %422, %497 : vector<1x512xf32>
    %499 = vector.broadcast %498 : vector<1x512xf32> to vector<8x512xf32>
    %500 = arith.addf %496, %499 : vector<8x512xf32>
    %cst_187 = arith.constant dense<0.000000e+00> : vector<8x512xf32>
    %501 = tpu.matmul %430, %418, %cst_187 {dimension_numbers = #tpu.dot_dimension_numbers<[1], [0], [0], [1], [0, 0, 1, 1], [], []>} : vector<8x256xbf16>, vector<256x512xbf16>, vector<8x512xf32> -> vector<8x512xf32>
    %cst_188 = arith.constant dense<0.000000e+00> : vector<512xf32>
    %502 = vector.multi_reduction <add>, %501, %cst_188 [0] : vector<8x512xf32> to vector<512xf32>
    %503 = vector.shape_cast %502 : vector<512xf32> to vector<1x512xf32>
    %cst_189 = arith.constant 8.000000e+00 : f32
    %504 = vector.broadcast %cst_189 : f32 to vector<1x512xf32>
    %505 = arith.divf %503, %504 : vector<1x512xf32>
    %506 = arith.mulf %501, %501 : vector<8x512xf32>
    %cst_190 = arith.constant dense<0.000000e+00> : vector<512xf32>
    %507 = vector.multi_reduction <add>, %506, %cst_190 [0] : vector<8x512xf32> to vector<512xf32>
    %508 = vector.shape_cast %507 : vector<512xf32> to vector<1x512xf32>
    %cst_191 = arith.constant 8.000000e+00 : f32
    %509 = vector.broadcast %cst_191 : f32 to vector<1x512xf32>
    %510 = arith.divf %508, %509 : vector<1x512xf32>
    %511 = arith.mulf %505, %505 : vector<1x512xf32>
    %512 = arith.subf %510, %511 : vector<1x512xf32>
    %cst_192 = arith.constant 0.000000e+00 : f32
    %513 = vector.broadcast %cst_192 : f32 to vector<1x512xf32>
    %514 = arith.maximumf %512, %513 : vector<1x512xf32>
    %cst_193 = arith.constant 9.99999974E-6 : f32
    %515 = vector.broadcast %cst_193 : f32 to vector<1x512xf32>
    %516 = arith.addf %514, %515 : vector<1x512xf32>
    %517 = math.rsqrt %516 : vector<1x512xf32>
    %518 = arith.mulf %423, %517 : vector<1x512xf32>
    %519 = vector.broadcast %518 : vector<1x512xf32> to vector<8x512xf32>
    %520 = arith.mulf %501, %519 : vector<8x512xf32>
    %521 = arith.mulf %505, %518 : vector<1x512xf32>
    %522 = arith.subf %424, %521 : vector<1x512xf32>
    %523 = vector.broadcast %522 : vector<1x512xf32> to vector<8x512xf32>
    %524 = arith.addf %520, %523 : vector<8x512xf32>
    %525 = arith.addf %500, %524 : vector<8x512xf32>
    %cst_194 = arith.constant 0.000000e+00 : f32
    %526 = vector.broadcast %cst_194 : f32 to vector<8x512xf32>
    %527 = arith.maximumf %525, %526 : vector<8x512xf32>
    %528 = arith.truncf %527 : vector<8x512xf32> to vector<8x512xbf16>
    %c0_195 = arith.constant 0 : index
    %c0_196 = arith.constant 0 : index
    %529 = vector.load %arg5[%c0_195, %c0_196] : memref<2x8xbf16, #tpu.memory_space<vmem>>, vector<2x8xbf16>
    %cst_197 = arith.constant dense<0.000000e+00> : vector<2x512xf32>
    %530 = tpu.matmul %529, %528, %cst_197 {dimension_numbers = #tpu.dot_dimension_numbers<[1], [0], [0], [1], [0, 0, 1, 1], [], []>} : vector<2x8xbf16>, vector<8x512xbf16>, vector<2x512xf32> -> vector<2x512xf32>
    %531 = arith.truncf %530 : vector<2x512xf32> to vector<2x512xbf16>
    %c0_198 = arith.constant 0 : index
    %c0_199 = arith.constant 0 : index
    %532 = vector.load %arg6[%c0_198, %c0_199] : memref<512x128xbf16, #tpu.memory_space<vmem>>, vector<512x128xbf16>
    %cst_200 = arith.constant dense<0.000000e+00> : vector<2x128xf32>
    %533 = tpu.matmul %531, %532, %cst_200 {dimension_numbers = #tpu.dot_dimension_numbers<[1], [0], [0], [1], [0, 0, 1, 1], [], []>} : vector<2x512xbf16>, vector<512x128xbf16>, vector<2x128xf32> -> vector<2x128xf32>
    %c0_201 = arith.constant 0 : index
    %c0_202 = arith.constant 0 : index
    %534 = vector.load %arg7[%c0_201, %c0_202] : memref<1x128xf32, #tpu.memory_space<vmem>>, vector<1x128xf32>
    %535 = vector.broadcast %534 : vector<1x128xf32> to vector<2x128xf32>
    %536 = arith.addf %533, %535 : vector<2x128xf32>
    %c0_203 = arith.constant 0 : index
    %c0_204 = arith.constant 0 : index
    %537 = vector.load %arg28[%c0_203, %c0_204] : memref<2x128xf32, #tpu.memory_space<vmem>>, vector<2x128xf32>
    tpu.vector_store %arg28[%c0_203, %c0_204], %536 {strides = array<i32>} : memref<2x128xf32, #tpu.memory_space<vmem>>, vector<2x128xf32>,
    return
  }
}

</mosaic_0001>

<bundles_post_ra>
// kernel: mini_resnet_forward.1
= control target key start
LH: loop header
LB: loop body
LE: loop exit
PB: predicated region body
PF: predicated region fallthrough
CT: control target
= control target key end

     0   :  { %s20951_s0 = inlined_call_operand.vmem [shape: bf16[146,10], index: 0, kind: input, shape index: {}]   ;;  %s20952_s1 = inlined_call_operand.hbm [shape: bf16[10,32], index: 1, kind: input, shape index: {}]   ;;  %s20953_s2 = inlined_call_operand.hbm [shape: f32[1,3200], index: 2, kind: input, shape index: {}]   ;;  %s20954_s3 = inlined_call_operand.hbm [shape: f32[1,3200], index: 3, kind: input, shape index: {}]   ;;  %s20955_s4 = inlined_call_operand.vmem [shape: bf16[1280,146], index: 4, kind: input, shape index: {}]   ;;  %s20956_s5 = inlined_call_operand.hbm [shape: bf16[2,8], index: 5, kind: input, shape index: {}]   ;;  %s20957_s6 = inlined_call_operand.hbm [shape: bf16[512,128], index: 6, kind: input, shape index: {}]   ;;  %s20958_s7 = inlined_call_operand.hbm [shape: f32[1,128], index: 7, kind: input, shape index: {}]   ;;  %s20959_s8 = inlined_call_operand.hbm [shape: bf16[192,128], index: 8, kind: input, shape index: {}]   ;;  %s20960_s9 = inlined_call_operand.vmem [shape: bf16[64,2], index: 9, kind: input, shape index: {}]   ;;  %s20961_s10 = inlined_call_operand.vmem [shape: bf16[96,64], index: 10, kind: input, shape index: {}]   ;;  %s20962_s11 = inlined_call_operand.vmem [shape: bf16[192,64], index: 11, kind: input, shape index: {}]   ;;  %s20963_s12 = inlined_call_operand.hbm [shape: bf16[32,64], index: 12, kind: input, shape index: {}]   ;;  %s20964_s13 = inlined_call_operand.vmem [shape: bf16[96,64], index: 13, kind: input, shape index: {}]   ;;  %s20965_s14 = inlined_call_operand.vmem [shape: bf16[32,2], index: 14, kind: input, shape index: {}]   ;;  %s20966_s15 = inlined_call_operand.hbm [shape: bf16[192,128], index: 15, kind: input, shape index: {}]   ;;  %s20967_s16 = inlined_call_operand.hbm [shape: bf16[384,128], index: 16, kind: input, shape index: {}]   ;;  %s20968_s17 = inlined_call_operand.hbm [shape: bf16[64,128], index: 17, kind: input, shape index: {}]   ;;  %s20969_s18 = inlined_call_operand.vmem [shape: bf16[48,32], index: 18, kind: input, shape index: {}]   ;;  %s20970_s19 = inlined_call_operand.vmem [shape: bf16[16,2], index: 19, kind: input, shape index: {}]   ;;  %s20971_s20 = inlined_call_operand.hbm [shape: bf16[384,256], index: 20, kind: input, shape index: {}]   ;;  %s20972_s21 = inlined_call_operand.vmem [shape: bf16[768,256], index: 21, kind: input, shape index: {}]   ;;  %s20973_s22 = inlined_call_operand.hbm [shape: bf16[128,256], index: 22, kind: input, shape index: {}]   ;;  %s20974_s23 = inlined_call_operand.vmem [shape: bf16[24,16], index: 23, kind: input, shape index: {}]   ;;  %s20975_s24 = inlined_call_operand.vmem [shape: bf16[8,2], index: 24, kind: input, shape index: {}]   ;;  %s20976_s25 = inlined_call_operand.vmem [shape: bf16[768,512], index: 25, kind: input, shape index: {}]   ;;  %s20977_s26 = inlined_call_operand.hbm [shape: bf16[1536,512], index: 26, kind: input, shape index: {}]   ;;  %s20978_s27 = inlined_call_operand.hbm [shape: bf16[256,512], index: 27, kind: input, shape index: {}]   ;;  %s20979_s28 = inlined_call_operand.hbm [shape: f32[2,128], index: 28, kind: output, shape index: {}]  }
   0x1   :  { %21267 = sst [smem:[#allocation330_spill]] %s20951_s0 }
   0x2   :  { %21268 = sst [smem:[#allocation331_spill]] %s20952_s1 }
   0x3   :  { %21269 = sst [smem:[#allocation332_spill]] %s20953_s2 }
   0x4   :  { %21270 = sst [smem:[#allocation333_spill]] %s20954_s3 }
   0x5   :  { %21271 = sst [smem:[#allocation334_spill]] %s20955_s4 }
   0x6   :  { %21272 = sst [smem:[#allocation335_spill]] %s20956_s5 }
   0x7   :  { %21273 = sst [smem:[#allocation336_spill]] %s20957_s6 }
   0x8   :  { %21274 = sst [smem:[#allocation337_spill]] %s20958_s7 }
   0x9   :  { %21275 = sst [smem:[#allocation338_spill]] %s20959_s8 }
   0xa   :  { %21276 = sst [smem:[#allocation339_spill]] %s20960_s9 }
   0xb   :  { %21277 = sst [smem:[#allocation340_spill]] %s20961_s10 }
   0xc   :  { %21278 = sst [smem:[#allocation341_spill]] %s20962_s11 }
   0xd   :  { %21279 = sst [smem:[#allocation342_spill]] %s20963_s12 }
   0xe   :  { %33 = vsyncpa [#allocation10], 0 }
   0xf   :  { %34 = vsyncpa [#allocation13], 0 }
  0x10   :  { %35 = vsyncpa [#allocation16], 0 }
  0x11   :  { %36 = vsyncpa [#allocation19], 0 }
  0x12   :  { %37 = vsyncpa [#allocation22], 0 }
  0x13   :  { %38 = vsyncpa [#allocation25], 0 }
  0x14   :  { %39 = vsyncpa [#allocation11], 0  ;;  %s16315_s8 = smov [#allocation12]   ;;  %s16316_s9 = smov [#allocation15]  }
  0x15   :  { %s60_s5 = sshll.u32 %s16315_s8, 4  ;;  %s82_s30 = sshll.u32 %s16316_s9, 4  ;;  %s61_s5 = int_to_ptr.vmem [resolvable:$true] %s60_s5  ;;  %s83_s30 = int_to_ptr.vmem [resolvable:$true] %s82_s30 }
  0x16   :  { %s15977_s3 = scalar_lea.vmem %s61_s5, 400  ;;  %s15981_s6 = scalar_lea.vmem %s61_s5, 416 }
  0x17   :  { %p15978_p0 = scmp.ne.s32.totalorder %s61_s5, %s15977_s3  ;;  %p15982_p1 = scmp.lt.s32.totalorder %s61_s5, %s61_s5 }
  0x18   :  { %p15983_p2 = scmp.lt.s32.totalorder %s15981_s6, %s15977_s3 }
  0x1a   :  { %p15984_p3 = por %p15983_p2, %p15982_p1 }
  0x1c   :  { %p15985_p4 = pnand %p15984_p3, %p15978_p0 }
  0x1e   :  { %15988 = shalt.err (!%p15985_p4)
}
  0x1f   :  { %s21280_s11 = sld [smem:[#allocation332_spill]]  ;;  %s15997_s29 = scalar_lea.vmem %s83_s30, 16 }
  0x20   :  { %p15998_p5 = scmp.ne.s32.totalorder %s83_s30, %s15997_s29  ;;  %s16001_s2 = scalar_lea.vmem %s83_s30, 32 }
  0x21   :  { %p16002_p6 = scmp.lt.s32.totalorder %s83_s30, %s83_s30  ;;  %p16003_p7 = scmp.lt.s32.totalorder %s16001_s2, %s15997_s29 }
  0x23   :  { %p16004_p8 = por %p16003_p7, %p16002_p6 }
  0x25   :  { %63 = dma.hbm_to_vmem [thread:$0]  %s21280_s11, 400, %s61_s5, [#allocation13]  }
  0x26   :  { %p16005_p9 = pnand %p16004_p8, %p15998_p5 }
  0x28   :  { %16008 = shalt.err (!%p16005_p9)
}
  0x29   :  { %s21281_s1 = sld [smem:[#allocation335_spill]]  ;;  %s16317_s4 = smov [#allocation18]  }
  0x2a   :  { %s104_s8 = sshll.u32 %s16317_s4, 4  ;;  %s105_s8 = int_to_ptr.vmem [resolvable:$true] %s104_s8 }
  0x2b   :  { %s16017_s9 = scalar_lea.vmem %s105_s8, 16  ;;  %s16021_s3 = scalar_lea.vmem %s105_s8, 32 }
  0x2c   :  { %p16018_p10 = scmp.ne.s32.totalorder %s105_s8, %s16017_s9  ;;  %p16022_p11 = scmp.lt.s32.totalorder %s105_s8, %s105_s8 }
  0x2d   :  { %p16023_p12 = scmp.lt.s32.totalorder %s16021_s3, %s16017_s9 }
  0x2f   :  { %85 = dma.hbm_to_vmem [thread:$0]  %s21281_s1, 16, %s83_s30, [#allocation16]  }
  0x30   :  { %p16024_p13 = por %p16023_p12, %p16022_p11 }
  0x32   :  { %p16025_p0 = pnand %p16024_p13, %p16018_p10 }
  0x34   :  { %16028 = shalt.err (!%p16025_p0)
}
  0x35   :  { %s21282_s10 = sld [smem:[#allocation337_spill]]  ;;  %s16318_s0 = smov [#allocation21]  }
  0x36   :  { %s131_s11 = sshll.u32 %s16318_s0, 4  ;;  %s16319_s29 = smov [#allocation24]   ;;  %s132_s11 = int_to_ptr.vmem [resolvable:$true] %s131_s11 }
  0x37   :  { %s159_s30 = sshll.u32 %s16319_s29, 4  ;;  %s16037_s2 = scalar_lea.vmem %s132_s11, 256  ;;  %s160_s30 = int_to_ptr.vmem [resolvable:$true] %s159_s30 }
  0x38   :  { %p16038_p1 = scmp.ne.s32.totalorder %s132_s11, %s16037_s2  ;;  %p16042_p2 = scmp.lt.s32.totalorder %s132_s11, %s132_s11 }
  0x39   :  { %p16043_p3 = scmp.lt.s32.totalorder %s16037_s2, %s16037_s2 }
  0x3b   :  { %107 = dma.hbm_to_vmem [thread:$0]  %s21282_s10, 16, %s105_s8, [#allocation19]  }
  0x3c   :  { %p16044_p4 = por %p16043_p3, %p16042_p2 }
  0x3e   :  { %p16045_p5 = pnand %p16044_p4, %p16038_p1 }
  0x40   :  { %16048 = shalt.err (!%p16045_p5)
}
  0x41   :  { %s16320_s7 = smov 64   ;;  %s16321_s12 = smov 4  }
  0x42   :  { %s21283_s8 = sld [smem:[#allocation342_spill]]  ;;  %s16057_s9 = scalar_lea.vmem %s160_s30, 3072 }
  0x43   :  { %p16058_p6 = scmp.ne.s32.totalorder %s160_s30, %s16057_s9  ;;  %p16062_p7 = scmp.lt.s32.totalorder %s160_s30, %s160_s30 }
  0x44   :  { %p16063_p8 = scmp.lt.s32.totalorder %s16057_s9, %s16057_s9 }
  0x46   :  { %p16064_p9 = por %p16063_p8, %p16062_p7 }
  0x48   :  { %137 = dma.hbm_to_vmem [thread:$0]  %s21283_s8, 256, %s132_s11, [#allocation22], %s16320_s7, %s16320_s7, %s16321_s12  }
  0x49   :  { %p16065_p10 = pnand %p16064_p9, %p16058_p6 }
  0x4b   :  { %16068 = shalt.err (!%p16065_p10)
}
  0x4c   :  { %165 = dma.hbm_to_vmem [thread:$0]  %s20967_s16, 3072, %s160_s30, [#allocation25], %s16320_s7, %s16320_s7, %s16321_s12  }
  0x4d   :  { %s16322_s6 = smov [#allocation9]   ;;  %s16323_s0 = smov [#allocation14]  }
  0x4e   :  { %s47_s10 = sshll.u32 %s16322_s6, 4  ;;  %s70_s11 = sshll.u32 %s16323_s0, 4  ;;  %s48_s10 = int_to_ptr.vmem [resolvable:$true] %s47_s10  ;;  %s71_s11 = int_to_ptr.vmem [resolvable:$true] %s70_s11 }
  0x4f   :  { %s16077_s29 = scalar_lea.vmem %s48_s10, 128  ;;  %p16082_p12 = scmp.lt.s32.totalorder %s48_s10, %s48_s10 }
  0x50   :  { %p16078_p11 = scmp.ne.s32.totalorder %s48_s10, %s16077_s29  ;;  %p16083_p13 = scmp.lt.s32.totalorder %s16077_s29, %s16077_s29 }
  0x52   :  { %p16084_p0 = por %p16083_p13, %p16082_p12 }
  0x54   :  { %p16085_p1 = pnand %p16084_p0, %p16078_p11 }
  0x56   :  { %16088 = shalt.err (!%p16085_p1)
}
  0x57   :  { %s21284_s4 = sld [smem:[#allocation331_spill]]  ;;  %s16097_s16 = scalar_lea.vmem %s71_s11, 400 }
  0x58   :  { %p16098_p2 = scmp.ne.s32.totalorder %s71_s11, %s16097_s16  ;;  %s16101_s30 = scalar_lea.vmem %s71_s11, 416 }
  0x59   :  { %p16102_p3 = scmp.lt.s32.totalorder %s71_s11, %s71_s11  ;;  %p16103_p4 = scmp.lt.s32.totalorder %s16101_s30, %s16097_s16 }
  0x5b   :  { %p16104_p5 = por %p16103_p4, %p16102_p3 }
  0x5d   :  { %53 = dma.hbm_to_vmem [thread:$0]  %s21284_s4, 128, %s48_s10, [#allocation10], %s16320_s7, %s16320_s7, %s16321_s12  }
  0x5e   :  { %p16105_p6 = pnand %p16104_p5, %p16098_p2 }
  0x60   :  { %16108 = shalt.err (!%p16105_p6)
}
  0x61   :  { %s21285_s3 = sld [smem:[#allocation333_spill]]  ;;  %s16324_s5 = smov [#allocation17]  }
  0x62   :  { %s91_s6 = sshll.u32 %s16324_s5, 4  ;;  %s16325_s0 = smov [#allocation20]   ;;  %s92_s6 = int_to_ptr.vmem [resolvable:$true] %s91_s6 }
  0x63   :  { %s113_s29 = sshll.u32 %s16325_s0, 4  ;;  %s16117_s2 = scalar_lea.vmem %s92_s6, 4096  ;;  %s114_s29 = int_to_ptr.vmem [resolvable:$true] %s113_s29 }
  0x64   :  { %p16118_p7 = scmp.ne.s32.totalorder %s92_s6, %s16117_s2  ;;  %p16122_p8 = scmp.lt.s32.totalorder %s92_s6, %s92_s6 }
  0x65   :  { %p16123_p9 = scmp.lt.s32.totalorder %s16117_s2, %s16117_s2 }
  0x67   :  { %73 = dma.hbm_to_vmem [thread:$0]  %s21285_s3, 400, %s71_s11, [#allocation13]  }
  0x68   :  { %p16124_p10 = por %p16123_p9, %p16122_p8 }
  0x6a   :  { %p16125_p11 = pnand %p16124_p10, %p16118_p7 }
  0x6c   :  { %16128 = shalt.err (!%p16125_p11)
}
  0x6d   :  { %s21286_s4 = sld [smem:[#allocation336_spill]]  ;;  %s16137_s11 = scalar_lea.vmem %s114_s29, 1536 }
  0x6e   :  { %p16138_p12 = scmp.ne.s32.totalorder %s114_s29, %s16137_s11  ;;  %p16142_p13 = scmp.lt.s32.totalorder %s114_s29, %s114_s29 }
  0x6f   :  { %p16143_p0 = scmp.lt.s32.totalorder %s16137_s11, %s16137_s11 }
  0x71   :  { %p16144_p1 = por %p16143_p0, %p16142_p13 }
  0x73   :  { %97 = dma.hbm_to_vmem [thread:$0]  %s21286_s4, 4096, %s92_s6, [#allocation16], %s16320_s7, %s16320_s7, %s16321_s12  }
  0x74   :  { %p16145_p2 = pnand %p16144_p1, %p16138_p12 }
  0x76   :  { %16148 = shalt.err (!%p16145_p2)
}
  0x77   :  { %s21287_s8 = sld [smem:[#allocation338_spill]]  ;;  %s16326_s9 = smov [#allocation23]  }
  0x78   :  { %s147_s3 = sshll.u32 %s16326_s9, 4  ;;  %s16327_s5 = smov [#allocation26]   ;;  %s148_s3 = int_to_ptr.vmem [resolvable:$true] %s147_s3 }
  0x79   :  { %s171_s6 = sshll.u32 %s16327_s5, 4  ;;  %s16157_s0 = scalar_lea.vmem %s148_s3, 1536  ;;  %s172_s6 = int_to_ptr.vmem [resolvable:$true] %s171_s6 }
  0x7a   :  { %p16158_p3 = scmp.ne.s32.totalorder %s148_s3, %s16157_s0  ;;  %p16162_p4 = scmp.lt.s32.totalorder %s148_s3, %s148_s3 }
  0x7b   :  { %p16163_p5 = scmp.lt.s32.totalorder %s16157_s0, %s16157_s0 }
  0x7d   :  { %119 = dma.hbm_to_vmem [thread:$0]  %s21287_s8, 1536, %s114_s29, [#allocation19], %s16320_s7, %s16320_s7, %s16321_s12  }
  0x7e   :  { %p16164_p6 = por %p16163_p5, %p16162_p4 }
  0x80   :  { %p16165_p7 = pnand %p16164_p6, %p16158_p3 }
  0x82   :  { %16168 = shalt.err (!%p16165_p7)
}
  0x83   :  { %153 = dma.hbm_to_vmem [thread:$0]  %s20966_s15, 1536, %s148_s3, [#allocation22], %s16320_s7, %s16320_s7, %s16321_s12  }
  0x84   :  { %s16177_s29 = scalar_lea.vmem %s172_s6, 512  ;;  %p16182_p9 = scmp.lt.s32.totalorder %s172_s6, %s172_s6 }
  0x85   :  { %p16178_p8 = scmp.ne.s32.totalorder %s172_s6, %s16177_s29  ;;  %p16183_p10 = scmp.lt.s32.totalorder %s16177_s29, %s16177_s29 }
  0x87   :  { %p16184_p11 = por %p16183_p10, %p16182_p9 }
  0x89   :  { %p16185_p12 = pnand %p16184_p11, %p16178_p8 }
  0x8b   :  { %16188 = shalt.err (!%p16185_p12)
}
  0x8c   :  { %177 = dma.hbm_to_vmem [thread:$0]  %s20968_s17, 512, %s172_s6, [#allocation25], %s16320_s7, %s16320_s7, %s16321_s12  }
  0x8d   :  { %16289 = dma.done.wait [#allocation10], 128  }
  0x8e   :  { %16290 = vsyncadd [#allocation10], 4294967168 }
  0x8f   :  { %16291 = dma.done.wait [#allocation13], 800  }
  0x90   :  { %16292 = vsyncadd [#allocation13], 4294966496 }
  0x91   :  { %16293 = dma.done.wait [#allocation16], 4112  }
  0x92   :  { %16294 = vsyncadd [#allocation16], 4294963184 }
  0x93   :  { %16295 = dma.done.wait [#allocation19], 1552  }
  0x94   :  { %16296 = vsyncadd [#allocation19], 4294965744 }
  0x95   :  { %16297 = dma.done.wait [#allocation22], 1792  }
  0x96   :  { %16298 = vsyncadd [#allocation22], 4294965504 }
  0x97   :  { %16299 = dma.done.wait [#allocation25], 3584  }
  0x98   :  { %16300 = vsyncadd [#allocation25], 4294963712  ;;  %s16328_s15 = smov [#allocation2]  }
  0x99   :  { %s227_s11 = sshll.u32 %s16328_s15, 4  ;;  %s228_s11 = int_to_ptr.vmem [resolvable:$true] %s227_s11 }
  0x9a   :  { %s16197_s16 = scalar_lea.vmem %s228_s11, 6144  ;;  %p16202_p0 = scmp.lt.s32.totalorder %s228_s11, %s228_s11 }
  0x9b   :  { %p16198_p13 = scmp.ne.s32.totalorder %s228_s11, %s16197_s16  ;;  %p16203_p1 = scmp.lt.s32.totalorder %s16197_s16, %s16197_s16 }
  0x9d   :  { %p16204_p2 = por %p16203_p1, %p16202_p0 }
  0x9f   :  { %p16205_p3 = pnand %p16204_p2, %p16198_p13 }
  0xa1   :  { %16208 = shalt.err (!%p16205_p3)  }
  0xa2   :  { %230 = dma.hbm_to_vmem [thread:$0]  %s20971_s20, 6144, %s228_s11, [#allocation8]  ;;  %v16544_v0 = vld [vmem:[%s20972_s21] sm:$0xff]  ;;  %v16549_v1 = vld [vmem:[%s20972_s21 + $0x8] sm:$0xff]  ;;  %v16554_v2 = vld [vmem:[%s20972_s21 + $0x10] sm:$0xff] }
  0xa3   :  { %21288 = vst [vmem:[#allocation53_spill] sm:$0xff] %v16544_v0  ;;  %21289 = vst [vmem:[#allocation54_spill] sm:$0xff] %v16549_v1  ;;  %v16559_v3 = vld [vmem:[%s20972_s21 + $0x18] sm:$0xff]  ;;  %v16564_v4 = vld [vmem:[%s20972_s21 + $0x20] sm:$0xff] }
  0xa4   :  { %21290 = vst [vmem:[#allocation55_spill] sm:$0xff] %v16554_v2  ;;  %21291 = vst [vmem:[#allocation56_spill] sm:$0xff] %v16559_v3  ;;  %v16569_v5 = vld [vmem:[%s20972_s21 + $0x28] sm:$0xff]  ;;  %v16574_v6 = vld [vmem:[%s20972_s21 + $0x30] sm:$0xff] }
  0xa5   :  { %v16579_v7 = vld [vmem:[%s20972_s21 + $0x38] sm:$0xff]  ;;  %v16584_v8 = vld [vmem:[%s20972_s21 + $0x40] sm:$0xff]  ;;  %v16589_v9 = vld [vmem:[%s20972_s21 + $0x48] sm:$0xff] }
  0xa6   :  { %v16594_v10 = vld [vmem:[%s20972_s21 + $0x50] sm:$0xff]  ;;  %v16599_v11 = vld [vmem:[%s20972_s21 + $0x58] sm:$0xff]  ;;  %v16604_v12 = vld [vmem:[%s20972_s21 + $0x60] sm:$0xff] }
  0xa7   :  { %v16609_v13 = vld [vmem:[%s20972_s21 + $0x68] sm:$0xff]  ;;  %v16614_v14 = vld [vmem:[%s20972_s21 + $0x70] sm:$0xff]  ;;  %v16619_v15 = vld [vmem:[%s20972_s21 + $0x78] sm:$0xff] }
  0xa8   :  { %v16624_v16 = vld [vmem:[%s20972_s21 + $0x80] sm:$0xff]  ;;  %v16629_v17 = vld [vmem:[%s20972_s21 + $0x88] sm:$0xff]  ;;  %v16634_v18 = vld [vmem:[%s20972_s21 + $0x90] sm:$0xff] }
  0xa9   :  { %21292 = vst [vmem:[#allocation57_spill] sm:$0xff] %v16624_v16  ;;  %21293 = vst [vmem:[#allocation58_spill] sm:$0xff] %v16629_v17  ;;  %v16639_v19 = vld [vmem:[%s20972_s21 + $0x98] sm:$0xff]  ;;  %v16644_v20 = vld [vmem:[%s20972_s21 + $0xa0] sm:$0xff] }
  0xaa   :  { %21294 = vst [vmem:[#allocation59_spill] sm:$0xff] %v16634_v18  ;;  %21295 = vst [vmem:[#allocation60_spill] sm:$0xff] %v16639_v19  ;;  %v16649_v21 = vld [vmem:[%s20972_s21 + $0xa8] sm:$0xff]  ;;  %v16654_v22 = vld [vmem:[%s20972_s21 + $0xb0] sm:$0xff] }
  0xab   :  { %21296 = vst [vmem:[#allocation61_spill] sm:$0xff] %v16644_v20  ;;  %21297 = vst [vmem:[#allocation62_spill] sm:$0xff] %v16649_v21  ;;  %v16659_v23 = vld [vmem:[%s20972_s21 + $0xb8] sm:$0xff]  ;;  %v16664_v24 = vld [vmem:[%s20972_s21 + $0xc0] sm:$0xff] }
  0xac   :  { %21298 = vst [vmem:[#allocation63_spill] sm:$0xff] %v16654_v22  ;;  %21299 = vst [vmem:[#allocation64_spill] sm:$0xff] %v16659_v23  ;;  %v16669_v25 = vld [vmem:[%s20972_s21 + $0xc8] sm:$0xff]  ;;  %v16674_v26 = vld [vmem:[%s20972_s21 + $0xd0] sm:$0xff] }
  0xad   :  { %21300 = vst [vmem:[#allocation65_spill] sm:$0xff] %v16664_v24  ;;  %21301 = vst [vmem:[#allocation66_spill] sm:$0xff] %v16669_v25  ;;  %v16679_v27 = vld [vmem:[%s20972_s21 + $0xd8] sm:$0xff]  ;;  %v16684_v28 = vld [vmem:[%s20972_s21 + $0xe0] sm:$0xff] }
  0xae   :  { %21302 = vst [vmem:[#allocation67_spill] sm:$0xff] %v16674_v26  ;;  %21303 = vst [vmem:[#allocation68_spill] sm:$0xff] %v16679_v27  ;;  %v16689_v29 = vld [vmem:[%s20972_s21 + $0xe8] sm:$0xff]  ;;  %v16694_v30 = vld [vmem:[%s20972_s21 + $0xf0] sm:$0xff] }
  0xaf   :  { %21304 = vst [vmem:[#allocation69_spill] sm:$0xff] %v16684_v28  ;;  %21305 = vst [vmem:[#allocation70_spill] sm:$0xff] %v16689_v29  ;;  %v16699_v31 = vld [vmem:[%s20972_s21 + $0xf8] sm:$0xff]  ;;  %v16704_v32 = vld [vmem:[%s20972_s21 + $0x100] sm:$0xff] }
  0xb0   :  { %21306 = vst [vmem:[#allocation71_spill] sm:$0xff] %v16694_v30  ;;  %21307 = vst [vmem:[#allocation72_spill] sm:$0xff] %v16699_v31  ;;  %v16709_v33 = vld [vmem:[%s20972_s21 + $0x108] sm:$0xff]  ;;  %v16714_v34 = vld [vmem:[%s20972_s21 + $0x110] sm:$0xff] }
  0xb1   :  { %21308 = vst [vmem:[#allocation73_spill] sm:$0xff] %v16704_v32  ;;  %21309 = vst [vmem:[#allocation74_spill] sm:$0xff] %v16709_v33  ;;  %v16719_v35 = vld [vmem:[%s20972_s21 + $0x118] sm:$0xff]  ;;  %v16724_v36 = vld [vmem:[%s20972_s21 + $0x120] sm:$0xff] }
  0xb2   :  { %21310 = vst [vmem:[#allocation75_spill] sm:$0xff] %v16714_v34  ;;  %21311 = vst [vmem:[#allocation76_spill] sm:$0xff] %v16719_v35  ;;  %v16729_v37 = vld [vmem:[%s20972_s21 + $0x128] sm:$0xff]  ;;  %v16734_v38 = vld [vmem:[%s20972_s21 + $0x130] sm:$0xff] }
  0xb3   :  { %21312 = vst [vmem:[#allocation77_spill] sm:$0xff] %v16724_v36  ;;  %21313 = vst [vmem:[#allocation78_spill] sm:$0xff] %v16729_v37  ;;  %v16739_v39 = vld [vmem:[%s20972_s21 + $0x138] sm:$0xff]  ;;  %v16744_v40 = vld [vmem:[%s20972_s21 + $0x140] sm:$0xff] }
  0xb4   :  { %21314 = vst [vmem:[#allocation79_spill] sm:$0xff] %v16734_v38  ;;  %21315 = vst [vmem:[#allocation80_spill] sm:$0xff] %v16739_v39  ;;  %v16749_v41 = vld [vmem:[%s20972_s21 + $0x148] sm:$0xff]  ;;  %v16754_v42 = vld [vmem:[%s20972_s21 + $0x150] sm:$0xff] }
  0xb5   :  { %21316 = vst [vmem:[#allocation81_spill] sm:$0xff] %v16744_v40  ;;  %21317 = vst [vmem:[#allocation82_spill] sm:$0xff] %v16749_v41  ;;  %v16759_v43 = vld [vmem:[%s20972_s21 + $0x158] sm:$0xff]  ;;  %v16764_v44 = vld [vmem:[%s20972_s21 + $0x160] sm:$0xff] }
  0xb6   :  { %21318 = vst [vmem:[#allocation83_spill] sm:$0xff] %v16754_v42  ;;  %21319 = vst [vmem:[#allocation84_spill] sm:$0xff] %v16759_v43  ;;  %v16769_v45 = vld [vmem:[%s20972_s21 + $0x168] sm:$0xff]  ;;  %v16774_v46 = vld [vmem:[%s20972_s21 + $0x170] sm:$0xff] }
  0xb7   :  { %21320 = vst [vmem:[#allocation85_spill] sm:$0xff] %v16764_v44  ;;  %21321 = vst [vmem:[#allocation86_spill] sm:$0xff] %v16769_v45  ;;  %v16779_v47 = vld [vmem:[%s20972_s21 + $0x178] sm:$0xff]  ;;  %v16784_v48 = vld [vmem:[%s20972_s21 + $0x180] sm:$0xff] }
  0xb8   :  { %21322 = vst [vmem:[#allocation87_spill] sm:$0xff] %v16774_v46  ;;  %21323 = vst [vmem:[#allocation88_spill] sm:$0xff] %v16779_v47  ;;  %v16789_v49 = vld [vmem:[%s20972_s21 + $0x188] sm:$0xff]  ;;  %v16794_v50 = vld [vmem:[%s20972_s21 + $0x190] sm:$0xff] }
  0xb9   :  { %21324 = vst [vmem:[#allocation89_spill] sm:$0xff] %v16784_v48  ;;  %21325 = vst [vmem:[#allocation90_spill] sm:$0xff] %v16789_v49  ;;  %v16799_v51 = vld [vmem:[%s20972_s21 + $0x198] sm:$0xff]  ;;  %v16804_v52 = vld [vmem:[%s20972_s21 + $0x1a0] sm:$0xff] }
  0xba   :  { %21326 = vst [vmem:[#allocation91_spill] sm:$0xff] %v16794_v50  ;;  %21327 = vst [vmem:[#allocation92_spill] sm:$0xff] %v16799_v51  ;;  %v16809_v53 = vld [vmem:[%s20972_s21 + $0x1a8] sm:$0xff]  ;;  %v16814_v54 = vld [vmem:[%s20972_s21 + $0x1b0] sm:$0xff] }
  0xbb   :  { %21328 = vst [vmem:[#allocation93_spill] sm:$0xff] %v16804_v52  ;;  %21329 = vst [vmem:[#allocation94_spill] sm:$0xff] %v16809_v53  ;;  %v16819_v55 = vld [vmem:[%s20972_s21 + $0x1b8] sm:$0xff]  ;;  %v16824_v56 = vld [vmem:[%s20972_s21 + $0x1c0] sm:$0xff] }
  0xbc   :  { %21330 = vst [vmem:[#allocation95_spill] sm:$0xff] %v16814_v54  ;;  %21331 = vst [vmem:[#allocation96_spill] sm:$0xff] %v16819_v55  ;;  %v16829_v57 = vld [vmem:[%s20972_s21 + $0x1c8] sm:$0xff]  ;;  %v16834_v58 = vld [vmem:[%s20972_s21 + $0x1d0] sm:$0xff] }
  0xbd   :  { %21332 = vst [vmem:[#allocation97_spill] sm:$0xff] %v16824_v56  ;;  %21333 = vst [vmem:[#allocation98_spill] sm:$0xff] %v16829_v57  ;;  %v16839_v59 = vld [vmem:[%s20972_s21 + $0x1d8] sm:$0xff]  ;;  %v16844_v60 = vld [vmem:[%s20972_s21 + $0x1e0] sm:$0xff] }
  0xbe   :  { %21334 = vst [vmem:[#allocation99_spill] sm:$0xff] %v16834_v58  ;;  %21335 = vst [vmem:[#allocation100_spill] sm:$0xff] %v16839_v59  ;;  %v16849_v61 = vld [vmem:[%s20972_s21 + $0x1e8] sm:$0xff]  ;;  %v16854_v62 = vld [vmem:[%s20972_s21 + $0x1f0] sm:$0xff] }
  0xbf   :  { %21336 = vst [vmem:[#allocation101_spill] sm:$0xff] %v16844_v60  ;;  %21337 = vst [vmem:[#allocation102_spill] sm:$0xff] %v16849_v61  ;;  %v16859_v63 = vld [vmem:[%s20972_s21 + $0x1f8] sm:$0xff]  ;;  %v16864_v48 = vld [vmem:[%s20972_s21 + $0x200] sm:$0xff] }
  0xc0   :  { %21338 = vst [vmem:[#allocation103_spill] sm:$0xff] %v16854_v62  ;;  %21339 = vst [vmem:[#allocation104_spill] sm:$0xff] %v16859_v63  ;;  %v16869_v49 = vld [vmem:[%s20972_s21 + $0x208] sm:$0xff]  ;;  %v16874_v50 = vld [vmem:[%s20972_s21 + $0x210] sm:$0xff] }
  0xc1   :  { %21340 = vst [vmem:[#allocation105_spill] sm:$0xff] %v16864_v48  ;;  %21341 = vst [vmem:[#allocation106_spill] sm:$0xff] %v16869_v49  ;;  %v16879_v51 = vld [vmem:[%s20972_s21 + $0x218] sm:$0xff]  ;;  %v16884_v52 = vld [vmem:[%s20972_s21 + $0x220] sm:$0xff] }
  0xc2   :  { %21342 = vst [vmem:[#allocation107_spill] sm:$0xff] %v16874_v50  ;;  %21343 = vst [vmem:[#allocation108_spill] sm:$0xff] %v16879_v51  ;;  %v16889_v48 = vld [vmem:[%s20972_s21 + $0x228] sm:$0xff]  ;;  %v16894_v49 = vld [vmem:[%s20972_s21 + $0x230] sm:$0xff] }
  0xc3   :  { %21344 = vst [vmem:[#allocation109_spill] sm:$0xff] %v16884_v52  ;;  %21345 = vst [vmem:[#allocation110_spill] sm:$0xff] %v16889_v48  ;;  %v16899_v50 = vld [vmem:[%s20972_s21 + $0x238] sm:$0xff]  ;;  %v16904_v51 = vld [vmem:[%s20972_s21 + $0x240] sm:$0xff] }
  0xc4   :  { %21346 = vst [vmem:[#allocation111_spill] sm:$0xff] %v16894_v49  ;;  %21347 = vst [vmem:[#allocation112_spill] sm:$0xff] %v16899_v50  ;;  %v16909_v52 = vld [vmem:[%s20972_s21 + $0x248] sm:$0xff]  ;;  %v16914_v48 = vld [vmem:[%s20972_s21 + $0x250] sm:$0xff] }
  0xc5   :  { %21348 = vst [vmem:[#allocation113_spill] sm:$0xff] %v16904_v51  ;;  %21349 = vst [vmem:[#allocation114_spill] sm:$0xff] %v16909_v52  ;;  %v16919_v49 = vld [vmem:[%s20972_s21 + $0x258] sm:$0xff]  ;;  %v16924_v50 = vld [vmem:[%s20972_s21 + $0x260] sm:$0xff] }
  0xc6   :  { %21350 = vst [vmem:[#allocation115_spill] sm:$0xff] %v16914_v48  ;;  %21351 = vst [vmem:[#allocation116_spill] sm:$0xff] %v16919_v49  ;;  %v16929_v51 = vld [vmem:[%s20972_s21 + $0x268] sm:$0xff]  ;;  %v16934_v52 = vld [vmem:[%s20972_s21 + $0x270] sm:$0xff] }
  0xc7   :  { %21352 = vst [vmem:[#allocation117_spill] sm:$0xff] %v16924_v50  ;;  %21353 = vst [vmem:[#allocation118_spill] sm:$0xff] %v16929_v51  ;;  %v16939_v48 = vld [vmem:[%s20972_s21 + $0x278] sm:$0xff]  ;;  %v16944_v49 = vld [vmem:[%s20972_s21 + $0x280] sm:$0xff] }
  0xc8   :  { %21354 = vst [vmem:[#allocation119_spill] sm:$0xff] %v16934_v52  ;;  %21355 = vst [vmem:[#allocation120_spill] sm:$0xff] %v16939_v48  ;;  %v16949_v50 = vld [vmem:[%s20972_s21 + $0x288] sm:$0xff]  ;;  %v16954_v51 = vld [vmem:[%s20972_s21 + $0x290] sm:$0xff] }
  0xc9   :  { %21356 = vst [vmem:[#allocation121_spill] sm:$0xff] %v16944_v49  ;;  %21357 = vst [vmem:[#allocation122_spill] sm:$0xff] %v16949_v50  ;;  %v16959_v52 = vld [vmem:[%s20972_s21 + $0x298] sm:$0xff]  ;;  %v16964_v48 = vld [vmem:[%s20972_s21 + $0x2a0] sm:$0xff] }
  0xca   :  { %21358 = vst [vmem:[#allocation123_spill] sm:$0xff] %v16954_v51  ;;  %21359 = vst [vmem:[#allocation124_spill] sm:$0xff] %v16959_v52  ;;  %v16969_v49 = vld [vmem:[%s20972_s21 + $0x2a8] sm:$0xff]  ;;  %v16974_v50 = vld [vmem:[%s20972_s21 + $0x2b0] sm:$0xff] }
  0xcb   :  { %21360 = vst [vmem:[#allocation125_spill] sm:$0xff] %v16964_v48  ;;  %21361 = vst [vmem:[#allocation126_spill] sm:$0xff] %v16969_v49  ;;  %v16979_v51 = vld [vmem:[%s20972_s21 + $0x2b8] sm:$0xff]  ;;  %v16984_v52 = vld [vmem:[%s20972_s21 + $0x2c0] sm:$0xff] }
  0xcc   :  { %21362 = vst [vmem:[#allocation127_spill] sm:$0xff] %v16974_v50  ;;  %21363 = vst [vmem:[#allocation128_spill] sm:$0xff] %v16979_v51  ;;  %v16989_v48 = vld [vmem:[%s20972_s21 + $0x2c8] sm:$0xff]  ;;  %v16994_v49 = vld [vmem:[%s20972_s21 + $0x2d0] sm:$0xff] }
  0xcd   :  { %21364 = vst [vmem:[#allocation129_spill] sm:$0xff] %v16984_v52  ;;  %21365 = vst [vmem:[#allocation130_spill] sm:$0xff] %v16989_v48  ;;  %v16999_v50 = vld [vmem:[%s20972_s21 + $0x2d8] sm:$0xff]  ;;  %v17004_v51 = vld [vmem:[%s20972_s21 + $0x2e0] sm:$0xff] }
  0xce   :  { %21366 = vst [vmem:[#allocation131_spill] sm:$0xff] %v16994_v49  ;;  %21367 = vst [vmem:[#allocation132_spill] sm:$0xff] %v16999_v50  ;;  %v17009_v52 = vld [vmem:[%s20972_s21 + $0x2e8] sm:$0xff]  ;;  %v17014_v48 = vld [vmem:[%s20972_s21 + $0x2f0] sm:$0xff] }
  0xcf   :  { %21368 = vst [vmem:[#allocation133_spill] sm:$0xff] %v17004_v51  ;;  %21369 = vst [vmem:[#allocation134_spill] sm:$0xff] %v17009_v52  ;;  %v17019_v49 = vld [vmem:[%s20972_s21 + $0x2f8] sm:$0xff] }
  0xd0   :  { %21370 = vst [vmem:[#allocation135_spill] sm:$0xff] %v17014_v48  ;;  %21371 = vst [vmem:[#allocation136_spill] sm:$0xff] %v17019_v49 }
  0xd1   :  { %464 = vsyncadd [#allocation8 + $0x1], 12288  ;;  %v17024_v50 = vld [vmem:[%s20976_s25] sm:$0xff]  ;;  %v17029_v51 = vld [vmem:[%s20976_s25 + $0x8] sm:$0xff]  ;;  %s16329_s17 = smov [#allocation4]  }
  0xd2   :  { %21372 = vst [vmem:[#allocation137_spill] sm:$0xff] %v17024_v50  ;;  %21373 = vst [vmem:[#allocation138_spill] sm:$0xff] %v17029_v51  ;;  %s473_s12 = sshll.u32 %s16329_s17, 4  ;;  %v17034_v52 = vld [vmem:[%s20976_s25 + $0x10] sm:$0xff]  ;;  %v17039_v48 = vld [vmem:[%s20976_s25 + $0x18] sm:$0xff]  ;;  %s474_s12 = int_to_ptr.vmem [resolvable:$true] %s473_s12 }
  0xd3   :  { %21374 = vst [vmem:[#allocation139_spill] sm:$0xff] %v17034_v52  ;;  %21375 = vst [vmem:[#allocation140_spill] sm:$0xff] %v17039_v48  ;;  %v17044_v50 = vld [vmem:[%s20976_s25 + $0x20] sm:$0xff]  ;;  %v17049_v51 = vld [vmem:[%s20976_s25 + $0x28] sm:$0xff]  ;;  %s16217_s1 = scalar_lea.vmem %s474_s12, 2048  ;;  %p16222_p5 = scmp.lt.s32.totalorder %s474_s12, %s474_s12 }
  0xd4   :  { %21376 = vst [vmem:[#allocation141_spill] sm:$0xff] %v17044_v50  ;;  %21377 = vst [vmem:[#allocation142_spill] sm:$0xff] %v17049_v51  ;;  %v17054_v52 = vld [vmem:[%s20976_s25 + $0x30] sm:$0xff]  ;;  %v17059_v48 = vld [vmem:[%s20976_s25 + $0x38] sm:$0xff]  ;;  %p16218_p4 = scmp.ne.s32.totalorder %s474_s12, %s16217_s1  ;;  %p16223_p6 = scmp.lt.s32.totalorder %s16217_s1, %s16217_s1 }
  0xd5   :  { %21378 = vst [vmem:[#allocation143_spill] sm:$0xff] %v17054_v52  ;;  %21379 = vst [vmem:[#allocation144_spill] sm:$0xff] %v17059_v48 }
  0xd6   :  { %p16224_p7 = por %p16223_p6, %p16222_p5 }
  0xd8   :  { %p16225_p8 = pnand %p16224_p7, %p16218_p4 }
  0xda   :  { %16228 = shalt.err (!%p16225_p8)  }
  0xdb   :  { %476 = dma.hbm_to_vmem [thread:$0]  %s20973_s22, 2048, %s474_s12, [#allocation8 + $0x2]  ;;  %v17067_v51 = vld [vmem:[%s20976_s25 + $0x40] sm:$0xff]  ;;  %v17072_v48 = vld [vmem:[%s20976_s25 + $0x48] sm:$0xff]  ;;  %v17077_v50 = vld [vmem:[%s20976_s25 + $0x50] sm:$0xff]  ;;  %vm1034_vm0 = vcmask 1044480  }
  0xdc   :  { %21380 = vst [vmem:[#allocation145_spill] sm:$0xff] %v17067_v51  ;;  %21381 = vst [vmem:[#allocation146_spill] sm:$0xff] %v17072_v48  ;;  %v17082_v52 = vld [vmem:[%s20976_s25 + $0x58] sm:$0xff]  ;;  %v17087_v49 = vld [vmem:[%s20976_s25 + $0x60] sm:$0xff]  ;;  %s21564_s5 = sld [smem:[#allocation330_spill]]  ;;  %vm1003_vm1 = vcmask 80896  }
  0xdd   :  { %21382 = vst [vmem:[#allocation147_spill] sm:$0xff] %v17077_v50  ;;  %21383 = vst [vmem:[#allocation148_spill] sm:$0xff] %v17082_v52  ;;  %v17092_v51 = vld [vmem:[%s20976_s25 + $0x68] sm:$0xff]  ;;  %v17097_v48 = vld [vmem:[%s20976_s25 + $0x70] sm:$0xff] }
  0xde   :  { %21384 = vst [vmem:[#allocation149_spill] sm:$0xff] %v17087_v49  ;;  %21385 = vst [vmem:[#allocation150_spill] sm:$0xff] %v17092_v51  ;;  %v17102_v50 = vld [vmem:[%s20976_s25 + $0x78] sm:$0xff]  ;;  %v17107_v52 = vld [vmem:[%s20976_s25 + $0x80] sm:$0xff] }
  0xdf   :  { %21386 = vst [vmem:[#allocation151_spill] sm:$0xff] %v17097_v48  ;;  %21387 = vst [vmem:[#allocation152_spill] sm:$0xff] %v17102_v50  ;;  %v17112_v49 = vld [vmem:[%s20976_s25 + $0x88] sm:$0xff]  ;;  %v17117_v51 = vld [vmem:[%s20976_s25 + $0x90] sm:$0xff] }
  0xe0   :  { %21388 = vst [vmem:[#allocation153_spill] sm:$0xff] %v17107_v52  ;;  %21389 = vst [vmem:[#allocation154_spill] sm:$0xff] %v17112_v49  ;;  %v17122_v48 = vld [vmem:[%s20976_s25 + $0x98] sm:$0xff]  ;;  %v17127_v50 = vld [vmem:[%s20976_s25 + $0xa0] sm:$0xff] }
  0xe1   :  { %21390 = vst [vmem:[#allocation155_spill] sm:$0xff] %v17117_v51  ;;  %21391 = vst [vmem:[#allocation156_spill] sm:$0xff] %v17122_v48  ;;  %v17132_v52 = vld [vmem:[%s20976_s25 + $0xa8] sm:$0xff]  ;;  %v17137_v49 = vld [vmem:[%s20976_s25 + $0xb0] sm:$0xff] }
  0xe2   :  { %21392 = vst [vmem:[#allocation157_spill] sm:$0xff] %v17127_v50  ;;  %21393 = vst [vmem:[#allocation158_spill] sm:$0xff] %v17132_v52  ;;  %v17142_v51 = vld [vmem:[%s20976_s25 + $0xb8] sm:$0xff]  ;;  %v17147_v48 = vld [vmem:[%s20976_s25 + $0xc0] sm:$0xff] }
  0xe3   :  { %21394 = vst [vmem:[#allocation159_spill] sm:$0xff] %v17137_v49  ;;  %21395 = vst [vmem:[#allocation160_spill] sm:$0xff] %v17142_v51  ;;  %v17152_v50 = vld [vmem:[%s20976_s25 + $0xc8] sm:$0xff]  ;;  %v17157_v52 = vld [vmem:[%s20976_s25 + $0xd0] sm:$0xff] }
  0xe4   :  { %21396 = vst [vmem:[#allocation161_spill] sm:$0xff] %v17147_v48  ;;  %21397 = vst [vmem:[#allocation162_spill] sm:$0xff] %v17152_v50  ;;  %v17162_v49 = vld [vmem:[%s20976_s25 + $0xd8] sm:$0xff]  ;;  %v17167_v51 = vld [vmem:[%s20976_s25 + $0xe0] sm:$0xff] }
  0xe5   :  { %21398 = vst [vmem:[#allocation163_spill] sm:$0xff] %v17157_v52  ;;  %21399 = vst [vmem:[#allocation164_spill] sm:$0xff] %v17162_v49  ;;  %v17172_v48 = vld [vmem:[%s20976_s25 + $0xe8] sm:$0xff]  ;;  %v17177_v50 = vld [vmem:[%s20976_s25 + $0xf0] sm:$0xff] }
  0xe6   :  { %21400 = vst [vmem:[#allocation165_spill] sm:$0xff] %v17167_v51  ;;  %21401 = vst [vmem:[#allocation166_spill] sm:$0xff] %v17172_v48  ;;  %v17182_v52 = vld [vmem:[%s20976_s25 + $0xf8] sm:$0xff]  ;;  %v17187_v49 = vld [vmem:[%s20976_s25 + $0x100] sm:$0xff] }
  0xe7   :  { %21402 = vst [vmem:[#allocation167_spill] sm:$0xff] %v17177_v50  ;;  %21403 = vst [vmem:[#allocation168_spill] sm:$0xff] %v17182_v52  ;;  %v17192_v51 = vld [vmem:[%s20976_s25 + $0x108] sm:$0xff]  ;;  %v17197_v48 = vld [vmem:[%s20976_s25 + $0x110] sm:$0xff] }
  0xe8   :  { %21404 = vst [vmem:[#allocation169_spill] sm:$0xff] %v17187_v49  ;;  %21405 = vst [vmem:[#allocation170_spill] sm:$0xff] %v17192_v51  ;;  %v17202_v50 = vld [vmem:[%s20976_s25 + $0x118] sm:$0xff]  ;;  %v17207_v52 = vld [vmem:[%s20976_s25 + $0x120] sm:$0xff] }
  0xe9   :  { %21406 = vst [vmem:[#allocation171_spill] sm:$0xff] %v17197_v48  ;;  %21407 = vst [vmem:[#allocation172_spill] sm:$0xff] %v17202_v50  ;;  %v17212_v49 = vld [vmem:[%s20976_s25 + $0x128] sm:$0xff]  ;;  %v17217_v51 = vld [vmem:[%s20976_s25 + $0x130] sm:$0xff] }
  0xea   :  { %21408 = vst [vmem:[#allocation173_spill] sm:$0xff] %v17207_v52  ;;  %21409 = vst [vmem:[#allocation174_spill] sm:$0xff] %v17212_v49  ;;  %v17222_v48 = vld [vmem:[%s20976_s25 + $0x138] sm:$0xff]  ;;  %v17227_v50 = vld [vmem:[%s20976_s25 + $0x140] sm:$0xff] }
  0xeb   :  { %21410 = vst [vmem:[#allocation175_spill] sm:$0xff] %v17217_v51  ;;  %21411 = vst [vmem:[#allocation176_spill] sm:$0xff] %v17222_v48  ;;  %v17232_v52 = vld [vmem:[%s20976_s25 + $0x148] sm:$0xff]  ;;  %v17237_v49 = vld [vmem:[%s20976_s25 + $0x150] sm:$0xff] }
  0xec   :  { %21412 = vst [vmem:[#allocation177_spill] sm:$0xff] %v17227_v50  ;;  %21413 = vst [vmem:[#allocation178_spill] sm:$0xff] %v17232_v52  ;;  %v17242_v51 = vld [vmem:[%s20976_s25 + $0x158] sm:$0xff]  ;;  %v17247_v48 = vld [vmem:[%s20976_s25 + $0x160] sm:$0xff] }
  0xed   :  { %21414 = vst [vmem:[#allocation179_spill] sm:$0xff] %v17237_v49  ;;  %21415 = vst [vmem:[#allocation180_spill] sm:$0xff] %v17242_v51  ;;  %v17252_v50 = vld [vmem:[%s20976_s25 + $0x168] sm:$0xff]  ;;  %v17257_v52 = vld [vmem:[%s20976_s25 + $0x170] sm:$0xff] }
  0xee   :  { %21416 = vst [vmem:[#allocation181_spill] sm:$0xff] %v17247_v48  ;;  %21417 = vst [vmem:[#allocation182_spill] sm:$0xff] %v17252_v50  ;;  %v17262_v49 = vld [vmem:[%s20976_s25 + $0x178] sm:$0xff]  ;;  %v17267_v51 = vld [vmem:[%s20976_s25 + $0x180] sm:$0xff] }
  0xef   :  { %21418 = vst [vmem:[#allocation183_spill] sm:$0xff] %v17257_v52  ;;  %21419 = vst [vmem:[#allocation184_spill] sm:$0xff] %v17262_v49  ;;  %v17272_v48 = vld [vmem:[%s20976_s25 + $0x188] sm:$0xff]  ;;  %v17277_v50 = vld [vmem:[%s20976_s25 + $0x190] sm:$0xff] }
  0xf0   :  { %21420 = vst [vmem:[#allocation185_spill] sm:$0xff] %v17267_v51  ;;  %21421 = vst [vmem:[#allocation186_spill] sm:$0xff] %v17272_v48  ;;  %v17282_v52 = vld [vmem:[%s20976_s25 + $0x198] sm:$0xff]  ;;  %v17287_v49 = vld [vmem:[%s20976_s25 + $0x1a0] sm:$0xff] }
  0xf1   :  { %21422 = vst [vmem:[#allocation187_spill] sm:$0xff] %v17277_v50  ;;  %21423 = vst [vmem:[#allocation188_spill] sm:$0xff] %v17282_v52  ;;  %v17292_v51 = vld [vmem:[%s20976_s25 + $0x1a8] sm:$0xff]  ;;  %v17297_v48 = vld [vmem:[%s20976_s25 + $0x1b0] sm:$0xff] }
  0xf2   :  { %21424 = vst [vmem:[#allocation189_spill] sm:$0xff] %v17287_v49  ;;  %21425 = vst [vmem:[#allocation190_spill] sm:$0xff] %v17292_v51  ;;  %v17302_v50 = vld [vmem:[%s20976_s25 + $0x1b8] sm:$0xff]  ;;  %v17307_v52 = vld [vmem:[%s20976_s25 + $0x1c0] sm:$0xff] }
  0xf3   :  { %21426 = vst [vmem:[#allocation191_spill] sm:$0xff] %v17297_v48  ;;  %21427 = vst [vmem:[#allocation192_spill] sm:$0xff] %v17302_v50  ;;  %v17312_v49 = vld [vmem:[%s20976_s25 + $0x1c8] sm:$0xff]  ;;  %v17317_v51 = vld [vmem:[%s20976_s25 + $0x1d0] sm:$0xff] }
  0xf4   :  { %21428 = vst [vmem:[#allocation193_spill] sm:$0xff] %v17307_v52  ;;  %21429 = vst [vmem:[#allocation194_spill] sm:$0xff] %v17312_v49  ;;  %v17322_v48 = vld [vmem:[%s20976_s25 + $0x1d8] sm:$0xff]  ;;  %v17327_v50 = vld [vmem:[%s20976_s25 + $0x1e0] sm:$0xff] }
  0xf5   :  { %21430 = vst [vmem:[#allocation195_spill] sm:$0xff] %v17317_v51  ;;  %21431 = vst [vmem:[#allocation196_spill] sm:$0xff] %v17322_v48  ;;  %v17332_v52 = vld [vmem:[%s20976_s25 + $0x1e8] sm:$0xff]  ;;  %v17337_v49 = vld [vmem:[%s20976_s25 + $0x1f0] sm:$0xff] }
  0xf6   :  { %21432 = vst [vmem:[#allocation197_spill] sm:$0xff] %v17327_v50  ;;  %21433 = vst [vmem:[#allocation198_spill] sm:$0xff] %v17332_v52  ;;  %v17342_v51 = vld [vmem:[%s20976_s25 + $0x1f8] sm:$0xff]  ;;  %v17347_v48 = vld [vmem:[%s20976_s25 + $0x200] sm:$0xff] }
  0xf7   :  { %21434 = vst [vmem:[#allocation199_spill] sm:$0xff] %v17337_v49  ;;  %21435 = vst [vmem:[#allocation200_spill] sm:$0xff] %v17342_v51  ;;  %v17352_v50 = vld [vmem:[%s20976_s25 + $0x208] sm:$0xff]  ;;  %v17357_v52 = vld [vmem:[%s20976_s25 + $0x210] sm:$0xff] }
  0xf8   :  { %21436 = vst [vmem:[#allocation201_spill] sm:$0xff] %v17347_v48  ;;  %21437 = vst [vmem:[#allocation202_spill] sm:$0xff] %v17352_v50  ;;  %v17362_v49 = vld [vmem:[%s20976_s25 + $0x218] sm:$0xff]  ;;  %v17367_v51 = vld [vmem:[%s20976_s25 + $0x220] sm:$0xff] }
  0xf9   :  { %21438 = vst [vmem:[#allocation203_spill] sm:$0xff] %v17357_v52  ;;  %21439 = vst [vmem:[#allocation204_spill] sm:$0xff] %v17362_v49  ;;  %v17372_v48 = vld [vmem:[%s20976_s25 + $0x228] sm:$0xff]  ;;  %v17377_v50 = vld [vmem:[%s20976_s25 + $0x230] sm:$0xff] }
  0xfa   :  { %21440 = vst [vmem:[#allocation205_spill] sm:$0xff] %v17367_v51  ;;  %21441 = vst [vmem:[#allocation206_spill] sm:$0xff] %v17372_v48  ;;  %v17382_v52 = vld [vmem:[%s20976_s25 + $0x238] sm:$0xff]  ;;  %v17387_v49 = vld [vmem:[%s20976_s25 + $0x240] sm:$0xff] }
  0xfb   :  { %21442 = vst [vmem:[#allocation207_spill] sm:$0xff] %v17377_v50  ;;  %21443 = vst [vmem:[#allocation208_spill] sm:$0xff] %v17382_v52  ;;  %v17392_v51 = vld [vmem:[%s20976_s25 + $0x248] sm:$0xff]  ;;  %v17397_v48 = vld [vmem:[%s20976_s25 + $0x250] sm:$0xff] }
  0xfc   :  { %21444 = vst [vmem:[#allocation209_spill] sm:$0xff] %v17387_v49  ;;  %21445 = vst [vmem:[#allocation210_spill] sm:$0xff] %v17392_v51  ;;  %v17402_v50 = vld [vmem:[%s20976_s25 + $0x258] sm:$0xff]  ;;  %v17407_v52 = vld [vmem:[%s20976_s25 + $0x260] sm:$0xff] }
  0xfd   :  { %21446 = vst [vmem:[#allocation211_spill] sm:$0xff] %v17397_v48  ;;  %21447 = vst [vmem:[#allocation212_spill] sm:$0xff] %v17402_v50  ;;  %v17412_v49 = vld [vmem:[%s20976_s25 + $0x268] sm:$0xff]  ;;  %v17417_v51 = vld [vmem:[%s20976_s25 + $0x270] sm:$0xff] }
  0xfe   :  { %21448 = vst [vmem:[#allocation213_spill] sm:$0xff] %v17407_v52  ;;  %21449 = vst [vmem:[#allocation214_spill] sm:$0xff] %v17412_v49  ;;  %v17422_v48 = vld [vmem:[%s20976_s25 + $0x278] sm:$0xff]  ;;  %v17427_v50 = vld [vmem:[%s20976_s25 + $0x280] sm:$0xff] }
  0xff   :  { %21450 = vst [vmem:[#allocation215_spill] sm:$0xff] %v17417_v51  ;;  %21451 = vst [vmem:[#allocation216_spill] sm:$0xff] %v17422_v48  ;;  %v17432_v52 = vld [vmem:[%s20976_s25 + $0x288] sm:$0xff]  ;;  %v17437_v49 = vld [vmem:[%s20976_s25 + $0x290] sm:$0xff] }
 0x100   :  { %21452 = vst [vmem:[#allocation217_spill] sm:$0xff] %v17427_v50  ;;  %21453 = vst [vmem:[#allocation218_spill] sm:$0xff] %v17432_v52  ;;  %v17442_v51 = vld [vmem:[%s20976_s25 + $0x298] sm:$0xff]  ;;  %v17447_v48 = vld [vmem:[%s20976_s25 + $0x2a0] sm:$0xff] }
 0x101   :  { %21454 = vst [vmem:[#allocation219_spill] sm:$0xff] %v17437_v49  ;;  %21455 = vst [vmem:[#allocation220_spill] sm:$0xff] %v17442_v51  ;;  %v17452_v50 = vld [vmem:[%s20976_s25 + $0x2a8] sm:$0xff]  ;;  %v17457_v52 = vld [vmem:[%s20976_s25 + $0x2b0] sm:$0xff] }
 0x102   :  { %21456 = vst [vmem:[#allocation221_spill] sm:$0xff] %v17447_v48  ;;  %21457 = vst [vmem:[#allocation222_spill] sm:$0xff] %v17452_v50  ;;  %v17462_v49 = vld [vmem:[%s20976_s25 + $0x2b8] sm:$0xff]  ;;  %v17467_v51 = vld [vmem:[%s20976_s25 + $0x2c0] sm:$0xff] }
 0x103   :  { %21458 = vst [vmem:[#allocation223_spill] sm:$0xff] %v17457_v52  ;;  %21459 = vst [vmem:[#allocation224_spill] sm:$0xff] %v17462_v49  ;;  %v17472_v48 = vld [vmem:[%s20976_s25 + $0x2c8] sm:$0xff]  ;;  %v17477_v50 = vld [vmem:[%s20976_s25 + $0x2d0] sm:$0xff] }
 0x104   :  { %21460 = vst [vmem:[#allocation225_spill] sm:$0xff] %v17467_v51  ;;  %21461 = vst [vmem:[#allocation226_spill] sm:$0xff] %v17472_v48  ;;  %v17482_v52 = vld [vmem:[%s20976_s25 + $0x2d8] sm:$0xff]  ;;  %v17487_v49 = vld [vmem:[%s20976_s25 + $0x2e0] sm:$0xff] }
 0x105   :  { %21462 = vst [vmem:[#allocation227_spill] sm:$0xff] %v17477_v50  ;;  %21463 = vst [vmem:[#allocation228_spill] sm:$0xff] %v17482_v52  ;;  %v17492_v51 = vld [vmem:[%s20976_s25 + $0x2e8] sm:$0xff]  ;;  %v17497_v48 = vld [vmem:[%s20976_s25 + $0x2f0] sm:$0xff] }
 0x106   :  { %21464 = vst [vmem:[#allocation229_spill] sm:$0xff] %v17487_v49  ;;  %21465 = vst [vmem:[#allocation230_spill] sm:$0xff] %v17492_v51  ;;  %v17502_v50 = vld [vmem:[%s20976_s25 + $0x2f8] sm:$0xff]  ;;  %v17507_v52 = vld [vmem:[%s20976_s25 + $0x300] sm:$0xff] }
 0x107   :  { %21466 = vst [vmem:[#allocation231_spill] sm:$0xff] %v17497_v48  ;;  %21467 = vst [vmem:[#allocation232_spill] sm:$0xff] %v17502_v50  ;;  %v17512_v49 = vld [vmem:[%s20976_s25 + $0x308] sm:$0xff]  ;;  %v17517_v51 = vld [vmem:[%s20976_s25 + $0x310] sm:$0xff] }
 0x108   :  { %21468 = vst [vmem:[#allocation233_spill] sm:$0xff] %v17507_v52  ;;  %21469 = vst [vmem:[#allocation234_spill] sm:$0xff] %v17512_v49  ;;  %v17522_v48 = vld [vmem:[%s20976_s25 + $0x318] sm:$0xff]  ;;  %v17527_v50 = vld [vmem:[%s20976_s25 + $0x320] sm:$0xff] }
 0x109   :  { %21470 = vst [vmem:[#allocation235_spill] sm:$0xff] %v17517_v51  ;;  %21471 = vst [vmem:[#allocation236_spill] sm:$0xff] %v17522_v48  ;;  %v17532_v52 = vld [vmem:[%s20976_s25 + $0x328] sm:$0xff]  ;;  %v17537_v49 = vld [vmem:[%s20976_s25 + $0x330] sm:$0xff] }
 0x10a   :  { %21472 = vst [vmem:[#allocation237_spill] sm:$0xff] %v17527_v50  ;;  %21473 = vst [vmem:[#allocation238_spill] sm:$0xff] %v17532_v52  ;;  %v17542_v51 = vld [vmem:[%s20976_s25 + $0x338] sm:$0xff]  ;;  %v17547_v48 = vld [vmem:[%s20976_s25 + $0x340] sm:$0xff] }
 0x10b   :  { %21474 = vst [vmem:[#allocation239_spill] sm:$0xff] %v17537_v49  ;;  %21475 = vst [vmem:[#allocation240_spill] sm:$0xff] %v17542_v51  ;;  %v17552_v50 = vld [vmem:[%s20976_s25 + $0x348] sm:$0xff]  ;;  %v17557_v52 = vld [vmem:[%s20976_s25 + $0x350] sm:$0xff] }
 0x10c   :  { %21476 = vst [vmem:[#allocation241_spill] sm:$0xff] %v17547_v48  ;;  %21477 = vst [vmem:[#allocation242_spill] sm:$0xff] %v17552_v50  ;;  %v17562_v49 = vld [vmem:[%s20976_s25 + $0x358] sm:$0xff]  ;;  %v17567_v51 = vld [vmem:[%s20976_s25 + $0x360] sm:$0xff] }
 0x10d   :  { %21478 = vst [vmem:[#allocation243_spill] sm:$0xff] %v17557_v52  ;;  %21479 = vst [vmem:[#allocation244_spill] sm:$0xff] %v17562_v49  ;;  %v17572_v48 = vld [vmem:[%s20976_s25 + $0x368] sm:$0xff]  ;;  %v17577_v50 = vld [vmem:[%s20976_s25 + $0x370] sm:$0xff] }
 0x10e   :  { %21480 = vst [vmem:[#allocation245_spill] sm:$0xff] %v17567_v51  ;;  %21481 = vst [vmem:[#allocation246_spill] sm:$0xff] %v17572_v48  ;;  %v17582_v52 = vld [vmem:[%s20976_s25 + $0x378] sm:$0xff]  ;;  %v17587_v49 = vld [vmem:[%s20976_s25 + $0x380] sm:$0xff] }
 0x10f   :  { %21482 = vst [vmem:[#allocation247_spill] sm:$0xff] %v17577_v50  ;;  %21483 = vst [vmem:[#allocation248_spill] sm:$0xff] %v17582_v52  ;;  %v17592_v51 = vld [vmem:[%s20976_s25 + $0x388] sm:$0xff]  ;;  %v17597_v48 = vld [vmem:[%s20976_s25 + $0x390] sm:$0xff] }
 0x110   :  { %21484 = vst [vmem:[#allocation249_spill] sm:$0xff] %v17587_v49  ;;  %21485 = vst [vmem:[#allocation250_spill] sm:$0xff] %v17592_v51  ;;  %v17602_v50 = vld [vmem:[%s20976_s25 + $0x398] sm:$0xff]  ;;  %v17607_v52 = vld [vmem:[%s20976_s25 + $0x3a0] sm:$0xff] }
 0x111   :  { %21486 = vst [vmem:[#allocation251_spill] sm:$0xff] %v17597_v48  ;;  %21487 = vst [vmem:[#allocation252_spill] sm:$0xff] %v17602_v50  ;;  %v17612_v49 = vld [vmem:[%s20976_s25 + $0x3a8] sm:$0xff]  ;;  %v17617_v51 = vld [vmem:[%s20976_s25 + $0x3b0] sm:$0xff] }
 0x112   :  { %21488 = vst [vmem:[#allocation253_spill] sm:$0xff] %v17607_v52  ;;  %21489 = vst [vmem:[#allocation254_spill] sm:$0xff] %v17612_v49  ;;  %v17622_v48 = vld [vmem:[%s20976_s25 + $0x3b8] sm:$0xff]  ;;  %v17627_v50 = vld [vmem:[%s20976_s25 + $0x3c0] sm:$0xff] }
 0x113   :  { %21490 = vst [vmem:[#allocation255_spill] sm:$0xff] %v17617_v51  ;;  %21491 = vst [vmem:[#allocation256_spill] sm:$0xff] %v17622_v48  ;;  %v17632_v52 = vld [vmem:[%s20976_s25 + $0x3c8] sm:$0xff]  ;;  %v17637_v49 = vld [vmem:[%s20976_s25 + $0x3d0] sm:$0xff] }
 0x114   :  { %21492 = vst [vmem:[#allocation257_spill] sm:$0xff] %v17627_v50  ;;  %21493 = vst [vmem:[#allocation258_spill] sm:$0xff] %v17632_v52  ;;  %v17642_v51 = vld [vmem:[%s20976_s25 + $0x3d8] sm:$0xff]  ;;  %v17647_v48 = vld [vmem:[%s20976_s25 + $0x3e0] sm:$0xff] }
 0x115   :  { %21494 = vst [vmem:[#allocation259_spill] sm:$0xff] %v17637_v49  ;;  %21495 = vst [vmem:[#allocation260_spill] sm:$0xff] %v17642_v51  ;;  %v17652_v50 = vld [vmem:[%s20976_s25 + $0x3e8] sm:$0xff]  ;;  %v17657_v52 = vld [vmem:[%s20976_s25 + $0x3f0] sm:$0xff] }
 0x116   :  { %21496 = vst [vmem:[#allocation261_spill] sm:$0xff] %v17647_v48  ;;  %21497 = vst [vmem:[#allocation262_spill] sm:$0xff] %v17652_v50  ;;  %v17662_v49 = vld [vmem:[%s20976_s25 + $0x3f8] sm:$0xff]  ;;  %v17667_v51 = vld [vmem:[%s20976_s25 + $0x400] sm:$0xff] }
 0x117   :  { %21498 = vst [vmem:[#allocation263_spill] sm:$0xff] %v17657_v52  ;;  %21499 = vst [vmem:[#allocation264_spill] sm:$0xff] %v17662_v49  ;;  %v17672_v48 = vld [vmem:[%s20976_s25 + $0x408] sm:$0xff]  ;;  %v17677_v50 = vld [vmem:[%s20976_s25 + $0x410] sm:$0xff] }
 0x118   :  { %21500 = vst [vmem:[#allocation265_spill] sm:$0xff] %v17667_v51  ;;  %21501 = vst [vmem:[#allocation266_spill] sm:$0xff] %v17672_v48  ;;  %v17682_v52 = vld [vmem:[%s20976_s25 + $0x418] sm:$0xff]  ;;  %v17687_v49 = vld [vmem:[%s20976_s25 + $0x420] sm:$0xff] }
 0x119   :  { %21502 = vst [vmem:[#allocation267_spill] sm:$0xff] %v17677_v50  ;;  %21503 = vst [vmem:[#allocation268_spill] sm:$0xff] %v17682_v52  ;;  %v17692_v51 = vld [vmem:[%s20976_s25 + $0x428] sm:$0xff]  ;;  %v17697_v48 = vld [vmem:[%s20976_s25 + $0x430] sm:$0xff] }
 0x11a   :  { %21504 = vst [vmem:[#allocation269_spill] sm:$0xff] %v17687_v49  ;;  %21505 = vst [vmem:[#allocation270_spill] sm:$0xff] %v17692_v51  ;;  %v17702_v50 = vld [vmem:[%s20976_s25 + $0x438] sm:$0xff]  ;;  %v17707_v52 = vld [vmem:[%s20976_s25 + $0x440] sm:$0xff] }
 0x11b   :  { %21506 = vst [vmem:[#allocation271_spill] sm:$0xff] %v17697_v48  ;;  %21507 = vst [vmem:[#allocation272_spill] sm:$0xff] %v17702_v50  ;;  %v17712_v49 = vld [vmem:[%s20976_s25 + $0x448] sm:$0xff]  ;;  %v17717_v51 = vld [vmem:[%s20976_s25 + $0x450] sm:$0xff] }
 0x11c   :  { %21508 = vst [vmem:[#allocation273_spill] sm:$0xff] %v17707_v52  ;;  %21509 = vst [vmem:[#allocation274_spill] sm:$0xff] %v17712_v49  ;;  %v17722_v48 = vld [vmem:[%s20976_s25 + $0x458] sm:$0xff]  ;;  %v17727_v50 = vld [vmem:[%s20976_s25 + $0x460] sm:$0xff] }
 0x11d   :  { %21510 = vst [vmem:[#allocation275_spill] sm:$0xff] %v17717_v51  ;;  %21511 = vst [vmem:[#allocation276_spill] sm:$0xff] %v17722_v48  ;;  %v17732_v52 = vld [vmem:[%s20976_s25 + $0x468] sm:$0xff]  ;;  %v17737_v49 = vld [vmem:[%s20976_s25 + $0x470] sm:$0xff] }
 0x11e   :  { %21512 = vst [vmem:[#allocation277_spill] sm:$0xff] %v17727_v50  ;;  %21513 = vst [vmem:[#allocation278_spill] sm:$0xff] %v17732_v52  ;;  %v17742_v51 = vld [vmem:[%s20976_s25 + $0x478] sm:$0xff]  ;;  %v17747_v48 = vld [vmem:[%s20976_s25 + $0x480] sm:$0xff] }
 0x11f   :  { %21514 = vst [vmem:[#allocation279_spill] sm:$0xff] %v17737_v49  ;;  %21515 = vst [vmem:[#allocation280_spill] sm:$0xff] %v17742_v51  ;;  %v17752_v50 = vld [vmem:[%s20976_s25 + $0x488] sm:$0xff]  ;;  %v17757_v52 = vld [vmem:[%s20976_s25 + $0x490] sm:$0xff] }
 0x120   :  { %21516 = vst [vmem:[#allocation281_spill] sm:$0xff] %v17747_v48  ;;  %21517 = vst [vmem:[#allocation282_spill] sm:$0xff] %v17752_v50  ;;  %v17762_v49 = vld [vmem:[%s20976_s25 + $0x498] sm:$0xff]  ;;  %v17767_v51 = vld [vmem:[%s20976_s25 + $0x4a0] sm:$0xff] }
 0x121   :  { %21518 = vst [vmem:[#allocation283_spill] sm:$0xff] %v17757_v52  ;;  %21519 = vst [vmem:[#allocation284_spill] sm:$0xff] %v17762_v49  ;;  %v17772_v48 = vld [vmem:[%s20976_s25 + $0x4a8] sm:$0xff]  ;;  %v17777_v50 = vld [vmem:[%s20976_s25 + $0x4b0] sm:$0xff] }
 0x122   :  { %21520 = vst [vmem:[#allocation285_spill] sm:$0xff] %v17767_v51  ;;  %21521 = vst [vmem:[#allocation286_spill] sm:$0xff] %v17772_v48  ;;  %v17782_v52 = vld [vmem:[%s20976_s25 + $0x4b8] sm:$0xff]  ;;  %v17787_v49 = vld [vmem:[%s20976_s25 + $0x4c0] sm:$0xff] }
 0x123   :  { %21522 = vst [vmem:[#allocation287_spill] sm:$0xff] %v17777_v50  ;;  %21523 = vst [vmem:[#allocation288_spill] sm:$0xff] %v17782_v52  ;;  %v17792_v51 = vld [vmem:[%s20976_s25 + $0x4c8] sm:$0xff]  ;;  %v17797_v48 = vld [vmem:[%s20976_s25 + $0x4d0] sm:$0xff] }
 0x124   :  { %21524 = vst [vmem:[#allocation289_spill] sm:$0xff] %v17787_v49  ;;  %21525 = vst [vmem:[#allocation290_spill] sm:$0xff] %v17792_v51  ;;  %v17802_v50 = vld [vmem:[%s20976_s25 + $0x4d8] sm:$0xff]  ;;  %v17807_v52 = vld [vmem:[%s20976_s25 + $0x4e0] sm:$0xff] }
 0x125   :  { %21526 = vst [vmem:[#allocation291_spill] sm:$0xff] %v17797_v48  ;;  %21527 = vst [vmem:[#allocation292_spill] sm:$0xff] %v17802_v50  ;;  %v17812_v49 = vld [vmem:[%s20976_s25 + $0x4e8] sm:$0xff]  ;;  %v17817_v51 = vld [vmem:[%s20976_s25 + $0x4f0] sm:$0xff] }
 0x126   :  { %21528 = vst [vmem:[#allocation293_spill] sm:$0xff] %v17807_v52  ;;  %21529 = vst [vmem:[#allocation294_spill] sm:$0xff] %v17812_v49  ;;  %v17822_v48 = vld [vmem:[%s20976_s25 + $0x4f8] sm:$0xff]  ;;  %v17827_v50 = vld [vmem:[%s20976_s25 + $0x500] sm:$0xff] }
 0x127   :  { %21530 = vst [vmem:[#allocation295_spill] sm:$0xff] %v17817_v51  ;;  %21531 = vst [vmem:[#allocation296_spill] sm:$0xff] %v17822_v48  ;;  %v17832_v52 = vld [vmem:[%s20976_s25 + $0x508] sm:$0xff]  ;;  %v17837_v49 = vld [vmem:[%s20976_s25 + $0x510] sm:$0xff] }
 0x128   :  { %21532 = vst [vmem:[#allocation297_spill] sm:$0xff] %v17827_v50  ;;  %21533 = vst [vmem:[#allocation298_spill] sm:$0xff] %v17832_v52  ;;  %v17842_v51 = vld [vmem:[%s20976_s25 + $0x518] sm:$0xff]  ;;  %v17847_v48 = vld [vmem:[%s20976_s25 + $0x520] sm:$0xff] }
 0x129   :  { %21534 = vst [vmem:[#allocation299_spill] sm:$0xff] %v17837_v49  ;;  %21535 = vst [vmem:[#allocation300_spill] sm:$0xff] %v17842_v51  ;;  %v17852_v50 = vld [vmem:[%s20976_s25 + $0x528] sm:$0xff]  ;;  %v17857_v52 = vld [vmem:[%s20976_s25 + $0x530] sm:$0xff] }
 0x12a   :  { %21536 = vst [vmem:[#allocation301_spill] sm:$0xff] %v17847_v48  ;;  %21537 = vst [vmem:[#allocation302_spill] sm:$0xff] %v17852_v50  ;;  %v17862_v49 = vld [vmem:[%s20976_s25 + $0x538] sm:$0xff]  ;;  %v17867_v51 = vld [vmem:[%s20976_s25 + $0x540] sm:$0xff] }
 0x12b   :  { %21538 = vst [vmem:[#allocation303_spill] sm:$0xff] %v17857_v52  ;;  %21539 = vst [vmem:[#allocation304_spill] sm:$0xff] %v17862_v49  ;;  %v17872_v48 = vld [vmem:[%s20976_s25 + $0x548] sm:$0xff]  ;;  %v17877_v50 = vld [vmem:[%s20976_s25 + $0x550] sm:$0xff] }
 0x12c   :  { %21540 = vst [vmem:[#allocation305_spill] sm:$0xff] %v17867_v51  ;;  %21541 = vst [vmem:[#allocation306_spill] sm:$0xff] %v17872_v48  ;;  %v17882_v52 = vld [vmem:[%s20976_s25 + $0x558] sm:$0xff]  ;;  %v17887_v49 = vld [vmem:[%s20976_s25 + $0x560] sm:$0xff] }
 0x12d   :  { %21542 = vst [vmem:[#allocation307_spill] sm:$0xff] %v17877_v50  ;;  %21543 = vst [vmem:[#allocation308_spill] sm:$0xff] %v17882_v52  ;;  %v17892_v51 = vld [vmem:[%s20976_s25 + $0x568] sm:$0xff]  ;;  %v17897_v48 = vld [vmem:[%s20976_s25 + $0x570] sm:$0xff] }
 0x12e   :  { %21544 = vst [vmem:[#allocation309_spill] sm:$0xff] %v17887_v49  ;;  %21545 = vst [vmem:[#allocation310_spill] sm:$0xff] %v17892_v51  ;;  %v17902_v50 = vld [vmem:[%s20976_s25 + $0x578] sm:$0xff]  ;;  %v17907_v52 = vld [vmem:[%s20976_s25 + $0x580] sm:$0xff] }
 0x12f   :  { %21546 = vst [vmem:[#allocation311_spill] sm:$0xff] %v17897_v48  ;;  %21547 = vst [vmem:[#allocation312_spill] sm:$0xff] %v17902_v50  ;;  %v17912_v49 = vld [vmem:[%s20976_s25 + $0x588] sm:$0xff]  ;;  %v17917_v51 = vld [vmem:[%s20976_s25 + $0x590] sm:$0xff] }
 0x130   :  { %21548 = vst [vmem:[#allocation313_spill] sm:$0xff] %v17907_v52  ;;  %21549 = vst [vmem:[#allocation314_spill] sm:$0xff] %v17912_v49  ;;  %v17922_v48 = vld [vmem:[%s20976_s25 + $0x598] sm:$0xff]  ;;  %v17927_v50 = vld [vmem:[%s20976_s25 + $0x5a0] sm:$0xff] }
 0x131   :  { %21550 = vst [vmem:[#allocation315_spill] sm:$0xff] %v17917_v51  ;;  %21551 = vst [vmem:[#allocation316_spill] sm:$0xff] %v17922_v48  ;;  %v17932_v52 = vld [vmem:[%s20976_s25 + $0x5a8] sm:$0xff]  ;;  %v17937_v49 = vld [vmem:[%s20976_s25 + $0x5b0] sm:$0xff] }
 0x132   :  { %21552 = vst [vmem:[#allocation317_spill] sm:$0xff] %v17927_v50  ;;  %21553 = vst [vmem:[#allocation318_spill] sm:$0xff] %v17932_v52  ;;  %v17942_v51 = vld [vmem:[%s20976_s25 + $0x5b8] sm:$0xff]  ;;  %v17947_v48 = vld [vmem:[%s20976_s25 + $0x5c0] sm:$0xff] }
 0x133   :  { %21554 = vst [vmem:[#allocation319_spill] sm:$0xff] %v17937_v49  ;;  %21555 = vst [vmem:[#allocation320_spill] sm:$0xff] %v17942_v51  ;;  %v17952_v50 = vld [vmem:[%s20976_s25 + $0x5c8] sm:$0xff]  ;;  %v17957_v52 = vld [vmem:[%s20976_s25 + $0x5d0] sm:$0xff] }
 0x134   :  { %21556 = vst [vmem:[#allocation321_spill] sm:$0xff] %v17947_v48  ;;  %21557 = vst [vmem:[#allocation322_spill] sm:$0xff] %v17952_v50  ;;  %v17962_v49 = vld [vmem:[%s20976_s25 + $0x5d8] sm:$0xff]  ;;  %v17967_v51 = vld [vmem:[%s20976_s25 + $0x5e0] sm:$0xff] }
 0x135   :  { %21558 = vst [vmem:[#allocation323_spill] sm:$0xff] %v17957_v52  ;;  %21559 = vst [vmem:[#allocation324_spill] sm:$0xff] %v17962_v49  ;;  %v17972_v48 = vld [vmem:[%s20976_s25 + $0x5e8] sm:$0xff]  ;;  %v17977_v50 = vld [vmem:[%s20976_s25 + $0x5f0] sm:$0xff] }
 0x136   :  { %21560 = vst [vmem:[#allocation325_spill] sm:$0xff] %v17967_v51  ;;  %21561 = vst [vmem:[#allocation326_spill] sm:$0xff] %v17972_v48  ;;  %v17982_v52 = vld [vmem:[%s20976_s25 + $0x5f8] sm:$0xff]  ;;  %v14771_v49 = vld [vmem:[#allocation9] sm:$0x1f]  }
 0x137   :  { %21562 = vst [vmem:[#allocation327_spill] sm:$0xff] %v17977_v50  ;;  %21563 = vst [vmem:[#allocation328_spill] sm:$0xff] %v17982_v52  ;;  %v14772_v51 = vld [vmem:[%s21564_s5] sm:$0xff]   ;;  %14677 = vmatprep.subr.msk.bf16.mxu1 %vm1034_vm0, %v14771_v49  ;;  %v1036_v53 = vsel %vm1034_vm0, %v14771_v49, 0  ;;  %v14773_v48 = vld [vmem:[%s21564_s5 + $0x8] sm:$0xff]  }
 0x138   :  { %14516 = vmatpush3.bf16.msra.mxu1 %v1036_v53  ;;  %14517 = vmatprep.mubr.msk.bf16.mxu1 %vm1003_vm1, %v14772_v51  ;;  %v14774_v52 = vld [vmem:[%s21564_s5 + $0x10] sm:$0xff]   ;;  %v14775_v49 = vld [vmem:[%s21564_s5 + $0x18] sm:$0xff]   ;;  %v14776_v51 = vld [vmem:[%s21564_s5 + $0x20] sm:$0xff]  }
 0x139   :  { %v14777_v53 = vld [vmem:[%s21564_s5 + $0x28] sm:$0xff]  }
 0x13b   :  { %14518 = vmatmul.mubr.msk.bf16.vlgmr.msra.gmra.mxu1 %vm1003_vm1, %v14773_v48  ;;  %v14778_v48 = vld [vmem:[%s21564_s5 + $0x30] sm:$0xff]  }
 0x13c   :  { %14521 = vmatprep.mubr.msk.bf16.mxu1 %vm1003_vm1, %v14774_v52  ;;  %v14779_v52 = vld [vmem:[%s21564_s5 + $0x38] sm:$0xff]  }
 0x143   :  { %14522 = vmatmul.mubr.msk.bf16.gmra.mxu1 %vm1003_vm1, %v14775_v49  ;;  %v14780_v49 = vld [vmem:[%s21564_s5 + $0x40] sm:$0xff]  }
 0x144   :  { %14525 = vmatprep.mubr.msk.bf16.mxu1 %vm1003_vm1, %v14776_v51  ;;  %v14781_v51 = vld [vmem:[%s21564_s5 + $0x48] ss:$0 sps:$4 sm:$0x11]  }
 0x14b   :  { %14526 = vmatmul.mubr.msk.bf16.gmra.mxu1 %vm1003_vm1, %v14777_v53 }
 0x14c   :  { %14529 = vmatprep.mubr.msk.bf16.mxu1 %vm1003_vm1, %v14778_v48 }
 0x153   :  { %14530 = vmatmul.mubr.msk.bf16.gmra.mxu1 %vm1003_vm1, %v14779_v52 }
 0x154   :  { %14533 = vmatprep.mubr.msk.bf16.mxu1 %vm1003_vm1, %v14780_v49 }
 0x15b   :  { %14534 = vmatmul.mubr.msk.bf16.gmra.mxu1 %vm1003_vm1, %v14781_v51 }
 0x15c   :  { %902 = vsyncadd [#allocation8 + $0x3], 24576  ;;  %v21216_v53 = vmov 0   ;;  %s21565_s6 = sld [smem:[#allocation334_spill]]  ;;  %vm2227_vm2 = vcmask 146432   ;;  %vm1150_vm3 = vcmask 261120  }
 0x15d   :  { %2472 = vmatprep.subr.bf16.mxu1 %v21216_v53  ;;  %14702 = vset.pattern.permute.xlu0 %v21216_v53  ;;  %vm1186_vm4 = vcmask 254976   ;;  %vm2468_vm5 = vcmask 1040384   ;;  %s21611_s12 = sld [smem:[#allocation340_spill]]  ;;  %s16331_s11 = smov 32   ;;  %vm3624_vm6 = vcmask 523264   ;;  %vm3669_vm7 = vcmask 785408  }
 0x15e   :  { %s21612_s30 = sld [smem:[#allocation339_spill]]  ;;  %vm3937_vm8 = vcmask 1046528  }
 0x15f   :  { %s21613_s0 = sld [smem:[#allocation341_spill]] }
 0x162   :  { %v14784_v52 = vld [vmem:[%s21565_s6 + $0x4] ss:$8 sps:$4 sm:$0xff]  }
 0x163   :  { %13300 = vmatprep.mubr.msk.bf16.mxu1 %vm2227_vm2, %v14784_v52 }
 0x1fb   :  { %v18026_v48 = vpop.f32.mrf.mxu1 }
 0x1fc   :  { %v1199_v53 = vmul.f32 %v18026_v48, %v18026_v48  ;;  %v1154_v59 = vsel %vm1150_vm3, %v18026_v48, 0.0 }
 0x1fd   :  { %v18028_v50 = vpop.f32.mrf.mxu1 }
 0x1fe   :  { %v1197_v51 = vmul.f32 %v18028_v50, %v18028_v50  ;;  %v1151_v55 = vsel %vm1150_vm3, %v18028_v50, 0.0  ;;  %v1219_v34 = vsel %vm1150_vm3, %v1199_v53, 0.0 }
 0x1ff   :  { %v18033_v49 = vpop.f32.mrf.mxu1 }
 0x200   :  { %v1216_v60 = vsel %vm1150_vm3, %v1197_v51, 0.0  ;;  %v1200_v61 = vmul.f32 %v18033_v49, %v18033_v49 }
 0x201   :  { %v18038_v54 = vpop.f32.mrf.mxu1 }
 0x202   :  { %v1152_v56 = vsel %vm1150_vm3, %v18038_v54, 0.0  ;;  %v1198_v57 = vmul.f32 %v18038_v54, %v18038_v54  ;;  %v1221_v37 = vsel %vm1150_vm3, %v1200_v61, 0.0 }
 0x203   :  { %v1153_v58 = vadd.f32 %v1152_v56, %v1151_v55  ;;  %v18048_v52 = vpop.f32.mrf.mxu1  ;;  %v1156_v55 = vsel %vm1150_vm3, %v18033_v49, 0.0 }
 0x204   :  { %v1217_v62 = vsel %vm1150_vm3, %v1198_v57, 0.0 }
 0x205   :  { %v1218_v63 = vadd.f32 %v1217_v62, %v1216_v60  ;;  %v18056_v32 = vpop.f32.mrf.mxu1  ;;  %v1155_v33 = vadd.f32 %v1154_v59, %v1153_v58  ;;  %v1203_v59 = vmul.f32 %v18048_v52, %v18048_v52 }
 0x206   :  { %v1201_v56 = vmul.f32 %v18056_v32, %v18056_v32  ;;  %v1158_v57 = vsel %vm1150_vm3, %v18056_v32, 0.0 }
 0x207   :  { %v1157_v35 = vadd.f32 %v1156_v55, %v1155_v33  ;;  %v1220_v36 = vadd.f32 %v1219_v34, %v1218_v63  ;;  %v18063_v51 = vpop.f32.mrf.mxu1  ;;  %v1227_v39 = vsel %vm1150_vm3, %v1203_v59, 0.0 }
 0x208   :  { %v1223_v53 = vsel %vm1150_vm3, %v1201_v56, 0.0 }
 0x209   :  { %v1159_v60 = vadd.f32 %v1158_v57, %v1157_v35  ;;  %v1222_v62 = vadd.f32 %v1221_v37, %v1220_v36  ;;  %v18068_v58 = vpop.f32.mrf.mxu1  ;;  %v1162_v35 = vsel %vm1150_vm3, %v18048_v52, 0.0  ;;  %v1204_v36 = vmul.f32 %v18063_v51, %v18063_v51 }
 0x20a   :  { %v1160_v33 = vsel %vm1150_vm3, %v18068_v58, 0.0  ;;  %v1202_v34 = vmul.f32 %v18068_v58, %v18068_v58 }
 0x20b   :  { %v1224_v63 = vadd.f32 %v1223_v53, %v1222_v62  ;;  %v1161_v61 = vadd.f32 %v1160_v33, %v1159_v60  ;;  %v18077_v55 = vpop.f32.mrf.mxu1  ;;  %v1164_v62 = vsel %vm1150_vm3, %v18063_v51, 0.0  ;;  %v1229_v41 = vsel %vm1150_vm3, %v1204_v36, 0.0 }
 0x20c   :  { %v1225_v37 = vsel %vm1150_vm3, %v1202_v34, 0.0  ;;  %v1207_v59 = vmul.f32 %v18077_v55, %v18077_v55 }
 0x20d   :  { %v1226_v57 = vadd.f32 %v1225_v37, %v1224_v63  ;;  %v18084_v56 = vpop.f32.mrf.mxu1  ;;  %v1163_v38 = vadd.f32 %v1162_v35, %v1161_v61 }
 0x20e   :  { %v1205_v60 = vmul.f32 %v18084_v56, %v18084_v56  ;;  %v1166_v34 = vsel %vm1150_vm3, %v18084_v56, 0.0  ;;  %v1235_v43 = vsel %vm1150_vm3, %v1207_v59, 0.0 }
 0x20f   :  { %v1165_v53 = vadd.f32 %v1164_v62, %v1163_v38  ;;  %v1228_v33 = vadd.f32 %v1227_v39, %v1226_v57  ;;  %v18091_v40 = vpop.f32.mrf.mxu1 }
 0x210   :  { %v1231_v35 = vsel %vm1150_vm3, %v1205_v60, 0.0 }
 0x211   :  { %v1167_v63 = vadd.f32 %v1166_v34, %v1165_v53  ;;  %v1230_v37 = vadd.f32 %v1229_v41, %v1228_v33  ;;  %v18096_v61 = vpop.f32.mrf.mxu1  ;;  %v1170_v41 = vsel %vm1150_vm3, %v18077_v55, 0.0  ;;  %v1208_v53 = vmul.f32 %v18091_v40, %v18091_v40 }
 0x212   :  { %v1168_v38 = vsel %vm1150_vm3, %v18096_v61, 0.0  ;;  %v1206_v39 = vmul.f32 %v18096_v61, %v18096_v61 }
 0x213   :  { %v1232_v57 = vadd.f32 %v1231_v35, %v1230_v37  ;;  %v1169_v36 = vadd.f32 %v1168_v38, %v1167_v63  ;;  %v18105_v62 = vpop.f32.mrf.mxu1  ;;  %v1172_v37 = vsel %vm1150_vm3, %v18091_v40, 0.0  ;;  %v1237_v45 = vsel %vm1150_vm3, %v1208_v53, 0.0 }
 0x214   :  { %v1233_v33 = vsel %vm1150_vm3, %v1206_v39, 0.0  ;;  %v1211_v59 = vmul.f32 %v18105_v62, %v18105_v62 }
 0x215   :  { %v1234_v34 = vadd.f32 %v1233_v33, %v1232_v57  ;;  %v18112_v60 = vpop.f32.mrf.mxu1  ;;  %v1171_v42 = vadd.f32 %v1170_v41, %v1169_v36 }
 0x216   :  { %v1209_v63 = vmul.f32 %v18112_v60, %v18112_v60  ;;  %v1174_v39 = vsel %vm1150_vm3, %v18112_v60, 0.0  ;;  %v1243_v47 = vsel %vm1150_vm3, %v1211_v59, 0.0 }
 0x217   :  { %v1173_v35 = vadd.f32 %v1172_v37, %v1171_v42  ;;  %v1236_v38 = vadd.f32 %v1235_v43, %v1234_v34  ;;  %v18119_v44 = vpop.f32.mrf.mxu1 }
 0x218   :  { %v1239_v41 = vsel %vm1150_vm3, %v1209_v63, 0.0 }
 0x219   :  { %v1175_v57 = vadd.f32 %v1174_v39, %v1173_v35  ;;  %v1238_v33 = vadd.f32 %v1237_v45, %v1236_v38  ;;  %v18124_v36 = vpop.f32.mrf.mxu1  ;;  %v1178_v45 = vsel %vm1150_vm3, %v18105_v62, 0.0  ;;  %v1212_v35 = vmul.f32 %v18119_v44, %v18119_v44 }
 0x21a   :  { %v1176_v42 = vsel %vm1150_vm3, %v18124_v36, 0.0  ;;  %v1210_v43 = vmul.f32 %v18124_v36, %v18124_v36 }
 0x21b   :  { %v1240_v34 = vadd.f32 %v1239_v41, %v1238_v33  ;;  %v1177_v53 = vadd.f32 %v1176_v42, %v1175_v57  ;;  %v18133_v37 = vpop.f32.mrf.mxu1  ;;  %v1180_v33 = vsel %vm1150_vm3, %v18119_v44, 0.0  ;;  %v1245_v17 = vsel %vm1150_vm3, %v1212_v35, 0.0 }
 0x21c   :  { %v1241_v38 = vsel %vm1150_vm3, %v1210_v43, 0.0  ;;  %v1215_v59 = vmul.f32 %v18133_v37, %v18133_v37 }
 0x21d   :  { %v1242_v39 = vadd.f32 %v1241_v38, %v1240_v34  ;;  %v18140_v63 = vpop.f32.mrf.mxu1  ;;  %v1179_v46 = vadd.f32 %v1178_v45, %v1177_v53 }
 0x21e   :  { %v1213_v57 = vmul.f32 %v18140_v63, %v18140_v63  ;;  %v1182_v43 = vsel %vm1150_vm3, %v18140_v63, 0.0 }
 0x21f   :  { %v1181_v41 = vadd.f32 %v1180_v33, %v1179_v46  ;;  %v1244_v42 = vadd.f32 %v1243_v47, %v1242_v39  ;;  %v14536_v16 = vpop.f32.mrf.mxu1  ;;  %v1187_v39 = vsel %vm1186_vm4, %v18133_v37, 0.0 }
 0x220   :  { %v1247_v45 = vsel %vm1150_vm3, %v1213_v57, 0.0 }
 0x221   :  { %v1183_v34 = vadd.f32 %v1182_v43, %v1181_v41  ;;  %v1246_v38 = vadd.f32 %v1245_v17, %v1244_v42  ;;  %v18150_v53 = vpop.f32.mrf.mxu1  ;;  %v1251_v42 = vsel %vm1186_vm4, %v1215_v59, 0.0  ;;  %v1267_v59 = vlaneseq }
 0x222   :  { %v1184_v46 = vsel %vm1150_vm3, %v18150_v53, 0.0  ;;  %v1214_v16 = vmul.f32 %v18150_v53, %v18150_v53 }
 0x223   :  { %v1248_v47 = vadd.f32 %v1247_v45, %v1246_v38  ;;  %v1185_v35 = vadd.f32 %v1184_v46, %v1183_v34 }
 0x224   :  { %v1249_v33 = vsel %vm1150_vm3, %v1214_v16, 0.0 }
 0x225   :  { %v1188_v17 = vadd.f32 %v1187_v39, %v1185_v35  ;;  %v1250_v41 = vadd.f32 %v1249_v33, %v1248_v47  ;;  %v18161_v39 = vshrl.u32 %v1267_v59, 7  ;;  %v927_v33 = vld [vmem:[#allocation12] sm:$0x1] }
 0x227   :  { %v1189_v43 = vrot.slane %v1188_v17, 4  ;;  %v1252_v18 = vadd.f32 %v1251_v42, %v1250_v41  ;;  %21566 = vst [vmem:[#allocation329_spill] sm:$0xff] %v18161_v39 }
 0x229   :  { %v1190_v19 = vadd.f32 %v1189_v43, %v1188_v17  ;;  %v1253_v20 = vrot.slane %v1252_v18, 4 }
 0x22b   :  { %v1191_v57 = vrot.slane %v1190_v19, 2  ;;  %v1254_v21 = vadd.f32 %v1253_v20, %v1252_v18  ;;  %v18164_v18 = vsub.s32 0, %v18161_v39 }
 0x22d   :  { %v1192_v22 = vadd.f32 %v1191_v57, %v1190_v19  ;;  %v1255_v23 = vrot.slane %v1254_v21, 2 }
 0x22f   :  { %v1193_v24 = vrot.slane %v1192_v22, 1  ;;  %v1256_v25 = vadd.f32 %v1255_v23, %v1254_v21  ;;  %v928_v21 = vld [vmem:[#allocation14] sm:$0x1] }
 0x231   :  { %v1194_v26 = vadd.f32 %v1193_v24, %v1192_v22  ;;  %v1257_v38 = vrot.slane %v1256_v25, 1 }
 0x233   :  { %v1196_v34 = vmul.f32 0.006849315, %v1194_v26  ;;  %v1258_v45 = vadd.f32 %v1257_v38, %v1256_v25 }
 0x235   :  { %v1259_v46 = vmul.f32 0.006849315, %v1258_v45  ;;  %v1260_v27 = vmul.f32 %v1196_v34, %v1196_v34 }
 0x237   :  { %v1261_v16 = vsub.f32 %v1259_v46, %v1260_v27 }
 0x239   :  { %v1262_v35 = vmax.f32 %v1261_v16, 0.0 }
 0x23b   :  { %v1263_v47 = vadd.f32 1e-05, %v1262_v35 }
 0x23d   :  { %15100 = vrsqrt.f32 %v1263_v47 }
 0x24a   :  { %v15101_v19 = vpop.eup %15100 }
 0x24b   :  { %v1265_v20 = vmul.f32 %v15101_v19, %v927_v33 }
 0x24d   :  { %v18167_v22 = vrot.slane %v1265_v20, %v18164_v18  ;;  %v1291_v23 = vmul.f32 %v1265_v20, %v1196_v34 }
 0x24f   :  { %v1292_v24 = vsub.f32 %v928_v21, %v1291_v23  ;;  %v1286_v26 = vmul.f32 %v18105_v62, %v18167_v22  ;;  %v1287_v27 = vmul.f32 %v18119_v44, %v18167_v22  ;;  %v1284_v17 = vmul.f32 %v18167_v22, %v18112_v60 }
 0x250   :  { %v1285_v41 = vmul.f32 %v18167_v22, %v18124_v36  ;;  %v1282_v62 = vmul.f32 %v18077_v55, %v18167_v22  ;;  %v1283_v44 = vmul.f32 %v18091_v40, %v18167_v22  ;;  %v1280_v47 = vmul.f32 %v18167_v22, %v18084_v56 }
 0x251   :  { %v18170_v25 = vrot.slane %v1292_v24, %v18164_v18  ;;  %v1281_v59 = vmul.f32 %v18167_v22, %v18096_v61  ;;  %v21567_v55 = vmov 0   ;;  %v1278_v23 = vmul.f32 %v18048_v52, %v18167_v22 }
 0x252   :  { %v1279_v56 = vmul.f32 %v18063_v51, %v18167_v22 }
 0x253   :  { %v1313_v42 = vadd.f32 %v18170_v25, %v1286_v26  ;;  %v1314_v43 = vadd.f32 %v18170_v25, %v1287_v27  ;;  %v1311_v57 = vadd.f32 %v18170_v25, %v1284_v17  ;;  %v1312_v38 = vadd.f32 %v18170_v25, %v1285_v41 }
 0x254   :  { %v1309_v60 = vadd.f32 %v18170_v25, %v1282_v62  ;;  %v1310_v35 = vadd.f32 %v18170_v25, %v1283_v44  ;;  %v1307_v33 = vadd.f32 %v18170_v25, %v1280_v47  ;;  %v1308_v21 = vadd.f32 %v18170_v25, %v1281_v59 }
 0x255   :  { %v1332_v34 = vmax.f32 %v1313_v42, 0.0  ;;  %v1333_v45 = vmax.f32 %v1314_v43, 0.0  ;;  %v1330_v36 = vmax.f32 %v1311_v57, 0.0  ;;  %v1331_v16 = vmax.f32 %v1312_v38, 0.0 }
 0x256   :  { %v1328_v40 = vmax.f32 %v1309_v60, 0.0  ;;  %v1329_v20 = vmax.f32 %v1310_v35, 0.0  ;;  %v1326_v24 = vmax.f32 %v1307_v33, 0.0  ;;  %v1327_v26 = vmax.f32 %v1308_v21, 0.0 }
 0x257   :  { %v1344_v46 = vpack.c.bf16 %v1333_v45, %v1332_v34  ;;  %v1343_v19 = vpack.c.bf16 %v1331_v16, %v1330_v36  ;;  %v1305_v27 = vadd.f32 %v18170_v25, %v1278_v23  ;;  %v1306_v17 = vadd.f32 %v18170_v25, %v1279_v56 }
 0x258   :  { %v1342_v61 = vpack.c.bf16 %v1329_v20, %v1328_v40  ;;  %v1276_v41 = vmul.f32 %v18167_v22, %v18056_v32  ;;  %v1277_v42 = vmul.f32 %v18167_v22, %v18068_v58  ;;  %v1341_v51 = vpack.c.bf16 %v1327_v26, %v1326_v24 }
 0x259   :  { %2473 = vmatpush1.bf16.msra.mxu1 %v1344_v46  ;;  %v1324_v43 = vmax.f32 %v1305_v27, 0.0  ;;  %v1325_v57 = vmax.f32 %v1306_v17, 0.0  ;;  %v1274_v62 = vmul.f32 %v18026_v48, %v18167_v22  ;;  %v1275_v32 = vmul.f32 %v18033_v49, %v18167_v22  ;;  %v14787_v27 = vld [vmem:[%s21565_s6 + $0x10] ss:$8 sps:$4 sm:$0xff]   ;;  %v14788_v17 = vld [vmem:[%s21565_s6 + $0x24] ss:$8 sps:$4 sm:$0xff]  }
 0x25a   :  { %2474 = vmatprep.subr.bf16.mxu1 %v21567_v55  ;;  %v1303_v52 = vadd.f32 %v18170_v25, %v1276_v41  ;;  %v1304_v38 = vadd.f32 %v18170_v25, %v1277_v42  ;;  %v1272_v46 = vmul.f32 %v18167_v22, %v18028_v50  ;;  %v1273_v48 = vmul.f32 %v18167_v22, %v18038_v54  ;;  %v14790_v41 = vld [vmem:[%s21565_s6 + $0x20] ss:$8 sps:$4 sm:$0xff]   ;;  %v14791_v42 = vld [vmem:[%s21565_s6 + $0x34] ss:$8 sps:$4 sm:$0xff]  }
 0x25b   :  { %v1301_v58 = vadd.f32 %v18170_v25, %v1274_v62  ;;  %v1340_v34 = vpack.c.bf16 %v1325_v57, %v1324_v43  ;;  %v1302_v60 = vadd.f32 %v18170_v25, %v1275_v32  ;;  %v1290_v49 = vmul.f32 %v18133_v37, %v18167_v22  ;;  %v14796_v43 = vld [vmem:[%s21565_s6 + $0x40] ss:$8 sps:$4 sm:$0xff]   ;;  %v14797_v57 = vld [vmem:[%s21565_s6 + $0x54] ss:$8 sps:$4 sm:$0xff]   ;;  %v14800_v62 = vld [vmem:[%s21565_s6 + $0x64] ss:$8 sps:$4 sm:$0xff]  }
 0x25c   :  { %v1322_v45 = vmax.f32 %v1303_v52, 0.0  ;;  %v1323_v44 = vmax.f32 %v1304_v38, 0.0  ;;  %v1299_v47 = vadd.f32 %v18170_v25, %v1272_v46  ;;  %v1300_v59 = vadd.f32 %v18170_v25, %v1273_v48  ;;  %v14793_v52 = vld [vmem:[%s21565_s6 + $0x30] ss:$8 sps:$4 sm:$0xff]   ;;  %v14802_v32 = vld [vmem:[%s21565_s6 + $0x60] ss:$8 sps:$4 sm:$0xff]  }
 0x25d   :  { %2475 = vmatpush1.bf16.msra.mxu1 %v1343_v19  ;;  %v1320_v36 = vmax.f32 %v1301_v58, 0.0  ;;  %v1321_v35 = vmax.f32 %v1302_v60, 0.0  ;;  %v1317_v33 = vadd.f32 %v18170_v25, %v1290_v49  ;;  %v1289_v20 = vmul.f32 %v18167_v22, %v18150_v53  ;;  %v14799_v38 = vld [vmem:[%s21565_s6 + $0x50] ss:$8 sps:$4 sm:$0xff]   ;;  %v14803_v58 = vld [vmem:[%s21565_s6 + $0x74] ss:$8 sps:$4 sm:$0xff]  }
 0x25e   :  { %2476 = vmatprep.subr.bf16.mxu1 %v21567_v55  ;;  %v1339_v16 = vpack.c.bf16 %v1323_v44, %v1322_v45  ;;  %v1318_v19 = vmax.f32 %v1299_v47, 0.0  ;;  %v1319_v54 = vmax.f32 %v1300_v59, 0.0  ;;  %v1288_v37 = vmul.f32 %v18167_v22, %v18140_v63  ;;  %v14782_v22 = vld [vmem:[%s21565_s6] ss:$8 sps:$4 sm:$0xff]   ;;  %v14806_v45 = vld [vmem:[%s21565_s6 + $0x84] ss:$8 sps:$4 sm:$0xff]  }
 0x25f   :  { %v1338_v50 = vpack.c.bf16 %v1321_v35, %v1320_v36  ;;  %v1336_v40 = vmax.f32 %v1317_v33, 0.0  ;;  %v1316_v21 = vadd.f32 %v18170_v25, %v1289_v20  ;;  %v14808_v44 = vld [vmem:[%s21565_s6 + $0x80] ss:$8 sps:$4 sm:$0xff]   ;;  %v14809_v60 = vld [vmem:[%s21565_s6 + $0x94] ss:$8 sps:$4 sm:$0xff]  }
 0x260   :  { %v1337_v23 = vpack.c.bf16 %v1319_v54, %v1318_v19  ;;  %v1315_v56 = vadd.f32 %v18170_v25, %v1288_v37  ;;  %v14785_v25 = vld [vmem:[%s21565_s6 + $0x14] ss:$8 sps:$4 sm:$0xff]   ;;  %v14811_v46 = vld [vmem:[%s21565_s6 + $0x90] ss:$8 sps:$4 sm:$0xff]   ;;  %v14812_v48 = vld [vmem:[%s21565_s6 + $0xa4] ss:$8 sps:$4 sm:$0xff]  }
 0x261   :  { %2477 = vmatpush1.bf16.msra.mxu1 %v1342_v61  ;;  %v1346_v24 = vpack.c.bf16 %v1336_v40, %v1336_v40  ;;  %v1335_v61 = vmax.f32 %v1316_v21, 0.0  ;;  %v14814_v36 = vld [vmem:[%s21565_s6 + $0xa0] ss:$8 sps:$4 sm:$0xff]   ;;  %v14815_v49 = vld [vmem:[%s21565_s6 + $0xb4] ss:$8 sps:$4 sm:$0xff]  }
 0x262   :  { %2478 = vmatprep.subr.bf16.mxu1 %v21567_v55  ;;  %v1334_v26 = vmax.f32 %v1315_v56, 0.0  ;;  %v14818_v35 = vld [vmem:[%s21565_s6 + $0xc4] ss:$8 sps:$4 sm:$0xff]   ;;  %v14820_v47 = vld [vmem:[%s21565_s6 + $0xc0] ss:$8 sps:$4 sm:$0xff]  }
 0x263   :  { %v2470_v53 = vsel %vm2468_vm5, %v1346_v24, 0  ;;  %v14821_v59 = vld [vmem:[%s21565_s6 + $0xd4] ss:$8 sps:$4 sm:$0xff]   ;;  %v14823_v33 = vld [vmem:[%s21565_s6 + $0xd0] ss:$8 sps:$4 sm:$0xff]  }
 0x264   :  { %v1345_v63 = vpack.c.bf16 %v1335_v61, %v1334_v26  ;;  %v14826_v19 = vld [vmem:[%s21565_s6 + $0xe0] ss:$8 sps:$4 sm:$0xff]   ;;  %v14827_v54 = vld [vmem:[%s21565_s6 + $0xf4] ss:$8 sps:$4 sm:$0xff]   ;;  %v14829_v40 = vld [vmem:[%s21565_s6 + $0xf0] ss:$8 sps:$4 sm:$0xff]  }
 0x265   :  { %2479 = vmatpush1.bf16.msra.mxu1 %v1341_v51  ;;  %v14794_v51 = vld [vmem:[%s21565_s6 + $0x44] ss:$8 sps:$4 sm:$0xff]   ;;  %v14832_v37 = vld [vmem:[%s21565_s6 + $0x100] ss:$8 sps:$4 sm:$0xff]   ;;  %v14833_v21 = vld [vmem:[%s21565_s6 + $0x114] ss:$8 sps:$4 sm:$0xff]  }
 0x266   :  { %2480 = vmatprep.subr.bf16.mxu1 %v21567_v55  ;;  %v14830_v20 = vld [vmem:[%s21565_s6 + $0x104] ss:$8 sps:$4 sm:$0xff]   ;;  %v14838_v24 = vld [vmem:[%s21565_s6 + $0x120] ss:$8 sps:$4 sm:$0xff]   ;;  %v14839_v61 = vld [vmem:[%s21565_s6 + $0x134] ss:$8 sps:$4 sm:$0xff]  }
 0x267   :  { %v14836_v56 = vld [vmem:[%s21565_s6 + $0x124] ss:$8 sps:$4 sm:$0xff]   ;;  %v14841_v26 = vld [vmem:[%s21565_s6 + $0x130] ss:$8 sps:$4 sm:$0xff]  }
 0x269   :  { %2481 = vmatpush1.bf16.msra.mxu1 %v1340_v34  ;;  %v14805_v34 = vld [vmem:[%s21565_s6 + $0x70] ss:$8 sps:$4 sm:$0xff]  }
 0x26a   :  { %2482 = vmatprep.subr.bf16.mxu1 %v21567_v55 }
 0x26d   :  { %2483 = vmatpush1.bf16.msra.mxu1 %v1339_v16  ;;  %v14817_v16 = vld [vmem:[%s21565_s6 + $0xb0] ss:$8 sps:$4 sm:$0xff]  }
 0x26e   :  { %2484 = vmatprep.subr.bf16.mxu1 %v21567_v55 }
 0x271   :  { %2485 = vmatpush1.bf16.msra.mxu1 %v1338_v50  ;;  %v14824_v50 = vld [vmem:[%s21565_s6 + $0xe4] ss:$8 sps:$4 sm:$0xff]  }
 0x272   :  { %2486 = vmatprep.subr.bf16.mxu1 %v21567_v55 }
 0x275   :  { %2487 = vmatpush1.bf16.msra.mxu1 %v1337_v23  ;;  %v14835_v23 = vld [vmem:[%s21565_s6 + $0x110] ss:$8 sps:$4 sm:$0xff]  }
 0x276   :  { %2500 = vmatprep.subr.bf16.mxu1 %v21567_v55 }
 0x279   :  { %2501 = vmatpush2.bf16.msra.mxu1 %v2470_v53  ;;  %v14842_v53 = vld [vmem:[%s21565_s6 + $0x144] ss:$8 sps:$4 sm:$0xff]  }
 0x27a   :  { %2502 = vmatprep.subr.bf16.mxu1 %v21567_v55 }
 0x27d   :  { %2503 = vmatpush2.bf16.msra.mxu1 %v1345_v63  ;;  %v14844_v63 = vld [vmem:[%s21565_s6 + $0x140] ss:$8 sps:$4 sm:$0xff]  }
 0x280   :  { %2505 = vmatmul.mubr.bf16.vlgmr.msra.gmra.mxu1 %v14782_v22  ;;  %v14845_v22 = vld [vmem:[%s21565_s6 + $0x154] ss:$8 sps:$4 sm:$0xff]  }
 0x281   :  { %13301 = vmatprep.mubr.msk.bf16.mxu1 %vm2227_vm2, %v14785_v25  ;;  %v14847_v25 = vld [vmem:[%s21565_s6 + $0x150] ss:$8 sps:$4 sm:$0xff]  }
 0x288   :  { %2513 = vmatmul.mubr.bf16.gmra.mxu1 %v14787_v27  ;;  %v14848_v27 = vld [vmem:[%s21565_s6 + $0x164] ss:$8 sps:$4 sm:$0xff]  }
 0x289   :  { %13302 = vmatprep.mubr.msk.bf16.mxu1 %vm2227_vm2, %v14788_v17  ;;  %v14850_v17 = vld [vmem:[%s21565_s6 + $0x160] ss:$8 sps:$4 sm:$0xff]  }
 0x290   :  { %2521 = vmatmul.mubr.bf16.gmra.mxu1 %v14790_v41  ;;  %v14851_v41 = vld [vmem:[%s21565_s6 + $0x174] ss:$8 sps:$4 sm:$0xff]  }
 0x291   :  { %13303 = vmatprep.mubr.msk.bf16.mxu1 %vm2227_vm2, %v14791_v42  ;;  %v14853_v42 = vld [vmem:[%s21565_s6 + $0x170] ss:$8 sps:$4 sm:$0xff]  }
 0x298   :  { %2529 = vmatmul.mubr.bf16.gmra.mxu1 %v14793_v52  ;;  %v14854_v52 = vld [vmem:[%s21565_s6 + $0x184] ss:$8 sps:$4 sm:$0xff]  }
 0x299   :  { %13304 = vmatprep.mubr.msk.bf16.mxu1 %vm2227_vm2, %v14794_v51  ;;  %v14856_v51 = vld [vmem:[%s21565_s6 + $0x180] ss:$8 sps:$4 sm:$0xff]  }
 0x2a0   :  { %2537 = vmatmul.mubr.bf16.gmra.mxu1 %v14796_v43  ;;  %v14857_v43 = vld [vmem:[%s21565_s6 + $0x194] ss:$8 sps:$4 sm:$0xff]  }
 0x2a1   :  { %13305 = vmatprep.mubr.msk.bf16.mxu1 %vm2227_vm2, %v14797_v57 }
 0x2a8   :  { %2545 = vmatmul.mubr.bf16.gmra.mxu1 %v14799_v38 }
 0x2a9   :  { %13306 = vmatprep.mubr.msk.bf16.mxu1 %vm2227_vm2, %v14800_v62 }
 0x2b0   :  { %2553 = vmatmul.mubr.bf16.gmra.mxu1 %v14802_v32  ;;  %v14859_v32 = vld [vmem:[%s21565_s6 + $0x190] ss:$8 sps:$4 sm:$0xff]  }
 0x2b1   :  { %13307 = vmatprep.mubr.msk.bf16.mxu1 %vm2227_vm2, %v14803_v58  ;;  %v14860_v58 = vld [vmem:[%s21565_s6 + $0x1a4] ss:$8 sps:$4 sm:$0xff]  }
 0x2b8   :  { %2561 = vmatmul.mubr.bf16.gmra.mxu1 %v14805_v34 }
 0x2b9   :  { %13308 = vmatprep.mubr.msk.bf16.mxu1 %vm2227_vm2, %v14806_v45 }
 0x2c0   :  { %2569 = vmatmul.mubr.bf16.gmra.mxu1 %v14808_v44 }
 0x2c1   :  { %13309 = vmatprep.mubr.msk.bf16.mxu1 %vm2227_vm2, %v14809_v60 }
 0x2c8   :  { %2577 = vmatmul.mubr.bf16.gmra.mxu1 %v14811_v46  ;;  %v14862_v46 = vld [vmem:[%s21565_s6 + $0x1a0] ss:$8 sps:$4 sm:$0xff]  }
 0x2c9   :  { %13310 = vmatprep.mubr.msk.bf16.mxu1 %vm2227_vm2, %v14812_v48  ;;  %v14863_v48 = vld [vmem:[%s21565_s6 + $0x1b4] ss:$8 sps:$4 sm:$0xff]  }
 0x2d0   :  { %2585 = vmatmul.mubr.bf16.gmra.mxu1 %v14814_v36 }
 0x2d1   :  { %13311 = vmatprep.mubr.msk.bf16.mxu1 %vm2227_vm2, %v14815_v49 }
 0x2d8   :  { %2593 = vmatmul.mubr.bf16.gmra.mxu1 %v14817_v16 }
 0x2d9   :  { %13312 = vmatprep.mubr.msk.bf16.mxu1 %vm2227_vm2, %v14818_v35 }
 0x2e0   :  { %2601 = vmatmul.mubr.bf16.gmra.mxu1 %v14820_v47  ;;  %v14865_v47 = vld [vmem:[%s21565_s6 + $0x1b0] ss:$8 sps:$4 sm:$0xff]  }
 0x2e1   :  { %13313 = vmatprep.mubr.msk.bf16.mxu1 %vm2227_vm2, %v14821_v59  ;;  %v14866_v59 = vld [vmem:[%s21565_s6 + $0x1c4] ss:$8 sps:$4 sm:$0xff]  }
 0x2e8   :  { %2609 = vmatmul.mubr.bf16.gmra.mxu1 %v14823_v33 }
 0x2e9   :  { %13314 = vmatprep.mubr.msk.bf16.mxu1 %vm2227_vm2, %v14824_v50 }
 0x2f0   :  { %2617 = vmatmul.mubr.bf16.gmra.mxu1 %v14826_v19 }
 0x2f1   :  { %13315 = vmatprep.mubr.msk.bf16.mxu1 %vm2227_vm2, %v14827_v54 }
 0x2f8   :  { %2625 = vmatmul.mubr.bf16.gmra.mxu1 %v14829_v40  ;;  %v14868_v40 = vld [vmem:[%s21565_s6 + $0x1c0] ss:$8 sps:$4 sm:$0xff]  }
 0x2f9   :  { %13316 = vmatprep.mubr.msk.bf16.mxu1 %vm2227_vm2, %v14830_v20  ;;  %v14869_v20 = vld [vmem:[%s21565_s6 + $0x1d4] ss:$8 sps:$4 sm:$0xff]  }
 0x300   :  { %2633 = vmatmul.mubr.bf16.gmra.mxu1 %v14832_v37 }
 0x301   :  { %13317 = vmatprep.mubr.msk.bf16.mxu1 %vm2227_vm2, %v14833_v21 }
 0x308   :  { %2641 = vmatmul.mubr.bf16.gmra.mxu1 %v14835_v23 }
 0x309   :  { %13318 = vmatprep.mubr.msk.bf16.mxu1 %vm2227_vm2, %v14836_v56 }
 0x310   :  { %2649 = vmatmul.mubr.bf16.gmra.mxu1 %v14838_v24  ;;  %v14871_v24 = vld [vmem:[%s21565_s6 + $0x1d0] ss:$8 sps:$4 sm:$0xff]  }
 0x311   :  { %13319 = vmatprep.mubr.msk.bf16.mxu1 %vm2227_vm2, %v14839_v61  ;;  %v14872_v61 = vld [vmem:[%s21565_s6 + $0x1e4] ss:$8 sps:$4 sm:$0xff]  }
 0x318   :  { %2657 = vmatmul.mubr.bf16.gmra.mxu1 %v14841_v26 }
 0x319   :  { %13320 = vmatprep.mubr.msk.bf16.mxu1 %vm2227_vm2, %v14842_v53 }
 0x320   :  { %2665 = vmatmul.mubr.bf16.gmra.mxu1 %v14844_v63 }
 0x321   :  { %13321 = vmatprep.mubr.msk.bf16.mxu1 %vm2227_vm2, %v14845_v22 }
 0x328   :  { %2673 = vmatmul.mubr.bf16.gmra.mxu1 %v14847_v25  ;;  %v14874_v25 = vld [vmem:[%s21565_s6 + $0x1e0] ss:$8 sps:$4 sm:$0xff]  }
 0x329   :  { %13322 = vmatprep.mubr.msk.bf16.mxu1 %vm2227_vm2, %v14848_v27  ;;  %v14875_v27 = vld [vmem:[%s21565_s6 + $0x1f4] ss:$8 sps:$4 sm:$0xff]  }
 0x330   :  { %2681 = vmatmul.mubr.bf16.gmra.mxu1 %v14850_v17 }
 0x331   :  { %13323 = vmatprep.mubr.msk.bf16.mxu1 %vm2227_vm2, %v14851_v41 }
 0x338   :  { %2689 = vmatmul.mubr.bf16.gmra.mxu1 %v14853_v42 }
 0x339   :  { %13324 = vmatprep.mubr.msk.bf16.mxu1 %vm2227_vm2, %v14854_v52 }
 0x340   :  { %v18413_v57 = vpop.f32.mrf.mxu1  ;;  %2697 = vmatmul.mubr.bf16.gmra.mxu1 %v14856_v51  ;;  %v14877_v51 = vld [vmem:[%s21565_s6 + $0x1f0] ss:$8 sps:$4 sm:$0xff]  }
 0x341   :  { %13325 = vmatprep.mubr.msk.bf16.mxu1 %vm2227_vm2, %v14857_v43  ;;  %v14878_v43 = vld [vmem:[%s21565_s6 + $0x204] ss:$8 sps:$4 sm:$0xff]  }
 0x342   :  { %v2508_v38 = vpop.f32.mrf.mxu1 }
 0x344   :  { %v18416_v62 = vpop.f32.mrf.mxu1 }
 0x346   :  { %v2511_v34 = vpop.f32.mrf.mxu1 }
 0x348   :  { %v18424_v45 = vpop.f32.mrf.mxu1  ;;  %2705 = vmatmul.mubr.bf16.gmra.mxu1 %v14859_v32 }
 0x349   :  { %13326 = vmatprep.mubr.msk.bf16.mxu1 %vm2227_vm2, %v14860_v58 }
 0x34a   :  { %v2516_v44 = vpop.f32.mrf.mxu1 }
 0x34b   :  { %v14880_v44 = vld [vmem:[%s21565_s6 + $0x200] ss:$8 sps:$4 sm:$0xff]  }
 0x34c   :  { %v18427_v60 = vpop.f32.mrf.mxu1 }
 0x34e   :  { %v2519_v36 = vpop.f32.mrf.mxu1 }
 0x350   :  { %v18435_v49 = vpop.f32.mrf.mxu1  ;;  %2713 = vmatmul.mubr.bf16.gmra.mxu1 %v14862_v46  ;;  %v14881_v46 = vld [vmem:[%s21565_s6 + $0x214] ss:$8 sps:$4 sm:$0xff]  }
 0x351   :  { %13327 = vmatprep.mubr.msk.bf16.mxu1 %vm2227_vm2, %v14863_v48 }
 0x352   :  { %v2524_v16 = vpop.f32.mrf.mxu1 }
 0x354   :  { %v18438_v35 = vpop.f32.mrf.mxu1 }
 0x356   :  { %v2527_v33 = vpop.f32.mrf.mxu1 }
 0x357   :  { %v14883_v33 = vld [vmem:[%s21565_s6 + $0x210] ss:$8 sps:$4 sm:$0xff]  }
 0x358   :  { %v18446_v50 = vpop.f32.mrf.mxu1  ;;  %2721 = vmatmul.mubr.bf16.gmra.mxu1 %v14865_v47 }
 0x359   :  { %13328 = vmatprep.mubr.msk.bf16.mxu1 %vm2227_vm2, %v14866_v59 }
 0x35a   :  { %v2532_v19 = vpop.f32.mrf.mxu1 }
 0x35c   :  { %v18449_v54 = vpop.f32.mrf.mxu1 }
 0x35e   :  { %v2535_v37 = vpop.f32.mrf.mxu1 }
 0x360   :  { %v18457_v21 = vpop.f32.mrf.mxu1  ;;  %2729 = vmatmul.mubr.bf16.gmra.mxu1 %v14868_v40  ;;  %v14884_v40 = vld [vmem:[%s21565_s6 + $0x224] ss:$8 sps:$4 sm:$0xff]  }
 0x361   :  { %13329 = vmatprep.mubr.msk.bf16.mxu1 %vm2227_vm2, %v14869_v20 }
 0x362   :  { %v2540_v23 = vpop.f32.mrf.mxu1 }
 0x363   :  { %v14907_v23 = vld [vmem:[%s21565_s6 + $0x290] ss:$8 sps:$4 sm:$0xff]  }
 0x364   :  { %v18460_v56 = vpop.f32.mrf.mxu1 }
 0x366   :  { %v2543_v26 = vpop.f32.mrf.mxu1 }
 0x367   :  { %v14886_v26 = vld [vmem:[%s21565_s6 + $0x220] ss:$8 sps:$4 sm:$0xff]  }
 0x368   :  { %v18468_v53 = vpop.f32.mrf.mxu1  ;;  %2737 = vmatmul.mubr.bf16.gmra.mxu1 %v14871_v24 }
 0x369   :  { %13330 = vmatprep.mubr.msk.bf16.mxu1 %vm2227_vm2, %v14872_v61 }
 0x36a   :  { %v2548_v63 = vpop.f32.mrf.mxu1 }
 0x36c   :  { %v18471_v22 = vpop.f32.mrf.mxu1 }
 0x36e   :  { %v2551_v17 = vpop.f32.mrf.mxu1 }
 0x370   :  { %v18479_v41 = vpop.f32.mrf.mxu1  ;;  %2745 = vmatmul.mubr.bf16.gmra.mxu1 %v14874_v25  ;;  %v14887_v25 = vld [vmem:[%s21565_s6 + $0x234] ss:$8 sps:$4 sm:$0xff]  }
 0x371   :  { %13331 = vmatprep.mubr.msk.bf16.mxu1 %vm2227_vm2, %v14875_v27 }
 0x372   :  { %v2556_v42 = vpop.f32.mrf.mxu1 }
 0x373   :  { %v14904_v42 = vld [vmem:[%s21565_s6 + $0x280] ss:$8 sps:$4 sm:$0xff]  }
 0x374   :  { %v18482_v52 = vpop.f32.mrf.mxu1 }
 0x376   :  { %v2559_v38 = vpop.f32.mrf.mxu1 }
 0x377   :  { %v14889_v38 = vld [vmem:[%s21565_s6 + $0x230] ss:$8 sps:$4 sm:$0xff]  }
 0x378   :  { %v18490_v32 = vpop.f32.mrf.mxu1  ;;  %2753 = vmatmul.mubr.bf16.gmra.mxu1 %v14877_v51 }
 0x379   :  { %13332 = vmatprep.mubr.msk.bf16.mxu1 %vm2227_vm2, %v14878_v43 }
 0x37a   :  { %v2564_v58 = vpop.f32.mrf.mxu1 }
 0x37c   :  { %v18493_v34 = vpop.f32.mrf.mxu1 }
 0x37e   :  { %v2567_v48 = vpop.f32.mrf.mxu1 }
 0x380   :  { %v18501_v36 = vpop.f32.mrf.mxu1  ;;  %2761 = vmatmul.mubr.bf16.gmra.mxu1 %v14880_v44  ;;  %v14890_v44 = vld [vmem:[%s21565_s6 + $0x244] ss:$8 sps:$4 sm:$0xff]  }
 0x381   :  { %v3145_v16 = vmax.f32 %v18413_v57, %v18501_v36  ;;  %13333 = vmatprep.mubr.msk.bf16.mxu1 %vm2227_vm2, %v14881_v46 }
 0x382   :  { %v2572_v47 = vpop.f32.mrf.mxu1 }
 0x383   :  { %v14901_v47 = vld [vmem:[%s21565_s6 + $0x270] ss:$8 sps:$4 sm:$0xff]  }
 0x384   :  { %v18506_v59 = vpop.f32.mrf.mxu1 }
 0x385   :  { %v21568_v39 = vmax.f32 %v18416_v62, %v18506_v59 }
 0x386   :  { %v2575_v20 = vpop.f32.mrf.mxu1 }
 0x387   :  { %v14892_v20 = vld [vmem:[%s21565_s6 + $0x240] ss:$8 sps:$4 sm:$0xff]  }
 0x388   :  { %v18516_v37 = vpop.f32.mrf.mxu1  ;;  %2769 = vmatmul.mubr.bf16.gmra.mxu1 %v14883_v33 }
 0x389   :  { %13334 = vmatprep.mubr.msk.bf16.mxu1 %vm2227_vm2, %v14884_v40 }
 0x38a   :  { %v2580_v24 = vpop.f32.mrf.mxu1 }
 0x38c   :  { %v18521_v61 = vpop.f32.mrf.mxu1 }
 0x38d   :  { %v21570_v62 = vmax.f32 %v18427_v60, %v18521_v61  ;;  %v14913_v60 = vld [vmem:[%s21565_s6 + $0x2b0] ss:$8 sps:$4 sm:$0xff]  }
 0x38e   :  { %v2583_v27 = vpop.f32.mrf.mxu1 }
 0x390   :  { %v18531_v17 = vpop.f32.mrf.mxu1  ;;  %2777 = vmatmul.mubr.bf16.gmra.mxu1 %v14886_v26  ;;  %v14893_v26 = vld [vmem:[%s21565_s6 + $0x254] ss:$8 sps:$4 sm:$0xff]  }
 0x391   :  { %13335 = vmatprep.mubr.msk.bf16.mxu1 %vm2227_vm2, %v14887_v25 }
 0x392   :  { %v2588_v51 = vpop.f32.mrf.mxu1 }
 0x394   :  { %v18536_v43 = vpop.f32.mrf.mxu1 }
 0x395   :  { %v21572_v61 = vmax.f32 %v18438_v35, %v18536_v43  ;;  %v14916_v35 = vld [vmem:[%s21565_s6 + $0x2c0] ss:$8 sps:$4 sm:$0xff]  }
 0x396   :  { %v2591_v46 = vpop.f32.mrf.mxu1 }
 0x397   :  { %v14895_v46 = vld [vmem:[%s21565_s6 + $0x250] ss:$8 sps:$4 sm:$0xff]  }
 0x398   :  { %v18546_v48 = vpop.f32.mrf.mxu1  ;;  %2785 = vmatmul.mubr.bf16.gmra.mxu1 %v14889_v38 }
 0x399   :  { %13336 = vmatprep.mubr.msk.bf16.mxu1 %vm2227_vm2, %v14890_v44 }
 0x39a   :  { %v2596_v33 = vpop.f32.mrf.mxu1 }
 0x39b   :  { %v14898_v33 = vld [vmem:[%s21565_s6 + $0x260] ss:$8 sps:$4 sm:$0xff]  }
 0x39c   :  { %v18551_v40 = vpop.f32.mrf.mxu1 }
 0x39d   :  { %v21574_v43 = vmax.f32 %v18449_v54, %v18551_v40  ;;  %v14919_v54 = vld [vmem:[%s21565_s6 + $0x2d0] ss:$8 sps:$4 sm:$0xff]  }
 0x39e   :  { %v2599_v25 = vpop.f32.mrf.mxu1 }
 0x39f   :  { %v14896_v25 = vld [vmem:[%s21565_s6 + $0x264] ss:$8 sps:$4 sm:$0xff]  }
 0x3a0   :  { %v18561_v27 = vpop.f32.mrf.mxu1  ;;  %2793 = vmatmul.mubr.bf16.gmra.mxu1 %v14892_v20 }
 0x3a1   :  { %13337 = vmatprep.mubr.msk.bf16.mxu1 %vm2227_vm2, %v14893_v26 }
 0x3a2   :  { %v2604_v38 = vpop.f32.mrf.mxu1 }
 0x3a4   :  { %v18566_v44 = vpop.f32.mrf.mxu1 }
 0x3a5   :  { %v21576_v40 = vmax.f32 %v18460_v56, %v18566_v44  ;;  %v14922_v56 = vld [vmem:[%s21565_s6 + $0x2e0] ss:$8 sps:$4 sm:$0xff]  }
 0x3a6   :  { %v2607_v20 = vpop.f32.mrf.mxu1 }
 0x3a7   :  { %v14899_v20 = vld [vmem:[%s21565_s6 + $0x274] ss:$8 sps:$4 sm:$0xff]  }
 0x3a8   :  { %v18576_v24 = vpop.f32.mrf.mxu1  ;;  %2801 = vmatmul.mubr.bf16.gmra.mxu1 %v14895_v46 }
 0x3a9   :  { %13338 = vmatprep.mubr.msk.bf16.mxu1 %vm2227_vm2, %v14896_v25 }
 0x3aa   :  { %v2612_v38 = vpop.f32.mrf.mxu1 }
 0x3ac   :  { %v18581_v51 = vpop.f32.mrf.mxu1 }
 0x3ad   :  { %v21578_v44 = vmax.f32 %v18471_v22, %v18581_v51  ;;  %v14925_v22 = vld [vmem:[%s21565_s6 + $0x2f0] ss:$8 sps:$4 sm:$0xff]  }
 0x3ae   :  { %v2615_v46 = vpop.f32.mrf.mxu1 }
 0x3af   :  { %v14902_v46 = vld [vmem:[%s21565_s6 + $0x284] ss:$8 sps:$4 sm:$0xff]  }
 0x3b0   :  { %v18591_v58 = vpop.f32.mrf.mxu1  ;;  %2809 = vmatmul.mubr.bf16.gmra.mxu1 %v14898_v33 }
 0x3b1   :  { %13339 = vmatprep.mubr.msk.bf16.mxu1 %vm2227_vm2, %v14899_v20 }
 0x3b2   :  { %v2620_v38 = vpop.f32.mrf.mxu1 }
 0x3b4   :  { %v18596_v26 = vpop.f32.mrf.mxu1 }
 0x3b5   :  { %v21580_v51 = vmax.f32 %v18482_v52, %v18596_v26  ;;  %v14928_v52 = vld [vmem:[%s21565_s6 + $0x300] ss:$8 sps:$4 sm:$0xff]  }
 0x3b6   :  { %v2623_v33 = vpop.f32.mrf.mxu1 }
 0x3b7   :  { %v14905_v33 = vld [vmem:[%s21565_s6 + $0x294] ss:$8 sps:$4 sm:$0xff]  }
 0x3b8   :  { %v18606_v63 = vpop.f32.mrf.mxu1  ;;  %2817 = vmatmul.mubr.bf16.gmra.mxu1 %v14901_v47 }
 0x3b9   :  { %13340 = vmatprep.mubr.msk.bf16.mxu1 %vm2227_vm2, %v14902_v46 }
 0x3ba   :  { %v2628_v38 = vpop.f32.mrf.mxu1 }
 0x3bc   :  { %v18611_v25 = vpop.f32.mrf.mxu1 }
 0x3bd   :  { %v21582_v26 = vmax.f32 %v18493_v34, %v18611_v25  ;;  %v14931_v34 = vld [vmem:[%s21565_s6 + $0x310] ss:$8 sps:$4 sm:$0xff]  }
 0x3be   :  { %v2631_v47 = vpop.f32.mrf.mxu1 }
 0x3c0   :  { %v2634_v19 = vpop.f32.mrf.mxu1  ;;  %2825 = vmatmul.mubr.bf16.gmra.mxu1 %v14904_v42  ;;  %v14908_v42 = vld [vmem:[%s21565_s6 + $0x2a4] ss:$8 sps:$4 sm:$0xff]  }
 0x3c1   :  { %v18624_v46 = vmax.f32 %v3145_v16, %v2634_v19  ;;  %13341 = vmatprep.mubr.msk.bf16.mxu1 %vm2227_vm2, %v14905_v33  ;;  %v21569_v16 = vmax.f32 %v18424_v45, %v18516_v37 }
 0x3c2   :  { %v2636_v38 = vpop.f32.mrf.mxu1 }
 0x3c4   :  { %v2637_v20 = vpop.f32.mrf.mxu1 }
 0x3c5   :  { %v18633_v28 = vmax.f32 %v21568_v39, %v2637_v20  ;;  %v14910_v39 = vld [vmem:[%s21565_s6 + $0x2a0] ss:$8 sps:$4 sm:$0xff]   ;;  %v21571_v20 = vmax.f32 %v18435_v49, %v18531_v17 }
 0x3c6   :  { %v2639_v57 = vpop.f32.mrf.mxu1 }
 0x3c8   :  { %v2642_v36 = vpop.f32.mrf.mxu1  ;;  %2833 = vmatmul.mubr.bf16.gmra.mxu1 %v14907_v23  ;;  %v14911_v23 = vld [vmem:[%s21565_s6 + $0x2b4] ss:$8 sps:$4 sm:$0xff]  }
 0x3c9   :  { %v18641_v19 = vmax.f32 %v21569_v16, %v2642_v36  ;;  %13342 = vmatprep.mubr.msk.bf16.mxu1 %vm2227_vm2, %v14908_v42  ;;  %v14914_v16 = vld [vmem:[%s21565_s6 + $0x2c4] ss:$8 sps:$4 sm:$0xff]  }
 0x3ca   :  { %v2644_v33 = vpop.f32.mrf.mxu1 }
 0x3cb   :  { %v21573_v33 = vmax.f32 %v18446_v50, %v18546_v48 }
 0x3cc   :  { %v2645_v47 = vpop.f32.mrf.mxu1 }
 0x3cd   :  { %v18650_v59 = vmax.f32 %v21570_v62, %v2645_v47 }
 0x3ce   :  { %v2647_v45 = vpop.f32.mrf.mxu1 }
 0x3cf   :  { %v14917_v45 = vld [vmem:[%s21565_s6 + $0x2d4] ss:$8 sps:$4 sm:$0xff]  }
 0x3d0   :  { %v2650_v37 = vpop.f32.mrf.mxu1  ;;  %2841 = vmatmul.mubr.bf16.gmra.mxu1 %v14910_v39 }
 0x3d1   :  { %v18658_v38 = vmax.f32 %v21571_v20, %v2650_v37  ;;  %13343 = vmatprep.mubr.msk.bf16.mxu1 %vm2227_vm2, %v14911_v23  ;;  %v21575_v37 = vmax.f32 %v18457_v21, %v18561_v27 }
 0x3d2   :  { %v2652_v42 = vpop.f32.mrf.mxu1 }
 0x3d4   :  { %v2653_v57 = vpop.f32.mrf.mxu1 }
 0x3d5   :  { %v18667_v36 = vmax.f32 %v21572_v61, %v2653_v57  ;;  %v14920_v61 = vld [vmem:[%s21565_s6 + $0x2e4] ss:$8 sps:$4 sm:$0xff]  }
 0x3d6   :  { %v2655_v49 = vpop.f32.mrf.mxu1 }
 0x3d8   :  { %v2658_v17 = vpop.f32.mrf.mxu1  ;;  %2849 = vmatmul.mubr.bf16.gmra.mxu1 %v14913_v60 }
 0x3d9   :  { %v18675_v47 = vmax.f32 %v21573_v33, %v2658_v17  ;;  %13344 = vmatprep.mubr.msk.bf16.mxu1 %vm2227_vm2, %v14914_v16  ;;  %v21577_v16 = vmax.f32 %v18468_v53, %v18576_v24 }
 0x3da   :  { %v2660_v39 = vpop.f32.mrf.mxu1 }
 0x3dc   :  { %v2661_v62 = vpop.f32.mrf.mxu1 }
 0x3dd   :  { %v18684_v23 = vmax.f32 %v21574_v43, %v2661_v62  ;;  %v14923_v62 = vld [vmem:[%s21565_s6 + $0x2f4] ss:$8 sps:$4 sm:$0xff]  }
 0x3de   :  { %v2663_v50 = vpop.f32.mrf.mxu1 }
 0x3e0   :  { %v2666_v48 = vpop.f32.mrf.mxu1  ;;  %2857 = vmatmul.mubr.bf16.gmra.mxu1 %v14916_v35  ;;  %v21579_v35 = vmax.f32 %v18479_v41, %v18591_v58 }
 0x3e1   :  { %v18692_v20 = vmax.f32 %v21575_v37, %v2666_v48  ;;  %13345 = vmatprep.mubr.msk.bf16.mxu1 %vm2227_vm2, %v14917_v45  ;;  %v14926_v37 = vld [vmem:[%s21565_s6 + $0x304] ss:$8 sps:$4 sm:$0xff]  }
 0x3e2   :  { %v2668_v42 = vpop.f32.mrf.mxu1 }
 0x3e3   :  { %v21581_v42 = vmax.f32 %v18490_v32, %v18606_v63 }
 0x3e4   :  { %v2669_v57 = vpop.f32.mrf.mxu1 }
 0x3e5   :  { %v18701_v60 = vmax.f32 %v21576_v40, %v2669_v57 }
 0x3e6   :  { %v2671_v21 = vpop.f32.mrf.mxu1 }
 0x3e7   :  { %v14929_v21 = vld [vmem:[%s21565_s6 + $0x314] ss:$8 sps:$4 sm:$0xff]  }
 0x3e8   :  { %v2674_v27 = vpop.f32.mrf.mxu1  ;;  %2865 = vmatmul.mubr.bf16.gmra.mxu1 %v14919_v54 }
 0x3e9   :  { %v18709_v49 = vmax.f32 %v21577_v16, %v2674_v27  ;;  %13346 = vmatprep.mubr.msk.bf16.mxu1 %vm2227_vm2, %v14920_v61 }
 0x3ea   :  { %v2676_v17 = vpop.f32.mrf.mxu1 }
 0x3ec   :  { %v2677_v33 = vpop.f32.mrf.mxu1 }
 0x3ed   :  { %v18718_v39 = vmax.f32 %v21578_v44, %v2677_v33  ;;  %v14932_v33 = vld [vmem:[%s21565_s6 + $0x324] ss:$8 sps:$4 sm:$0xff]  }
 0x3ee   :  { %v2679_v53 = vpop.f32.mrf.mxu1 }
 0x3f0   :  { %v2682_v24 = vpop.f32.mrf.mxu1  ;;  %2873 = vmatmul.mubr.bf16.gmra.mxu1 %v14922_v56 }
 0x3f1   :  { %v18726_v43 = vmax.f32 %v21579_v35, %v2682_v24  ;;  %13347 = vmatprep.mubr.msk.bf16.mxu1 %vm2227_vm2, %v14923_v62  ;;  %v14934_v35 = vld [vmem:[%s21565_s6 + $0x320] ss:$8 sps:$4 sm:$0xff]  }
 0x3f2   :  { %v2684_v45 = vpop.f32.mrf.mxu1 }
 0x3f4   :  { %v2685_v50 = vpop.f32.mrf.mxu1 }
 0x3f5   :  { %v18735_v48 = vmax.f32 %v21580_v51, %v2685_v50  ;;  %v14935_v50 = vld [vmem:[%s21565_s6 + $0x334] ss:$8 sps:$4 sm:$0xff]  }
 0x3f6   :  { %v2687_v41 = vpop.f32.mrf.mxu1 }
 0x3f8   :  { %v2690_v58 = vpop.f32.mrf.mxu1  ;;  %2881 = vmatmul.mubr.bf16.gmra.mxu1 %v14925_v22 }
 0x3f9   :  { %v18743_v57 = vmax.f32 %v21581_v42, %v2690_v58  ;;  %13348 = vmatprep.mubr.msk.bf16.mxu1 %vm2227_vm2, %v14926_v37  ;;  %v14937_v42 = vld [vmem:[%s21565_s6 + $0x330] ss:$8 sps:$4 sm:$0xff]  }
 0x3fa   :  { %v2692_v54 = vpop.f32.mrf.mxu1  ;;  %v14955_v37 = vld [vmem:[%s21565_s6 + $0x390] ss:$8 sps:$4 sm:$0xff]  }
 0x3fc   :  { %v2693_v40 = vpop.f32.mrf.mxu1 }
 0x3fd   :  { %v18752_v61 = vmax.f32 %v21582_v26, %v2693_v40  ;;  %v14938_v40 = vld [vmem:[%s21565_s6 + $0x344] ss:$8 sps:$4 sm:$0xff]  }
 0x3fe   :  { %v2695_v32 = vpop.f32.mrf.mxu1 }
 0x400   :  { %v18757_v63 = vpop.f32.mrf.mxu1  ;;  %2889 = vmatmul.mubr.bf16.gmra.mxu1 %v14928_v52 }
 0x401   :  { %v3177_v27 = vmax.f32 %v18624_v46, %v18757_v63  ;;  %13349 = vmatprep.mubr.msk.bf16.mxu1 %vm2227_vm2, %v14929_v21  ;;  %v14952_v21 = vld [vmem:[%s21565_s6 + $0x380] ss:$8 sps:$4 sm:$0xff]  }
 0x402   :  { %v2700_v16 = vpop.f32.mrf.mxu1 }
 0x404   :  { %v18762_v17 = vpop.f32.mrf.mxu1 }
 0x405   :  { %v3178_v25 = vmax.f32 %v18633_v28, %v18762_v17  ;;  %v14958_v28 = vld [vmem:[%s21565_s6 + $0x3a0] ss:$8 sps:$4 sm:$0xff]  }
 0x406   :  { %v2703_v56 = vpop.f32.mrf.mxu1 }
 0x407   :  { %v14941_v56 = vld [vmem:[%s21565_s6 + $0x354] ss:$8 sps:$4 sm:$0xff]  }
 0x408   :  { %v18772_v44 = vpop.f32.mrf.mxu1  ;;  %2897 = vmatmul.mubr.bf16.gmra.mxu1 %v14931_v34  ;;  %v14940_v34 = vld [vmem:[%s21565_s6 + $0x340] ss:$8 sps:$4 sm:$0xff]  }
 0x409   :  { %13350 = vmatprep.mubr.msk.bf16.mxu1 %vm2227_vm2, %v14932_v33 }
 0x40a   :  { %v2708_v53 = vpop.f32.mrf.mxu1 }
 0x40c   :  { %v18777_v24 = vpop.f32.mrf.mxu1 }
 0x40d   :  { %v21584_v17 = vmax.f32 %v18650_v59, %v18777_v24  ;;  %v14961_v59 = vld [vmem:[%s21565_s6 + $0x3b0] ss:$8 sps:$4 sm:$0xff]  }
 0x40e   :  { %v2711_v22 = vpop.f32.mrf.mxu1 }
 0x410   :  { %v18787_v51 = vpop.f32.mrf.mxu1  ;;  %2905 = vmatmul.mubr.bf16.gmra.mxu1 %v14934_v35 }
 0x411   :  { %13351 = vmatprep.mubr.msk.bf16.mxu1 %vm2227_vm2, %v14935_v50  ;;  %v14949_v50 = vld [vmem:[%s21565_s6 + $0x370] ss:$8 sps:$4 sm:$0xff]  }
 0x412   :  { %v2716_v41 = vpop.f32.mrf.mxu1 }
 0x414   :  { %v18792_v58 = vpop.f32.mrf.mxu1 }
 0x415   :  { %v21586_v24 = vmax.f32 %v18667_v36, %v18792_v58  ;;  %v14964_v36 = vld [vmem:[%s21565_s6 + $0x3c0] ss:$8 sps:$4 sm:$0xff]  }
 0x416   :  { %v2719_v52 = vpop.f32.mrf.mxu1 }
 0x417   :  { %v14944_v52 = vld [vmem:[%s21565_s6 + $0x364] ss:$8 sps:$4 sm:$0xff]  }
 0x418   :  { %v18802_v26 = vpop.f32.mrf.mxu1  ;;  %2913 = vmatmul.mubr.bf16.gmra.mxu1 %v14937_v42  ;;  %v14943_v42 = vld [vmem:[%s21565_s6 + $0x350] ss:$8 sps:$4 sm:$0xff]  }
 0x419   :  { %13352 = vmatprep.mubr.msk.bf16.mxu1 %vm2227_vm2, %v14938_v40  ;;  %v14946_v40 = vld [vmem:[%s21565_s6 + $0x360] ss:$8 sps:$4 sm:$0xff]  }
 0x41a   :  { %v2724_v32 = vpop.f32.mrf.mxu1 }
 0x41c   :  { %v18807_v16 = vpop.f32.mrf.mxu1 }
 0x41d   :  { %v21588_v58 = vmax.f32 %v18684_v23, %v18807_v16  ;;  %v14967_v23 = vld [vmem:[%s21565_s6 + $0x3d0] ss:$8 sps:$4 sm:$0xff]  }
 0x41e   :  { %v2727_v53 = vpop.f32.mrf.mxu1 }
 0x420   :  { %v18817_v35 = vpop.f32.mrf.mxu1  ;;  %2921 = vmatmul.mubr.bf16.gmra.mxu1 %v14940_v34 }
 0x421   :  { %13353 = vmatprep.mubr.msk.bf16.mxu1 %vm2227_vm2, %v14941_v56 }
 0x422   :  { %v2732_v22 = vpop.f32.mrf.mxu1 }
 0x424   :  { %v18822_v41 = vpop.f32.mrf.mxu1 }
 0x425   :  { %v21590_v16 = vmax.f32 %v18701_v60, %v18822_v41  ;;  %v14970_v60 = vld [vmem:[%s21565_s6 + $0x3e0] ss:$8 sps:$4 sm:$0xff]  }
 0x426   :  { %v2735_v32 = vpop.f32.mrf.mxu1 }
 0x427   :  { %v14947_v32 = vld [vmem:[%s21565_s6 + $0x374] ss:$8 sps:$4 sm:$0xff]  }
 0x428   :  { %v18832_v34 = vpop.f32.mrf.mxu1  ;;  %2929 = vmatmul.mubr.bf16.gmra.mxu1 %v14943_v42 }
 0x429   :  { %13354 = vmatprep.mubr.msk.bf16.mxu1 %vm2227_vm2, %v14944_v52 }
 0x42a   :  { %v2740_v53 = vpop.f32.mrf.mxu1 }
 0x42c   :  { %v18837_v22 = vpop.f32.mrf.mxu1 }
 0x42d   :  { %v21592_v41 = vmax.f32 %v18718_v39, %v18837_v22  ;;  %v14973_v39 = vld [vmem:[%s21565_s6 + $0x3f0] ss:$8 sps:$4 sm:$0xff]  }
 0x42e   :  { %v2743_v42 = vpop.f32.mrf.mxu1 }
 0x42f   :  { %v14950_v42 = vld [vmem:[%s21565_s6 + $0x384] ss:$8 sps:$4 sm:$0xff]  }
 0x430   :  { %v18847_v33 = vpop.f32.mrf.mxu1  ;;  %2937 = vmatmul.mubr.bf16.gmra.mxu1 %v14946_v40 }
 0x431   :  { %13355 = vmatprep.mubr.msk.bf16.mxu1 %vm2227_vm2, %v14947_v32 }
 0x432   :  { %v2748_v53 = vpop.f32.mrf.mxu1 }
 0x434   :  { %v18852_v56 = vpop.f32.mrf.mxu1 }
 0x435   :  { %v21594_v22 = vmax.f32 %v18735_v48, %v18852_v56  ;;  %v14976_v48 = vld [vmem:[%s21565_s6 + $0x400] ss:$8 sps:$4 sm:$0xff]  }
 0x436   :  { %v2751_v40 = vpop.f32.mrf.mxu1 }
 0x437   :  { %v14953_v40 = vld [vmem:[%s21565_s6 + $0x394] ss:$8 sps:$4 sm:$0xff]  }
 0x438   :  { %v18862_v54 = vpop.f32.mrf.mxu1  ;;  %2945 = vmatmul.mubr.bf16.gmra.mxu1 %v14949_v50 }
 0x439   :  { %13356 = vmatprep.mubr.msk.bf16.mxu1 %vm2227_vm2, %v14950_v42 }
 0x43a   :  { %v2756_v53 = vpop.f32.mrf.mxu1 }
 0x43c   :  { %v18867_v52 = vpop.f32.mrf.mxu1 }
 0x43d   :  { %v21596_v56 = vmax.f32 %v18752_v61, %v18867_v52  ;;  %v14979_v61 = vld [vmem:[%s21565_s6 + $0x410] ss:$8 sps:$4 sm:$0xff]  }
 0x43e   :  { %v2759_v50 = vpop.f32.mrf.mxu1 }
 0x440   :  { %v2762_v45 = vpop.f32.mrf.mxu1  ;;  %2953 = vmatmul.mubr.bf16.gmra.mxu1 %v14952_v21  ;;  %v14956_v21 = vld [vmem:[%s21565_s6 + $0x3a4] ss:$8 sps:$4 sm:$0xff]  }
 0x441   :  { %v18880_v42 = vmax.f32 %v3177_v27, %v2762_v45  ;;  %13357 = vmatprep.mubr.msk.bf16.mxu1 %vm2227_vm2, %v14953_v40  ;;  %v21583_v27 = vmax.f32 %v18641_v19, %v18772_v44 }
 0x442   :  { %v2764_v53 = vpop.f32.mrf.mxu1 }
 0x444   :  { %v2765_v32 = vpop.f32.mrf.mxu1 }
 0x445   :  { %v18889_v62 = vmax.f32 %v3178_v25, %v2765_v32  ;;  %v21585_v32 = vmax.f32 %v18658_v38, %v18787_v51 }
 0x446   :  { %v2767_v46 = vpop.f32.mrf.mxu1 }
 0x448   :  { %v2770_v63 = vpop.f32.mrf.mxu1  ;;  %2961 = vmatmul.mubr.bf16.gmra.mxu1 %v14955_v37  ;;  %v14959_v37 = vld [vmem:[%s21565_s6 + $0x3b4] ss:$8 sps:$4 sm:$0xff]  }
 0x449   :  { %v18897_v45 = vmax.f32 %v21583_v27, %v2770_v63  ;;  %13358 = vmatprep.mubr.msk.bf16.mxu1 %vm2227_vm2, %v14956_v21  ;;  %v14962_v27 = vld [vmem:[%s21565_s6 + $0x3c4] ss:$8 sps:$4 sm:$0xff]  }
 0x44a   :  { %v2772_v40 = vpop.f32.mrf.mxu1 }
 0x44b   :  { %v21587_v40 = vmax.f32 %v18675_v47, %v18802_v26 }
 0x44c   :  { %v2773_v50 = vpop.f32.mrf.mxu1 }
 0x44d   :  { %v18906_v25 = vmax.f32 %v21584_v17, %v2773_v50 }
 0x44e   :  { %v2775_v19 = vpop.f32.mrf.mxu1 }
 0x44f   :  { %v14965_v19 = vld [vmem:[%s21565_s6 + $0x3d4] ss:$8 sps:$4 sm:$0xff]  }
 0x450   :  { %v2778_v44 = vpop.f32.mrf.mxu1  ;;  %2969 = vmatmul.mubr.bf16.gmra.mxu1 %v14958_v28 }
 0x451   :  { %v18914_v53 = vmax.f32 %v21585_v32, %v2778_v44  ;;  %13359 = vmatprep.mubr.msk.bf16.mxu1 %vm2227_vm2, %v14959_v37  ;;  %v21589_v44 = vmax.f32 %v18692_v20, %v18817_v35 }
 0x452   :  { %v2780_v21 = vpop.f32.mrf.mxu1 }
 0x454   :  { %v2781_v46 = vpop.f32.mrf.mxu1 }
 0x455   :  { %v18923_v63 = vmax.f32 %v21586_v24, %v2781_v46  ;;  %v14968_v24 = vld [vmem:[%s21565_s6 + $0x3e4] ss:$8 sps:$4 sm:$0xff]  }
 0x456   :  { %v2783_v38 = vpop.f32.mrf.mxu1 }
 0x458   :  { %v2786_v51 = vpop.f32.mrf.mxu1  ;;  %2977 = vmatmul.mubr.bf16.gmra.mxu1 %v14961_v59 }
 0x459   :  { %v18931_v50 = vmax.f32 %v21587_v40, %v2786_v51  ;;  %13360 = vmatprep.mubr.msk.bf16.mxu1 %vm2227_vm2, %v14962_v27  ;;  %v21591_v27 = vmax.f32 %v18709_v49, %v18832_v34 }
 0x45a   :  { %v2788_v28 = vpop.f32.mrf.mxu1 }
 0x45c   :  { %v2789_v17 = vpop.f32.mrf.mxu1 }
 0x45d   :  { %v18940_v37 = vmax.f32 %v21588_v58, %v2789_v17  ;;  %v14971_v17 = vld [vmem:[%s21565_s6 + $0x3f4] ss:$8 sps:$4 sm:$0xff]  }
 0x45e   :  { %v2791_v47 = vpop.f32.mrf.mxu1 }
 0x460   :  { %v2794_v26 = vpop.f32.mrf.mxu1  ;;  %2985 = vmatmul.mubr.bf16.gmra.mxu1 %v14964_v36  ;;  %v21593_v36 = vmax.f32 %v18726_v43, %v18847_v33 }
 0x461   :  { %v18948_v32 = vmax.f32 %v21589_v44, %v2794_v26  ;;  %13361 = vmatprep.mubr.msk.bf16.mxu1 %vm2227_vm2, %v14965_v19  ;;  %v14974_v44 = vld [vmem:[%s21565_s6 + $0x404] ss:$8 sps:$4 sm:$0xff]  }
 0x462   :  { %v2796_v21 = vpop.f32.mrf.mxu1 }
 0x463   :  { %v21595_v21 = vmax.f32 %v18743_v57, %v18862_v54 }
 0x464   :  { %v2797_v46 = vpop.f32.mrf.mxu1 }
 0x465   :  { %v18957_v59 = vmax.f32 %v21590_v16, %v2797_v46 }
 0x466   :  { %v2799_v20 = vpop.f32.mrf.mxu1 }
 0x467   :  { %v14977_v20 = vld [vmem:[%s21565_s6 + $0x414] ss:$8 sps:$4 sm:$0xff]  }
 0x468   :  { %v2802_v35 = vpop.f32.mrf.mxu1  ;;  %2993 = vmatmul.mubr.bf16.gmra.mxu1 %v14967_v23 }
 0x469   :  { %v18965_v38 = vmax.f32 %v21591_v27, %v2802_v35  ;;  %13362 = vmatprep.mubr.msk.bf16.mxu1 %vm2227_vm2, %v14968_v24 }
 0x46a   :  { %v2804_v51 = vpop.f32.mrf.mxu1 }
 0x46c   :  { %v2805_v40 = vpop.f32.mrf.mxu1 }
 0x46d   :  { %v18974_v28 = vmax.f32 %v21592_v41, %v2805_v40  ;;  %v14980_v40 = vld [vmem:[%s21565_s6 + $0x424] ss:$8 sps:$4 sm:$0xff]  }
 0x46e   :  { %v2807_v49 = vpop.f32.mrf.mxu1 }
 0x470   :  { %v2810_v34 = vpop.f32.mrf.mxu1  ;;  %3001 = vmatmul.mubr.bf16.gmra.mxu1 %v14970_v60 }
 0x471   :  { %v18982_v58 = vmax.f32 %v21593_v36, %v2810_v34  ;;  %13363 = vmatprep.mubr.msk.bf16.mxu1 %vm2227_vm2, %v14971_v17  ;;  %v14982_v36 = vld [vmem:[%s21565_s6 + $0x420] ss:$8 sps:$4 sm:$0xff]  }
 0x472   :  { %v2812_v19 = vpop.f32.mrf.mxu1 }
 0x474   :  { %v2813_v47 = vpop.f32.mrf.mxu1 }
 0x475   :  { %v18991_v26 = vmax.f32 %v21594_v22, %v2813_v47  ;;  %v14983_v47 = vld [vmem:[%s21565_s6 + $0x434] ss:$8 sps:$4 sm:$0xff]  }
 0x476   :  { %v2815_v43 = vpop.f32.mrf.mxu1 }
 0x478   :  { %v2818_v33 = vpop.f32.mrf.mxu1  ;;  %3009 = vmatmul.mubr.bf16.gmra.mxu1 %v14973_v39 }
 0x479   :  { %v18999_v46 = vmax.f32 %v21595_v21, %v2818_v33  ;;  %13364 = vmatprep.mubr.msk.bf16.mxu1 %vm2227_vm2, %v14974_v44  ;;  %v14985_v21 = vld [vmem:[%s21565_s6 + $0x430] ss:$8 sps:$4 sm:$0xff]  }
 0x47a   :  { %v2820_v23 = vpop.f32.mrf.mxu1  ;;  %v15003_v44 = vld [vmem:[%s21565_s6 + $0x490] ss:$8 sps:$4 sm:$0xff]  }
 0x47c   :  { %v2821_v16 = vpop.f32.mrf.mxu1 }
 0x47d   :  { %v19008_v24 = vmax.f32 %v21596_v56, %v2821_v16  ;;  %v14986_v16 = vld [vmem:[%s21565_s6 + $0x444] ss:$8 sps:$4 sm:$0xff]  }
 0x47e   :  { %v2823_v57 = vpop.f32.mrf.mxu1 }
 0x480   :  { %v19013_v54 = vpop.f32.mrf.mxu1  ;;  %3017 = vmatmul.mubr.bf16.gmra.mxu1 %v14976_v48 }
 0x481   :  { %v3209_v35 = vmax.f32 %v18880_v42, %v19013_v54  ;;  %13365 = vmatprep.mubr.msk.bf16.mxu1 %vm2227_vm2, %v14977_v20  ;;  %v15000_v20 = vld [vmem:[%s21565_s6 + $0x480] ss:$8 sps:$4 sm:$0xff]  }
 0x482   :  { %v2828_v27 = vpop.f32.mrf.mxu1 }
 0x484   :  { %v19018_v51 = vpop.f32.mrf.mxu1 }
 0x485   :  { %v3210_v52 = vmax.f32 %v18889_v62, %v19018_v51  ;;  %v15006_v62 = vld [vmem:[%s21565_s6 + $0x4a0] ss:$8 sps:$4 sm:$0xff]  }
 0x486   :  { %v2831_v60 = vpop.f32.mrf.mxu1 }
 0x487   :  { %v14989_v60 = vld [vmem:[%s21565_s6 + $0x454] ss:$8 sps:$4 sm:$0xff]  }
 0x488   :  { %v19028_v41 = vpop.f32.mrf.mxu1  ;;  %3025 = vmatmul.mubr.bf16.gmra.mxu1 %v14979_v61  ;;  %v14988_v61 = vld [vmem:[%s21565_s6 + $0x440] ss:$8 sps:$4 sm:$0xff]  }
 0x489   :  { %13366 = vmatprep.mubr.msk.bf16.mxu1 %vm2227_vm2, %v14980_v40 }
 0x48a   :  { %v2836_v49 = vpop.f32.mrf.mxu1 }
 0x48c   :  { %v19033_v34 = vpop.f32.mrf.mxu1 }
 0x48d   :  { %v21598_v51 = vmax.f32 %v18906_v25, %v19033_v34  ;;  %v15009_v25 = vld [vmem:[%s21565_s6 + $0x4b0] ss:$8 sps:$4 sm:$0xff]  }
 0x48e   :  { %v2839_v39 = vpop.f32.mrf.mxu1 }
 0x490   :  { %v19043_v22 = vpop.f32.mrf.mxu1  ;;  %3033 = vmatmul.mubr.bf16.gmra.mxu1 %v14982_v36 }
 0x491   :  { %13367 = vmatprep.mubr.msk.bf16.mxu1 %vm2227_vm2, %v14983_v47  ;;  %v14997_v47 = vld [vmem:[%s21565_s6 + $0x470] ss:$8 sps:$4 sm:$0xff]  }
 0x492   :  { %v2844_v43 = vpop.f32.mrf.mxu1 }
 0x494   :  { %v19048_v33 = vpop.f32.mrf.mxu1 }
 0x495   :  { %v21600_v34 = vmax.f32 %v18923_v63, %v19048_v33  ;;  %v15012_v63 = vld [vmem:[%s21565_s6 + $0x4c0] ss:$8 sps:$4 sm:$0xff]  }
 0x496   :  { %v2847_v48 = vpop.f32.mrf.mxu1 }
 0x497   :  { %v14992_v48 = vld [vmem:[%s21565_s6 + $0x464] ss:$8 sps:$4 sm:$0xff]  }
 0x498   :  { %v19058_v56 = vpop.f32.mrf.mxu1  ;;  %3041 = vmatmul.mubr.bf16.gmra.mxu1 %v14985_v21  ;;  %v14991_v21 = vld [vmem:[%s21565_s6 + $0x450] ss:$8 sps:$4 sm:$0xff]  }
 0x499   :  { %13368 = vmatprep.mubr.msk.bf16.mxu1 %vm2227_vm2, %v14986_v16  ;;  %v14994_v16 = vld [vmem:[%s21565_s6 + $0x460] ss:$8 sps:$4 sm:$0xff]  }
 0x49a   :  { %v2852_v57 = vpop.f32.mrf.mxu1 }
 0x49c   :  { %v19063_v27 = vpop.f32.mrf.mxu1 }
 0x49d   :  { %v21602_v33 = vmax.f32 %v18940_v37, %v19063_v27  ;;  %v15015_v37 = vld [vmem:[%s21565_s6 + $0x4d0] ss:$8 sps:$4 sm:$0xff]  }
 0x49e   :  { %v2855_v49 = vpop.f32.mrf.mxu1 }
 0x4a0   :  { %v19073_v36 = vpop.f32.mrf.mxu1  ;;  %3049 = vmatmul.mubr.bf16.gmra.mxu1 %v14988_v61 }
 0x4a1   :  { %13369 = vmatprep.mubr.msk.bf16.mxu1 %vm2227_vm2, %v14989_v60 }
 0x4a2   :  { %v2860_v39 = vpop.f32.mrf.mxu1 }
 0x4a4   :  { %v19078_v43 = vpop.f32.mrf.mxu1 }
 0x4a5   :  { %v21604_v27 = vmax.f32 %v18957_v59, %v19078_v43  ;;  %v15018_v59 = vld [vmem:[%s21565_s6 + $0x4e0] ss:$8 sps:$4 sm:$0xff]  }
 0x4a6   :  { %v2863_v57 = vpop.f32.mrf.mxu1 }
 0x4a7   :  { %v14995_v57 = vld [vmem:[%s21565_s6 + $0x474] ss:$8 sps:$4 sm:$0xff]  }
 0x4a8   :  { %v19088_v61 = vpop.f32.mrf.mxu1  ;;  %3057 = vmatmul.mubr.bf16.gmra.mxu1 %v14991_v21 }
 0x4a9   :  { %13370 = vmatprep.mubr.msk.bf16.mxu1 %vm2227_vm2, %v14992_v48 }
 0x4aa   :  { %v2868_v49 = vpop.f32.mrf.mxu1 }
 0x4ac   :  { %v19093_v39 = vpop.f32.mrf.mxu1 }
 0x4ad   :  { %v21606_v43 = vmax.f32 %v18974_v28, %v19093_v39  ;;  %v15021_v28 = vld [vmem:[%s21565_s6 + $0x4f0] ss:$8 sps:$4 sm:$0xff]  }
 0x4ae   :  { %v2871_v21 = vpop.f32.mrf.mxu1 }
 0x4af   :  { %v14998_v21 = vld [vmem:[%s21565_s6 + $0x484] ss:$8 sps:$4 sm:$0xff]  }
 0x4b0   :  { %v19103_v40 = vpop.f32.mrf.mxu1  ;;  %3065 = vmatmul.mubr.bf16.gmra.mxu1 %v14994_v16 }
 0x4b1   :  { %13371 = vmatprep.mubr.msk.bf16.mxu1 %vm2227_vm2, %v14995_v57 }
 0x4b2   :  { %v2876_v49 = vpop.f32.mrf.mxu1 }
 0x4b4   :  { %v19108_v60 = vpop.f32.mrf.mxu1 }
 0x4b5   :  { %v21608_v39 = vmax.f32 %v18991_v26, %v19108_v60 }
 0x4b6   :  { %v2879_v16 = vpop.f32.mrf.mxu1 }
 0x4b7   :  { %v15001_v16 = vld [vmem:[%s21565_s6 + $0x494] ss:$8 sps:$4 sm:$0xff]  }
 0x4b8   :  { %v19118_v23 = vpop.f32.mrf.mxu1  ;;  %3073 = vmatmul.mubr.bf16.gmra.mxu1 %v14997_v47 }
 0x4b9   :  { %13372 = vmatprep.mubr.msk.bf16.mxu1 %vm2227_vm2, %v14998_v21 }
 0x4ba   :  { %v2884_v49 = vpop.f32.mrf.mxu1 }
 0x4bc   :  { %v19123_v48 = vpop.f32.mrf.mxu1 }
 0x4be   :  { %v2887_v47 = vpop.f32.mrf.mxu1 }
 0x4c0   :  { %v2890_v19 = vpop.f32.mrf.mxu1  ;;  %3081 = vmatmul.mubr.bf16.gmra.mxu1 %v15000_v20  ;;  %v15004_v20 = vld [vmem:[%s21565_s6 + $0x4a4] ss:$8 sps:$4 sm:$0xff]  }
 0x4c1   :  { %v19136_v21 = vmax.f32 %v3209_v35, %v2890_v19  ;;  %13373 = vmatprep.mubr.msk.bf16.mxu1 %vm2227_vm2, %v15001_v16  ;;  %v21597_v35 = vmax.f32 %v18897_v45, %v19028_v41 }
 0x4c2   :  { %v2892_v49 = vpop.f32.mrf.mxu1 }
 0x4c4   :  { %v2893_v57 = vpop.f32.mrf.mxu1 }
 0x4c5   :  { %v19145_v17 = vmax.f32 %v3210_v52, %v2893_v57  ;;  %v21599_v57 = vmax.f32 %v18914_v53, %v19043_v22 }
 0x4c6   :  { %v2895_v42 = vpop.f32.mrf.mxu1 }
 0x4c8   :  { %v2898_v54 = vpop.f32.mrf.mxu1  ;;  %3089 = vmatmul.mubr.bf16.gmra.mxu1 %v15003_v44  ;;  %v15007_v44 = vld [vmem:[%s21565_s6 + $0x4b4] ss:$8 sps:$4 sm:$0xff]  }
 0x4c9   :  { %v19153_v19 = vmax.f32 %v21597_v35, %v2898_v54  ;;  %13374 = vmatprep.mubr.msk.bf16.mxu1 %vm2227_vm2, %v15004_v20  ;;  %v15010_v35 = vld [vmem:[%s21565_s6 + $0x4c4] ss:$8 sps:$4 sm:$0xff]  }
 0x4ca   :  { %v2900_v16 = vpop.f32.mrf.mxu1 }
 0x4cb   :  { %v21601_v16 = vmax.f32 %v18931_v50, %v19058_v56 }
 0x4cc   :  { %v2901_v47 = vpop.f32.mrf.mxu1 }
 0x4cd   :  { %v19162_v52 = vmax.f32 %v21598_v51, %v2901_v47 }
 0x4ce   :  { %v2903_v45 = vpop.f32.mrf.mxu1 }
 0x4cf   :  { %v15013_v45 = vld [vmem:[%s21565_s6 + $0x4d4] ss:$8 sps:$4 sm:$0xff]  }
 0x4d0   :  { %v2906_v41 = vpop.f32.mrf.mxu1  ;;  %3097 = vmatmul.mubr.bf16.gmra.mxu1 %v15006_v62 }
 0x4d1   :  { %v19170_v49 = vmax.f32 %v21599_v57, %v2906_v41  ;;  %13375 = vmatprep.mubr.msk.bf16.mxu1 %vm2227_vm2, %v15007_v44  ;;  %v21603_v41 = vmax.f32 %v18948_v32, %v19073_v36 }
 0x4d2   :  { %v2908_v20 = vpop.f32.mrf.mxu1 }
 0x4d4   :  { %v2909_v42 = vpop.f32.mrf.mxu1 }
 0x4d5   :  { %v19179_v54 = vmax.f32 %v21600_v34, %v2909_v42  ;;  %v15016_v34 = vld [vmem:[%s21565_s6 + $0x4e4] ss:$8 sps:$4 sm:$0xff]  }
 0x4d6   :  { %v2911_v53 = vpop.f32.mrf.mxu1 }
 0x4d8   :  { %v2914_v22 = vpop.f32.mrf.mxu1  ;;  %3105 = vmatmul.mubr.bf16.gmra.mxu1 %v15009_v25 }
 0x4d9   :  { %v19187_v47 = vmax.f32 %v21601_v16, %v2914_v22  ;;  %13376 = vmatprep.mubr.msk.bf16.mxu1 %vm2227_vm2, %v15010_v35  ;;  %v21605_v35 = vmax.f32 %v18965_v38, %v19088_v61 }
 0x4da   :  { %v2916_v62 = vpop.f32.mrf.mxu1 }
 0x4dc   :  { %v2917_v51 = vpop.f32.mrf.mxu1 }
 0x4dd   :  { %v19196_v44 = vmax.f32 %v21602_v33, %v2917_v51  ;;  %v15019_v51 = vld [vmem:[%s21565_s6 + $0x4f4] ss:$8 sps:$4 sm:$0xff]   ;;  %s16334_s6 = smov [#allocation7]  }
 0x4de   :  { %v2919_v50 = vpop.f32.mrf.mxu1  ;;  %s923_s22 = sshll.u32 %s16334_s6, 4  ;;  %s924_s22 = int_to_ptr.vmem [resolvable:$true] %s923_s22 }
 0x4e0   :  { %v2922_v56 = vpop.f32.mrf.mxu1  ;;  %3113 = vmatmul.mubr.bf16.gmra.mxu1 %v15012_v63  ;;  %v21607_v63 = vmax.f32 %v18982_v58, %v19103_v40  ;;  %v21609_v58 = vmax.f32 %v18999_v46, %v19118_v23 }
 0x4e1   :  { %v19204_v57 = vmax.f32 %v21603_v41, %v2922_v56  ;;  %13377 = vmatprep.mubr.msk.bf16.mxu1 %vm2227_vm2, %v15013_v45 }
 0x4e2   :  { %v2924_v20 = vpop.f32.mrf.mxu1 }
 0x4e4   :  { %v2925_v42 = vpop.f32.mrf.mxu1 }
 0x4e5   :  { %v19213_v25 = vmax.f32 %v21604_v27, %v2925_v42  ;;  %v21610_v27 = vmax.f32 %v19008_v24, %v19123_v48 }
 0x4e6   :  { %v2927_v32 = vpop.f32.mrf.mxu1 }
 0x4e8   :  { %v2930_v36 = vpop.f32.mrf.mxu1  ;;  %3121 = vmatmul.mubr.bf16.gmra.mxu1 %v15015_v37 }
 0x4e9   :  { %v19221_v53 = vmax.f32 %v21605_v35, %v2930_v36  ;;  %13378 = vmatprep.mubr.msk.bf16.mxu1 %vm2227_vm2, %v15016_v34 }
 0x4ea   :  { %v2932_v22 = vpop.f32.mrf.mxu1 }
 0x4ec   :  { %v2933_v16 = vpop.f32.mrf.mxu1 }
 0x4ed   :  { %v19230_v62 = vmax.f32 %v21606_v43, %v2933_v16 }
 0x4ee   :  { %v2935_v38 = vpop.f32.mrf.mxu1 }
 0x4f0   :  { %v2938_v61 = vpop.f32.mrf.mxu1  ;;  %3129 = vmatmul.mubr.bf16.gmra.mxu1 %v15018_v59 }
 0x4f1   :  { %v19238_v33 = vmax.f32 %v21607_v63, %v2938_v61  ;;  %13379 = vmatprep.mubr.msk.bf16.mxu1 %vm2227_vm2, %v15019_v51 }
 0x4f2   :  { %v2940_v45 = vpop.f32.mrf.mxu1 }
 0x4f4   :  { %v2941_v50 = vpop.f32.mrf.mxu1 }
 0x4f5   :  { %v19247_v56 = vmax.f32 %v21608_v39, %v2941_v50 }
 0x4f6   :  { %v2943_v41 = vpop.f32.mrf.mxu1 }
 0x4f8   :  { %v2946_v20 = vpop.f32.mrf.mxu1  ;;  %3137 = vmatmul.mubr.bf16.gmra.mxu1 %v15021_v28 }
 0x4f9   :  { %v19252_v40 = vmax.f32 %v21609_v58, %v2946_v20 }
 0x4fa   :  { %v2948_v42 = vpop.f32.mrf.mxu1 }
 0x4fc   :  { %v2949_v37 = vpop.f32.mrf.mxu1 }
 0x4fd   :  { %v19257_v34 = vmax.f32 %v21610_v27, %v2949_v37 }
 0x4fe   :  { %v2951_v32 = vpop.f32.mrf.mxu1 }
 0x500   :  { %v2954_v36 = vpop.f32.mrf.mxu1 }
 0x501   :  { %v3241_v26 = vmax.f32 %v19136_v21, %v2954_v36 }
 0x502   :  { %v2956_v60 = vpop.f32.mrf.mxu1 }
 0x504   :  { %v2957_v35 = vpop.f32.mrf.mxu1 }
 0x505   :  { %v3242_v22 = vmax.f32 %v19145_v17, %v2957_v35 }
 0x506   :  { %v2959_v16 = vpop.f32.mrf.mxu1 }
 0x508   :  { %v2962_v59 = vpop.f32.mrf.mxu1 }
 0x509   :  { %v3243_v46 = vmax.f32 %v19153_v19, %v2962_v59 }
 0x50a   :  { %v2964_v23 = vpop.f32.mrf.mxu1 }
 0x50c   :  { %v2965_v43 = vpop.f32.mrf.mxu1 }
 0x50d   :  { %v3244_v51 = vmax.f32 %v19162_v52, %v2965_v43 }
 0x50e   :  { %v2967_v38 = vpop.f32.mrf.mxu1 }
 0x510   :  { %v2970_v24 = vpop.f32.mrf.mxu1 }
 0x511   :  { %v3245_v48 = vmax.f32 %v19170_v49, %v2970_v24 }
 0x512   :  { %v2972_v61 = vpop.f32.mrf.mxu1 }
 0x514   :  { %v2973_v63 = vpop.f32.mrf.mxu1 }
 0x515   :  { %v3246_v21 = vmax.f32 %v19179_v54, %v2973_v63 }
 0x516   :  { %v2975_v45 = vpop.f32.mrf.mxu1 }
 0x518   :  { %v2978_v50 = vpop.f32.mrf.mxu1 }
 0x519   :  { %v3247_v17 = vmax.f32 %v19187_v47, %v2978_v50 }
 0x51a   :  { %v2980_v28 = vpop.f32.mrf.mxu1 }
 0x51c   :  { %v2981_v39 = vpop.f32.mrf.mxu1 }
 0x51d   :  { %v3248_v19 = vmax.f32 %v19196_v44, %v2981_v39 }
 0x51e   :  { %v2983_v41 = vpop.f32.mrf.mxu1 }
 0x520   :  { %v2986_v20 = vpop.f32.mrf.mxu1 }
 0x521   :  { %v3249_v52 = vmax.f32 %v19204_v57, %v2986_v20 }
 0x522   :  { %v2988_v58 = vpop.f32.mrf.mxu1 }
 0x524   :  { %v2989_v42 = vpop.f32.mrf.mxu1 }
 0x525   :  { %v3250_v49 = vmax.f32 %v19213_v25, %v2989_v42 }
 0x526   :  { %v2991_v37 = vpop.f32.mrf.mxu1 }
 0x528   :  { %v2994_v27 = vpop.f32.mrf.mxu1 }
 0x529   :  { %v3251_v54 = vmax.f32 %v19221_v53, %v2994_v27 }
 0x52a   :  { %v2996_v32 = vpop.f32.mrf.mxu1 }
 0x52c   :  { %v2997_v36 = vpop.f32.mrf.mxu1 }
 0x52d   :  { %v3252_v47 = vmax.f32 %v19230_v62, %v2997_v36 }
 0x52e   :  { %v2999_v60 = vpop.f32.mrf.mxu1 }
 0x530   :  { %v3002_v35 = vpop.f32.mrf.mxu1 }
 0x531   :  { %v3253_v44 = vmax.f32 %v19238_v33, %v3002_v35 }
 0x532   :  { %v3004_v16 = vpop.f32.mrf.mxu1 }
 0x534   :  { %v3005_v59 = vpop.f32.mrf.mxu1 }
 0x535   :  { %v3254_v57 = vmax.f32 %v19247_v56, %v3005_v59 }
 0x536   :  { %v3007_v23 = vpop.f32.mrf.mxu1 }
 0x538   :  { %v3010_v43 = vpop.f32.mrf.mxu1 }
 0x539   :  { %v3255_v25 = vmax.f32 %v19252_v40, %v3010_v43 }
 0x53a   :  { %v3012_v38 = vpop.f32.mrf.mxu1 }
 0x53c   :  { %v19274_v24 = vpop.f32.mrf.mxu1 }
 0x53d   :  { %v3256_v53 = vmax.f32 %v19257_v34, %v19274_v24  ;;  %v15023_v34 = vld [vmem:[#allocation20 + $0x8] sm:$0xff]   ;;  %v15024_v24 = vld [vmem:[#allocation20 + $0x10] sm:$0xff]  }
 0x53e   :  { %v3015_v61 = vpop.f32.mrf.mxu1 }
 0x540   :  { %v3018_v62 = vpop.f32.mrf.mxu1 }
 0x541   :  { %v3257_v63 = vmax.f32 %v3241_v26, %v3018_v62 }
 0x542   :  { %v3020_v45 = vpop.f32.mrf.mxu1 }
 0x544   :  { %v3021_v50 = vpop.f32.mrf.mxu1 }
 0x545   :  { %v3258_v33 = vmax.f32 %v3242_v22, %v3021_v50  ;;  %v15022_v22 = vld [vmem:[#allocation20] sm:$0xff]  }
 0x546   :  { %v3023_v28 = vpop.f32.mrf.mxu1  ;;  %14553 = vmatprep.mubr.bf16.mxu0 %v15022_v22 }
 0x548   :  { %v3026_v39 = vpop.f32.mrf.mxu1 }
 0x549   :  { %v3259_v41 = vmax.f32 %v3243_v46, %v3026_v39 }
 0x54a   :  { %v3028_v56 = vpop.f32.mrf.mxu1 }
 0x54c   :  { %v3029_v20 = vpop.f32.mrf.mxu1 }
 0x54d   :  { %v3260_v58 = vmax.f32 %v3244_v51, %v3029_v20 }
 0x54e   :  { %v3031_v42 = vpop.f32.mrf.mxu1 }
 0x550   :  { %v3034_v40 = vpop.f32.mrf.mxu1 }
 0x551   :  { %v3261_v37 = vmax.f32 %v3245_v48, %v3034_v40 }
 0x552   :  { %v3036_v27 = vpop.f32.mrf.mxu1 }
 0x554   :  { %v3037_v32 = vpop.f32.mrf.mxu1 }
 0x555   :  { %v3262_v36 = vmax.f32 %v3246_v21, %v3037_v32 }
 0x556   :  { %v3039_v60 = vpop.f32.mrf.mxu1 }
 0x558   :  { %v3042_v35 = vpop.f32.mrf.mxu1 }
 0x559   :  { %v3263_v16 = vmax.f32 %v3247_v17, %v3042_v35 }
 0x55a   :  { %v3044_v59 = vpop.f32.mrf.mxu1 }
 0x55c   :  { %v3045_v26 = vpop.f32.mrf.mxu1 }
 0x55d   :  { %v3264_v23 = vmax.f32 %v3248_v19, %v3045_v26 }
 0x55e   :  { %v3047_v43 = vpop.f32.mrf.mxu1 }
 0x560   :  { %v3050_v38 = vpop.f32.mrf.mxu1 }
 0x561   :  { %v3265_v46 = vmax.f32 %v3249_v52, %v3050_v38 }
 0x562   :  { %v3052_v61 = vpop.f32.mrf.mxu1 }
 0x564   :  { %v3053_v62 = vpop.f32.mrf.mxu1 }
 0x565   :  { %v3266_v51 = vmax.f32 %v3250_v49, %v3053_v62 }
 0x566   :  { %v3055_v45 = vpop.f32.mrf.mxu1 }
 0x568   :  { %v3058_v50 = vpop.f32.mrf.mxu1 }
 0x569   :  { %v3267_v48 = vmax.f32 %v3251_v54, %v3058_v50 }
 0x56a   :  { %v3060_v28 = vpop.f32.mrf.mxu1 }
 0x56c   :  { %v3061_v39 = vpop.f32.mrf.mxu1 }
 0x56d   :  { %v3268_v21 = vmax.f32 %v3252_v47, %v3061_v39 }
 0x56e   :  { %v3063_v56 = vpop.f32.mrf.mxu1 }
 0x570   :  { %v3066_v20 = vpop.f32.mrf.mxu1 }
 0x571   :  { %v3269_v17 = vmax.f32 %v3253_v44, %v3066_v20 }
 0x572   :  { %v3068_v42 = vpop.f32.mrf.mxu1 }
 0x574   :  { %v3069_v40 = vpop.f32.mrf.mxu1 }
 0x575   :  { %v3270_v19 = vmax.f32 %v3254_v57, %v3069_v40 }
 0x576   :  { %v3071_v27 = vpop.f32.mrf.mxu1 }
 0x578   :  { %v3074_v32 = vpop.f32.mrf.mxu1 }
 0x579   :  { %v3271_v60 = vmax.f32 %v3255_v25, %v3074_v32 }
 0x57a   :  { %v3076_v35 = vpop.f32.mrf.mxu1 }
 0x57c   :  { %v3077_v52 = vpop.f32.mrf.mxu1 }
 0x57e   :  { %v3079_v59 = vpop.f32.mrf.mxu1 }
 0x580   :  { %v3082_v26 = vpop.f32.mrf.mxu1 }
 0x581   :  { %v3273_v49 = vmax.f32 %v3257_v63, %v3082_v26 }
 0x582   :  { %v3084_v43 = vpop.f32.mrf.mxu1 }
 0x584   :  { %v3085_v22 = vpop.f32.mrf.mxu1 }
 0x585   :  { %v3274_v54 = vmax.f32 %v3258_v33, %v3085_v22 }
 0x586   :  { %v3087_v38 = vpop.f32.mrf.mxu1 }
 0x587   :  { %v19278_v61 = vpack.c.bf16 %v3274_v54, %v3273_v49 }
 0x588   :  { %v3090_v47 = vpop.f32.mrf.mxu1 }
 0x589   :  { %v3275_v62 = vmax.f32 %v3259_v41, %v3090_v47 }
 0x58a   :  { %v3092_v44 = vpop.f32.mrf.mxu1 }
 0x58c   :  { %v3093_v45 = vpop.f32.mrf.mxu1 }
 0x58d   :  { %v3276_v50 = vmax.f32 %v3260_v58, %v3093_v45 }
 0x58e   :  { %v3095_v57 = vpop.f32.mrf.mxu1 }
 0x58f   :  { %v3290_v28 = vpack.c.bf16 %v3276_v50, %v3275_v62 }
 0x590   :  { %v3098_v39 = vpop.f32.mrf.mxu1 }
 0x591   :  { %v3277_v20 = vmax.f32 %v3261_v37, %v3098_v39 }
 0x592   :  { %v3100_v25 = vpop.f32.mrf.mxu1 }
 0x594   :  { %v3101_v56 = vpop.f32.mrf.mxu1 }
 0x595   :  { %v3278_v42 = vmax.f32 %v3262_v36, %v3101_v56 }
 0x596   :  { %v3103_v40 = vpop.f32.mrf.mxu1 }
 0x597   :  { %v3291_v63 = vpack.c.bf16 %v3278_v42, %v3277_v20 }
 0x598   :  { %v3106_v27 = vpop.f32.mrf.mxu1 }
 0x599   :  { %v3279_v35 = vmax.f32 %v3263_v16, %v3106_v27 }
 0x59a   :  { %v3108_v32 = vpop.f32.mrf.mxu1 }
 0x59c   :  { %v3109_v33 = vpop.f32.mrf.mxu1 }
 0x59d   :  { %v3280_v59 = vmax.f32 %v3264_v23, %v3109_v33 }
 0x59e   :  { %v3111_v26 = vpop.f32.mrf.mxu1 }
 0x59f   :  { %v3292_v49 = vpack.c.bf16 %v3280_v59, %v3279_v35  ;;  %v15032_v35 = vld [vmem:[#allocation20 + $0x50] sm:$0xff]   ;;  %v15034_v59 = vld [vmem:[%s21611_s12 + $0x28] sm:$0xff]   ;;  %v15035_v26 = vld [vmem:[%s21611_s12 + $0x20] sm:$0xff]  }
 0x5a0   :  { %v3114_v41 = vpop.f32.mrf.mxu1 }
 0x5a1   :  { %v3281_v58 = vmax.f32 %v3265_v46, %v3114_v41  ;;  %v3272_v46 = vmax.f32 %v3256_v53, %v3077_v52  ;;  %v15025_v53 = vld [vmem:[#allocation20 + $0x18] sm:$0xff]   ;;  %v15037_v41 = vld [vmem:[%s21611_s12 + $0x10] sm:$0xff]  }
 0x5a2   :  { %v3116_v43 = vpop.f32.mrf.mxu1  ;;  %v15029_v52 = vld [vmem:[#allocation20 + $0x38] sm:$0xff]  }
 0x5a4   :  { %v3117_v22 = vpop.f32.mrf.mxu1 }
 0x5a5   :  { %v3282_v54 = vmax.f32 %v3266_v51, %v3117_v22 }
 0x5a6   :  { %v3119_v38 = vpop.f32.mrf.mxu1 }
 0x5a7   :  { %v3293_v47 = vpack.c.bf16 %v3282_v54, %v3281_v58 }
 0x5a8   :  { %v3122_v62 = vpop.f32.mrf.mxu1 }
 0x5a9   :  { %v3283_v36 = vmax.f32 %v3267_v48, %v3122_v62 }
 0x5aa   :  { %v3124_v44 = vpop.f32.mrf.mxu1 }
 0x5ac   :  { %v3125_v37 = vpop.f32.mrf.mxu1 }
 0x5ad   :  { %v3284_v45 = vmax.f32 %v3268_v21, %v3125_v37 }
 0x5ae   :  { %v3127_v50 = vpop.f32.mrf.mxu1 }
 0x5af   :  { %v3294_v57 = vpack.c.bf16 %v3284_v45, %v3283_v36 }
 0x5b0   :  { %v3130_v39 = vpop.f32.mrf.mxu1 }
 0x5b1   :  { %v3285_v23 = vmax.f32 %v3269_v17, %v3130_v39  ;;  %v15026_v17 = vld [vmem:[#allocation20 + $0x20] sm:$0xff]   ;;  %v15038_v39 = vld [vmem:[%s21611_s12 + $0x8] sm:$0xff]  }
 0x5b2   :  { %v3132_v25 = vpop.f32.mrf.mxu1 }
 0x5b4   :  { %v3133_v16 = vpop.f32.mrf.mxu1 }
 0x5b5   :  { %v3286_v56 = vmax.f32 %v3270_v19, %v3133_v16  ;;  %v15027_v19 = vld [vmem:[#allocation20 + $0x28] sm:$0xff]  }
 0x5b6   :  { %v3135_v20 = vpop.f32.mrf.mxu1 }
 0x5b7   :  { %v3295_v42 = vpack.c.bf16 %v3286_v56, %v3285_v23  ;;  %v15039_v23 = vld [vmem:[%s21611_s12] sm:$0xff]  }
 0x5b8   :  { %v3138_v40 = vpop.f32.mrf.mxu1 }
 0x5b9   :  { %v3287_v32 = vmax.f32 %v3271_v60, %v3138_v40  ;;  %v15028_v60 = vld [vmem:[#allocation20 + $0x30] sm:$0xff]  }
 0x5ba   :  { %v3140_v27 = vpop.f32.mrf.mxu1 }
 0x5bc   :  { %v3141_v51 = vpop.f32.mrf.mxu1 }
 0x5bd   :  { %v3288_v33 = vmax.f32 %v3272_v46, %v3141_v51 }
 0x5be   :  { %v3143_v48 = vpop.f32.mrf.mxu1 }
 0x5bf   :  { %v3296_v21 = vpack.c.bf16 %v3288_v33, %v3287_v32 }
 0x5c1   :  { %14537 = vmatprep.subr.bf16.mxu0 %v3296_v21 }
 0x5c2   :  { %14538 = vmatpush3.bf16.msra.mxu0 %v3296_v21 }
 0x5c3   :  { %14539 = vmatprep.subr.bf16.mxu0 %v3295_v42 }
 0x5c6   :  { %14540 = vmatpush3.bf16.msra.mxu0 %v3295_v42 }
 0x5c7   :  { %14541 = vmatprep.subr.bf16.mxu0 %v3294_v57 }
 0x5ca   :  { %14542 = vmatpush3.bf16.msra.mxu0 %v3294_v57 }
 0x5cb   :  { %14543 = vmatprep.subr.bf16.mxu0 %v3293_v47 }
 0x5ce   :  { %14544 = vmatpush3.bf16.msra.mxu0 %v3293_v47 }
 0x5cf   :  { %14545 = vmatprep.subr.bf16.mxu0 %v3292_v49 }
 0x5d2   :  { %14546 = vmatpush3.bf16.msra.mxu0 %v3292_v49  ;;  %v15036_v49 = vld [vmem:[%s21611_s12 + $0x18] sm:$0xff]  }
 0x5d3   :  { %14547 = vmatprep.subr.bf16.mxu0 %v3291_v63 }
 0x5d6   :  { %14548 = vmatpush3.bf16.msra.mxu0 %v3291_v63  ;;  %v15030_v63 = vld [vmem:[#allocation20 + $0x40] sm:$0xff]  }
 0x5d7   :  { %14549 = vmatprep.subr.bf16.mxu0 %v3290_v28 }
 0x5da   :  { %14550 = vmatpush3.bf16.msra.mxu0 %v3290_v28  ;;  %v15031_v28 = vld [vmem:[#allocation20 + $0x48] sm:$0xff]  }
 0x5db   :  { %14551 = vmatprep.subr.bf16.mxu0 %v19278_v61 }
 0x5de   :  { %14552 = vmatpush3.bf16.msra.mxu0 %v19278_v61  ;;  %v15033_v61 = vld [vmem:[#allocation20 + $0x58] sm:$0xff]  }
 0x5df   :  { %14577 = vmatprep.subr.bf16.mxu0 %v15034_v59 }
 0x5e1   :  { %14554 = vmatmul.mubr.bf16.vlgmr.msra.gmra.mxu0 %v15023_v34 }
 0x5e2   :  { %14557 = vmatprep.mubr.bf16.mxu0 %v15024_v24  ;;  %14578 = vmatpush3.bf16.msra.mxu0 %v15034_v59 }
 0x5e3   :  { %14579 = vmatprep.subr.bf16.mxu0 %v15035_v26 }
 0x5e6   :  { %14580 = vmatpush3.bf16.msra.mxu0 %v15035_v26 }
 0x5e7   :  { %14581 = vmatprep.subr.bf16.mxu0 %v15036_v49 }
 0x5e9   :  { %14558 = vmatmul.mubr.bf16.gmra.mxu0 %v15025_v53 }
 0x5ea   :  { %14561 = vmatprep.mubr.bf16.mxu0 %v15026_v17  ;;  %14582 = vmatpush3.bf16.msra.mxu0 %v15036_v49  ;;  %v14361_v49 = vld [vmem:[%s21612_s30 + $0x8] sm:$0xff]  }
 0x5eb   :  { %14583 = vmatprep.subr.bf16.mxu0 %v15037_v41 }
 0x5ee   :  { %14584 = vmatpush3.bf16.msra.mxu0 %v15037_v41 }
 0x5ef   :  { %14585 = vmatprep.subr.bf16.mxu0 %v15038_v39 }
 0x5f1   :  { %14562 = vmatmul.mubr.bf16.gmra.mxu0 %v15027_v19  ;;  %v14334_v19 = vld [vmem:[%s21612_s30] sm:$0xff]  }
 0x5f2   :  { %14565 = vmatprep.mubr.bf16.mxu0 %v15028_v60  ;;  %14586 = vmatpush3.bf16.msra.mxu0 %v15038_v39  ;;  %v21258_v60 = vmov 1   ;;  %v14340_v39 = vunpack.c.h.bf16 %v14361_v49 }
 0x5f3   :  { %14587 = vmatprep.subr.bf16.mxu0 %v15039_v23  ;;  %14708 = vset.pattern.permute.xlu1 %v21258_v60 }
 0x5f6   :  { %14588 = vmatpush3.bf16.msra.mxu0 %v15039_v23 }
 0x5f7   :  { %4119 = vmatprep.subr.bf16.mxu0 %v21567_v55 }
 0x5f9   :  { %14566 = vmatmul.mubr.bf16.gmra.mxu0 %v15029_v52 }
 0x5fa   :  { %14569 = vmatprep.mubr.bf16.mxu0 %v15030_v63 }
 0x601   :  { %14570 = vmatmul.mubr.bf16.gmra.mxu0 %v15031_v28  ;;  %v14335_v28 = vunpack.c.l.bf16 %v14334_v19 }
 0x602   :  { %14573 = vmatprep.mubr.bf16.mxu0 %v15032_v35  ;;  %v14336_v35 = vunpack.c.h.bf16 %v14334_v19 }
 0x604   :  { %v14703_v41 = vpack.i.bf16 %v14336_v35, %v14335_v28 }
 0x609   :  { %14574 = vmatmul.mubr.bf16.gmra.mxu0 %v15033_v61 }
 0x6a1   :  { %v19297_v43 = vpop.f32.mrf.mxu0 }
 0x6a3   :  { %v19299_v22 = vpop.f32.mrf.mxu0 }
 0x6a5   :  { %v19301_v58 = vpop.f32.mrf.mxu0 }
 0x6a6   :  { %v3577_v54 = vpack.c.bf16 %v19301_v58, %v19297_v43 }
 0x6a7   :  { %v19305_v38 = vpop.f32.mrf.mxu0 }
 0x6a8   :  { %v3576_v47 = vpack.c.bf16 %v19305_v38, %v19299_v22 }
 0x6a9   :  { %v19309_v62 = vpop.f32.mrf.mxu0 }
 0x6ab   :  { %v19311_v44 = vpop.f32.mrf.mxu0 }
 0x6ad   :  { %v19313_v37 = vpop.f32.mrf.mxu0 }
 0x6ae   :  { %v3579_v36 = vpack.c.bf16 %v19313_v37, %v19309_v62  ;;  %v15042_v62 = vld [vmem:[%s21613_s0 + $0x28] sm:$0xff]   ;;  %v15043_v37 = vld [vmem:[%s21613_s0 + $0x20] sm:$0xff]  }
 0x6af   :  { %v19317_v45 = vpop.f32.mrf.mxu0 }
 0x6b0   :  { %v3578_v50 = vpack.c.bf16 %v19317_v45, %v19311_v44  ;;  %v15040_v44 = vld [vmem:[%s21613_s0 + $0x38] sm:$0xff]   ;;  %v15041_v45 = vld [vmem:[%s21613_s0 + $0x30] sm:$0xff]  }
 0x6b1   :  { %v14563_v57 = vpop.f32.mrf.mxu0 }
 0x6b3   :  { %v3513_v25 = vpop.f32.mrf.mxu0 }
 0x6b5   :  { %v14564_v16 = vpop.f32.mrf.mxu0 }
 0x6b6   :  { %v19331_v27 = vpack.c.bf16 %v14564_v16, %v14563_v57  ;;  %v14339_v57 = vunpack.c.l.bf16 %v14361_v49  ;;  %v14362_v16 = vld [vmem:[%s21612_s30 + $0x10] sm:$0xff]   ;;  %v15048_v49 = vld [vmem:[%s21613_s0 + $0x58] sm:$0xff]  }
 0x6b7   :  { %v3516_v56 = vpop.f32.mrf.mxu0 }
 0x6b8   :  { %v19327_v20 = vpack.c.bf16 %v3516_v56, %v3513_v25  ;;  %v14721_v23 = vpack.i.bf16 %v14340_v39, %v14339_v57  ;;  %v14343_v56 = vunpack.c.l.bf16 %v14362_v16  ;;  %v15049_v39 = vld [vmem:[%s21613_s0 + $0x50] sm:$0xff]  }
 0x6b9   :  { %v14567_v42 = vpop.f32.mrf.mxu0 }
 0x6ba   :  { %3592 = vrot.lane.b32.xlu0 %v19327_v20, %s16331_s11 }
 0x6bb   :  { %v3529_v40 = vpop.f32.mrf.mxu0 }
 0x6bd   :  { %v14568_v46 = vpop.f32.mrf.mxu0 }
 0x6be   :  { %3594 = vrot.lane.b32.xlu0 %v19331_v27, %s16331_s11  ;;  %v19343_v59 = vpack.c.bf16 %v14568_v46, %v14567_v42  ;;  %v14344_v42 = vunpack.c.h.bf16 %v14362_v16 }
 0x6bf   :  { %v3532_v51 = vpop.f32.mrf.mxu0 }
 0x6c0   :  { %v19334_v32 = vpack.c.bf16 %v3532_v51, %v3529_v40  ;;  %v14363_v40 = vld [vmem:[%s21612_s30 + $0x18] sm:$0xff]   ;;  %v19358_v46 = vpack.i.bf16 %v14344_v42, %v14343_v56  ;;  %v15050_v56 = vld [vmem:[%s21613_s0 + $0x48] sm:$0xff]  }
 0x6c1   :  { %v14571_v33 = vpop.f32.mrf.mxu0  ;;  %v14347_v51 = vunpack.c.l.bf16 %v14363_v40 }
 0x6c2   :  { %3596 = vrot.lane.b32.xlu0 %v19334_v32, %s16331_s11 }
 0x6c3   :  { %v3545_v48 = vpop.f32.mrf.mxu0 }
 0x6c5   :  { %v14572_v21 = vpop.f32.mrf.mxu0 }
 0x6c6   :  { %v3585_v52 = vpack.c.bf16 %v14572_v21, %v14571_v33  ;;  %v14348_v33 = vunpack.c.h.bf16 %v14363_v40 }
 0x6c7   :  { %v3548_v34 = vpop.f32.mrf.mxu0 }
 0x6c8   :  { %v3584_v24 = vpack.c.bf16 %v3548_v34, %v3545_v48  ;;  %v19362_v48 = vpack.i.bf16 %v14348_v33, %v14347_v51 }
 0x6c9   :  { %v14575_v53 = vpop.f32.mrf.mxu0 }
 0x6ca   :  { %3604 = vrot.lane.b32.xlu1 %v3584_v24, %s16320_s7 }
 0x6cb   :  { %v3561_v17 = vpop.f32.mrf.mxu0 }
 0x6cd   :  { %v14576_v63 = vpop.f32.mrf.mxu0 }
 0x6ce   :  { %3606 = vrot.lane.b32.xlu1 %v3585_v52, %s16320_s7  ;;  %v3587_v25 = vpack.c.bf16 %v14576_v63, %v14575_v53 }
 0x6cf   :  { %v3564_v61 = vpop.f32.mrf.mxu0 }
 0x6d0   :  { %v3586_v26 = vpack.c.bf16 %v3564_v61, %v3561_v17  ;;  %v15046_v61 = vld [vmem:[%s21613_s0 + $0x8] sm:$0xff]  }
 0x6d2   :  { %3598 = vrot.lane.b32.xlu1 %v19343_v59, %s16331_s11  ;;  %3608 = vrot.lane.b32.xlu0 %v3586_v26, %s16320_s7  ;;  %v15047_v26 = vld [vmem:[%s21613_s0] sm:$0xff]  }
 0x6d6   :  { %3610 = vrot.lane.b32.xlu1 %v3587_v25, %s16320_s7  ;;  %14704 = vperm.xlu0 %14702, %v14703_v41  }
 0x6da   :  { %14720 = vset.pattern.permute.xlu0 %v21258_v60  ;;  %14710 = vperm.xlu1 %14708, %v14703_v41  }
 0x6db   :  { %14722 = vperm.xlu0 %14720, %v14721_v23  }
 0x6de   :  { %14714 = vset.pattern.permute.xlu1 %v21567_v55 }
 0x6df   :  { %14732 = vperm.xlu0 %14720, %v19358_v46   ;;  %14716 = vperm.xlu1 %14714, %v14721_v23  }
 0x6e3   :  { %14736 = vset.pattern.permute.xlu0 %v21567_v55 }
 0x6e4   :  { %14738 = vperm.xlu0 %14736, %v19362_v48  }
 0x72c   :  { %v3593_v21 = vpop.permute.xlu0 %3592 }
 0x72d   :  { %v3614_v24 = vsel %vm1150_vm3, %v3576_v47, %v3593_v21 }
 0x730   :  { %v3595_v34 = vpop.permute.xlu0 %3594 }
 0x731   :  { %v3617_v19 = vsel %vm1150_vm3, %v3577_v54, %v3595_v34 }
 0x734   :  { %v3597_v52 = vpop.permute.xlu0 %3596 }
 0x735   :  { %v3620_v22 = vsel %vm1150_vm3, %v3578_v50, %v3597_v52  ;;  %v15045_v50 = vld [vmem:[%s21613_s0 + $0x10] sm:$0xff]  }
 0x73c   :  { %v3605_v53 = vpop.permute.xlu1 %3604 }
 0x73d   :  { %v3626_v17 = vsel %vm3624_vm6, %v3614_v24, %v3605_v53 }
 0x73e   :  { %14589 = vmatprep.mubr.msk.bf16.mxu0 %vm3669_vm7, %v3626_v17 }
 0x740   :  { %v3607_v63 = vpop.permute.xlu1 %3606 }
 0x741   :  { %v3628_v28 = vsel %vm3624_vm6, %v3617_v19, %v3607_v63 }
 0x742   :  { %14590 = vmatmul.mubr.msk.bf16.vlgmr.msra.gmra.mxu0 %vm3669_vm7, %v3628_v28 }
 0x743   :  { %4120 = vmatpush1.bf16.msra.mxu0 %v15040_v44 }
 0x744   :  { %v3599_v38 = vpop.permute.xlu1 %3598  ;;  %v3609_v47 = vpop.permute.xlu0 %3608  ;;  %4121 = vmatprep.subr.bf16.mxu0 %v21567_v55 }
 0x745   :  { %v3630_v35 = vsel %vm3624_vm6, %v3620_v22, %v3609_v47  ;;  %v3623_v43 = vsel %vm1150_vm3, %v3579_v36, %v3599_v38  ;;  %v15044_v36 = vld [vmem:[%s21613_s0 + $0x18] sm:$0xff]   ;;  %v15051_v22 = vld [vmem:[%s21613_s0 + $0x40] sm:$0xff]  }
 0x746   :  { %14593 = vmatprep.mubr.msk.bf16.mxu0 %vm3669_vm7, %v3630_v35 }
 0x747   :  { %4122 = vmatpush1.bf16.msra.mxu0 %v15041_v45 }
 0x748   :  { %v3611_v58 = vpop.permute.xlu1 %3610  ;;  %4123 = vmatprep.subr.bf16.mxu0 %v21567_v55 }
 0x749   :  { %v3632_v54 = vsel %vm3624_vm6, %v3623_v43, %v3611_v58 }
 0x74a   :  { %14594 = vmatmul.mubr.msk.bf16.gmra.mxu0 %vm3669_vm7, %v3632_v54 }
 0x74b   :  { %4124 = vmatpush1.bf16.msra.mxu0 %v15042_v62 }
 0x74c   :  { %4125 = vmatprep.subr.bf16.mxu0 %v21567_v55 }
 0x74f   :  { %4126 = vmatpush1.bf16.msra.mxu0 %v15043_v37 }
 0x750   :  { %4127 = vmatprep.subr.bf16.mxu0 %v21567_v55 }
 0x753   :  { %4128 = vmatpush1.bf16.msra.mxu0 %v15044_v36 }
 0x754   :  { %4129 = vmatprep.subr.bf16.mxu0 %v21567_v55 }
 0x757   :  { %4130 = vmatpush1.bf16.msra.mxu0 %v15045_v50 }
 0x758   :  { %4131 = vmatprep.subr.bf16.mxu0 %v21567_v55 }
 0x75b   :  { %4132 = vmatpush1.bf16.msra.mxu0 %v15046_v61 }
 0x75c   :  { %4133 = vmatprep.subr.bf16.mxu0 %v21567_v55 }
 0x75f   :  { %4134 = vmatpush1.bf16.msra.mxu0 %v15047_v26 }
 0x760   :  { %4143 = vmatprep.subr.bf16.mxu0 %v21567_v55 }
 0x763   :  { %4144 = vmatpush2.bf16.msra.mxu0 %v15048_v49 }
 0x764   :  { %4145 = vmatprep.subr.bf16.mxu0 %v21567_v55 }
 0x767   :  { %4146 = vmatpush2.bf16.msra.mxu0 %v15049_v39 }
 0x768   :  { %4147 = vmatprep.subr.bf16.mxu0 %v21567_v55 }
 0x76b   :  { %4148 = vmatpush2.bf16.msra.mxu0 %v15050_v56 }
 0x76c   :  { %4149 = vmatprep.subr.bf16.mxu0 %v21567_v55 }
 0x76f   :  { %4150 = vmatpush2.bf16.msra.mxu0 %v15051_v22 }
 0x802   :  { %v19425_v41 = vpop.f32.mrf.mxu0 }
 0x803   :  { %v3768_v42 = vmul.f32 %v19425_v41, %v19425_v41  ;;  %v3746_v24 = vsel %vm3624_vm6, %v19425_v41, 0.0 }
 0x804   :  { %v19427_v57 = vpop.f32.mrf.mxu0 }
 0x805   :  { %v3766_v16 = vmul.f32 %v19427_v57, %v19427_v57  ;;  %v3743_v40 = vsel %vm3624_vm6, %v19427_v57, 0.0  ;;  %v3777_v38 = vsel %vm3624_vm6, %v3768_v42, 0.0 }
 0x806   :  { %v19433_v25 = vpop.f32.mrf.mxu0 }
 0x807   :  { %v3774_v53 = vsel %vm3624_vm6, %v3766_v16, 0.0  ;;  %v3769_v17 = vmul.f32 %v19433_v25, %v19433_v25  ;;  %v3748_v47 = vsel %vm3624_vm6, %v19433_v25, 0.0 }
 0x808   :  { %v19437_v23 = vpop.f32.mrf.mxu0 }
 0x809   :  { %v3744_v51 = vsel %vm3624_vm6, %v19437_v23, 0.0  ;;  %v3767_v33 = vmul.f32 %v19437_v23, %v19437_v23  ;;  %v3779_v44 = vsel %vm3624_vm6, %v3769_v17, 0.0 }
 0x80a   :  { %v3745_v21 = vadd.f32 %v3744_v51, %v3743_v40  ;;  %v19451_v34 = vpop.f32.mrf.mxu0 }
 0x80b   :  { %v3775_v19 = vsel %vm3624_vm6, %v3767_v33, 0.0  ;;  %v3772_v50 = vmul.f32 %v19451_v34, %v19451_v34  ;;  %v3754_v56 = vsel %vm3624_vm6, %v19451_v34, 0.0 }
 0x80c   :  { %v3747_v52 = vadd.f32 %v3746_v24, %v3745_v21  ;;  %v3776_v63 = vadd.f32 %v3775_v19, %v3774_v53  ;;  %v19459_v28 = vpop.f32.mrf.mxu0 }
 0x80d   :  { %v3770_v35 = vmul.f32 %v19459_v28, %v19459_v28  ;;  %v3750_v45 = vsel %vm3624_vm6, %v19459_v28, 0.0  ;;  %v3785_v21 = vsel %vm3624_vm6, %v3772_v50, 0.0 }
 0x80e   :  { %v3778_v43 = vadd.f32 %v3777_v38, %v3776_v63  ;;  %v3749_v58 = vadd.f32 %v3748_v47, %v3747_v52  ;;  %v19470_v54 = vpop.f32.mrf.mxu0 }
 0x80f   :  { %v3781_v61 = vsel %vm3624_vm6, %v3770_v35, 0.0  ;;  %v3773_v42 = vmul.f32 %v19470_v54, %v19470_v54  ;;  %v3756_v24 = vsel %vm3624_vm6, %v19470_v54, 0.0 }
 0x810   :  { %v3751_v62 = vadd.f32 %v3750_v45, %v3749_v58  ;;  %v3780_v37 = vadd.f32 %v3779_v44, %v3778_v43  ;;  %v3731_v36 = vpop.f32.mrf.mxu0 }
 0x811   :  { %v3752_v26 = vsel %vm3624_vm6, %v3731_v36, 0.0  ;;  %v3771_v49 = vmul.f32 %v3731_v36, %v3731_v36  ;;  %v3787_v19 = vsel %vm3624_vm6, %v3773_v42, 0.0  ;;  %v19488_v42 = vpop.permute.xlu0 %14704 }
 0x812   :  { %v3782_v39 = vadd.f32 %v3781_v61, %v3780_v37  ;;  %v3753_v16 = vadd.f32 %v3752_v26, %v3751_v62 }
 0x813   :  { %v3783_v40 = vsel %vm3624_vm6, %v3771_v49, 0.0 }
 0x814   :  { %v3755_v51 = vadd.f32 %v3754_v56, %v3753_v16  ;;  %v3784_v33 = vadd.f32 %v3783_v40, %v3782_v39 }
 0x815   :  { %v19490_v40 = vpop.permute.xlu0 %14722 }
 0x816   :  { %v3757_v53 = vadd.f32 %v3756_v24, %v3755_v51  ;;  %v3786_v17 = vadd.f32 %v3785_v21, %v3784_v33  ;;  %v19492_v51 = vpop.permute.xlu1 %14710  ;;  %v3337_v21 = vld [vmem:[#allocation12 + $0x1] sm:$0x1] }
 0x818   :  { %v3758_v52 = vrot.slane %v3757_v53, 4  ;;  %v3788_v63 = vadd.f32 %v3787_v19, %v3786_v17  ;;  %v3338_v17 = vld [vmem:[#allocation14 + $0x1] sm:$0x1] }
 0x819   :  { %v19494_v33 = vpop.permute.xlu0 %14732 }
 0x81a   :  { %v3759_v22 = vadd.f32 %v3758_v52, %v3757_v53  ;;  %v3789_v38 = vrot.slane %v3788_v63, 4  ;;  %v19496_v19 = vpop.permute.xlu1 %14716 }
 0x81c   :  { %v3760_v47 = vrot.slane %v3759_v22, 2  ;;  %v3790_v35 = vadd.f32 %v3789_v38, %v3788_v63  ;;  %v14706_v38 = vunpack.i.l.bf16 %v19488_v42 }
 0x81e   :  { %v3761_v43 = vadd.f32 %v3760_v47, %v3759_v22  ;;  %v3791_v58 = vrot.slane %v3790_v35, 2  ;;  %v14707_v22 = vunpack.i.h.bf16 %v19488_v42  ;;  %v19501_v47 = vpop.permute.xlu0 %14738 }
 0x820   :  { %v3762_v44 = vrot.slane %v3761_v43, 1  ;;  %v3792_v45 = vadd.f32 %v3791_v58, %v3790_v35  ;;  %v14725_v35 = vunpack.i.h.bf16 %v19490_v40  ;;  %v14713_v58 = vunpack.i.h.bf16 %v19492_v51 }
 0x822   :  { %v3763_v62 = vadd.f32 %v3762_v44, %v3761_v43  ;;  %v3793_v37 = vrot.slane %v3792_v45, 1  ;;  %v14724_v43 = vunpack.i.l.bf16 %v19490_v40  ;;  %v14712_v44 = vunpack.i.l.bf16 %v19492_v51 }
 0x824   :  { %v3765_v50 = vmul.f32 0.015625, %v3763_v62  ;;  %v3794_v61 = vadd.f32 %v3793_v37, %v3792_v45  ;;  %v14735_v62 = vunpack.i.h.bf16 %v19494_v33  ;;  %v14734_v37 = vunpack.i.l.bf16 %v19494_v33 }
 0x826   :  { %v3795_v26 = vmul.f32 0.015625, %v3794_v61  ;;  %v3796_v49 = vmul.f32 %v3765_v50, %v3765_v50 }
 0x828   :  { %v3797_v39 = vsub.f32 %v3795_v26, %v3796_v49 }
 0x82a   :  { %v3798_v16 = vmax.f32 %v3797_v39, 0.0 }
 0x82c   :  { %v3799_v56 = vadd.f32 1e-05, %v3798_v16 }
 0x82e   :  { %15102 = vrsqrt.f32 %v3799_v56 }
 0x83b   :  { %v15103_v24 = vpop.eup %15102 }
 0x83c   :  { %v3801_v53 = vmul.f32 %v15103_v24, %v3337_v21 }
 0x83e   :  { %v3806_v52 = vrot.slane %v3801_v53, %v18164_v18  ;;  %v3816_v63 = vmul.f32 %v3801_v53, %v3765_v50 }
 0x840   :  { %v3817_v45 = vsub.f32 %v3338_v17, %v3816_v63  ;;  %v3813_v61 = vmul.f32 %v3806_v52, %v3731_v36  ;;  %v3808_v56 = vmul.f32 %v3806_v52, %v19427_v57  ;;  %v3809_v42 = vmul.f32 %v3806_v52, %v19437_v23 }
 0x841   :  { %v3815_v40 = vmul.f32 %v19470_v54, %v3806_v52  ;;  %v3810_v51 = vmul.f32 %v19425_v41, %v3806_v52  ;;  %v3811_v33 = vmul.f32 %v19433_v25, %v3806_v52  ;;  %v3812_v36 = vmul.f32 %v3806_v52, %v19459_v28 }
 0x842   :  { %v3822_v16 = vrot.slane %v3817_v45, %v18164_v18  ;;  %v3814_v21 = vmul.f32 %v19451_v34, %v3806_v52  ;;  %v19531_v52 = vld [vmem:[#allocation21 + $0x8] sm:$0xff]  }
 0x843   :  { %14597 = vmatprep.subr.bf16.mxu0 %v19531_v52 }
 0x844   :  { %v3829_v24 = vadd.f32 %v3822_v16, %v3813_v61  ;;  %v3824_v53 = vadd.f32 %v3822_v16, %v3808_v56  ;;  %v3825_v17 = vadd.f32 %v3822_v16, %v3809_v42  ;;  %v3831_v63 = vadd.f32 %v3822_v16, %v3815_v40 }
 0x845   :  { %v3826_v60 = vadd.f32 %v3822_v16, %v3810_v51  ;;  %v3827_v45 = vadd.f32 %v3822_v16, %v3811_v33  ;;  %v3828_v39 = vadd.f32 %v3822_v16, %v3812_v36  ;;  %v3830_v57 = vadd.f32 %v3822_v16, %v3814_v21 }
 0x846   :  { %v19521_v49 = vmax.f32 %v3829_v24, 0.0  ;;  %v19523_v23 = vmax.f32 %v3824_v53, 0.0  ;;  %v3833_v54 = vmax.f32 %v3825_v17, 0.0  ;;  %v19525_v41 = vmax.f32 %v3831_v63, 0.0 }
 0x847   :  { %v19527_v25 = vmax.f32 %v3826_v60, 0.0  ;;  %v3835_v28 = vmax.f32 %v3827_v45, 0.0  ;;  %v19529_v50 = vmax.f32 %v3828_v39, 0.0  ;;  %v3838_v34 = vmax.f32 %v3830_v57, 0.0 }
 0x848   :  { %v3845_v61 = vrot.slane %v19525_v41, 7  ;;  %v3854_v56 = vrot.slane %v19523_v23, 7  ;;  %v3855_v16 = vrot.slane %v3833_v54, 7  ;;  %v3938_v42 = vrot.slane %v19523_v23, 1 }
 0x849   :  { %v3941_v40 = vrot.slane %v19527_v25, 1  ;;  %v3943_v51 = vrot.slane %v3835_v28, 1  ;;  %v3945_v33 = vrot.slane %v19529_v50, 1  ;;  %v3939_v60 = vrot.slane %v3833_v54, 1 }
 0x84a   :  { %v3856_v39 = vsel %vm2468_vm5, %v3854_v56, %v3855_v16  ;;  %v3876_v36 = vsel %vm2468_vm5, %v3845_v61, %v3854_v56  ;;  %v3947_v21 = vrot.slane %v19521_v49, 1  ;;  %v3949_v24 = vrot.slane %v3838_v34, 1 }
 0x84b   :  { %v3926_v53 = vmul.f32 %v14707_v22, %v3856_v39  ;;  %v3925_v17 = vmul.f32 %v14706_v38, %v3876_v36  ;;  %v3944_v63 = vsel %vm3937_vm8, %v3941_v40, %v3943_v51  ;;  %v3946_v45 = vsel %vm3937_vm8, %v3943_v51, %v3945_v33 }
 0x84c   :  { %v3998_v57 = vmul.f32 %v14725_v35, %v3946_v45  ;;  %v3997_v26 = vmul.f32 %v14724_v43, %v3944_v63  ;;  %v3940_v29 = vsel %vm3937_vm8, %v3938_v42, %v3939_v60  ;;  %v3942_v30 = vsel %vm3937_vm8, %v3939_v60, %v3941_v40 }
 0x84d   :  { %v3933_v31 = vpack.c.bf16 %v3926_v53, %v3925_v17  ;;  %v3995_v0 = vmul.f32 %v14712_v44, %v3940_v29  ;;  %v3996_v1 = vmul.f32 %v14713_v58, %v3942_v30  ;;  %v3948_v56 = vsel %vm3937_vm8, %v3945_v33, %v3947_v21 }
 0x84e   :  { %v4004_v2 = vpack.c.bf16 %v3998_v57, %v3997_v26  ;;  %v3950_v3 = vsel %vm3937_vm8, %v3947_v21, %v3949_v24  ;;  %v3999_v22 = vmul.f32 %v14734_v37, %v3948_v56  ;;  %v3857_v38 = vrot.slane %v19527_v25, 7  ;;  %v15053_v57 = vld [vmem:[#allocation21] sm:$0xff]  }
 0x84f   :  { %v4003_v39 = vpack.c.bf16 %v3996_v1, %v3995_v0  ;;  %v4000_v36 = vmul.f32 %v14735_v62, %v3950_v3  ;;  %v3859_v51 = vrot.slane %v3835_v28, 7  ;;  %v3863_v35 = vrot.slane %v19521_v49, 7 }
 0x850   :  { %v3858_v43 = vsel %vm2468_vm5, %v3855_v16, %v3857_v38  ;;  %v3865_v63 = vrot.slane %v3838_v34, 7  ;;  %v3843_v40 = vpack.c.bf16 %v19525_v41, %v3838_v34  ;;  %v3840_v29 = vpack.c.bf16 %v3833_v54, %v19523_v23 }
 0x851   :  { %v4005_v30 = vpack.c.bf16 %v4000_v36, %v3999_v22  ;;  %v3860_v58 = vsel %vm2468_vm5, %v3857_v38, %v3859_v51  ;;  %v21614_v44 = vunpack.i.l.bf16 %v19496_v19  ;;  %13414 = vmatprep.mubr.msk.bf16.mxu0 %vm3624_vm6, %v4003_v39  ;;  %v21615_v0 = vunpack.i.h.bf16 %v19496_v19 }
 0x852   :  { %v3866_v3 = vsel %vm2468_vm5, %v3863_v35, %v3865_v63  ;;  %v3867_v62 = vsel %vm2468_vm5, %v3865_v63, %v3845_v61  ;;  %4017 = vrot.lane.b32.xlu0 %v3843_v40, %s16320_s7  ;;  %4011 = vrot.lane.b32.xlu1 %v3840_v29, %s16320_s7  ;;  %v3861_v26 = vrot.slane %v19529_v50, 7  ;;  %v21616_v23 = vunpack.i.h.bf16 %v19501_v47  ;;  %v15054_v29 = vld [vmem:[%s20964_s13] sm:$0xff]  }
 0x853   :  { %v3927_v37 = vmul.f32 %v21614_v44, %v3858_v43  ;;  %v3928_v1 = vmul.f32 %v21615_v0, %v3860_v58  ;;  %v21617_v34 = vunpack.i.l.bf16 %v19501_v47  ;;  %v3951_v33 = vrot.slane %v19525_v41, 1 }
 0x854   :  { %v3932_v54 = vmul.f32 %v21616_v23, %v3867_v62  ;;  %v3862_v60 = vsel %vm2468_vm5, %v3859_v51, %v3861_v26  ;;  %v3864_v21 = vsel %vm2468_vm5, %v3861_v26, %v3863_v35  ;;  %v3841_v45 = vpack.c.bf16 %v3835_v28, %v19527_v25 }
 0x855   :  { %v3931_v16 = vmul.f32 %v21617_v34, %v3866_v3  ;;  %v3934_v19 = vpack.c.bf16 %v3928_v1, %v3927_v37  ;;  %v3952_v53 = vsel %vm3937_vm8, %v3949_v24, %v3951_v33  ;;  %v3962_v17 = vsel %vm3937_vm8, %v3951_v33, %v3938_v42 }
 0x856   :  { %14727 = vperm.xlu1 %14714, %v19358_v46   ;;  %v21618_v47 = vmov 1   ;;  %v3842_v41 = vpack.c.bf16 %v19521_v49, %v19529_v50 }
 0x857   :  { %v3936_v61 = vpack.c.bf16 %v3932_v54, %v3931_v16 }
 0x85a   :  { %4013 = vrot.lane.b32.xlu1 %v3841_v45, %s16320_s7 }
 0x85b   :  { %14742 = vset.pattern.permute.xlu1 %v21618_v47 }
 0x85e   :  { %14744 = vperm.xlu1 %14742, %v19362_v48  }
 0x862   :  { %4015 = vrot.lane.b32.xlu1 %v3842_v41, %s16320_s7 }
 0x863   :  { %14748 = vset.pattern.permute.xlu1 %v21567_v55 }
 0x8c4   :  { %v4012_v24 = vpop.permute.xlu1 %4011  ;;  %v4018_v43 = vpop.permute.xlu0 %4017 }
 0x8c5   :  { %v4021_v42 = vsel %vm3624_vm6, %v3933_v31, %v4012_v24  ;;  %v4033_v63 = vsel %vm3624_vm6, %v3936_v61, %v4018_v43 }
 0x8c6   :  { %4152 = vmatmul.mubr.bf16.vlgmr.msra.gmra.mxu0 %v4021_v42 }
 0x8c7   :  { %13415 = vmatprep.mubr.msk.bf16.mxu0 %vm3624_vm6, %v4004_v2  ;;  %14598 = vmatpush3.bf16.msra.mxu0 %v19531_v52 }
 0x8c8   :  { %14599 = vmatprep.subr.bf16.mxu0 %v15053_v57 }
 0x8cb   :  { %14600 = vmatpush3.bf16.msra.mxu0 %v15053_v57 }
 0x8d1   :  { %v14728_v46 = vpop.permute.xlu1 %14727 }
 0x8d2   :  { %v14730_v48 = vunpack.i.h.bf16 %v14728_v46  ;;  %v14729_v25 = vunpack.i.l.bf16 %v14728_v46 }
 0x8d4   :  { %v3930_v28 = vmul.f32 %v14730_v48, %v3864_v21  ;;  %v3929_v50 = vmul.f32 %v14729_v25, %v3862_v60 }
 0x8d5   :  { %v4014_v49 = vpop.permute.xlu1 %4013 }
 0x8d6   :  { %v3935_v56 = vpack.c.bf16 %v3930_v28, %v3929_v50  ;;  %v4025_v22 = vsel %vm3624_vm6, %v3934_v19, %v4014_v49 }
 0x8d7   :  { %4160 = vmatmul.mubr.bf16.gmra.mxu0 %v4025_v22 }
 0x8d8   :  { %13416 = vmatprep.mubr.msk.bf16.mxu0 %vm3624_vm6, %v4005_v30 }
 0x8d9   :  { %v14745_v31 = vpop.permute.xlu1 %14744 }
 0x8da   :  { %v14747_v38 = vunpack.i.h.bf16 %v14745_v31  ;;  %v14746_v39 = vunpack.i.l.bf16 %v14745_v31 }
 0x8dc   :  { %v4002_v2 = vmul.f32 %v14747_v38, %v3962_v17  ;;  %v4001_v36 = vmul.f32 %v14746_v39, %v3952_v53 }
 0x8dd   :  { %v4016_v52 = vpop.permute.xlu1 %4015 }
 0x8de   :  { %v4006_v51 = vpack.c.bf16 %v4002_v2, %v4001_v36  ;;  %v4029_v35 = vsel %vm3624_vm6, %v3935_v56, %v4016_v52 }
 0x8df   :  { %4168 = vmatmul.mubr.bf16.gmra.mxu0 %v4029_v35 }
 0x8e0   :  { %13417 = vmatprep.mubr.msk.bf16.mxu0 %vm3624_vm6, %v4006_v51 }
 0x8e7   :  { %4176 = vmatmul.mubr.bf16.gmra.mxu0 %v4033_v63 }
 0x8e8   :  { %14601 = vmatprep.mubr.msk.bf16.mxu0 %vm1150_vm3, %v19327_v20 }
 0x8ef   :  { %14602 = vmatmul.mubr.msk.bf16.vlgmr.msra.gmra.mxu0 %vm1150_vm3, %v19331_v27 }
 0x8f0   :  { %14605 = vmatprep.mubr.msk.bf16.mxu0 %vm1150_vm3, %v19334_v32 }
 0x8f7   :  { %14606 = vmatmul.mubr.msk.bf16.gmra.mxu0 %vm1150_vm3, %v19343_v59 }
 0x8f8   :  { %14617 = vmatprep.mubr.msk.bf16.mxu0 %vm3624_vm6, %v15054_v29 }
 0x986   :  { %v19598_v40 = vpop.f32.mrf.mxu0 }
 0x987   :  { %v4206_v0 = vmul.f32 %v19598_v40, %v19598_v40  ;;  %v4184_v26 = vsel %vm3624_vm6, %v19598_v40, 0.0 }
 0x988   :  { %v4155_v30 = vpop.f32.mrf.mxu0 }
 0x989   :  { %v4214_v19 = vsel %vm3624_vm6, %v4206_v0, 0.0 }
 0x98a   :  { %v19604_v58 = vpop.f32.mrf.mxu0 }
 0x98b   :  { %v4207_v32 = vmul.f32 %v19604_v58, %v19604_v58  ;;  %v4185_v1 = vsel %vm3624_vm6, %v19604_v58, 0.0 }
 0x98c   :  { %v4158_v20 = vpop.f32.mrf.mxu0  ;;  %v4186_v16 = vadd.f32 %v4185_v1, %v4184_v26 }
 0x98d   :  { %v4215_v23 = vsel %vm3624_vm6, %v4207_v32, 0.0 }
 0x98e   :  { %v4216_v53 = vadd.f32 %v4215_v23, %v4214_v19 }
 0x997   :  { %v19606_v44 = vpop.f32.mrf.mxu0 }
 0x998   :  { %v4208_v3 = vmul.f32 %v19606_v44, %v19606_v44  ;;  %v4187_v54 = vsel %vm3624_vm6, %v19606_v44, 0.0 }
 0x999   :  { %v4163_v27 = vpop.f32.mrf.mxu0  ;;  %v4188_v17 = vadd.f32 %v4187_v54, %v4186_v16 }
 0x99a   :  { %v4217_v60 = vsel %vm3624_vm6, %v4208_v3, 0.0 }
 0x99b   :  { %v19608_v37 = vpop.f32.mrf.mxu0  ;;  %v4218_v42 = vadd.f32 %v4217_v60, %v4216_v53 }
 0x99c   :  { %v4209_v34 = vmul.f32 %v19608_v37, %v19608_v37  ;;  %v4189_v21 = vsel %vm3624_vm6, %v19608_v37, 0.0 }
 0x99d   :  { %v4166_v59 = vpop.f32.mrf.mxu0  ;;  %v4190_v46 = vadd.f32 %v4189_v21, %v4188_v17 }
 0x99e   :  { %v4219_v41 = vsel %vm3624_vm6, %v4209_v34, 0.0 }
 0x99f   :  { %v19618_v62 = vpop.f32.mrf.mxu0  ;;  %v4220_v50 = vadd.f32 %v4219_v41, %v4218_v42 }
 0x9a0   :  { %v4210_v61 = vmul.f32 %v19618_v62, %v19618_v62  ;;  %v4191_v24 = vsel %vm3624_vm6, %v19618_v62, 0.0 }
 0x9a1   :  { %v4171_v33 = vpop.f32.mrf.mxu0  ;;  %v4192_v49 = vadd.f32 %v4191_v24, %v4190_v46 }
 0x9a2   :  { %v4221_v25 = vsel %vm3624_vm6, %v4210_v61, 0.0 }
 0x9a3   :  { %v19633_v45 = vpop.f32.mrf.mxu0  ;;  %v4222_v39 = vadd.f32 %v4221_v25, %v4220_v50 }
 0x9a4   :  { %v4211_v57 = vmul.f32 %v19633_v45, %v19633_v45  ;;  %v4193_v28 = vsel %vm3624_vm6, %v19633_v45, 0.0 }
 0x9a5   :  { %v4174_v48 = vpop.f32.mrf.mxu0  ;;  %v4194_v2 = vadd.f32 %v4193_v28, %v4192_v49 }
 0x9a6   :  { %v4223_v22 = vsel %vm3624_vm6, %v4211_v57, 0.0 }
 0x9a7   :  { %v19643_v56 = vpop.f32.mrf.mxu0  ;;  %v4224_v51 = vadd.f32 %v4223_v22, %v4222_v39 }
 0x9a8   :  { %v4195_v31 = vsel %vm3624_vm6, %v19643_v56, 0.0  ;;  %v4212_v38 = vmul.f32 %v19643_v56, %v19643_v56 }
 0x9a9   :  { %v4179_v36 = vpop.f32.mrf.mxu0  ;;  %v4196_v35 = vadd.f32 %v4195_v31, %v4194_v2 }
 0x9aa   :  { %v4225_v52 = vsel %vm3624_vm6, %v4212_v38, 0.0 }
 0x9ab   :  { %v19651_v43 = vpop.f32.mrf.mxu0  ;;  %v4226_v30 = vadd.f32 %v4225_v52, %v4224_v51 }
 0x9ac   :  { %v4197_v63 = vsel %vm3624_vm6, %v19651_v43, 0.0  ;;  %v4213_v29 = vmul.f32 %v19651_v43, %v19651_v43 }
 0x9ad   :  { %v4198_v20 = vadd.f32 %v4197_v63, %v4196_v35  ;;  %v4182_v27 = vpop.f32.mrf.mxu0 }
 0x9ae   :  { %v4227_v32 = vsel %vm3624_vm6, %v4213_v29, 0.0 }
 0x9af   :  { %v4199_v59 = vrot.slane %v4198_v20, 4  ;;  %v4228_v0 = vadd.f32 %v4227_v32, %v4226_v30  ;;  %v19658_v1 = vpop.f32.mrf.mxu0 }
 0x9b0   :  { %v4385_v61 = vmul.f32 %v19658_v1, %v19658_v1  ;;  %v4364_v48 = vsel %vm3624_vm6, %v19658_v1, 0.0 }
 0x9b1   :  { %v4200_v3 = vadd.f32 %v4199_v59, %v4198_v20  ;;  %v4229_v26 = vrot.slane %v4228_v0, 4  ;;  %v19660_v23 = vpop.f32.mrf.mxu0 }
 0x9b2   :  { %v4383_v33 = vmul.f32 %v19660_v23, %v19660_v23  ;;  %v4361_v53 = vsel %vm3624_vm6, %v19660_v23, 0.0  ;;  %v4394_v2 = vsel %vm3624_vm6, %v4385_v61, 0.0 }
 0x9b3   :  { %v4201_v54 = vrot.slane %v4200_v3, 2  ;;  %v4230_v34 = vadd.f32 %v4229_v26, %v4228_v0  ;;  %v19662_v16 = vpop.f32.mrf.mxu0 }
 0x9b4   :  { %v4391_v25 = vsel %vm3624_vm6, %v4383_v33, 0.0  ;;  %v4386_v28 = vmul.f32 %v19662_v16, %v19662_v16  ;;  %v4366_v36 = vsel %vm3624_vm6, %v19662_v16, 0.0 }
 0x9b5   :  { %v4202_v19 = vadd.f32 %v4201_v54, %v4200_v3  ;;  %v4231_v60 = vrot.slane %v4230_v34, 2  ;;  %v19666_v21 = vpop.f32.mrf.mxu0 }
 0x9b6   :  { %v4362_v17 = vsel %vm3624_vm6, %v19666_v21, 0.0  ;;  %v4384_v41 = vmul.f32 %v19666_v21, %v19666_v21  ;;  %v4396_v20 = vsel %vm3624_vm6, %v4386_v28, 0.0 }
 0x9b7   :  { %v4203_v24 = vrot.slane %v4202_v19, 1  ;;  %v4232_v57 = vadd.f32 %v4231_v60, %v4230_v34  ;;  %v4363_v42 = vadd.f32 %v4362_v17, %v4361_v53  ;;  %v19676_v46 = vpop.f32.mrf.mxu0 }
 0x9b8   :  { %v4392_v50 = vsel %vm3624_vm6, %v4384_v41, 0.0  ;;  %v4389_v54 = vmul.f32 %v19676_v46, %v19676_v46  ;;  %v4372_v17 = vsel %vm3624_vm6, %v19676_v46, 0.0 }
 0x9b9   :  { %v4204_v49 = vadd.f32 %v4203_v24, %v4202_v19  ;;  %v4233_v22 = vrot.slane %v4232_v57, 1  ;;  %v4365_v31 = vadd.f32 %v4364_v48, %v4363_v42  ;;  %v4393_v38 = vadd.f32 %v4392_v50, %v4391_v25  ;;  %v19684_v39 = vpop.f32.mrf.mxu0 }
 0x9ba   :  { %v4387_v52 = vmul.f32 %v19684_v39, %v19684_v39  ;;  %v4368_v27 = vsel %vm3624_vm6, %v19684_v39, 0.0  ;;  %v4402_v48 = vsel %vm3624_vm6, %v4389_v54, 0.0 }
 0x9bb   :  { %v4205_v51 = vmul.f32 0.015625, %v4204_v49  ;;  %v4234_v35 = vadd.f32 %v4233_v22, %v4232_v57  ;;  %v4395_v63 = vadd.f32 %v4394_v2, %v4393_v38  ;;  %v4367_v29 = vadd.f32 %v4366_v36, %v4365_v31  ;;  %v19691_v30 = vpop.f32.mrf.mxu0 }
 0x9bc   :  { %v4398_v34 = vsel %vm3624_vm6, %v4387_v52, 0.0  ;;  %v4390_v41 = vmul.f32 %v19691_v30, %v19691_v30  ;;  %v4374_v25 = vsel %vm3624_vm6, %v19691_v30, 0.0 }
 0x9bd   :  { %v4235_v32 = vmul.f32 0.015625, %v4234_v35  ;;  %v4236_v59 = vmul.f32 %v4205_v51, %v4205_v51  ;;  %v4369_v0 = vadd.f32 %v4368_v27, %v4367_v29  ;;  %v4397_v3 = vadd.f32 %v4396_v20, %v4395_v63  ;;  %v19696_v26 = vpop.f32.mrf.mxu0 }
 0x9be   :  { %v4370_v33 = vsel %vm3624_vm6, %v19696_v26, 0.0  ;;  %v4388_v19 = vmul.f32 %v19696_v26, %v19696_v26  ;;  %v4404_v22 = vsel %vm3624_vm6, %v4390_v41, 0.0 }
 0x9bf   :  { %v4399_v60 = vadd.f32 %v4398_v34, %v4397_v3  ;;  %v4371_v61 = vadd.f32 %v4370_v33, %v4369_v0  ;;  %v4237_v53 = vsub.f32 %v4235_v32, %v4236_v59 }
 0x9c0   :  { %v4400_v24 = vsel %vm3624_vm6, %v4388_v19, 0.0 }
 0x9c1   :  { %v4373_v57 = vadd.f32 %v4372_v17, %v4371_v61  ;;  %v4401_v42 = vadd.f32 %v4400_v24, %v4399_v60  ;;  %v4238_v49 = vmax.f32 %v4237_v53, 0.0  ;;  %v3339_v53 = vld [vmem:[#allocation12 + $0x2] sm:$0x1] }
 0x9c3   :  { %v4375_v28 = vadd.f32 %v4374_v25, %v4373_v57  ;;  %v4403_v50 = vadd.f32 %v4402_v48, %v4401_v42  ;;  %v4239_v52 = vadd.f32 1e-05, %v4238_v49  ;;  %v3340_v57 = vld [vmem:[#allocation14 + $0x2] sm:$0x1]  ;;  %v3341_v25 = vld [vmem:[#allocation12 + $0x3] sm:$0x1] }
 0x9c5   :  { %v4376_v31 = vrot.slane %v4375_v28, 4  ;;  %v4405_v38 = vadd.f32 %v4404_v22, %v4403_v50  ;;  %15104 = vrsqrt.f32 %v4239_v52 }
 0x9c7   :  { %v4377_v2 = vadd.f32 %v4376_v31, %v4375_v28  ;;  %v4406_v36 = vrot.slane %v4405_v38, 4  ;;  %v3342_v31 = vld [vmem:[#allocation14 + $0x3] sm:$0x1] }
 0x9c9   :  { %v4378_v35 = vrot.slane %v4377_v2, 2  ;;  %v4407_v63 = vadd.f32 %v4406_v36, %v4405_v38 }
 0x9cb   :  { %v4379_v29 = vadd.f32 %v4378_v35, %v4377_v2  ;;  %v4408_v20 = vrot.slane %v4407_v63, 2 }
 0x9cd   :  { %v4380_v27 = vrot.slane %v4379_v29, 1  ;;  %v4409_v32 = vadd.f32 %v4408_v20, %v4407_v63 }
 0x9cf   :  { %v4381_v59 = vadd.f32 %v4380_v27, %v4379_v29  ;;  %v4410_v0 = vrot.slane %v4409_v32, 1 }
 0x9d1   :  { %v4382_v3 = vmul.f32 0.015625, %v4381_v59  ;;  %v4411_v54 = vadd.f32 %v4410_v0, %v4409_v32 }
 0x9d2   :  { %v15105_v61 = vpop.eup %15104 }
 0x9d3   :  { %v4412_v34 = vmul.f32 0.015625, %v4411_v54  ;;  %v4413_v33 = vmul.f32 %v4382_v3, %v4382_v3  ;;  %v4241_v41 = vmul.f32 %v15105_v61, %v3339_v53 }
 0x9d5   :  { %v4414_v19 = vsub.f32 %v4412_v34, %v4413_v33  ;;  %v4256_v24 = vmul.f32 %v4241_v41, %v4205_v51  ;;  %v4246_v48 = vrot.slane %v4241_v41, %v18164_v18 }
 0x9d7   :  { %v4415_v60 = vmax.f32 %v4414_v19, 0.0  ;;  %v4257_v42 = vsub.f32 %v3340_v57, %v4256_v24  ;;  %v4255_v22 = vmul.f32 %v4246_v48, %v19651_v43  ;;  %v4254_v38 = vmul.f32 %v4246_v48, %v19643_v56 }
 0x9d8   :  { %v4252_v2 = vmul.f32 %v4246_v48, %v19618_v62  ;;  %v4253_v36 = vmul.f32 %v4246_v48, %v19633_v45  ;;  %v4250_v35 = vmul.f32 %v4246_v48, %v19606_v44  ;;  %v4251_v63 = vmul.f32 %v4246_v48, %v19608_v37 }
 0x9d9   :  { %v4416_v17 = vadd.f32 1e-05, %v4415_v60  ;;  %v4262_v50 = vrot.slane %v4257_v42, %v18164_v18  ;;  %v4248_v27 = vmul.f32 %v4246_v48, %v19598_v40  ;;  %v4249_v43 = vmul.f32 %v4246_v48, %v19604_v58 }
 0x9db   :  { %15106 = vrsqrt.f32 %v4416_v17  ;;  %v4271_v29 = vadd.f32 %v4262_v50, %v4255_v22  ;;  %v4270_v20 = vadd.f32 %v4262_v50, %v4254_v38  ;;  %v4268_v59 = vadd.f32 %v4262_v50, %v4252_v2 }
 0x9dc   :  { %v4269_v56 = vadd.f32 %v4262_v50, %v4253_v36  ;;  %v4266_v0 = vadd.f32 %v4262_v50, %v4250_v35  ;;  %v4267_v45 = vadd.f32 %v4262_v50, %v4251_v63  ;;  %v4264_v54 = vadd.f32 %v4262_v50, %v4248_v27  ;;  %v15055_v63 = vld [vmem:[%s20964_s13 + $0x8] sm:$0xff]   ;;  %v15058_v27 = vld [vmem:[%s20964_s13 + $0x20] sm:$0xff]  }
 0x9dd   :  { %v4265_v34 = vadd.f32 %v4262_v50, %v4249_v43  ;;  %v15059_v43 = vld [vmem:[%s20964_s13 + $0x28] sm:$0xff]  }
 0x9e8   :  { %v15107_v28 = vpop.eup %15106 }
 0x9e9   :  { %v4418_v49 = vmul.f32 %v15107_v28, %v3341_v25 }
 0x9eb   :  { %v4423_v51 = vrot.slane %v4418_v49, %v18164_v18  ;;  %v4433_v52 = vmul.f32 %v4418_v49, %v4382_v3 }
 0x9ed   :  { %v4434_v32 = vsub.f32 %v3342_v31, %v4433_v52  ;;  %v4430_v62 = vmul.f32 %v4423_v51, %v19696_v26  ;;  %v4431_v44 = vmul.f32 %v19676_v46, %v4423_v51  ;;  %v4432_v37 = vmul.f32 %v19691_v30, %v4423_v51 }
 0x9ee   :  { %v4429_v33 = vmul.f32 %v4423_v51, %v19684_v39  ;;  %v4427_v40 = vmul.f32 %v19658_v1, %v4423_v51  ;;  %v4428_v58 = vmul.f32 %v19662_v16, %v4423_v51  ;;  %v4425_v19 = vmul.f32 %v4423_v51, %v19660_v23 }
 0x9ef   :  { %v4439_v3 = vrot.slane %v4434_v32, %v18164_v18  ;;  %v4426_v60 = vmul.f32 %v4423_v51, %v19666_v21  ;;  %v15060_v32 = vld [vmem:[#allocation23 + $0x38] sm:$0xff]  }
 0x9f1   :  { %v4446_v26 = vadd.f32 %v4439_v3, %v4430_v62  ;;  %v4447_v61 = vadd.f32 %v4439_v3, %v4431_v44  ;;  %v4448_v53 = vadd.f32 %v4439_v3, %v4432_v37  ;;  %v4445_v17 = vadd.f32 %v4439_v3, %v4429_v33  ;;  %v15064_v62 = vld [vmem:[#allocation23 + $0x18] sm:$0xff]   ;;  %v15069_v44 = vld [vmem:[#allocation23 + $0x50] sm:$0xff]   ;;  %v15070_v37 = vld [vmem:[#allocation23 + $0x48] sm:$0xff]  }
 0x9f2   :  { %v4443_v41 = vadd.f32 %v4439_v3, %v4427_v40  ;;  %v4444_v24 = vadd.f32 %v4439_v3, %v4428_v58  ;;  %v4441_v57 = vadd.f32 %v4439_v3, %v4425_v19  ;;  %v4442_v46 = vadd.f32 %v4439_v3, %v4426_v60  ;;  %v15068_v3 = vld [vmem:[#allocation23 + $0x58] sm:$0xff]   ;;  %v15071_v40 = vld [vmem:[#allocation23 + $0x40] sm:$0xff]  }
 0x9f3   :  { %v4455_v42 = vadd.f32 %v4447_v61, %v4270_v20  ;;  %v4456_v30 = vadd.f32 %v4448_v53, %v4271_v29  ;;  %v4453_v48 = vadd.f32 %v4445_v17, %v4268_v59  ;;  %v4454_v39 = vadd.f32 %v4446_v26, %v4269_v56  ;;  %v15056_v29 = vld [vmem:[%s20964_s13 + $0x10] sm:$0xff]   ;;  %v15057_v20 = vld [vmem:[%s20964_s13 + $0x18] sm:$0xff]   ;;  %v15061_v59 = vld [vmem:[#allocation23 + $0x30] sm:$0xff]  }
 0x9f4   :  { %v4451_v25 = vadd.f32 %v4443_v41, %v4266_v0  ;;  %v4452_v1 = vadd.f32 %v4444_v24, %v4267_v45  ;;  %v4449_v28 = vadd.f32 %v4441_v57, %v4264_v54  ;;  %v4450_v16 = vadd.f32 %v4442_v46, %v4265_v34  ;;  %v15062_v56 = vld [vmem:[#allocation23 + $0x28] sm:$0xff]   ;;  %v15063_v0 = vld [vmem:[#allocation23 + $0x20] sm:$0xff]   ;;  %v15065_v45 = vld [vmem:[#allocation23 + $0x10] sm:$0xff]  }
 0x9f5   :  { %v4463_v50 = vmax.f32 %v4455_v42, 0.0  ;;  %v4464_v23 = vmax.f32 %v4456_v30, 0.0  ;;  %v4461_v49 = vmax.f32 %v4453_v48, 0.0  ;;  %v4462_v21 = vmax.f32 %v4454_v39, 0.0  ;;  %v15066_v54 = vld [vmem:[#allocation23 + $0x8] sm:$0xff]   ;;  %v15067_v34 = vld [vmem:[#allocation23] sm:$0xff]  }
 0x9f6   :  { %v4459_v22 = vmax.f32 %v4451_v25, 0.0  ;;  %v4460_v31 = vmax.f32 %v4452_v1, 0.0  ;;  %v4457_v38 = vmax.f32 %v4449_v28, 0.0  ;;  %v4458_v2 = vmax.f32 %v4450_v16, 0.0  ;;  %v14364_v17 = vld [vmem:[%s20965_s14 + $0x8] sm:$0xff]   ;;  %v14350_v25 = vld [vmem:[%s20965_s14] sm:$0xff]  }
 0x9f7   :  { %v4468_v36 = vpack.c.bf16 %v4464_v23, %v4463_v50  ;;  %v4467_v51 = vpack.c.bf16 %v4462_v21, %v4461_v49  ;;  %v14355_v24 = vunpack.c.l.bf16 %v14364_v17  ;;  %v14356_v57 = vunpack.c.h.bf16 %v14364_v17  ;;  %s16333_s14 = smov [#allocation6]  }
 0x9f8   :  { %v4466_v52 = vpack.c.bf16 %v4460_v31, %v4459_v22  ;;  %v4465_v35 = vpack.c.bf16 %v4458_v2, %v4457_v38  ;;  %v14351_v28 = vunpack.c.l.bf16 %v14350_v25  ;;  %v14352_v16 = vunpack.c.h.bf16 %v14350_v25 }
 0x9f9   :  { %14609 = vmatprep.subr.bf16.mxu0 %v4468_v36  ;;  %v14754_v39 = vpack.i.bf16 %v14356_v57, %v14355_v24 }
 0x9fa   :  { %14610 = vmatpush3.bf16.msra.mxu0 %v4468_v36  ;;  %v14749_v23 = vpack.i.bf16 %v14352_v16, %v14351_v28 }
 0x9fb   :  { %14611 = vmatprep.subr.bf16.mxu0 %v4467_v51 }
 0x9fe   :  { %14612 = vmatpush3.bf16.msra.mxu0 %v4467_v51 }
 0x9ff   :  { %14613 = vmatprep.subr.bf16.mxu0 %v4466_v52 }
 0xa02   :  { %14614 = vmatpush3.bf16.msra.mxu0 %v4466_v52  ;;  %v15072_v52 = vld [vmem:[#allocation24 + $0x78] sm:$0xff]  }
 0xa03   :  { %14615 = vmatprep.subr.bf16.mxu0 %v4465_v35 }
 0xa06   :  { %14616 = vmatpush3.bf16.msra.mxu0 %v4465_v35  ;;  %v15073_v35 = vld [vmem:[#allocation24 + $0x38] sm:$0xff]  }
 0xa07   :  { %4798 = vmatprep.subr.bf16.mxu0 %v21567_v55 }
 0xa09   :  { %14618 = vmatmul.mubr.msk.bf16.vlgmr.msra.gmra.mxu0 %vm3624_vm6, %v15055_v63  ;;  %v15074_v63 = vld [vmem:[#allocation24 + $0x70] sm:$0xff]  }
 0xa0a   :  { %14621 = vmatprep.mubr.msk.bf16.mxu0 %vm3624_vm6, %v15056_v29  ;;  %4799 = vmatpush1.bf16.msra.mxu0 %v15060_v32  ;;  %v15075_v29 = vld [vmem:[#allocation24 + $0x30] sm:$0xff]   ;;  %v15079_v32 = vld [vmem:[#allocation24 + $0x20] sm:$0xff]  }
 0xa0b   :  { %4800 = vmatprep.subr.bf16.mxu0 %v21567_v55 }
 0xa0e   :  { %4801 = vmatpush1.bf16.msra.mxu0 %v15061_v59  ;;  %v15080_v59 = vld [vmem:[#allocation24 + $0x58] sm:$0xff]  }
 0xa0f   :  { %4802 = vmatprep.subr.bf16.mxu0 %v21567_v55 }
 0xa11   :  { %14622 = vmatmul.mubr.msk.bf16.gmra.mxu0 %vm3624_vm6, %v15057_v20  ;;  %v15076_v20 = vld [vmem:[#allocation24 + $0x68] sm:$0xff]  }
 0xa12   :  { %14625 = vmatprep.mubr.msk.bf16.mxu0 %vm3624_vm6, %v15058_v27  ;;  %4803 = vmatpush1.bf16.msra.mxu0 %v15062_v56  ;;  %v15077_v27 = vld [vmem:[#allocation24 + $0x28] sm:$0xff]   ;;  %v15081_v56 = vld [vmem:[#allocation24 + $0x18] sm:$0xff]  }
 0xa13   :  { %4804 = vmatprep.subr.bf16.mxu0 %v21567_v55 }
 0xa16   :  { %4805 = vmatpush1.bf16.msra.mxu0 %v15063_v0  ;;  %v15082_v0 = vld [vmem:[#allocation24 + $0x50] sm:$0xff]  }
 0xa17   :  { %4806 = vmatprep.subr.bf16.mxu0 %v21567_v55 }
 0xa19   :  { %14626 = vmatmul.mubr.msk.bf16.gmra.mxu0 %vm3624_vm6, %v15059_v43  ;;  %v15078_v43 = vld [vmem:[#allocation24 + $0x60] sm:$0xff]  }
 0xa1a   :  { %4807 = vmatpush1.bf16.msra.mxu0 %v15064_v62  ;;  %v15083_v62 = vld [vmem:[#allocation24 + $0x10] sm:$0xff]  }
 0xa1b   :  { %4808 = vmatprep.subr.bf16.mxu0 %v21567_v55 }
 0xa1e   :  { %4809 = vmatpush1.bf16.msra.mxu0 %v15065_v45  ;;  %v15084_v45 = vld [vmem:[#allocation24 + $0x48] sm:$0xff]  }
 0xa1f   :  { %4810 = vmatprep.subr.bf16.mxu0 %v21567_v55 }
 0xa22   :  { %4811 = vmatpush1.bf16.msra.mxu0 %v15066_v54  ;;  %v15085_v54 = vld [vmem:[#allocation24 + $0x8] sm:$0xff]  }
 0xa23   :  { %4812 = vmatprep.subr.bf16.mxu0 %v21567_v55 }
 0xa26   :  { %4813 = vmatpush1.bf16.msra.mxu0 %v15067_v34  ;;  %v15086_v34 = vld [vmem:[#allocation24 + $0x40] sm:$0xff]  }
 0xa27   :  { %4822 = vmatprep.subr.bf16.mxu0 %v21567_v55 }
 0xa2a   :  { %4823 = vmatpush2.bf16.msra.mxu0 %v15068_v3  ;;  %v15087_v3 = vld [vmem:[#allocation24] sm:$0xff]  }
 0xa2b   :  { %4824 = vmatprep.subr.bf16.mxu0 %v21567_v55 }
 0xa2e   :  { %4825 = vmatpush2.bf16.msra.mxu0 %v15069_v44  ;;  %v19786_v44 = vld [vmem:[#allocation24 + $0xb8] sm:$0xff]  }
 0xa2f   :  { %4826 = vmatprep.subr.bf16.mxu0 %v21567_v55 }
 0xa32   :  { %4827 = vmatpush2.bf16.msra.mxu0 %v15070_v37 }
 0xa33   :  { %4828 = vmatprep.subr.bf16.mxu0 %v21567_v55 }
 0xa36   :  { %4829 = vmatpush2.bf16.msra.mxu0 %v15071_v40 }
 0xa37   :  { %14422 = vmatprep.subr.bf16.mxu0 %v15072_v52 }
 0xac9   :  { %v14619_v33 = vpop.f32.mrf.mxu0 }
 0xacb   :  { %v4653_v58 = vpop.f32.mrf.mxu0 }
 0xacd   :  { %v14620_v19 = vpop.f32.mrf.mxu0 }
 0xace   :  { %v4701_v60 = vpack.c.bf16 %v14620_v19, %v14619_v33 }
 0xacf   :  { %v4656_v26 = vpop.f32.mrf.mxu0 }
 0xad0   :  { %v4700_v61 = vpack.c.bf16 %v4656_v26, %v4653_v58 }
 0xad1   :  { %v14623_v53 = vpop.f32.mrf.mxu0 }
 0xad3   :  { %v4669_v41 = vpop.f32.mrf.mxu0 }
 0xad5   :  { %v14624_v46 = vpop.f32.mrf.mxu0 }
 0xad6   :  { %v19769_v42 = vpack.c.bf16 %v14624_v46, %v14623_v53 }
 0xad7   :  { %v4672_v30 = vpop.f32.mrf.mxu0 }
 0xad8   :  { %v19771_v48 = vpack.c.bf16 %v4672_v30, %v4669_v41  ;;  %4710 = vrot.lane.b32.xlu0 %v19769_v42, %s16320_s7 }
 0xad9   :  { %v14627_v1 = vpop.f32.mrf.mxu0 }
 0xada   :  { %4708 = vrot.lane.b32.xlu1 %v19771_v48, %s16320_s7  ;;  %s911_s7 = sshll.u32 %s16333_s14, 4  ;;  %s912_s7 = int_to_ptr.vmem [resolvable:$true] %s911_s7 }
 0xadb   :  { %v4685_v50 = vpop.f32.mrf.mxu0  ;;  %s16237_s12 = scalar_lea.vmem %s912_s7, 49152  ;;  %p16242_p10 = scmp.lt.s32.totalorder %s912_s7, %s912_s7 }
 0xadc   :  { %14755 = vperm.xlu0 %14736, %v14754_v39   ;;  %p16238_p9 = scmp.ne.s32.totalorder %s912_s7, %s16237_s12  ;;  %p16243_p11 = scmp.lt.s32.totalorder %s16237_s12, %s16237_s12 }
 0xadd   :  { %v14628_v49 = vpop.f32.mrf.mxu0 }
 0xade   :  { %v4705_v21 = vpack.c.bf16 %v14628_v49, %v14627_v1  ;;  %14750 = vperm.xlu1 %14748, %v14749_v23   ;;  %p16244_p12 = por %p16243_p11, %p16242_p10 }
 0xadf   :  { %v4688_v22 = vpop.f32.mrf.mxu0 }
 0xae0   :  { %v4704_v31 = vpack.c.bf16 %v4688_v22, %v4685_v50  ;;  %14765 = vset.pattern.permute.xlu0 %v21618_v47  ;;  %p16245_p13 = pnand %p16244_p12, %p16238_p9 }
 0xae1   :  { %14767 = vperm.xlu0 %14765, %v14754_v39  }
 0xae2   :  { %13448 = vmatprep.mubr.msk.bf16.mxu0 %vm3624_vm6, %v4704_v31  ;;  %14759 = vset.pattern.permute.xlu1 %v21618_v47 }
 0xae3   :  { %14761 = vperm.xlu1 %14759, %v14749_v23  }
 0xb4a   :  { %v4711_v36 = vpop.permute.xlu0 %4710 }
 0xb4b   :  { %v4718_v51 = vsel %vm3624_vm6, %v4701_v60, %v4711_v36 }
 0xb4c   :  { %v4709_v38 = vpop.permute.xlu1 %4708 }
 0xb4d   :  { %v4714_v2 = vsel %vm3624_vm6, %v4700_v61, %v4709_v38 }
 0xb4e   :  { %4831 = vmatmul.mubr.bf16.vlgmr.msra.gmra.mxu0 %v4714_v2 }
 0xb4f   :  { %13449 = vmatprep.mubr.msk.bf16.mxu0 %vm3624_vm6, %v4705_v21  ;;  %14423 = vmatpush3.bf16.msra.mxu0 %v15073_v35 }
 0xb50   :  { %14424 = vmatprep.subr.bf16.mxu0 %v15074_v63 }
 0xb53   :  { %14425 = vmatpush3.bf16.msra.mxu0 %v15075_v29 }
 0xb54   :  { %14426 = vmatprep.subr.bf16.mxu0 %v15076_v20 }
 0xb56   :  { %4839 = vmatmul.mubr.bf16.gmra.mxu0 %v4718_v51 }
 0xb57   :  { %14427 = vmatpush3.bf16.msra.mxu0 %v15077_v27 }
 0xb58   :  { %14428 = vmatprep.subr.bf16.mxu0 %v15078_v43  ;;  %v4549_v43 = vld [vmem:[#allocation12 + $0x4] sm:$0x1] }
 0xb5b   :  { %14429 = vmatpush3.bf16.msra.mxu0 %v15079_v32 }
 0xb5c   :  { %14430 = vmatprep.subr.bf16.mxu0 %v15080_v59 }
 0xb5f   :  { %14431 = vmatpush3.bf16.msra.mxu0 %v15081_v56  ;;  %v4550_v56 = vld [vmem:[#allocation14 + $0x4] sm:$0x1] }
 0xb60   :  { %14432 = vmatprep.subr.bf16.mxu0 %v15082_v0 }
 0xb63   :  { %14433 = vmatpush3.bf16.msra.mxu0 %v15083_v62 }
 0xb64   :  { %14434 = vmatprep.subr.bf16.mxu0 %v15084_v45 }
 0xb67   :  { %14435 = vmatpush3.bf16.msra.mxu0 %v15085_v54 }
 0xb68   :  { %14436 = vmatprep.subr.bf16.mxu0 %v15086_v34 }
 0xb6b   :  { %14437 = vmatpush3.bf16.msra.mxu0 %v15087_v3 }
 0xb6c   :  { %14629 = vmatprep.subr.bf16.mxu0 %v19786_v44 }
 0xc0e   :  { %v4832_v37 = vpop.f32.mrf.mxu0 }
 0xc0f   :  { %v4858_v26 = vmul.f32 %v4832_v37, %v4832_v37 }
 0xc10   :  { %v4834_v33 = vpop.f32.mrf.mxu0 }
 0xc12   :  { %v4835_v40 = vpop.f32.mrf.mxu0 }
 0xc13   :  { %v4859_v19 = vmul.f32 %v4835_v40, %v4835_v40  ;;  %v4847_v61 = vadd.f32 %v4835_v40, %v4832_v37 }
 0xc14   :  { %v4837_v58 = vpop.f32.mrf.mxu0 }
 0xc15   :  { %v4862_v41 = vadd.f32 %v4859_v19, %v4858_v26  ;;  %v14751_v26 = vpop.permute.xlu1 %14750 }
 0xc16   :  { %v4840_v60 = vpop.f32.mrf.mxu0 }
 0xc17   :  { %v4860_v53 = vmul.f32 %v4840_v60, %v4840_v60  ;;  %v4848_v24 = vadd.f32 %v4847_v61, %v4840_v60 }
 0xc18   :  { %v4842_v17 = vpop.f32.mrf.mxu0 }
 0xc19   :  { %v4863_v46 = vadd.f32 %v4862_v41, %v4860_v53 }
 0xc1a   :  { %v4843_v57 = vpop.f32.mrf.mxu0 }
 0xc1b   :  { %v4849_v30 = vadd.f32 %v4848_v24, %v4843_v57  ;;  %v4861_v39 = vmul.f32 %v4843_v57, %v4843_v57 }
 0xc1c   :  { %v4845_v25 = vpop.f32.mrf.mxu0 }
 0xc1d   :  { %v4850_v1 = vrot.slane %v4849_v30, 4  ;;  %v4864_v28 = vadd.f32 %v4863_v46, %v4861_v39  ;;  %v14753_v39 = vunpack.i.h.bf16 %v14751_v26  ;;  %v14752_v25 = vunpack.i.l.bf16 %v14751_v26 }
 0xc1f   :  { %v4851_v16 = vadd.f32 %v4850_v1, %v4849_v30  ;;  %v4865_v50 = vrot.slane %v4864_v28, 4 }
 0xc21   :  { %v4852_v23 = vrot.slane %v4851_v16, 2  ;;  %v4866_v49 = vadd.f32 %v4865_v50, %v4864_v28  ;;  %v14762_v50 = vpop.permute.xlu1 %14761 }
 0xc23   :  { %v4853_v21 = vadd.f32 %v4852_v23, %v4851_v16  ;;  %v4867_v22 = vrot.slane %v4866_v49, 2 }
 0xc25   :  { %v4854_v31 = vrot.slane %v4853_v21, 1  ;;  %v4868_v38 = vadd.f32 %v4867_v22, %v4866_v49 }
 0xc27   :  { %v4855_v2 = vadd.f32 %v4854_v31, %v4853_v21  ;;  %v4869_v36 = vrot.slane %v4868_v38, 1 }
 0xc29   :  { %v4857_v51 = vmul.f32 0.03125, %v4855_v2  ;;  %v4870_v52 = vadd.f32 %v4869_v36, %v4868_v38  ;;  %v14756_v38 = vpop.permute.xlu0 %14755  ;;  %v14764_v36 = vunpack.i.h.bf16 %v14762_v50 }
 0xc2b   :  { %v4871_v35 = vmul.f32 0.03125, %v4870_v52  ;;  %v4872_v63 = vmul.f32 %v4857_v51, %v4857_v51  ;;  %v14763_v52 = vunpack.i.l.bf16 %v14762_v50 }
 0xc2d   :  { %v4873_v29 = vsub.f32 %v4871_v35, %v4872_v63 }
 0xc2f   :  { %v4874_v20 = vmax.f32 %v4873_v29, 0.0 }
 0xc31   :  { %v4875_v27 = vadd.f32 1e-05, %v4874_v20  ;;  %v14758_v20 = vunpack.i.h.bf16 %v14756_v38 }
 0xc33   :  { %15108 = vrsqrt.f32 %v4875_v27  ;;  %v14757_v27 = vunpack.i.l.bf16 %v14756_v38 }
 0xc40   :  { %v15109_v32 = vpop.eup %15108 }
 0xc41   :  { %v4877_v59 = vmul.f32 %v15109_v32, %v4549_v43 }
 0xc43   :  { %v4882_v0 = vrot.slane %v4877_v59, %v18164_v18  ;;  %v4888_v62 = vmul.f32 %v4877_v59, %v4857_v51  ;;  %v15089_v51 = vld [vmem:[#allocation24 + $0xb0] sm:$0xff]   ;;  %v15090_v59 = vld [vmem:[#allocation24 + $0xa8] sm:$0xff]  }
 0xc45   :  { %v4889_v45 = vsub.f32 %v4550_v56, %v4888_v62  ;;  %v4887_v54 = vmul.f32 %v4882_v0, %v4843_v57  ;;  %v4884_v3 = vmul.f32 %v4882_v0, %v4832_v37  ;;  %v4885_v33 = vmul.f32 %v4882_v0, %v4835_v40 }
 0xc46   :  { %v4886_v58 = vmul.f32 %v4882_v0, %v4840_v60 }
 0xc47   :  { %v4894_v34 = vrot.slane %v4889_v45, %v18164_v18 }
 0xc49   :  { %v4899_v19 = vadd.f32 %v4894_v34, %v4887_v54  ;;  %v4896_v61 = vadd.f32 %v4894_v34, %v4884_v3  ;;  %v4897_v53 = vadd.f32 %v4894_v34, %v4885_v33  ;;  %v4898_v17 = vadd.f32 %v4894_v34, %v4886_v58  ;;  %v15091_v34 = vld [vmem:[#allocation24 + $0xa0] sm:$0xff]   ;;  %v15092_v33 = vld [vmem:[#allocation24 + $0x98] sm:$0xff]   ;;  %v15094_v58 = vld [vmem:[#allocation24 + $0x88] sm:$0xff]  }
 0xc4b   :  { %v19791_v41 = vmax.f32 %v4899_v19, 0.0  ;;  %v19793_v24 = vmax.f32 %v4896_v61, 0.0  ;;  %v4901_v46 = vmax.f32 %v4897_v53, 0.0  ;;  %v19795_v30 = vmax.f32 %v4898_v17, 0.0  ;;  %v14768_v19 = vpop.permute.xlu0 %14767  ;;  %v15095_v17 = vld [vmem:[#allocation24 + $0x80] sm:$0xff]  }
 0xc4c   :  { %v14770_v61 = vunpack.i.h.bf16 %v14768_v19  ;;  %v14769_v53 = vunpack.i.l.bf16 %v14768_v19 }
 0xc4d   :  { %v4907_v57 = vrot.slane %v19791_v41, 7  ;;  %v4912_v37 = vrot.slane %v19793_v24, 7  ;;  %v4913_v40 = vrot.slane %v4901_v46, 7  ;;  %v4904_v60 = vpack.c.bf16 %v4901_v46, %v19793_v24 }
 0xc4e   :  { %v4953_v16 = vrot.slane %v19793_v24, 1  ;;  %v4915_v23 = vrot.slane %v19795_v30, 7  ;;  %v4956_v22 = vrot.slane %v19795_v30, 1  ;;  %v4954_v31 = vrot.slane %v4901_v46, 1 }
 0xc4f   :  { %v4914_v1 = vsel %vm2468_vm5, %v4912_v37, %v4913_v40  ;;  %v4922_v28 = vsel %vm2468_vm5, %v4907_v57, %v4912_v37  ;;  %5164 = vmatprep.mubr.bf16.mxu0 %v4904_v60  ;;  %v4905_v35 = vpack.c.bf16 %v19791_v41, %v19795_v30  ;;  %v4958_v26 = vrot.slane %v19791_v41, 1  ;;  %v15097_v37 = vld [vmem:[#allocation26 + $0x10] sm:$0xff]   ;;  %v15098_v41 = vld [vmem:[#allocation26 + $0x8] sm:$0xff]  }
 0xc50   :  { %v4947_v49 = vmul.f32 %v14752_v25, %v4922_v28  ;;  %v4948_v21 = vmul.f32 %v14753_v39, %v4914_v1  ;;  %v4916_v63 = vsel %vm2468_vm5, %v4913_v40, %v4915_v23  ;;  %v4917_v29 = vsel %vm2468_vm5, %v4915_v23, %v4907_v57  ;;  %v15096_v25 = vld [vmem:[#allocation26 + $0x18] sm:$0xff]   ;;  %v15099_v40 = vld [vmem:[#allocation26] sm:$0xff]  }
 0xc51   :  { %v4955_v43 = vsel %vm3937_vm8, %v4953_v16, %v4954_v31  ;;  %v4957_v32 = vsel %vm3937_vm8, %v4954_v31, %v4956_v22  ;;  %v4949_v56 = vmul.f32 %v14757_v27, %v4916_v63  ;;  %v4950_v0 = vmul.f32 %v14758_v20, %v4917_v29 }
 0xc52   :  { %v4951_v2 = vpack.c.bf16 %v4948_v21, %v4947_v49  ;;  %v4982_v62 = vmul.f32 %v14763_v52, %v4955_v43  ;;  %v4983_v45 = vmul.f32 %v14764_v36, %v4957_v32  ;;  %v4959_v24 = vsel %vm3937_vm8, %v4956_v22, %v4958_v26 }
 0xc53   :  { %v4952_v54 = vpack.c.bf16 %v4950_v0, %v4949_v56  ;;  %v4965_v46 = vsel %vm3937_vm8, %v4958_v26, %v4953_v16  ;;  %v4984_v30 = vmul.f32 %v14769_v53, %v4959_v24 }
 0xc54   :  { %5165 = vmatmul.mubr.bf16.vlgmr.msra.gmra.mxu0 %v4951_v2  ;;  %v4986_v3 = vpack.c.bf16 %v4983_v45, %v4982_v62  ;;  %v4985_v39 = vmul.f32 %v14770_v61, %v4965_v46 }
 0xc55   :  { %14630 = vmatpush3.bf16.msra.mxu0 %v19786_v44  ;;  %5172 = vmatprep.mubr.bf16.mxu0 %v4905_v35  ;;  %v15093_v44 = vld [vmem:[#allocation24 + $0x90] sm:$0xff]  }
 0xc56   :  { %14631 = vmatprep.subr.bf16.mxu0 %v15089_v51  ;;  %v4987_v57 = vpack.c.bf16 %v4985_v39, %v4984_v30 }
 0xc59   :  { %14632 = vmatpush3.bf16.msra.mxu0 %v15089_v51 }
 0xc5a   :  { %14633 = vmatprep.subr.bf16.mxu0 %v15090_v59 }
 0xc5c   :  { %5173 = vmatmul.mubr.bf16.gmra.mxu0 %v4952_v54 }
 0xc5d   :  { %14634 = vmatpush3.bf16.msra.mxu0 %v15090_v59  ;;  %14645 = vmatprep.mubr.bf16.mxu0 %v4986_v3 }
 0xc5e   :  { %14635 = vmatprep.subr.bf16.mxu0 %v15091_v34 }
 0xc61   :  { %14636 = vmatpush3.bf16.msra.mxu0 %v15091_v34 }
 0xc62   :  { %14637 = vmatprep.subr.bf16.mxu0 %v15092_v33 }
 0xc65   :  { %14638 = vmatpush3.bf16.msra.mxu0 %v15092_v33 }
 0xc66   :  { %14639 = vmatprep.subr.bf16.mxu0 %v15093_v44 }
 0xc69   :  { %14640 = vmatpush3.bf16.msra.mxu0 %v15093_v44 }
 0xc6a   :  { %14641 = vmatprep.subr.bf16.mxu0 %v15094_v58 }
 0xc6d   :  { %14642 = vmatpush3.bf16.msra.mxu0 %v15094_v58 }
 0xc6e   :  { %14643 = vmatprep.subr.bf16.mxu0 %v15095_v17 }
 0xc71   :  { %14644 = vmatpush3.bf16.msra.mxu0 %v15095_v17 }
 0xc72   :  { %14649 = vmatprep.subr.bf16.mxu0 %v15096_v25 }
 0xc74   :  { %14646 = vmatmul.mubr.bf16.vlgmr.msra.gmra.mxu0 %v4987_v57 }
 0xc75   :  { %14650 = vmatpush3.bf16.msra.mxu0 %v15096_v25  ;;  %14657 = vmatprep.mubr.msk.bf16.mxu0 %vm3624_vm6, %v19771_v48 }
 0xc76   :  { %14651 = vmatprep.subr.bf16.mxu0 %v15097_v37 }
 0xc79   :  { %14652 = vmatpush3.bf16.msra.mxu0 %v15097_v37 }
 0xc7a   :  { %14653 = vmatprep.subr.bf16.mxu0 %v15098_v41 }
 0xc7d   :  { %14654 = vmatpush3.bf16.msra.mxu0 %v15098_v41 }
 0xc7e   :  { %14655 = vmatprep.subr.bf16.mxu0 %v15099_v40 }
 0xc81   :  { %14656 = vmatpush3.bf16.msra.mxu0 %v15099_v40 }
 0xc84   :  { %14658 = vmatmul.mubr.msk.bf16.vlgmr.msra.gmra.mxu0 %vm3624_vm6, %v19769_v42 }
 0xc85   :  { %16248 = shalt.err (!%p16245_p13)  }
 0xc86   :  { %914 = dma.hbm_to_vmem [thread:$0]  %s20977_s26, 49152, %s912_s7, [#allocation8 + $0x4] }
 0xc87   :  { %s16257_s20 = scalar_lea.vmem %s924_s22, 8192  ;;  %p16262_p1 = scmp.lt.s32.totalorder %s924_s22, %s924_s22 }
 0xc88   :  { %p16258_p0 = scmp.ne.s32.totalorder %s924_s22, %s16257_s20  ;;  %p16263_p2 = scmp.lt.s32.totalorder %s16257_s20, %s16257_s20 }
 0xc8a   :  { %p16264_p3 = por %p16263_p2, %p16262_p1 }
 0xc8c   :  { %p16265_p4 = pnand %p16264_p3, %p16258_p0 }
 0xc8e   :  { %16268 = shalt.err (!%p16265_p4)  }
 0xc8f   :  { %926 = dma.hbm_to_vmem [thread:$0]  %s20978_s27, 8192, %s924_s22, [#allocation8 + $0x5] }
 0xd14   :  { %v14438_v42 = vpop.f32.mrf.mxu0 }
 0xd16   :  { %v14439_v48 = vpop.f32.mrf.mxu0 }
 0xd17   :  { %v14440_v22 = vadd.f32 %v14439_v48, %v14438_v42 }
 0xd18   :  { %v14441_v60 = vpop.f32.mrf.mxu0 }
 0xd1a   :  { %v14442_v1 = vpop.f32.mrf.mxu0 }
 0xd1b   :  { %v14443_v38 = vadd.f32 %v14442_v1, %v14441_v60 }
 0xd1c   :  { %v14444_v28 = vpop.f32.mrf.mxu0 }
 0xd1e   :  { %v14445_v16 = vpop.f32.mrf.mxu0 }
 0xd1f   :  { %v14446_v2 = vadd.f32 %v14445_v16, %v14444_v28 }
 0xd20   :  { %v14447_v50 = vpop.f32.mrf.mxu0 }
 0xd22   :  { %v14448_v23 = vpop.f32.mrf.mxu0 }
 0xd23   :  { %v14449_v52 = vadd.f32 %v14448_v23, %v14447_v50 }
 0xd34   :  { %v14647_v49 = vpop.f32.mrf.mxu0 }
 0xd35   :  { %v19827_v35 = vadd.f32 %v14647_v49, %v14446_v2 }
 0xd36   :  { %v5215_v21 = vpop.f32.mrf.mxu0 }
 0xd37   :  { %v19825_v36 = vadd.f32 %v14440_v22, %v5215_v21  ;;  %v5242_v32 = vmul.f32 %v19827_v35, %v19827_v35 }
 0xd38   :  { %v14648_v31 = vpop.f32.mrf.mxu0 }
 0xd39   :  { %v5240_v29 = vmul.f32 %v19825_v36, %v19825_v36  ;;  %v19833_v20 = vadd.f32 %v14648_v31, %v14449_v52 }
 0xd3a   :  { %v5218_v51 = vpop.f32.mrf.mxu0 }
 0xd3b   :  { %v19829_v63 = vadd.f32 %v14443_v38, %v5218_v51  ;;  %v5243_v0 = vmul.f32 %v19833_v20, %v19833_v20 }
 0xd3d   :  { %v5230_v27 = vadd.f32 %v19829_v63, %v19825_v36  ;;  %v5241_v43 = vmul.f32 %v19829_v63, %v19829_v63 }
 0xd3f   :  { %v5231_v59 = vadd.f32 %v5230_v27, %v19827_v35  ;;  %v5244_v56 = vadd.f32 %v5241_v43, %v5240_v29 }
 0xd41   :  { %v5232_v62 = vadd.f32 %v5231_v59, %v19833_v20  ;;  %v5245_v45 = vadd.f32 %v5244_v56, %v5242_v32 }
 0xd43   :  { %v5233_v54 = vrot.slane %v5232_v62, 4  ;;  %v5246_v34 = vadd.f32 %v5245_v45, %v5243_v0 }
 0xd44   :  { %v19845_v3 = vpop.f32.mrf.mxu0 }
 0xd45   :  { %v5234_v33 = vadd.f32 %v5233_v54, %v5232_v62  ;;  %v5247_v44 = vrot.slane %v5246_v34, 4  ;;  %v5373_v37 = vmul.f32 %v19845_v3, %v19845_v3 }
 0xd46   :  { %v19847_v58 = vpop.f32.mrf.mxu0 }
 0xd47   :  { %v5235_v19 = vrot.slane %v5234_v33, 2  ;;  %v5248_v26 = vadd.f32 %v5247_v44, %v5246_v34  ;;  %v5371_v24 = vmul.f32 %v19847_v58, %v19847_v58 }
 0xd48   :  { %v19849_v61 = vpop.f32.mrf.mxu0 }
 0xd49   :  { %v5236_v53 = vadd.f32 %v5235_v19, %v5234_v33  ;;  %v5249_v17 = vrot.slane %v5248_v26, 2  ;;  %v5374_v60 = vmul.f32 %v19849_v61, %v19849_v61 }
 0xd4a   :  { %v5349_v46 = vpop.f32.mrf.mxu0 }
 0xd4b   :  { %v5237_v30 = vrot.slane %v5236_v53, 1  ;;  %v5250_v39 = vadd.f32 %v5249_v17, %v5248_v26  ;;  %v5361_v25 = vadd.f32 %v5349_v46, %v19847_v58  ;;  %v5372_v57 = vmul.f32 %v5349_v46, %v5349_v46  ;;  %v4551_v17 = vld [vmem:[#allocation12 + $0x5] sm:$0x1] }
 0xd4d   :  { %v5238_v41 = vadd.f32 %v5237_v30, %v5236_v53  ;;  %v5251_v40 = vrot.slane %v5250_v39, 1  ;;  %v5362_v42 = vadd.f32 %v19845_v3, %v5361_v25  ;;  %v5375_v48 = vadd.f32 %v5372_v57, %v5371_v24  ;;  %v4553_v25 = vld [vmem:[#allocation12 + $0x6] sm:$0x1] }
 0xd4f   :  { %v5239_v1 = vmul.f32 0.03125, %v5238_v41  ;;  %v5252_v28 = vadd.f32 %v5251_v40, %v5250_v39  ;;  %v5363_v16 = vadd.f32 %v19849_v61, %v5362_v42  ;;  %v5376_v50 = vadd.f32 %v5375_v48, %v5373_v37  ;;  %v4552_v39 = vld [vmem:[#allocation14 + $0x5] sm:$0x1]  ;;  %v4554_v42 = vld [vmem:[#allocation14 + $0x6] sm:$0x1] }
 0xd51   :  { %v5253_v23 = vmul.f32 0.03125, %v5252_v28  ;;  %v5254_v49 = vmul.f32 %v5239_v1, %v5239_v1  ;;  %v5364_v21 = vrot.slane %v5363_v16, 4  ;;  %v5377_v22 = vadd.f32 %v5376_v50, %v5374_v60 }
 0xd53   :  { %v5255_v31 = vsub.f32 %v5253_v23, %v5254_v49  ;;  %v5365_v38 = vadd.f32 %v5364_v21, %v5363_v16  ;;  %v5378_v2 = vrot.slane %v5377_v22, 4 }
 0xd55   :  { %v5256_v51 = vmax.f32 %v5255_v31, 0.0  ;;  %v5366_v52 = vrot.slane %v5365_v38, 2  ;;  %v5379_v29 = vadd.f32 %v5378_v2, %v5377_v22 }
 0xd57   :  { %v5367_v27 = vadd.f32 %v5366_v52, %v5365_v38  ;;  %v5380_v43 = vrot.slane %v5379_v29, 2  ;;  %v5257_v32 = vadd.f32 1e-05, %v5256_v51 }
 0xd59   :  { %v5368_v59 = vrot.slane %v5367_v27, 1  ;;  %v5381_v56 = vadd.f32 %v5380_v43, %v5379_v29  ;;  %15110 = vrsqrt.f32 %v5257_v32 }
 0xd5b   :  { %v5369_v0 = vadd.f32 %v5368_v59, %v5367_v27  ;;  %v5382_v62 = vrot.slane %v5381_v56, 1 }
 0xd5d   :  { %v5370_v45 = vmul.f32 0.03125, %v5369_v0  ;;  %v5383_v54 = vadd.f32 %v5382_v62, %v5381_v56 }
 0xd5f   :  { %v5384_v34 = vmul.f32 0.03125, %v5383_v54  ;;  %v5385_v33 = vmul.f32 %v5370_v45, %v5370_v45 }
 0xd61   :  { %v5386_v44 = vsub.f32 %v5384_v34, %v5385_v33 }
 0xd63   :  { %v5387_v19 = vmax.f32 %v5386_v44, 0.0 }
 0xd65   :  { %v5388_v26 = vadd.f32 1e-05, %v5387_v19 }
 0xd66   :  { %v15111_v53 = vpop.eup %15110 }
 0xd67   :  { %15112 = vrsqrt.f32 %v5388_v26  ;;  %v5259_v24 = vmul.f32 %v15111_v53, %v4551_v17 }
 0xd69   :  { %v5270_v30 = vmul.f32 %v5259_v24, %v5239_v1  ;;  %v5264_v40 = vrot.slane %v5259_v24, %v18164_v18 }
 0xd6b   :  { %v5271_v37 = vsub.f32 %v4552_v39, %v5270_v30  ;;  %v5267_v16 = vmul.f32 %v5264_v40, %v19829_v63  ;;  %v5268_v23 = vmul.f32 %v5264_v40, %v19827_v35  ;;  %v5269_v1 = vmul.f32 %v5264_v40, %v19833_v20 }
 0xd6c   :  { %v5266_v49 = vmul.f32 %v5264_v40, %v19825_v36 }
 0xd6d   :  { %v5276_v28 = vrot.slane %v5271_v37, %v18164_v18 }
 0xd6f   :  { %v5279_v51 = vadd.f32 %v5276_v28, %v5267_v16  ;;  %v5280_v52 = vadd.f32 %v5276_v28, %v5268_v23  ;;  %v5281_v29 = vadd.f32 %v5276_v28, %v5269_v1  ;;  %v5278_v63 = vadd.f32 %v5276_v28, %v5266_v49 }
 0xd74   :  { %v15113_v57 = vpop.eup %15112 }
 0xd75   :  { %v5390_v41 = vmul.f32 %v15113_v57, %v4553_v25 }
 0xd77   :  { %v5395_v48 = vrot.slane %v5390_v41, %v18164_v18  ;;  %v5401_v60 = vmul.f32 %v5390_v41, %v5370_v45 }
 0xd79   :  { %v5402_v50 = vsub.f32 %v4554_v42, %v5401_v60  ;;  %v5397_v21 = vmul.f32 %v5395_v48, %v19847_v58  ;;  %v5398_v22 = vmul.f32 %v5395_v48, %v5349_v46  ;;  %v5399_v31 = vmul.f32 %v19845_v3, %v5395_v48 }
 0xd7a   :  { %v5400_v38 = vmul.f32 %v19849_v61, %v5395_v48 }
 0xd7b   :  { %v5407_v2 = vrot.slane %v5402_v50, %v18164_v18 }
 0xd7d   :  { %v5409_v27 = vadd.f32 %v5407_v2, %v5397_v21  ;;  %v5410_v43 = vadd.f32 %v5407_v2, %v5398_v22  ;;  %v5411_v35 = vadd.f32 %v5407_v2, %v5399_v31  ;;  %v5412_v32 = vadd.f32 %v5407_v2, %v5400_v38 }
 0xd7f   :  { %v5413_v20 = vadd.f32 %v5409_v27, %v5278_v63  ;;  %v5414_v59 = vadd.f32 %v5410_v43, %v5279_v51  ;;  %v5415_v36 = vadd.f32 %v5411_v35, %v5280_v52  ;;  %v5416_v56 = vadd.f32 %v5412_v32, %v5281_v29 }
 0xd81   :  { %v5417_v58 = vmax.f32 %v5413_v20, 0.0  ;;  %v5418_v46 = vmax.f32 %v5414_v59, 0.0  ;;  %v5419_v0 = vmax.f32 %v5415_v36, 0.0  ;;  %v5420_v3 = vmax.f32 %v5416_v56, 0.0 }
 0xd83   :  { %v5421_v62 = vpack.c.bf16 %v5418_v46, %v5417_v58  ;;  %v5422_v61 = vpack.c.bf16 %v5420_v3, %v5419_v0 }
 0xd84   :  { %16301 = dma.done.wait [#allocation8], 6144 }
 0xd85   :  { %16302 = vsyncadd [#allocation8], 4294961152 }
 0xd86   :  { %16303 = dma.done.wait [#allocation8 + $0x1], 12288 }
 0xd87   :  { %16304 = vsyncadd [#allocation8 + $0x1], 4294955008 }
 0xd88   :  { %16305 = dma.done.wait [#allocation8 + $0x2], 2048 }
 0xd89   :  { %16306 = vsyncadd [#allocation8 + $0x2], 4294965248  ;;  %15114 = vset.pattern.permute.xlu0 %v21567_v55  ;;  %v16335_v45 = vmov 0.0   ;;  %vm16336_vm9 = vmmov 0   ;;  %v15126_v54 = vld [vmem:[%s20969_s18] sm:$0xff]   ;;  %v15127_v19 = vld [vmem:[%s20969_s18 + $0x8] sm:$0xff]  }
 0xd8a   :  { %14661 = vmatprep.subr.bf16.mxu0 %v16335_v45  ;;  %14665 = vmatprep.mubr.msk.bf16.mxu0 %vm16336_vm9, %v16335_v45  ;;  %v15129_v34 = vld [vmem:[#allocation2 + $0x70] ss:$8 sps:$4 sm:$0xff]   ;;  %v15131_v33 = vld [vmem:[#allocation2 + $0x74] ss:$8 sps:$4 sm:$0xff]   ;;  %v15134_v44 = vld [vmem:[#allocation2 + $0x64] ss:$8 sps:$4 sm:$0xff]  }
 0xd8b   :  { %14662 = vmatpush3.bf16.msra.mxu0 %v5422_v61  ;;  %v15132_v26 = vld [vmem:[#allocation2 + $0x60] ss:$8 sps:$4 sm:$0xff]   ;;  %v15137_v53 = vld [vmem:[#allocation2 + $0x54] ss:$8 sps:$4 sm:$0xff]   ;;  %v15135_v17 = vld [vmem:[#allocation2 + $0x50] ss:$8 sps:$4 sm:$0xff]  }
 0xd8c   :  { %14663 = vmatprep.subr.bf16.mxu0 %v16335_v45  ;;  %v15140_v24 = vld [vmem:[#allocation2 + $0x44] ss:$8 sps:$4 sm:$0xff]   ;;  %v15128_v30 = vld [vmem:[%s20969_s18 + $0x10] sm:$0xff]   ;;  %v15138_v39 = vld [vmem:[#allocation2 + $0x40] ss:$8 sps:$4 sm:$0xff]  }
 0xd8d   :  { %v15143_v25 = vld [vmem:[#allocation2 + $0x34] ss:$8 sps:$4 sm:$0xff]   ;;  %v15141_v57 = vld [vmem:[#allocation2 + $0x30] ss:$8 sps:$4 sm:$0xff]   ;;  %v15146_v37 = vld [vmem:[#allocation2 + $0x24] ss:$8 sps:$4 sm:$0xff]  }
 0xd8e   :  { %v15144_v41 = vld [vmem:[#allocation2 + $0x20] ss:$8 sps:$4 sm:$0xff]   ;;  %v15149_v40 = vld [vmem:[#allocation2 + $0x14] ss:$8 sps:$4 sm:$0xff]   ;;  %v15147_v42 = vld [vmem:[#allocation2 + $0x10] ss:$8 sps:$4 sm:$0xff]  }
 0xd8f   :  { %14664 = vmatpush3.bf16.msra.mxu0 %v5421_v62  ;;  %v15152_v48 = vld [vmem:[#allocation2 + $0x4] ss:$8 sps:$4 sm:$0xff]   ;;  %v15150_v60 = vld [vmem:[#allocation2] ss:$8 sps:$4 sm:$0xff]   ;;  %v15155_v28 = vld [vmem:[#allocation2 + $0xf4] ss:$8 sps:$4 sm:$0xff]  }
 0xd90   :  { %5933 = vmatprep.subr.bf16.mxu0 %v15131_v33  ;;  %v15153_v16 = vld [vmem:[#allocation2 + $0xf0] ss:$8 sps:$4 sm:$0xff]   ;;  %v15158_v50 = vld [vmem:[#allocation2 + $0xe4] ss:$8 sps:$4 sm:$0xff]   ;;  %v15156_v23 = vld [vmem:[#allocation2 + $0xe0] ss:$8 sps:$4 sm:$0xff]  }
 0xd91   :  { %v15161_v1 = vld [vmem:[#allocation2 + $0xd4] ss:$8 sps:$4 sm:$0xff]   ;;  %v15159_v49 = vld [vmem:[#allocation2 + $0xd0] ss:$8 sps:$4 sm:$0xff]   ;;  %v15164_v21 = vld [vmem:[#allocation2 + $0xc4] ss:$8 sps:$4 sm:$0xff]  }
 0xd92   :  { %14666 = vmatmul.mubr.msk.bf16.vlgmr.msra.gmra.mxu0 %vm1150_vm3, %v15126_v54  ;;  %v15162_v22 = vld [vmem:[#allocation2 + $0xc0] ss:$8 sps:$4 sm:$0xff]   ;;  %v15167_v31 = vld [vmem:[#allocation2 + $0xb4] ss:$8 sps:$4 sm:$0xff]   ;;  %v15165_v38 = vld [vmem:[#allocation2 + $0xb0] ss:$8 sps:$4 sm:$0xff]  }
 0xd93   :  { %14669 = vmatprep.mubr.msk.bf16.mxu0 %vm16336_vm9, %v16335_v45  ;;  %5934 = vmatpush1.bf16.msra.mxu0 %v15129_v34  ;;  %v15170_v2 = vld [vmem:[#allocation2 + $0xa4] ss:$8 sps:$4 sm:$0xff]   ;;  %v15168_v51 = vld [vmem:[#allocation2 + $0xa0] ss:$8 sps:$4 sm:$0xff]   ;;  %v15173_v52 = vld [vmem:[#allocation2 + $0x94] ss:$8 sps:$4 sm:$0xff]  }
 0xd94   :  { %5935 = vmatprep.subr.bf16.mxu0 %v15134_v44  ;;  %v15171_v29 = vld [vmem:[#allocation2 + $0x90] ss:$8 sps:$4 sm:$0xff]   ;;  %v15176_v63 = vld [vmem:[#allocation2 + $0x84] ss:$8 sps:$4 sm:$0xff]   ;;  %v15174_v27 = vld [vmem:[#allocation2 + $0x80] ss:$8 sps:$4 sm:$0xff]  }
 0xd95   :  { %v15179_v43 = vld [vmem:[#allocation2 + $0x174] ss:$8 sps:$4 sm:$0xff]   ;;  %v14358_v35 = vld [vmem:[%s20970_s19] sm:$0xff]  }
 0xd96   :  { %v14359_v32 = vunpack.c.l.bf16 %v14358_v35  ;;  %v14360_v20 = vunpack.c.h.bf16 %v14358_v35  ;;  %v15182_v33 = vld [vmem:[#allocation2 + $0x164] ss:$8 sps:$4 sm:$0xff]  }
 0xd97   :  { %5936 = vmatpush1.bf16.msra.mxu0 %v15132_v26  ;;  %v15185_v26 = vld [vmem:[#allocation2 + $0x154] ss:$8 sps:$4 sm:$0xff]  }
 0xd98   :  { %5937 = vmatprep.subr.bf16.mxu0 %v15137_v53  ;;  %v15115_v59 = vpack.i.bf16 %v14360_v20, %v14359_v32  ;;  %v21627_v32 = vld [vmem:[#allocation68_spill] sm:$0xff]  ;;  %v21628_v20 = vld [vmem:[#allocation67_spill] sm:$0xff] }
 0xd9a   :  { %14670 = vmatmul.mubr.msk.bf16.gmra.mxu0 %vm1150_vm3, %v15127_v19  ;;  %15116 = vperm.xlu0 %15114, %v15115_v59   ;;  %v15180_v19 = vld [vmem:[#allocation2 + $0x160] ss:$8 sps:$4 sm:$0xff]  }
 0xd9b   :  { %14673 = vmatprep.mubr.msk.bf16.mxu0 %vm16336_vm9, %v16335_v45  ;;  %5938 = vmatpush1.bf16.msra.mxu0 %v15135_v17  ;;  %v15177_v45 = vld [vmem:[#allocation2 + $0x170] ss:$8 sps:$4 sm:$0xff]  }
 0xd9c   :  { %5939 = vmatprep.subr.bf16.mxu0 %v15140_v24  ;;  %v15183_v24 = vld [vmem:[#allocation2 + $0x150] ss:$8 sps:$4 sm:$0xff]  }
 0xd9e   :  { %15120 = vset.pattern.permute.xlu0 %v21618_v47 }
 0xd9f   :  { %5940 = vmatpush1.bf16.msra.mxu0 %v15138_v39  ;;  %15122 = vperm.xlu0 %15120, %v15115_v59   ;;  %v13561_v59 = vcombine.high %v21628_v20, %v21627_v32 }
 0xda0   :  { %5941 = vmatprep.subr.bf16.mxu0 %v15143_v25  ;;  %v15186_v25 = vld [vmem:[#allocation2 + $0x140] ss:$8 sps:$4 sm:$0xff]  }
 0xda2   :  { %14674 = vmatmul.mubr.msk.bf16.gmra.mxu0 %vm1150_vm3, %v15128_v30  ;;  %v15188_v30 = vld [vmem:[#allocation2 + $0x144] ss:$8 sps:$4 sm:$0xff]  }
 0xda3   :  { %5942 = vmatpush1.bf16.msra.mxu0 %v15141_v57  ;;  %v15191_v57 = vld [vmem:[#allocation2 + $0x134] ss:$8 sps:$4 sm:$0xff]  }
 0xda4   :  { %5943 = vmatprep.subr.bf16.mxu0 %v15146_v37  ;;  %v15189_v37 = vld [vmem:[#allocation2 + $0x130] ss:$8 sps:$4 sm:$0xff]  }
 0xda7   :  { %5944 = vmatpush1.bf16.msra.mxu0 %v15144_v41  ;;  %v15194_v41 = vld [vmem:[#allocation2 + $0x124] ss:$8 sps:$4 sm:$0xff]  }
 0xda8   :  { %5945 = vmatprep.subr.bf16.mxu0 %v15149_v40  ;;  %v15192_v40 = vld [vmem:[#allocation2 + $0x120] ss:$8 sps:$4 sm:$0xff]  }
 0xdab   :  { %5946 = vmatpush1.bf16.msra.mxu0 %v15147_v42  ;;  %v15197_v42 = vld [vmem:[#allocation2 + $0x114] ss:$8 sps:$4 sm:$0xff]  }
 0xdac   :  { %5947 = vmatprep.subr.bf16.mxu0 %v15152_v48  ;;  %v15195_v48 = vld [vmem:[#allocation2 + $0x110] ss:$8 sps:$4 sm:$0xff]  }
 0xdaf   :  { %5948 = vmatpush1.bf16.msra.mxu0 %v15150_v60  ;;  %v15200_v60 = vld [vmem:[#allocation2 + $0x104] ss:$8 sps:$4 sm:$0xff]  }
 0xdb0   :  { %5949 = vmatprep.subr.bf16.mxu0 %v15155_v28  ;;  %v15198_v28 = vld [vmem:[#allocation2 + $0x100] ss:$8 sps:$4 sm:$0xff]  }
 0xdb3   :  { %5950 = vmatpush2.bf16.msra.mxu0 %v15153_v16 }
 0xdb4   :  { %5951 = vmatprep.subr.bf16.mxu0 %v15158_v50  ;;  %v13549_v50 = vcombine.high %v16614_v14, %v16619_v15 }
 0xdb7   :  { %5952 = vmatpush2.bf16.msra.mxu0 %v15156_v23  ;;  %v13548_v23 = vcombine.low %v16614_v14, %v16619_v15  ;;  %v13543_v14 = vcombine.high %v16584_v8, %v16589_v9  ;;  %v13542_v15 = vcombine.low %v16584_v8, %v16589_v9  ;;  %v21620_v8 = vld [vmem:[#allocation55_spill] sm:$0xff] }
 0xdb8   :  { %5953 = vmatprep.subr.bf16.mxu0 %v15161_v1  ;;  %v13547_v1 = vcombine.high %v16604_v12, %v16609_v13 }
 0xdbb   :  { %5954 = vmatpush2.bf16.msra.mxu0 %v15159_v49  ;;  %v13546_v49 = vcombine.low %v16604_v12, %v16609_v13  ;;  %v13541_v12 = vcombine.high %v16574_v6, %v16579_v7  ;;  %v13540_v13 = vcombine.low %v16574_v6, %v16579_v7  ;;  %v21622_v6 = vld [vmem:[#allocation53_spill] sm:$0xff] }
 0xdbc   :  { %5955 = vmatprep.subr.bf16.mxu0 %v15164_v21  ;;  %v13545_v21 = vcombine.high %v16594_v10, %v16599_v11 }
 0xdbf   :  { %5956 = vmatpush2.bf16.msra.mxu0 %v15162_v22  ;;  %v13544_v22 = vcombine.low %v16594_v10, %v16599_v11  ;;  %v13539_v10 = vcombine.high %v16564_v4, %v16569_v5  ;;  %v13538_v11 = vcombine.low %v16564_v4, %v16569_v5  ;;  %v21624_v4 = vld [vmem:[#allocation71_spill] sm:$0xff] }
 0xdc0   :  { %5957 = vmatprep.subr.bf16.mxu0 %v15167_v31  ;;  %v21619_v31 = vld [vmem:[#allocation56_spill] sm:$0xff] }
 0xdc1   :  { %v13537_v9 = vcombine.high %v21620_v8, %v21619_v31 }
 0xdc3   :  { %5958 = vmatpush2.bf16.msra.mxu0 %v15165_v38  ;;  %v13536_v38 = vcombine.low %v21620_v8, %v21619_v31 }
 0xdc4   :  { %5959 = vmatprep.subr.bf16.mxu0 %v15170_v2  ;;  %v21621_v2 = vld [vmem:[#allocation54_spill] sm:$0xff] }
 0xdc5   :  { %v13535_v7 = vcombine.high %v21622_v6, %v21621_v2 }
 0xdc7   :  { %5960 = vmatpush2.bf16.msra.mxu0 %v15168_v51  ;;  %v13534_v51 = vcombine.low %v21622_v6, %v21621_v2 }
 0xdc8   :  { %5961 = vmatprep.subr.bf16.mxu0 %v15173_v52  ;;  %v21623_v52 = vld [vmem:[#allocation72_spill] sm:$0xff] }
 0xdc9   :  { %v13565_v5 = vcombine.high %v21624_v4, %v21623_v52 }
 0xdcb   :  { %5962 = vmatpush2.bf16.msra.mxu0 %v15171_v29  ;;  %v13564_v29 = vcombine.low %v21624_v4, %v21623_v52 }
 0xdcc   :  { %5963 = vmatprep.subr.bf16.mxu0 %v15176_v63  ;;  %v21625_v63 = vld [vmem:[#allocation70_spill] sm:$0xff] }
 0xdcf   :  { %5964 = vmatpush2.bf16.msra.mxu0 %v15174_v27  ;;  %v21626_v27 = vld [vmem:[#allocation69_spill] sm:$0xff] }
 0xdd0   :  { %5976 = vmatprep.subr.bf16.mxu0 %v15179_v43  ;;  %v13563_v43 = vcombine.high %v21626_v27, %v21625_v63  ;;  %v13562_v35 = vcombine.low %v21626_v27, %v21625_v63 }
 0xe52   :  { %v5667_v36 = vpop.f32.mrf.mxu0 }
 0xe54   :  { %v14667_v56 = vpop.f32.mrf.mxu0 }
 0xe55   :  { %v21629_v56 = vld [vmem:[#allocation66_spill] sm:$0xff] }
 0xe56   :  { %v5670_v58 = vpop.f32.mrf.mxu0 }
 0xe57   :  { %v5690_v54 = vpack.c.bf16 %v5670_v58, %v5667_v36  ;;  %v13560_v36 = vcombine.low %v21628_v20, %v21627_v32  ;;  %v21630_v58 = vld [vmem:[#allocation65_spill] sm:$0xff] }
 0xe58   :  { %v14668_v46 = vpop.f32.mrf.mxu0 }
 0xe59   :  { %v13559_v46 = vcombine.high %v21630_v58, %v21629_v56 }
 0xe5a   :  { %v5675_v0 = vpop.f32.mrf.mxu0 }
 0xe5c   :  { %v14671_v3 = vpop.f32.mrf.mxu0 }
 0xe5d   :  { %v21631_v3 = vld [vmem:[#allocation64_spill] sm:$0xff] }
 0xe5e   :  { %v5678_v62 = vpop.f32.mrf.mxu0 }
 0xe5f   :  { %v19891_v61 = vpack.c.bf16 %v5678_v62, %v5675_v0  ;;  %v13558_v0 = vcombine.low %v21630_v58, %v21629_v56  ;;  %v21632_v62 = vld [vmem:[#allocation63_spill] sm:$0xff] }
 0xe60   :  { %v14672_v34 = vpop.f32.mrf.mxu0 }
 0xe61   :  { %5965 = vmatprep.mubr.bf16.mxu0 %v19891_v61  ;;  %v21633_v34 = vld [vmem:[#allocation62_spill] sm:$0xff] }
 0xe62   :  { %5966 = vmatmul.mubr.bf16.vlgmr.msra.gmra.mxu0 %v5690_v54  ;;  %v5683_v44 = vpop.f32.mrf.mxu0  ;;  %v13556_v54 = vcombine.low %v21632_v62, %v21631_v3 }
 0xe63   :  { %5977 = vmatpush1.bf16.msra.mxu0 %v15177_v45  ;;  %6008 = vmatprep.mubr.bf16.mxu0 %v21567_v55  ;;  %v13557_v45 = vcombine.high %v21632_v62, %v21631_v3 }
 0xe64   :  { %5978 = vmatprep.subr.bf16.mxu0 %v15182_v33  ;;  %v14675_v53 = vpop.f32.mrf.mxu0  ;;  %v21634_v33 = vld [vmem:[#allocation61_spill] sm:$0xff] }
 0xe65   :  { %v21636_v53 = vld [vmem:[#allocation59_spill] sm:$0xff] }
 0xe66   :  { %v5686_v17 = vpop.f32.mrf.mxu0 }
 0xe67   :  { %5979 = vmatpush1.bf16.msra.mxu0 %v15180_v19  ;;  %v5692_v16 = vpack.c.bf16 %v5686_v17, %v5683_v44  ;;  %v13555_v44 = vcombine.high %v21634_v33, %v21633_v34  ;;  %v13554_v19 = vcombine.low %v21634_v33, %v21633_v34 }
 0xe68   :  { %5980 = vmatprep.subr.bf16.mxu0 %v15185_v26  ;;  %v14676_v39 = vpop.f32.mrf.mxu0  ;;  %v21635_v26 = vld [vmem:[#allocation60_spill] sm:$0xff] }
 0xe69   :  { %v13553_v17 = vcombine.high %v21636_v53, %v21635_v26  ;;  %v21638_v39 = vld [vmem:[#allocation57_spill] sm:$0xff] }
 0xe6b   :  { %5981 = vmatpush1.bf16.msra.mxu0 %v15183_v24  ;;  %v13552_v24 = vcombine.low %v21636_v53, %v21635_v26 }
 0xe6c   :  { %5982 = vmatprep.subr.bf16.mxu0 %v15188_v30  ;;  %v21637_v30 = vld [vmem:[#allocation58_spill] sm:$0xff] }
 0xe6f   :  { %5983 = vmatpush1.bf16.msra.mxu0 %v15186_v25  ;;  %v13551_v25 = vcombine.high %v21638_v39, %v21637_v30 }
 0xe70   :  { %5984 = vmatprep.subr.bf16.mxu0 %v15191_v57  ;;  %v13550_v57 = vcombine.low %v21638_v39, %v21637_v30 }
 0xe73   :  { %5985 = vmatpush1.bf16.msra.mxu0 %v15189_v37  ;;  %v21639_v37 = vld [vmem:[#allocation88_spill] sm:$0xff] }
 0xe74   :  { %5986 = vmatprep.subr.bf16.mxu0 %v15194_v41  ;;  %v21640_v41 = vld [vmem:[#allocation87_spill] sm:$0xff] }
 0xe77   :  { %5987 = vmatpush1.bf16.msra.mxu0 %v15192_v40  ;;  %v13581_v40 = vcombine.high %v21640_v41, %v21639_v37 }
 0xe78   :  { %5988 = vmatprep.subr.bf16.mxu0 %v15197_v42 }
 0xe7b   :  { %5989 = vmatpush1.bf16.msra.mxu0 %v15195_v48 }
 0xe7c   :  { %5990 = vmatprep.subr.bf16.mxu0 %v15200_v60 }
 0xe7f   :  { %5991 = vmatpush1.bf16.msra.mxu0 %v15198_v28 }
 0xe80   :  { %6686 = vmatprep.subr.bf16.mxu0 %v13549_v50 }
 0xe82   :  { %6009 = vmatmul.mubr.bf16.vlgmr.msra.gmra.mxu0 %v5692_v16 }
 0xe83   :  { %6687 = vmatpush1.bf16.msra.mxu0 %v13548_v23 }
 0xe84   :  { %6688 = vmatprep.subr.bf16.mxu0 %v13547_v1 }
 0xe87   :  { %6689 = vmatpush1.bf16.msra.mxu0 %v13546_v49 }
 0xe88   :  { %6690 = vmatprep.subr.bf16.mxu0 %v13545_v21 }
 0xe8b   :  { %6691 = vmatpush1.bf16.msra.mxu0 %v13544_v22 }
 0xe8c   :  { %6692 = vmatprep.subr.bf16.mxu0 %v13543_v14 }
 0xe8f   :  { %6693 = vmatpush1.bf16.msra.mxu0 %v13542_v15 }
 0xe90   :  { %6694 = vmatprep.subr.bf16.mxu0 %v13541_v12 }
 0xe93   :  { %6695 = vmatpush1.bf16.msra.mxu0 %v13540_v13 }
 0xe94   :  { %6696 = vmatprep.subr.bf16.mxu0 %v13539_v10 }
 0xe97   :  { %6697 = vmatpush1.bf16.msra.mxu0 %v13538_v11 }
 0xe98   :  { %6698 = vmatprep.subr.bf16.mxu0 %v13537_v9 }
 0xe9b   :  { %6699 = vmatpush1.bf16.msra.mxu0 %v13536_v38 }
 0xe9c   :  { %6700 = vmatprep.subr.bf16.mxu0 %v13535_v7 }
 0xe9f   :  { %6701 = vmatpush1.bf16.msra.mxu0 %v13534_v51 }
 0xea0   :  { %6702 = vmatprep.subr.bf16.mxu0 %v13565_v5 }
 0xea3   :  { %6703 = vmatpush2.bf16.msra.mxu0 %v13564_v29 }
 0xea4   :  { %6704 = vmatprep.subr.bf16.mxu0 %v13563_v43 }
 0xea7   :  { %6705 = vmatpush2.bf16.msra.mxu0 %v13562_v35 }
 0xea8   :  { %6706 = vmatprep.subr.bf16.mxu0 %v13561_v59 }
 0xeab   :  { %6707 = vmatpush2.bf16.msra.mxu0 %v13560_v36 }
 0xeac   :  { %6708 = vmatprep.subr.bf16.mxu0 %v13559_v46 }
 0xeaf   :  { %6709 = vmatpush2.bf16.msra.mxu0 %v13558_v0 }
 0xeb0   :  { %6710 = vmatprep.subr.bf16.mxu0 %v13557_v45 }
 0xeb3   :  { %6711 = vmatpush2.bf16.msra.mxu0 %v13556_v54 }
 0xeb4   :  { %6712 = vmatprep.subr.bf16.mxu0 %v13555_v44 }
 0xeb7   :  { %6713 = vmatpush2.bf16.msra.mxu0 %v13554_v19 }
 0xeb8   :  { %6714 = vmatprep.subr.bf16.mxu0 %v13553_v17 }
 0xebb   :  { %6715 = vmatpush2.bf16.msra.mxu0 %v13552_v24 }
 0xebc   :  { %6716 = vmatprep.subr.bf16.mxu0 %v13551_v25 }
 0xebf   :  { %6717 = vmatpush2.bf16.msra.mxu0 %v13550_v57  ;;  %v16337_v57 = vmov 1966171168  }
 0xec0   :  { %6729 = vmatprep.subr.bf16.mxu0 %v13581_v40  ;;  %v6070_v40 = vunpack.c.l.s4 %v16337_v57 }
 0xf22   :  { %v5967_v42 = vpop.f32.mrf.mxu0 }
 0xf24   :  { %v5969_v48 = vpop.f32.mrf.mxu0 }
 0xf26   :  { %v5971_v60 = vpop.f32.mrf.mxu0 }
 0xf28   :  { %v5973_v28 = vpop.f32.mrf.mxu0 }
 0xf42   :  { %v6010_v16 = vpop.f32.mrf.mxu0 }
 0xf43   :  { %v19961_v23 = vadd.f32 %v6010_v16, %v5967_v42  ;;  %v6071_v42 = vunpack.c.0.s8 %v6070_v40 }
 0xf44   :  { %v6012_v50 = vpop.f32.mrf.mxu0 }
 0xf45   :  { %v19963_v1 = vadd.f32 %v6012_v50, %v5969_v48  ;;  %v6036_v14 = vmul.f32 %v19961_v23, %v19961_v23 }
 0xf46   :  { %v6014_v49 = vpop.f32.mrf.mxu0 }
 0xf47   :  { %v19965_v21 = vadd.f32 %v6014_v49, %v5971_v60  ;;  %v6037_v10 = vmul.f32 %v19963_v1, %v19963_v1  ;;  %v21641_v60 = vld [vmem:[#allocation329_spill] sm:$0xff] }
 0xf48   :  { %v6016_v22 = vpop.f32.mrf.mxu0 }
 0xf49   :  { %v6019_v15 = vadd.f32 %v19965_v21, %v19961_v23  ;;  %v6038_v12 = vmul.f32 %v19965_v21, %v19965_v21  ;;  %v19973_v13 = vadd.f32 %v6016_v22, %v5973_v28  ;;  %v19982_v28 = vsub.s32 %v6071_v42, %v21641_v60  ;;  %v5595_v22 = vld [vmem:[#allocation12 + $0x7] sm:$0x3] }
 0xf4b   :  { %v6020_v11 = vrot.slane %v6019_v15, 4  ;;  %v6040_v31 = vadd.f32 %v6038_v12, %v6036_v14  ;;  %v6026_v8 = vadd.f32 %v19973_v13, %v19963_v1  ;;  %v6039_v9 = vmul.f32 %v19973_v13, %v19973_v13 }
 0xf4d   :  { %v6021_v38 = vadd.f32 %v6020_v11, %v6019_v15  ;;  %v6041_v2 = vrot.slane %v6040_v31, 4  ;;  %v6027_v6 = vrot.slane %v6026_v8, 4  ;;  %v6047_v7 = vadd.f32 %v6039_v9, %v6037_v10 }
 0xf4e   :  { %v19987_v15 = vsub.s32 1, %v21641_v60 }
 0xf4f   :  { %v6022_v51 = vrot.slane %v6021_v38, 2  ;;  %v6042_v52 = vadd.f32 %v6041_v2, %v6040_v31  ;;  %v6028_v4 = vadd.f32 %v6027_v6, %v6026_v8  ;;  %v6048_v5 = vrot.slane %v6047_v7, 4  ;;  %v5596_v2 = vld [vmem:[#allocation14 + $0x7] sm:$0x3] }
 0xf51   :  { %v6023_v29 = vadd.f32 %v6022_v51, %v6021_v38  ;;  %v6043_v63 = vrot.slane %v6042_v52, 2  ;;  %v6029_v27 = vrot.slane %v6028_v4, 2  ;;  %v6049_v43 = vadd.f32 %v6048_v5, %v6047_v7  ;;  %v15117_v7 = vpop.permute.xlu0 %15116 }
 0xf53   :  { %v6024_v35 = vrot.slane %v6023_v29, 1  ;;  %v6044_v32 = vadd.f32 %v6043_v63, %v6042_v52  ;;  %v6030_v20 = vadd.f32 %v6029_v27, %v6028_v4  ;;  %v6050_v59 = vrot.slane %v6049_v43, 2 }
 0xf55   :  { %v6025_v36 = vadd.f32 %v6024_v35, %v6023_v29  ;;  %v6045_v56 = vrot.slane %v6044_v32, 1  ;;  %v6031_v58 = vrot.slane %v6030_v20, 1  ;;  %v6051_v46 = vadd.f32 %v6050_v59, %v6049_v43  ;;  %v15123_v59 = vpop.permute.xlu0 %15122 }
 0xf57   :  { %v6034_v0 = vmul.f32 0.0625, %v6025_v36  ;;  %v6046_v3 = vadd.f32 %v6045_v56, %v6044_v32  ;;  %v6032_v62 = vadd.f32 %v6031_v58, %v6030_v20  ;;  %v6052_v45 = vrot.slane %v6051_v46, 1 }
 0xf59   :  { %v6054_v54 = vmul.f32 0.0625, %v6046_v3  ;;  %v6056_v34 = vmul.f32 %v6034_v0, %v6034_v0  ;;  %v6035_v33 = vmul.f32 0.0625, %v6032_v62  ;;  %v6053_v44 = vadd.f32 %v6052_v45, %v6051_v46 }
 0xf5a   :  { %v15118_v46 = vunpack.i.l.bf16 %v15117_v7  ;;  %v15124_v3 = vunpack.i.l.bf16 %v15123_v59 }
 0xf5b   :  { %v6058_v19 = vsub.f32 %v6054_v54, %v6056_v34  ;;  %v6055_v26 = vmul.f32 0.0625, %v6053_v44  ;;  %v6057_v53 = vmul.f32 %v6035_v33, %v6035_v33 }
 0xf5d   :  { %v6060_v17 = vmax.f32 %v6058_v19, 0.0  ;;  %v6059_v24 = vsub.f32 %v6055_v26, %v6057_v53 }
 0xf5f   :  { %v6062_v30 = vadd.f32 1e-05, %v6060_v17  ;;  %v6061_v39 = vmax.f32 %v6059_v24, 0.0 }
 0xf61   :  { %v6063_v25 = vadd.f32 1e-05, %v6061_v39  ;;  %15225 = vrsqrt.f32 %v6062_v30 }
 0xf63   :  { %15227 = vrsqrt.f32 %v6063_v25 }
 0xf6e   :  { %v15226_v48 = vpop.eup %15225 }
 0xf70   :  { %v15228_v16 = vpop.eup %15227 }
 0xf71   :  { %v6068_v50 = vcombine.low %v15226_v48, %v15228_v16 }
 0xf73   :  { %v6075_v49 = vrot.slane %v6068_v50, %v19982_v28 }
 0xf75   :  { %v6082_v14 = vrot.slane %v6075_v49, %v19982_v28 }
 0xf77   :  { %v6084_v12 = vmul.f32 %v6082_v14, %v5595_v22 }
 0xf79   :  { %v6089_v10 = vrot.slane %v6084_v12, %v18164_v18  ;;  %v6093_v11 = vrot.slane %v6084_v12, %v19987_v15 }
 0xf7b   :  { %v6100_v31 = vmul.f32 %v6089_v10, %v6034_v0  ;;  %v6101_v8 = vmul.f32 %v6093_v11, %v6035_v33  ;;  %v6097_v52 = vmul.f32 %v6093_v11, %v19963_v1  ;;  %v6099_v4 = vmul.f32 %v6093_v11, %v19973_v13 }
 0xf7c   :  { %v6096_v63 = vmul.f32 %v6089_v10, %v19961_v23  ;;  %v6098_v27 = vmul.f32 %v6089_v10, %v19965_v21  ;;  %v15119_v13 = vunpack.i.h.bf16 %v15117_v7  ;;  %v15125_v0 = vunpack.i.h.bf16 %v15123_v59  ;;  %v21645_v7 = vld [vmem:[#allocation83_spill] sm:$0xff]  ;;  %v21651_v59 = vld [vmem:[#allocation77_spill] sm:$0xff] }
 0xf7d   :  { %v6104_v9 = vcombine.low %v6100_v31, %v6101_v8  ;;  %v13580_v10 = vcombine.low %v21640_v41, %v21639_v37  ;;  %v21642_v8 = vld [vmem:[#allocation86_spill] sm:$0xff]  ;;  %v21644_v41 = vld [vmem:[#allocation84_spill] sm:$0xff] }
 0xf7f   :  { %v6111_v38 = vrot.slane %v6104_v9, %v19982_v28  ;;  %v21643_v9 = vld [vmem:[#allocation85_spill] sm:$0xff] }
 0xf80   :  { %v13578_v37 = vcombine.low %v21643_v9, %v21642_v8 }
 0xf81   :  { %v6118_v6 = vrot.slane %v6111_v38, %v19982_v28  ;;  %v13579_v38 = vcombine.high %v21643_v9, %v21642_v8  ;;  %v21666_v9 = vld [vmem:[#allocation94_spill] sm:$0xff] }
 0xf83   :  { %v6120_v51 = vsub.f32 %v5596_v2, %v6118_v6 }
 0xf85   :  { %v6125_v5 = vrot.slane %v6120_v51, %v18164_v18  ;;  %v6129_v29 = vrot.slane %v6120_v51, %v19987_v15  ;;  %v13577_v51 = vcombine.high %v21645_v7, %v21644_v41 }
 0xf87   :  { %v6133_v43 = vadd.f32 %v6129_v29, %v6097_v52  ;;  %v6135_v35 = vadd.f32 %v6129_v29, %v6099_v4  ;;  %v6132_v32 = vadd.f32 %v6125_v5, %v6096_v63  ;;  %v6134_v20 = vadd.f32 %v6125_v5, %v6098_v27  ;;  %v21646_v4 = vld [vmem:[#allocation82_spill] sm:$0xff]  ;;  %v21647_v5 = vld [vmem:[#allocation81_spill] sm:$0xff]  ;;  %v21648_v27 = vld [vmem:[#allocation80_spill] sm:$0xff] }
 0xf88   :  { %v13576_v52 = vcombine.low %v21645_v7, %v21644_v41  ;;  %v13575_v29 = vcombine.high %v21647_v5, %v21646_v4  ;;  %v13574_v63 = vcombine.low %v21647_v5, %v21646_v4  ;;  %v21668_v41 = vld [vmem:[#allocation92_spill] sm:$0xff]  ;;  %v21669_v7 = vld [vmem:[#allocation91_spill] sm:$0xff]  ;;  %v21670_v4 = vld [vmem:[#allocation90_spill] sm:$0xff] }
 0xf89   :  { %v6139_v36 = vmax.f32 %v6135_v35, 0.0  ;;  %v19999_v56 = vmax.f32 %v6132_v32, 0.0  ;;  %v6137_v58 = vmax.f32 %v6133_v43, 0.0  ;;  %v20001_v1 = vmax.f32 %v6134_v20, 0.0  ;;  %v21649_v43 = vld [vmem:[#allocation79_spill] sm:$0xff]  ;;  %v21650_v20 = vld [vmem:[#allocation78_spill] sm:$0xff] }
 0xf8a   :  { %v13573_v35 = vcombine.high %v21649_v43, %v21648_v27  ;;  %v13572_v32 = vcombine.low %v21649_v43, %v21648_v27  ;;  %v21671_v5 = vld [vmem:[#allocation89_spill] sm:$0xff]  ;;  %v21672_v27 = vld [vmem:[#allocation120_spill] sm:$0xff]  ;;  %v21673_v43 = vld [vmem:[#allocation119_spill] sm:$0xff] }
 0xf8b   :  { %v6144_v62 = vrot.slane %v20001_v1, 7  ;;  %v6145_v23 = vrot.slane %v6139_v36, 7  ;;  %v6150_v21 = vrot.slane %v19999_v56, 7  ;;  %v6151_v45 = vrot.slane %v6137_v58, 7 }
 0xf8c   :  { %v6178_v54 = vrot.slane %v19999_v56, 1  ;;  %v6179_v34 = vrot.slane %v20001_v1, 1  ;;  %v6181_v33 = vrot.slane %v6137_v58, 1  ;;  %v6182_v44 = vrot.slane %v6139_v36, 1 }
 0xf8d   :  { %v6152_v19 = vsel %vm2468_vm5, %v6150_v21, %v6144_v62  ;;  %v6153_v26 = vsel %vm2468_vm5, %v6151_v45, %v6145_v23  ;;  %v6158_v53 = vsel %vm2468_vm5, %v6144_v62, %v6150_v21  ;;  %v6159_v17 = vsel %vm2468_vm5, %v6145_v23, %v6151_v45  ;;  %v21654_v62 = vld [vmem:[#allocation74_spill] sm:$0xff]  ;;  %v21655_v23 = vld [vmem:[#allocation73_spill] sm:$0xff] }
 0xf8e   :  { %v6172_v24 = vmul.f32 %v15118_v46, %v6158_v53  ;;  %v6173_v30 = vmul.f32 %v15118_v46, %v6159_v17  ;;  %v6174_v39 = vmul.f32 %v15119_v13, %v6152_v19  ;;  %v6175_v25 = vmul.f32 %v15119_v13, %v6153_v26  ;;  %v21652_v13 = vld [vmem:[#allocation76_spill] sm:$0xff]  ;;  %v21653_v46 = vld [vmem:[#allocation75_spill] sm:$0xff]  ;;  %v21658_v19 = vld [vmem:[#allocation102_spill] sm:$0xff] }
 0xf8f   :  { %v6180_v57 = vsel %vm3937_vm8, %v6178_v54, %v6179_v34  ;;  %v6183_v40 = vsel %vm3937_vm8, %v6181_v33, %v6182_v44  ;;  %v6190_v42 = vsel %vm3937_vm8, %v6179_v34, %v6178_v54  ;;  %v6191_v48 = vsel %vm3937_vm8, %v6182_v44, %v6181_v33  ;;  %v21656_v54 = vld [vmem:[#allocation104_spill] sm:$0xff]  ;;  %v21657_v34 = vld [vmem:[#allocation103_spill] sm:$0xff]  ;;  %v21659_v26 = vld [vmem:[#allocation101_spill] sm:$0xff] }
 0xf90   :  { %v6176_v16 = vpack.c.bf16 %v6174_v39, %v6172_v24  ;;  %v20015_v50 = vmul.f32 %v15124_v3, %v6180_v57  ;;  %v20017_v49 = vmul.f32 %v15124_v3, %v6183_v40  ;;  %v20019_v22 = vmul.f32 %v15125_v0, %v6190_v42  ;;  %v21660_v24 = vld [vmem:[#allocation100_spill] sm:$0xff]  ;;  %v21662_v57 = vld [vmem:[#allocation98_spill] sm:$0xff]  ;;  %v21663_v40 = vld [vmem:[#allocation97_spill] sm:$0xff] }
 0xf91   :  { %v20021_v14 = vmul.f32 %v15125_v0, %v6191_v48  ;;  %v6177_v12 = vpack.c.bf16 %v6175_v25, %v6173_v30  ;;  %v6140_v11 = vpack.c.bf16 %v20001_v1, %v19999_v56  ;;  %v6141_v2 = vpack.c.bf16 %v6139_v36, %v6137_v58  ;;  %v21661_v30 = vld [vmem:[#allocation99_spill] sm:$0xff]  ;;  %v21679_v56 = vld [vmem:[#allocation113_spill] sm:$0xff] }
 0xf92   :  { %v6204_v31 = vpack.c.bf16 %v20019_v22, %v20015_v50  ;;  %v13571_v36 = vcombine.high %v21651_v59, %v21650_v20  ;;  %v13570_v58 = vcombine.low %v21651_v59, %v21650_v20  ;;  %v13569_v0 = vcombine.high %v21653_v46, %v21652_v13  ;;  %v21674_v20 = vld [vmem:[#allocation118_spill] sm:$0xff]  ;;  %v21675_v59 = vld [vmem:[#allocation117_spill] sm:$0xff] }
 0xf93   :  { %6718 = vmatprep.mubr.bf16.mxu0 %v6177_v12  ;;  %v6205_v6 = vpack.c.bf16 %v20021_v14, %v20017_v49  ;;  %v13568_v3 = vcombine.low %v21653_v46, %v21652_v13  ;;  %v13567_v21 = vcombine.high %v21655_v23, %v21654_v62  ;;  %v13566_v45 = vcombine.low %v21655_v23, %v21654_v62  ;;  %v21665_v12 = vld [vmem:[#allocation95_spill] sm:$0xff]  ;;  %v21676_v13 = vld [vmem:[#allocation116_spill] sm:$0xff]  ;;  %v21678_v62 = vld [vmem:[#allocation114_spill] sm:$0xff] }
 0xf94   :  { %6719 = vmatmul.mubr.bf16.vlgmr.msra.gmra.mxu0 %v6176_v16  ;;  %v13597_v33 = vcombine.high %v21657_v34, %v21656_v54  ;;  %v13596_v44 = vcombine.low %v21657_v34, %v21656_v54  ;;  %v13595_v53 = vcombine.high %v21659_v26, %v21658_v19  ;;  %v13594_v17 = vcombine.low %v21659_v26, %v21658_v19  ;;  %v21664_v16 = vld [vmem:[#allocation96_spill] sm:$0xff]  ;;  %v21677_v46 = vld [vmem:[#allocation115_spill] sm:$0xff]  ;;  %v15221_v22 = vld [vmem:[#allocation4 + $0x14] ss:$8 sps:$4 sm:$0xff]  }
 0xf95   :  { %6730 = vmatpush1.bf16.msra.mxu0 %v13580_v10  ;;  %6761 = vmatprep.mubr.bf16.mxu0 %v6141_v2  ;;  %v13593_v39 = vcombine.high %v21661_v30, %v21660_v24  ;;  %v13592_v25 = vcombine.low %v21661_v30, %v21660_v24  ;;  %v13591_v42 = vcombine.high %v21663_v40, %v21662_v57  ;;  %v21680_v14 = vld [vmem:[#allocation112_spill] sm:$0xff] }
 0xf96   :  { %6731 = vmatprep.subr.bf16.mxu0 %v13579_v38  ;;  %v13590_v48 = vcombine.low %v21663_v40, %v21662_v57  ;;  %v13589_v10 = vcombine.high %v21665_v12, %v21664_v16  ;;  %v13588_v8 = vcombine.low %v21665_v12, %v21664_v16  ;;  %v21667_v38 = vld [vmem:[#allocation93_spill] sm:$0xff]  ;;  %v13607_v1 = vcombine.high %v21679_v56, %v21678_v62  ;;  %v15216_v50 = vld [vmem:[#allocation4 + $0x20] ss:$8 sps:$4 sm:$0xff]  }
 0xf97   :  { %v13587_v2 = vcombine.high %v21667_v38, %v21666_v9  ;;  %v13606_v49 = vcombine.low %v21679_v56, %v21678_v62  ;;  %v15206_v62 = vld [vmem:[#allocation4 + $0x64] ss:$8 sps:$4 sm:$0xff]   ;;  %v15204_v56 = vld [vmem:[#allocation4 + $0x60] ss:$8 sps:$4 sm:$0xff]  }
 0xf99   :  { %6732 = vmatpush1.bf16.msra.mxu0 %v13578_v37  ;;  %v13586_v37 = vcombine.low %v21667_v38, %v21666_v9 }
 0xf9a   :  { %6733 = vmatprep.subr.bf16.mxu0 %v13577_v51  ;;  %v13585_v51 = vcombine.high %v21669_v7, %v21668_v41 }
 0xf9d   :  { %6734 = vmatpush1.bf16.msra.mxu0 %v13576_v52  ;;  %v13584_v52 = vcombine.low %v21669_v7, %v21668_v41 }
 0xf9e   :  { %6735 = vmatprep.subr.bf16.mxu0 %v13575_v29  ;;  %v13583_v29 = vcombine.high %v21671_v5, %v21670_v4 }
 0xfa1   :  { %6736 = vmatpush1.bf16.msra.mxu0 %v13574_v63  ;;  %v13582_v63 = vcombine.low %v21671_v5, %v21670_v4 }
 0xfa2   :  { %6737 = vmatprep.subr.bf16.mxu0 %v13573_v35  ;;  %v13613_v35 = vcombine.high %v21673_v43, %v21672_v27 }
 0xfa5   :  { %6738 = vmatpush1.bf16.msra.mxu0 %v13572_v32  ;;  %v13612_v32 = vcombine.low %v21673_v43, %v21672_v27 }
 0xfa6   :  { %6739 = vmatprep.subr.bf16.mxu0 %v13571_v36  ;;  %v13611_v36 = vcombine.high %v21675_v59, %v21674_v20 }
 0xfa9   :  { %6740 = vmatpush1.bf16.msra.mxu0 %v13570_v58  ;;  %v13610_v58 = vcombine.low %v21675_v59, %v21674_v20 }
 0xfaa   :  { %6741 = vmatprep.subr.bf16.mxu0 %v13569_v0  ;;  %v13609_v0 = vcombine.high %v21677_v46, %v21676_v13 }
 0xfad   :  { %6742 = vmatpush1.bf16.msra.mxu0 %v13568_v3  ;;  %v13608_v3 = vcombine.low %v21677_v46, %v21676_v13 }
 0xfae   :  { %6743 = vmatprep.subr.bf16.mxu0 %v13567_v21  ;;  %v21682_v21 = vld [vmem:[#allocation110_spill] sm:$0xff] }
 0xfb1   :  { %6744 = vmatpush1.bf16.msra.mxu0 %v13566_v45  ;;  %v21683_v45 = vld [vmem:[#allocation109_spill] sm:$0xff] }
 0xfb2   :  { %6745 = vmatprep.subr.bf16.mxu0 %v13597_v33  ;;  %v13603_v54 = vcombine.high %v21683_v45, %v21682_v21  ;;  %v13602_v34 = vcombine.low %v21683_v45, %v21682_v21  ;;  %v21684_v33 = vld [vmem:[#allocation108_spill] sm:$0xff] }
 0xfb3   :  { %v15218_v21 = vld [vmem:[#allocation4 + $0x24] ss:$8 sps:$4 sm:$0xff]  }
 0xfb4   :  { %v15224_v45 = vld [vmem:[#allocation4 + $0x4] ss:$8 sps:$4 sm:$0xff]  }
 0xfb5   :  { %6746 = vmatpush2.bf16.msra.mxu0 %v13596_v44  ;;  %v21685_v44 = vld [vmem:[#allocation107_spill] sm:$0xff] }
 0xfb6   :  { %6747 = vmatprep.subr.bf16.mxu0 %v13595_v53  ;;  %v13601_v19 = vcombine.high %v21685_v44, %v21684_v33  ;;  %v13600_v26 = vcombine.low %v21685_v44, %v21684_v33  ;;  %v21686_v53 = vld [vmem:[#allocation106_spill] sm:$0xff] }
 0xfb9   :  { %6748 = vmatpush2.bf16.msra.mxu0 %v13594_v17  ;;  %v21687_v17 = vld [vmem:[#allocation105_spill] sm:$0xff] }
 0xfba   :  { %6749 = vmatprep.subr.bf16.mxu0 %v13593_v39  ;;  %v13599_v24 = vcombine.high %v21687_v17, %v21686_v53  ;;  %v13598_v30 = vcombine.low %v21687_v17, %v21686_v53  ;;  %v21688_v39 = vld [vmem:[#allocation136_spill] sm:$0xff] }
 0xfbd   :  { %6750 = vmatpush2.bf16.msra.mxu0 %v13592_v25  ;;  %v21689_v25 = vld [vmem:[#allocation135_spill] sm:$0xff] }
 0xfbe   :  { %6751 = vmatprep.subr.bf16.mxu0 %v13591_v42  ;;  %v13629_v57 = vcombine.high %v21689_v25, %v21688_v39  ;;  %v13628_v40 = vcombine.low %v21689_v25, %v21688_v39  ;;  %v21690_v42 = vld [vmem:[#allocation134_spill] sm:$0xff] }
 0xfc1   :  { %6752 = vmatpush2.bf16.msra.mxu0 %v13590_v48  ;;  %v21691_v48 = vld [vmem:[#allocation133_spill] sm:$0xff] }
 0xfc2   :  { %6753 = vmatprep.subr.bf16.mxu0 %v13589_v10  ;;  %v13627_v16 = vcombine.high %v21691_v48, %v21690_v42  ;;  %v13626_v12 = vcombine.low %v21691_v48, %v21690_v42  ;;  %v21692_v10 = vld [vmem:[#allocation132_spill] sm:$0xff] }
 0xfc5   :  { %6754 = vmatpush2.bf16.msra.mxu0 %v13588_v8  ;;  %v21693_v8 = vld [vmem:[#allocation131_spill] sm:$0xff] }
 0xfc6   :  { %6755 = vmatprep.subr.bf16.mxu0 %v13587_v2  ;;  %v13625_v9 = vcombine.high %v21693_v8, %v21692_v10  ;;  %v13624_v38 = vcombine.low %v21693_v8, %v21692_v10  ;;  %v21694_v2 = vld [vmem:[#allocation130_spill] sm:$0xff] }
 0xfc9   :  { %6756 = vmatpush2.bf16.msra.mxu0 %v13586_v37  ;;  %v21695_v37 = vld [vmem:[#allocation129_spill] sm:$0xff] }
 0xfca   :  { %6757 = vmatprep.subr.bf16.mxu0 %v13585_v51  ;;  %v13623_v41 = vcombine.high %v21695_v37, %v21694_v2  ;;  %v13622_v7 = vcombine.low %v21695_v37, %v21694_v2  ;;  %v21696_v51 = vld [vmem:[#allocation128_spill] sm:$0xff] }
 0xfcd   :  { %6758 = vmatpush2.bf16.msra.mxu0 %v13584_v52  ;;  %v21697_v52 = vld [vmem:[#allocation127_spill] sm:$0xff] }
 0xfce   :  { %6759 = vmatprep.subr.bf16.mxu0 %v13583_v29  ;;  %v13621_v4 = vcombine.high %v21697_v52, %v21696_v51  ;;  %v13620_v5 = vcombine.low %v21697_v52, %v21696_v51  ;;  %v21698_v29 = vld [vmem:[#allocation126_spill] sm:$0xff] }
 0xfd1   :  { %6760 = vmatpush2.bf16.msra.mxu0 %v13582_v63  ;;  %v21699_v63 = vld [vmem:[#allocation125_spill] sm:$0xff] }
 0xfd2   :  { %6772 = vmatprep.subr.bf16.mxu0 %v13613_v35  ;;  %v13619_v27 = vcombine.high %v21699_v63, %v21698_v29  ;;  %v13618_v43 = vcombine.low %v21699_v63, %v21698_v29  ;;  %v21700_v35 = vld [vmem:[#allocation124_spill] sm:$0xff] }
 0xfd4   :  { %6762 = vmatmul.mubr.bf16.vlgmr.msra.gmra.mxu0 %v6140_v11  ;;  %v21681_v11 = vld [vmem:[#allocation111_spill] sm:$0xff] }
 0xfd5   :  { %6773 = vmatpush1.bf16.msra.mxu0 %v13612_v32  ;;  %6804 = vmatprep.mubr.bf16.mxu0 %v6205_v6  ;;  %v13605_v6 = vcombine.high %v21681_v11, %v21680_v14  ;;  %v13604_v23 = vcombine.low %v21681_v11, %v21680_v14  ;;  %v21701_v32 = vld [vmem:[#allocation123_spill] sm:$0xff] }
 0xfd6   :  { %6774 = vmatprep.subr.bf16.mxu0 %v13611_v36  ;;  %v13617_v20 = vcombine.high %v21701_v32, %v21700_v35  ;;  %v13616_v59 = vcombine.low %v21701_v32, %v21700_v35  ;;  %v21702_v36 = vld [vmem:[#allocation122_spill] sm:$0xff]  ;;  %v15212_v14 = vld [vmem:[#allocation4 + $0x44] ss:$8 sps:$4 sm:$0xff]  }
 0xfd7   :  { %v15210_v11 = vld [vmem:[#allocation4 + $0x40] ss:$8 sps:$4 sm:$0xff]  }
 0xfd9   :  { %6775 = vmatpush1.bf16.msra.mxu0 %v13610_v58  ;;  %v21703_v58 = vld [vmem:[#allocation121_spill] sm:$0xff] }
 0xfda   :  { %6776 = vmatprep.subr.bf16.mxu0 %v13609_v0  ;;  %v13615_v13 = vcombine.high %v21703_v58, %v21702_v36  ;;  %v13614_v46 = vcombine.low %v21703_v58, %v21702_v36  ;;  %v15203_v0 = vld [vmem:[#allocation4 + $0x74] ss:$8 sps:$4 sm:$0xff]  }
 0xfdd   :  { %6777 = vmatpush1.bf16.msra.mxu0 %v13608_v3  ;;  %v15201_v3 = vld [vmem:[#allocation4 + $0x70] ss:$8 sps:$4 sm:$0xff]  }
 0xfde   :  { %6778 = vmatprep.subr.bf16.mxu0 %v13607_v1  ;;  %v15209_v1 = vld [vmem:[#allocation4 + $0x54] ss:$8 sps:$4 sm:$0xff]  }
 0xfe1   :  { %6779 = vmatpush1.bf16.msra.mxu0 %v13606_v49  ;;  %v15207_v49 = vld [vmem:[#allocation4 + $0x50] ss:$8 sps:$4 sm:$0xff]  }
 0xfe2   :  { %6780 = vmatprep.subr.bf16.mxu0 %v13605_v6  ;;  %v15215_v6 = vld [vmem:[#allocation4 + $0x34] ss:$8 sps:$4 sm:$0xff]  }
 0xfe5   :  { %6781 = vmatpush1.bf16.msra.mxu0 %v13604_v23  ;;  %v15213_v23 = vld [vmem:[#allocation4 + $0x30] ss:$8 sps:$4 sm:$0xff]  }
 0xfe6   :  { %6782 = vmatprep.subr.bf16.mxu0 %v13603_v54  ;;  %v15222_v54 = vld [vmem:[#allocation4] ss:$8 sps:$4 sm:$0xff]  }
 0xfe9   :  { %6783 = vmatpush1.bf16.msra.mxu0 %v13602_v34 }
 0xfea   :  { %6784 = vmatprep.subr.bf16.mxu0 %v13601_v19 }
 0xfed   :  { %6785 = vmatpush1.bf16.msra.mxu0 %v13600_v26 }
 0xfee   :  { %6786 = vmatprep.subr.bf16.mxu0 %v13599_v24 }
 0xff1   :  { %6787 = vmatpush1.bf16.msra.mxu0 %v13598_v30 }
 0xff2   :  { %6788 = vmatprep.subr.bf16.mxu0 %v13629_v57 }
 0xff5   :  { %6789 = vmatpush2.bf16.msra.mxu0 %v13628_v40 }
 0xff6   :  { %6790 = vmatprep.subr.bf16.mxu0 %v13627_v16 }
 0xff9   :  { %6791 = vmatpush2.bf16.msra.mxu0 %v13626_v12 }
 0xffa   :  { %6792 = vmatprep.subr.bf16.mxu0 %v13625_v9 }
 0xffd   :  { %6793 = vmatpush2.bf16.msra.mxu0 %v13624_v38 }
 0xffe   :  { %6794 = vmatprep.subr.bf16.mxu0 %v13623_v41 }
0x1001   :  { %6795 = vmatpush2.bf16.msra.mxu0 %v13622_v7 }
0x1002   :  { %6796 = vmatprep.subr.bf16.mxu0 %v13621_v4 }
0x1005   :  { %6797 = vmatpush2.bf16.msra.mxu0 %v13620_v5 }
0x1006   :  { %6798 = vmatprep.subr.bf16.mxu0 %v13619_v27 }
0x1009   :  { %6799 = vmatpush2.bf16.msra.mxu0 %v13618_v43 }
0x100a   :  { %6800 = vmatprep.subr.bf16.mxu0 %v13617_v20 }
0x100d   :  { %6801 = vmatpush2.bf16.msra.mxu0 %v13616_v59 }
0x100e   :  { %6802 = vmatprep.subr.bf16.mxu0 %v13615_v13 }
0x1011   :  { %6803 = vmatpush2.bf16.msra.mxu0 %v13614_v46 }
0x1012   :  { %7011 = vmatprep.subr.bf16.mxu0 %v15203_v0 }
0x1014   :  { %6805 = vmatmul.mubr.bf16.vlgmr.msra.gmra.mxu0 %v6204_v31  ;;  %v15219_v31 = vld [vmem:[#allocation4 + $0x10] ss:$8 sps:$4 sm:$0xff]  }
0x1015   :  { %7012 = vmatpush1.bf16.msra.mxu0 %v15201_v3  ;;  %7043 = vmatprep.mubr.bf16.mxu0 %v21567_v55 }
0x1016   :  { %7013 = vmatprep.subr.bf16.mxu0 %v15206_v62 }
0x1019   :  { %7014 = vmatpush1.bf16.msra.mxu0 %v15204_v56 }
0x101a   :  { %7015 = vmatprep.subr.bf16.mxu0 %v15209_v1 }
0x101d   :  { %7016 = vmatpush1.bf16.msra.mxu0 %v15207_v49 }
0x101e   :  { %7017 = vmatprep.subr.bf16.mxu0 %v15212_v14 }
0x1021   :  { %7018 = vmatpush1.bf16.msra.mxu0 %v15210_v11 }
0x1022   :  { %7019 = vmatprep.subr.bf16.mxu0 %v15215_v6 }
0x1025   :  { %7020 = vmatpush1.bf16.msra.mxu0 %v15213_v23 }
0x1026   :  { %7021 = vmatprep.subr.bf16.mxu0 %v15218_v21 }
0x1029   :  { %7022 = vmatpush1.bf16.msra.mxu0 %v15216_v50 }
0x102a   :  { %7023 = vmatprep.subr.bf16.mxu0 %v15221_v22 }
0x102d   :  { %7024 = vmatpush1.bf16.msra.mxu0 %v15219_v31 }
0x102e   :  { %7025 = vmatprep.subr.bf16.mxu0 %v15224_v45 }
0x1031   :  { %7026 = vmatpush1.bf16.msra.mxu0 %v15222_v54 }
0x1034   :  { %7044 = vmatmul.mubr.bf16.vlgmr.msra.gmra.mxu0 %v19891_v61 }
0x1054   :  { %v6720_v34 = vpop.f32.mrf.mxu0 }
0x1056   :  { %v6722_v33 = vpop.f32.mrf.mxu0 }
0x1058   :  { %v6724_v44 = vpop.f32.mrf.mxu0 }
0x105a   :  { %v6726_v19 = vpop.f32.mrf.mxu0 }
0x1094   :  { %v6763_v26 = vpop.f32.mrf.mxu0 }
0x1095   :  { %v6764_v39 = vadd.f32 %v6763_v26, %v6720_v34 }
0x1096   :  { %v6765_v53 = vpop.f32.mrf.mxu0 }
0x1097   :  { %v6766_v25 = vadd.f32 %v6765_v53, %v6722_v33 }
0x1098   :  { %v6767_v17 = vpop.f32.mrf.mxu0 }
0x1099   :  { %v6768_v40 = vadd.f32 %v6767_v17, %v6724_v44 }
0x109a   :  { %v6769_v24 = vpop.f32.mrf.mxu0 }
0x109b   :  { %v6770_v12 = vadd.f32 %v6769_v24, %v6726_v19 }
0x10d4   :  { %v6806_v30 = vpop.f32.mrf.mxu0 }
0x10d5   :  { %v20166_v42 = vadd.f32 %v6806_v30, %v6764_v39 }
0x10d6   :  { %v6808_v57 = vpop.f32.mrf.mxu0 }
0x10d7   :  { %v20168_v48 = vadd.f32 %v6808_v57, %v6766_v25  ;;  %v6831_v8 = vmul.f32 %v20166_v42, %v20166_v42 }
0x10d8   :  { %v6810_v16 = vpop.f32.mrf.mxu0 }
0x10d9   :  { %v20170_v61 = vadd.f32 %v6810_v16, %v6768_v40  ;;  %v6832_v37 = vmul.f32 %v20168_v48, %v20168_v48 }
0x10da   :  { %v6812_v10 = vpop.f32.mrf.mxu0 }
0x10db   :  { %v6815_v9 = vadd.f32 %v20170_v61, %v20166_v42  ;;  %v6833_v38 = vmul.f32 %v20170_v61, %v20170_v61  ;;  %v20178_v2 = vadd.f32 %v6812_v10, %v6770_v12 }
0x10dd   :  { %v6816_v41 = vrot.slane %v6815_v9, 4  ;;  %v6835_v7 = vadd.f32 %v6833_v38, %v6831_v8  ;;  %v6822_v51 = vadd.f32 %v20178_v2, %v20168_v48  ;;  %v6834_v52 = vmul.f32 %v20178_v2, %v20178_v2 }
0x10df   :  { %v6817_v4 = vadd.f32 %v6816_v41, %v6815_v9  ;;  %v6836_v5 = vrot.slane %v6835_v7, 4  ;;  %v6823_v29 = vrot.slane %v6822_v51, 4  ;;  %v6842_v63 = vadd.f32 %v6834_v52, %v6832_v37 }
0x10e1   :  { %v6818_v27 = vrot.slane %v6817_v4, 2  ;;  %v6837_v43 = vadd.f32 %v6836_v5, %v6835_v7  ;;  %v6824_v35 = vadd.f32 %v6823_v29, %v6822_v51  ;;  %v6843_v32 = vrot.slane %v6842_v63, 4 }
0x10e3   :  { %v6819_v20 = vadd.f32 %v6818_v27, %v6817_v4  ;;  %v6838_v59 = vrot.slane %v6837_v43, 2  ;;  %v6825_v36 = vrot.slane %v6824_v35, 2  ;;  %v6844_v58 = vadd.f32 %v6843_v32, %v6842_v63 }
0x10e5   :  { %v6820_v13 = vrot.slane %v6819_v20, 1  ;;  %v6839_v46 = vadd.f32 %v6838_v59, %v6837_v43  ;;  %v6826_v0 = vadd.f32 %v6825_v36, %v6824_v35  ;;  %v6845_v3 = vrot.slane %v6844_v58, 2 }
0x10e7   :  { %v6821_v62 = vadd.f32 %v6820_v13, %v6819_v20  ;;  %v6840_v56 = vrot.slane %v6839_v46, 1  ;;  %v6827_v1 = vrot.slane %v6826_v0, 1  ;;  %v6846_v49 = vadd.f32 %v6845_v3, %v6844_v58 }
0x10e9   :  { %v6828_v14 = vadd.f32 %v6827_v1, %v6826_v0  ;;  %v6847_v11 = vrot.slane %v6846_v49, 1  ;;  %v20186_v6 = vmul.f32 0.0625, %v6821_v62  ;;  %v6841_v23 = vadd.f32 %v6840_v56, %v6839_v46 }
0x10eb   :  { %v20188_v21 = vmul.f32 0.0625, %v6828_v14  ;;  %v6848_v50 = vadd.f32 %v6847_v11, %v6846_v49  ;;  %v6849_v45 = vmul.f32 0.0625, %v6841_v23  ;;  %v6851_v54 = vmul.f32 %v20186_v6, %v20186_v6 }
0x10ed   :  { %v6850_v22 = vmul.f32 0.0625, %v6848_v50  ;;  %v6852_v31 = vmul.f32 %v20188_v21, %v20188_v21  ;;  %v6853_v33 = vsub.f32 %v6849_v45, %v6851_v54 }
0x10ef   :  { %v6854_v34 = vsub.f32 %v6850_v22, %v6852_v31  ;;  %v6855_v26 = vmax.f32 %v6853_v33, 0.0 }
0x10f1   :  { %v6856_v44 = vmax.f32 %v6854_v34, 0.0  ;;  %v6857_v57 = vadd.f32 1e-05, %v6855_v26 }
0x10f3   :  { %v6858_v17 = vadd.f32 1e-05, %v6856_v44 }
0x10f4   :  { %v20194_v19 = vpop.f32.mrf.mxu0 }
0x10f5   :  { %v7070_v30 = vmul.f32 %v20194_v19, %v20194_v19  ;;  %15229 = vrsqrt.f32 %v6858_v17 }
0x10f6   :  { %v20196_v53 = vpop.f32.mrf.mxu0  ;;  %15231 = vrsqrt.f32 %v6857_v57 }
0x10f7   :  { %v7071_v40 = vmul.f32 %v20196_v53, %v20196_v53 }
0x10f8   :  { %v20198_v24 = vpop.f32.mrf.mxu0 }
0x10f9   :  { %v7054_v39 = vadd.f32 %v20198_v24, %v20194_v19  ;;  %v7072_v25 = vmul.f32 %v20198_v24, %v20198_v24 }
0x10fa   :  { %v20208_v16 = vpop.f32.mrf.mxu0 }
0x10fb   :  { %v7055_v12 = vrot.slane %v7054_v39, 4  ;;  %v7074_v10 = vadd.f32 %v7072_v25, %v7070_v30  ;;  %v7061_v8 = vadd.f32 %v20208_v16, %v20196_v53  ;;  %v7073_v9 = vmul.f32 %v20208_v16, %v20208_v16  ;;  %v5597_v25 = vld [vmem:[#allocation12 + $0x9] sm:$0x3] }
0x10fd   :  { %v7056_v38 = vadd.f32 %v7055_v12, %v7054_v39  ;;  %v7075_v37 = vrot.slane %v7074_v10, 4  ;;  %v7062_v41 = vrot.slane %v7061_v8, 4  ;;  %v7081_v7 = vadd.f32 %v7073_v9, %v7071_v40 }
0x10ff   :  { %v7057_v51 = vrot.slane %v7056_v38, 2  ;;  %v7076_v52 = vadd.f32 %v7075_v37, %v7074_v10  ;;  %v7063_v4 = vadd.f32 %v7062_v41, %v7061_v8  ;;  %v7082_v5 = vrot.slane %v7081_v7, 4 }
0x1101   :  { %v7058_v29 = vadd.f32 %v7057_v51, %v7056_v38  ;;  %v7077_v63 = vrot.slane %v7076_v52, 2  ;;  %v7064_v27 = vrot.slane %v7063_v4, 2  ;;  %v7083_v43 = vadd.f32 %v7082_v5, %v7081_v7  ;;  %v5599_v51 = vld [vmem:[#allocation12 + $0xb] sm:$0x3] }
0x1102   :  { %v15230_v1 = vpop.eup %15229 }
0x1103   :  { %v7059_v35 = vrot.slane %v7058_v29, 1  ;;  %v7078_v32 = vadd.f32 %v7077_v63, %v7076_v52  ;;  %v7065_v20 = vadd.f32 %v7064_v27, %v7063_v4  ;;  %v7084_v59 = vrot.slane %v7083_v43, 2  ;;  %v15232_v50 = vpop.eup %15231 }
0x1104   :  { %v6863_v45 = vcombine.low %v15232_v50, %v15230_v1 }
0x1105   :  { %v7060_v36 = vadd.f32 %v7059_v35, %v7058_v29  ;;  %v7079_v58 = vrot.slane %v7078_v32, 1  ;;  %v7066_v13 = vrot.slane %v7065_v20, 1  ;;  %v7085_v46 = vadd.f32 %v7084_v59, %v7083_v43  ;;  %v5600_v59 = vld [vmem:[#allocation14 + $0xb] sm:$0x3] }
0x1106   :  { %v6870_v44 = vrot.slane %v6863_v45, %v19982_v28 }
0x1107   :  { %v7068_v0 = vmul.f32 0.0625, %v7060_v36  ;;  %v7080_v3 = vadd.f32 %v7079_v58, %v7078_v32  ;;  %v7067_v62 = vadd.f32 %v7066_v13, %v7065_v20  ;;  %v7086_v56 = vrot.slane %v7085_v46, 1 }
0x1108   :  { %v6877_v39 = vrot.slane %v6870_v44, %v19982_v28 }
0x1109   :  { %v7088_v49 = vmul.f32 0.0625, %v7080_v3  ;;  %v7090_v14 = vmul.f32 %v7068_v0, %v7068_v0  ;;  %v7069_v11 = vmul.f32 0.0625, %v7067_v62  ;;  %v7087_v23 = vadd.f32 %v7086_v56, %v7085_v46 }
0x110a   :  { %v6879_v57 = vmul.f32 %v6877_v39, %v5597_v25 }
0x110b   :  { %v7092_v22 = vsub.f32 %v7088_v49, %v7090_v14  ;;  %v7091_v31 = vmul.f32 %v7069_v11, %v7069_v11  ;;  %v7089_v54 = vmul.f32 0.0625, %v7087_v23 }
0x110c   :  { %v6884_v40 = vrot.slane %v6879_v57, %v18164_v18  ;;  %v6888_v12 = vrot.slane %v6879_v57, %v19987_v15 }
0x110d   :  { %v7094_v34 = vmax.f32 %v7092_v22, 0.0  ;;  %v7093_v33 = vsub.f32 %v7089_v54, %v7091_v31 }
0x110e   :  { %v6895_v8 = vmul.f32 %v6884_v40, %v20186_v6  ;;  %v6896_v9 = vmul.f32 %v6888_v12, %v20188_v21  ;;  %v5598_v6 = vld [vmem:[#allocation14 + $0x9] sm:$0x3]  ;;  %v6891_v46 = vmul.f32 %v6884_v40, %v20166_v42  ;;  %v6892_v3 = vmul.f32 %v6888_v12, %v20168_v48 }
0x110f   :  { %v7096_v26 = vadd.f32 1e-05, %v7094_v34  ;;  %v7095_v17 = vmax.f32 %v7093_v33, 0.0  ;;  %v6893_v56 = vmul.f32 %v6884_v40, %v20170_v61 }
0x1110   :  { %v6899_v41 = vcombine.low %v6895_v8, %v6896_v9 }
0x1111   :  { %v7097_v30 = vadd.f32 1e-05, %v7095_v17  ;;  %15233 = vrsqrt.f32 %v7096_v26 }
0x1112   :  { %v6906_v4 = vrot.slane %v6899_v41, %v19982_v28 }
0x1113   :  { %15235 = vrsqrt.f32 %v7097_v30 }
0x1114   :  { %v6913_v27 = vrot.slane %v6906_v4, %v19982_v28 }
0x1116   :  { %v6915_v32 = vsub.f32 %v5598_v6, %v6913_v27 }
0x1118   :  { %v6920_v58 = vrot.slane %v6915_v32, %v18164_v18  ;;  %v6924_v13 = vrot.slane %v6915_v32, %v19987_v15 }
0x111a   :  { %v6927_v42 = vadd.f32 %v6920_v58, %v6891_v46  ;;  %v6928_v22 = vadd.f32 %v6924_v13, %v6892_v3  ;;  %v6929_v48 = vadd.f32 %v6920_v58, %v6893_v56 }
0x111e   :  { %v15234_v10 = vpop.eup %15233 }
0x1120   :  { %v15236_v38 = vpop.eup %15235 }
0x1121   :  { %v7102_v37 = vcombine.low %v15234_v10, %v15236_v38 }
0x1123   :  { %v7109_v7 = vrot.slane %v7102_v37, %v19982_v28 }
0x1125   :  { %v7116_v52 = vrot.slane %v7109_v7, %v19982_v28 }
0x1127   :  { %v7118_v5 = vmul.f32 %v7116_v52, %v5599_v51 }
0x1129   :  { %v7123_v29 = vrot.slane %v7118_v5, %v18164_v18  ;;  %v7127_v63 = vrot.slane %v7118_v5, %v19987_v15 }
0x112b   :  { %v7134_v43 = vmul.f32 %v7123_v29, %v7068_v0  ;;  %v7135_v21 = vmul.f32 %v7127_v63, %v7069_v11  ;;  %v6894_v0 = vmul.f32 %v6888_v12, %v20178_v2  ;;  %v7130_v1 = vmul.f32 %v7123_v29, %v20194_v19 }
0x112c   :  { %v7131_v49 = vmul.f32 %v7127_v63, %v20196_v53  ;;  %v7132_v14 = vmul.f32 %v7123_v29, %v20198_v24  ;;  %v7133_v11 = vmul.f32 %v7127_v63, %v20208_v16 }
0x112d   :  { %v7138_v35 = vcombine.low %v7134_v43, %v7135_v21  ;;  %v6930_v31 = vadd.f32 %v6924_v13, %v6894_v0 }
0x112f   :  { %v7145_v20 = vrot.slane %v7138_v35, %v19982_v28 }
0x1131   :  { %v7152_v36 = vrot.slane %v7145_v20, %v19982_v28 }
0x1133   :  { %v7154_v62 = vsub.f32 %v5600_v59, %v7152_v36 }
0x1135   :  { %v7159_v23 = vrot.slane %v7154_v62, %v18164_v18  ;;  %v7163_v50 = vrot.slane %v7154_v62, %v19987_v15 }
0x1137   :  { %v7166_v45 = vadd.f32 %v7159_v23, %v7130_v1  ;;  %v7167_v61 = vadd.f32 %v7163_v50, %v7131_v49  ;;  %v7168_v54 = vadd.f32 %v7159_v23, %v7132_v14  ;;  %v7169_v2 = vadd.f32 %v7163_v50, %v7133_v11 }
0x1139   :  { %v7170_v34 = vadd.f32 %v7166_v45, %v6927_v42  ;;  %v7171_v19 = vadd.f32 %v7167_v61, %v6928_v22  ;;  %v7172_v33 = vadd.f32 %v7168_v54, %v6929_v48  ;;  %v7173_v53 = vadd.f32 %v7169_v2, %v6930_v31 }
0x113b   :  { %v7174_v44 = vmax.f32 %v7170_v34, 0.0  ;;  %v7175_v24 = vmax.f32 %v7171_v19, 0.0  ;;  %v7176_v26 = vmax.f32 %v7172_v33, 0.0  ;;  %v7177_v16 = vmax.f32 %v7173_v53, 0.0 }
0x113d   :  { %v7178_v17 = vpack.c.bf16 %v7176_v26, %v7174_v44  ;;  %v7179_v30 = vpack.c.bf16 %v7177_v16, %v7175_v24 }
0x113e   :  { %16307 = dma.done.wait [#allocation8 + $0x3], 24576 }
0x113f   :  { %16308 = vsyncadd [#allocation8 + $0x3], 4294942720 }
0x1140   :  { %16309 = dma.done.wait [#allocation8 + $0x4], 49152 }
0x1141   :  { %16310 = vsyncadd [#allocation8 + $0x4], 4294918144 }
0x1142   :  { %16311 = dma.done.wait [#allocation8 + $0x5], 8192 }
0x1143   :  { %16312 = vsyncadd [#allocation8 + $0x5], 4294959104  ;;  %7870 = vmatprep.subr.bf16.mxu0 %v7179_v30  ;;  %7888 = vmatprep.mubr.bf16.mxu0 %v21567_v55  ;;  %v21704_v39 = vld [vmem:[#allocation167_spill] sm:$0xff]  ;;  %v21705_v25 = vld [vmem:[#allocation165_spill] sm:$0xff]  ;;  %vm7849_vm10 = vcmask 130048   ;;  %vm12599_vm11 = vcmask 1043456  }
0x1144   :  { %v13679_v57 = vcombine.high %v21705_v25, %v21704_v39  ;;  %v13678_v40 = vcombine.low %v21705_v25, %v21704_v39  ;;  %v21706_v12 = vld [vmem:[#allocation231_spill] sm:$0xff]  ;;  %v21707_v10 = vld [vmem:[#allocation229_spill] sm:$0xff]  ;;  %7871 = vmatpush1.bf16.msra.mxu0 %v7178_v17  ;;  %15237 = vset.pattern.permute.xlu0 %v21567_v55  ;;  %vm12595_vm12 = vcmask 64512  }
0x1145   :  { %v13743_v8 = vcombine.high %v21707_v10, %v21706_v12  ;;  %v21708_v9 = vld [vmem:[#allocation163_spill] sm:$0xff]  ;;  %v21709_v38 = vld [vmem:[#allocation161_spill] sm:$0xff]  ;;  %v13742_v4 = vcombine.low %v21707_v10, %v21706_v12 }
0x1146   :  { %v13675_v37 = vcombine.high %v21709_v38, %v21708_v9  ;;  %8877 = vmatprep.subr.bf16.mxu1 %v13679_v57  ;;  %v13674_v41 = vcombine.low %v21709_v38, %v21708_v9  ;;  %v21710_v7 = vld [vmem:[#allocation159_spill] sm:$0xff]  ;;  %v21711_v51 = vld [vmem:[#allocation157_spill] sm:$0xff] }
0x1147   :  { %8918 = vmatprep.subr.bf16.mxu0 %v13743_v8  ;;  %8878 = vmatpush1.bf16.msra.mxu1 %v13678_v40  ;;  %v13671_v52 = vcombine.high %v21711_v51, %v21710_v7  ;;  %v15239_v5 = vld [vmem:[%s20974_s23] sm:$0xff]   ;;  %v21713_v63 = vld [vmem:[#allocation225_spill] sm:$0xff]  ;;  %v13670_v6 = vcombine.low %v21711_v51, %v21710_v7  ;;  %v15240_v20 = vld [vmem:[%s20974_s23 + $0x8] ss:$0 sps:$4 sm:$0xff]  }
0x1148   :  { %8879 = vmatprep.subr.bf16.mxu1 %v13675_v37  ;;  %v21712_v29 = vld [vmem:[#allocation227_spill] sm:$0xff]  ;;  %v21715_v21 = vld [vmem:[#allocation153_spill] sm:$0xff]  ;;  %13648 = vmatmul.mubr.msk.bf16.vlgmr.msra.gmra.mxu0 %vm7849_vm10, %v15239_v5 }
0x1149   :  { %v13739_v27 = vcombine.high %v21713_v63, %v21712_v29  ;;  %v21714_v43 = vld [vmem:[#allocation155_spill] sm:$0xff]  ;;  %7898 = vmatprep.mubr.bf16.mxu0 %v21567_v55  ;;  %8919 = vmatpush1.bf16.msra.mxu0 %v13742_v4  ;;  %v13738_v32 = vcombine.low %v21713_v63, %v21712_v29  ;;  %v21717_v36 = vld [vmem:[#allocation221_spill] sm:$0xff] }
0x114a   :  { %v13667_v35 = vcombine.high %v21715_v21, %v21714_v43  ;;  %v21716_v59 = vld [vmem:[#allocation223_spill] sm:$0xff]  ;;  %v13666_v13 = vcombine.low %v21715_v21, %v21714_v43  ;;  %v21719_v3 = vld [vmem:[#allocation149_spill] sm:$0xff] }
0x114b   :  { %8880 = vmatpush1.bf16.msra.mxu1 %v13674_v41  ;;  %8920 = vmatprep.subr.bf16.mxu0 %v13739_v27  ;;  %v13735_v58 = vcombine.high %v21717_v36, %v21716_v59  ;;  %v21718_v46 = vld [vmem:[#allocation151_spill] sm:$0xff]  ;;  %v13734_v56 = vcombine.low %v21717_v36, %v21716_v59  ;;  %v21721_v1 = vld [vmem:[#allocation217_spill] sm:$0xff] }
0x114c   :  { %8881 = vmatprep.subr.bf16.mxu1 %v13671_v52  ;;  %v13663_v62 = vcombine.high %v21719_v3, %v21718_v46  ;;  %v21720_v0 = vld [vmem:[#allocation219_spill] sm:$0xff]  ;;  %v13662_v14 = vcombine.low %v21719_v3, %v21718_v46  ;;  %v21723_v23 = vld [vmem:[#allocation145_spill] sm:$0xff] }
0x114d   :  { %8921 = vmatpush1.bf16.msra.mxu0 %v13738_v32  ;;  %v13731_v49 = vcombine.high %v21721_v1, %v21720_v0  ;;  %v21722_v11 = vld [vmem:[#allocation147_spill] sm:$0xff]  ;;  %v13730_v42 = vcombine.low %v21721_v1, %v21720_v0  ;;  %v21725_v48 = vld [vmem:[#allocation213_spill] sm:$0xff] }
0x114e   :  { %8922 = vmatprep.subr.bf16.mxu0 %v13735_v58  ;;  %v13659_v50 = vcombine.high %v21723_v23, %v21722_v11  ;;  %v21724_v22 = vld [vmem:[#allocation215_spill] sm:$0xff]  ;;  %v13658_v45 = vcombine.low %v21723_v23, %v21722_v11  ;;  %v21727_v54 = vld [vmem:[#allocation141_spill] sm:$0xff] }
0x114f   :  { %8882 = vmatpush1.bf16.msra.mxu1 %v13670_v6  ;;  %v13727_v31 = vcombine.high %v21725_v48, %v21724_v22  ;;  %v21726_v61 = vld [vmem:[#allocation143_spill] sm:$0xff]  ;;  %v13726_v34 = vcombine.low %v21725_v48, %v21724_v22  ;;  %v21729_v33 = vld [vmem:[#allocation209_spill] sm:$0xff] }
0x1150   :  { %8883 = vmatprep.subr.bf16.mxu1 %v13667_v35  ;;  %13649 = vmatmul.mubr.msk.bf16.gmra.mxu0 %vm7849_vm10, %v15240_v20  ;;  %v13655_v2 = vcombine.high %v21727_v54, %v21726_v61  ;;  %v21728_v19 = vld [vmem:[#allocation211_spill] sm:$0xff]  ;;  %v13654_v44 = vcombine.low %v21727_v54, %v21726_v61  ;;  %v21731_v26 = vld [vmem:[#allocation137_spill] sm:$0xff] }
0x1151   :  { %8923 = vmatpush1.bf16.msra.mxu0 %v13734_v56  ;;  %v13723_v53 = vcombine.high %v21729_v33, %v21728_v19  ;;  %v21730_v24 = vld [vmem:[#allocation139_spill] sm:$0xff]  ;;  %v13722_v17 = vcombine.low %v21729_v33, %v21728_v19  ;;  %v21733_v39 = vld [vmem:[#allocation205_spill] sm:$0xff] }
0x1152   :  { %8924 = vmatprep.subr.bf16.mxu0 %v13731_v49  ;;  %v13651_v16 = vcombine.high %v21731_v26, %v21730_v24  ;;  %v21732_v30 = vld [vmem:[#allocation207_spill] sm:$0xff]  ;;  %v13650_v57 = vcombine.low %v21731_v26, %v21730_v24  ;;  %v21735_v12 = vld [vmem:[#allocation197_spill] sm:$0xff] }
0x1153   :  { %8884 = vmatpush1.bf16.msra.mxu1 %v13666_v13  ;;  %v13719_v25 = vcombine.high %v21733_v39, %v21732_v30  ;;  %v21734_v40 = vld [vmem:[#allocation199_spill] sm:$0xff]  ;;  %v13718_v8 = vcombine.low %v21733_v39, %v21732_v30  ;;  %v21737_v38 = vld [vmem:[#allocation201_spill] sm:$0xff] }
0x1154   :  { %8885 = vmatprep.subr.bf16.mxu1 %v13663_v62  ;;  %v13711_v10 = vcombine.high %v21735_v12, %v21734_v40  ;;  %v21736_v9 = vld [vmem:[#allocation203_spill] sm:$0xff]  ;;  %v13710_v41 = vcombine.low %v21735_v12, %v21734_v40  ;;  %v21739_v51 = vld [vmem:[#allocation193_spill] sm:$0xff] }
0x1155   :  { %8925 = vmatpush1.bf16.msra.mxu0 %v13730_v42  ;;  %v13715_v37 = vcombine.high %v21737_v38, %v21736_v9  ;;  %v21738_v7 = vld [vmem:[#allocation195_spill] sm:$0xff]  ;;  %v13714_v4 = vcombine.low %v21737_v38, %v21736_v9  ;;  %v21741_v29 = vld [vmem:[#allocation261_spill] sm:$0xff] }
0x1156   :  { %8926 = vmatprep.subr.bf16.mxu0 %v13727_v31  ;;  %v13707_v52 = vcombine.high %v21739_v51, %v21738_v7  ;;  %v21740_v5 = vld [vmem:[#allocation263_spill] sm:$0xff]  ;;  %v13706_v27 = vcombine.low %v21739_v51, %v21738_v7  ;;  %v21743_v43 = vld [vmem:[#allocation189_spill] sm:$0xff] }
0x1157   :  { %8886 = vmatpush1.bf16.msra.mxu1 %v13662_v14  ;;  %v13775_v63 = vcombine.high %v21741_v29, %v21740_v5  ;;  %v21742_v6 = vld [vmem:[#allocation191_spill] sm:$0xff]  ;;  %v13774_v35 = vcombine.low %v21741_v29, %v21740_v5  ;;  %v21745_v20 = vld [vmem:[#allocation257_spill] sm:$0xff] }
0x1158   :  { %8887 = vmatprep.subr.bf16.mxu1 %v13659_v50  ;;  %v13703_v21 = vcombine.high %v21743_v43, %v21742_v6  ;;  %v21744_v32 = vld [vmem:[#allocation259_spill] sm:$0xff]  ;;  %v13702_v36 = vcombine.low %v21743_v43, %v21742_v6  ;;  %v21747_v13 = vld [vmem:[#allocation185_spill] sm:$0xff] }
0x1159   :  { %8927 = vmatpush1.bf16.msra.mxu0 %v13726_v34  ;;  %v13771_v59 = vcombine.high %v21745_v20, %v21744_v32  ;;  %v21746_v58 = vld [vmem:[#allocation187_spill] sm:$0xff]  ;;  %v13770_v3 = vcombine.low %v21745_v20, %v21744_v32  ;;  %v21749_v56 = vld [vmem:[#allocation253_spill] sm:$0xff] }
0x115a   :  { %8928 = vmatprep.subr.bf16.mxu0 %v13723_v53  ;;  %v13699_v46 = vcombine.high %v21747_v13, %v21746_v58  ;;  %v21748_v62 = vld [vmem:[#allocation255_spill] sm:$0xff]  ;;  %v13698_v1 = vcombine.low %v21747_v13, %v21746_v58  ;;  %v21751_v14 = vld [vmem:[#allocation181_spill] sm:$0xff] }
0x115b   :  { %8888 = vmatpush1.bf16.msra.mxu1 %v13658_v45  ;;  %v13767_v0 = vcombine.high %v21749_v56, %v21748_v62  ;;  %v21750_v49 = vld [vmem:[#allocation183_spill] sm:$0xff]  ;;  %v13766_v23 = vcombine.low %v21749_v56, %v21748_v62  ;;  %v21753_v42 = vld [vmem:[#allocation249_spill] sm:$0xff] }
0x115c   :  { %8889 = vmatprep.subr.bf16.mxu1 %v13655_v2  ;;  %v13695_v11 = vcombine.high %v21751_v14, %v21750_v49  ;;  %v21752_v50 = vld [vmem:[#allocation251_spill] sm:$0xff]  ;;  %v13694_v48 = vcombine.low %v21751_v14, %v21750_v49  ;;  %v21755_v45 = vld [vmem:[#allocation177_spill] sm:$0xff]  ;;  %v21775_v49 = vld [vmem:[#allocation162_spill] sm:$0xff] }
0x115d   :  { %8929 = vmatpush1.bf16.msra.mxu0 %v13722_v17  ;;  %v13763_v22 = vcombine.high %v21753_v42, %v21752_v50  ;;  %v21754_v31 = vld [vmem:[#allocation179_spill] sm:$0xff]  ;;  %v13762_v54 = vcombine.low %v21753_v42, %v21752_v50  ;;  %v21757_v34 = vld [vmem:[#allocation245_spill] sm:$0xff] }
0x115e   :  { %8930 = vmatprep.subr.bf16.mxu0 %v13719_v25  ;;  %v13691_v61 = vcombine.high %v21755_v45, %v21754_v31  ;;  %v21756_v2 = vld [vmem:[#allocation247_spill] sm:$0xff]  ;;  %v13690_v33 = vcombine.low %v21755_v45, %v21754_v31  ;;  %v21759_v24 = vld [vmem:[#allocation241_spill] sm:$0xff] }
0x115f   :  { %8890 = vmatpush1.bf16.msra.mxu1 %v13654_v44  ;;  %v13759_v19 = vcombine.high %v21757_v34, %v21756_v2  ;;  %v13758_v53 = vcombine.low %v21757_v34, %v21756_v2  ;;  %v21758_v44 = vld [vmem:[#allocation243_spill] sm:$0xff]  ;;  %v21761_v30 = vld [vmem:[#allocation173_spill] sm:$0xff] }
0x1160   :  { %8891 = vmatprep.subr.bf16.mxu1 %v13651_v16  ;;  %v13755_v26 = vcombine.high %v21759_v24, %v21758_v44  ;;  %v13754_v16 = vcombine.low %v21759_v24, %v21758_v44  ;;  %v21760_v17 = vld [vmem:[#allocation175_spill] sm:$0xff]  ;;  %v21763_v40 = vld [vmem:[#allocation237_spill] sm:$0xff] }
0x1161   :  { %8931 = vmatpush1.bf16.msra.mxu0 %v13718_v8  ;;  %v13687_v39 = vcombine.high %v21761_v30, %v21760_v17  ;;  %v13686_v25 = vcombine.low %v21761_v30, %v21760_v17  ;;  %v21764_v8 = vld [vmem:[#allocation171_spill] sm:$0xff]  ;;  %v21765_v9 = vld [vmem:[#allocation169_spill] sm:$0xff] }
0x1162   :  { %8932 = vmatprep.subr.bf16.mxu0 %v13715_v37  ;;  %v13683_v38 = vcombine.high %v21765_v9, %v21764_v8  ;;  %v13682_v37 = vcombine.low %v21765_v9, %v21764_v8  ;;  %v21767_v7 = vld [vmem:[#allocation233_spill] sm:$0xff]  ;;  %v21772_v58 = vld [vmem:[#allocation291_spill] sm:$0xff] }
0x1163   :  { %8892 = vmatpush1.bf16.msra.mxu1 %v13650_v57  ;;  %v21762_v57 = vld [vmem:[#allocation239_spill] sm:$0xff]  ;;  %v21769_v5 = vld [vmem:[#allocation293_spill] sm:$0xff] }
0x1164   :  { %8893 = vmatprep.subr.bf16.mxu1 %v13711_v10  ;;  %v13751_v12 = vcombine.high %v21763_v40, %v21762_v57  ;;  %v13750_v10 = vcombine.low %v21763_v40, %v21762_v57  ;;  %v21773_v13 = vld [vmem:[#allocation289_spill] sm:$0xff]  ;;  %v21776_v42 = vld [vmem:[#allocation287_spill] sm:$0xff] }
0x1165   :  { %8933 = vmatpush1.bf16.msra.mxu0 %v13714_v4  ;;  %v21768_v4 = vld [vmem:[#allocation295_spill] sm:$0xff] }
0x1166   :  { %8934 = vmatprep.subr.bf16.mxu0 %v13775_v63  ;;  %v13807_v29 = vcombine.high %v21769_v5, %v21768_v4  ;;  %v21770_v63 = vld [vmem:[#allocation168_spill] sm:$0xff] }
0x1167   :  { %8894 = vmatpush2.bf16.msra.mxu1 %v13710_v41  ;;  %v21766_v41 = vld [vmem:[#allocation235_spill] sm:$0xff] }
0x1168   :  { %8895 = vmatprep.subr.bf16.mxu1 %v13707_v52  ;;  %v13747_v51 = vcombine.high %v21767_v7, %v21766_v41  ;;  %v13746_v52 = vcombine.low %v21767_v7, %v21766_v41 }
0x1169   :  { %8935 = vmatpush2.bf16.msra.mxu0 %v13774_v35 }
0x116a   :  { %8936 = vmatprep.subr.bf16.mxu0 %v13771_v59 }
0x116b   :  { %8896 = vmatpush2.bf16.msra.mxu1 %v13706_v27  ;;  %v21771_v27 = vld [vmem:[#allocation166_spill] sm:$0xff] }
0x116c   :  { %8897 = vmatprep.subr.bf16.mxu1 %v13703_v21  ;;  %v13681_v6 = vcombine.high %v21771_v27, %v21770_v63  ;;  %v13680_v56 = vcombine.low %v21771_v27, %v21770_v63  ;;  %v21793_v63 = vld [vmem:[#allocation269_spill] sm:$0xff] }
0x116d   :  { %8937 = vmatpush2.bf16.msra.mxu0 %v13770_v3 }
0x116e   :  { %8938 = vmatprep.subr.bf16.mxu0 %v13767_v0 }
0x116f   :  { %8898 = vmatpush2.bf16.msra.mxu1 %v13702_v36  ;;  %v13806_v36 = vcombine.low %v21769_v5, %v21768_v4 }
0x1170   :  { %8899 = vmatprep.subr.bf16.mxu1 %v13699_v46  ;;  %v13803_v46 = vcombine.high %v21773_v13, %v21772_v58 }
0x1171   :  { %8939 = vmatpush2.bf16.msra.mxu0 %v13766_v23  ;;  %v13802_v23 = vcombine.low %v21773_v13, %v21772_v58 }
0x1172   :  { %8940 = vmatprep.subr.bf16.mxu0 %v13763_v22  ;;  %v21777_v22 = vld [vmem:[#allocation285_spill] sm:$0xff] }
0x1173   :  { %8900 = vmatpush2.bf16.msra.mxu1 %v13698_v1  ;;  %v21774_v1 = vld [vmem:[#allocation164_spill] sm:$0xff] }
0x1174   :  { %8901 = vmatprep.subr.bf16.mxu1 %v13695_v11  ;;  %v13677_v14 = vcombine.high %v21775_v49, %v21774_v1  ;;  %v13676_v45 = vcombine.low %v21775_v49, %v21774_v1 }
0x1175   :  { %8941 = vmatpush2.bf16.msra.mxu0 %v13762_v54  ;;  %v21779_v54 = vld [vmem:[#allocation158_spill] sm:$0xff] }
0x1176   :  { %8942 = vmatprep.subr.bf16.mxu0 %v13759_v19  ;;  %v13798_v19 = vcombine.low %v21777_v22, %v21776_v42 }
0x1177   :  { %8902 = vmatpush2.bf16.msra.mxu1 %v13694_v48  ;;  %v13799_v48 = vcombine.high %v21777_v22, %v21776_v42  ;;  %v21802_v22 = vld [vmem:[#allocation200_spill] sm:$0xff] }
0x1178   :  { %8903 = vmatprep.subr.bf16.mxu1 %v13691_v61  ;;  %v21778_v61 = vld [vmem:[#allocation160_spill] sm:$0xff] }
0x1179   :  { %8943 = vmatpush2.bf16.msra.mxu0 %v13758_v53  ;;  %v13673_v2 = vcombine.high %v21779_v54, %v21778_v61  ;;  %v21781_v53 = vld [vmem:[#allocation281_spill] sm:$0xff]  ;;  %v13672_v24 = vcombine.low %v21779_v54, %v21778_v61  ;;  %v21804_v61 = vld [vmem:[#allocation323_spill] sm:$0xff] }
0x117a   :  { %8944 = vmatprep.subr.bf16.mxu0 %v13755_v26  ;;  %v21782_v26 = vld [vmem:[#allocation156_spill] sm:$0xff]  ;;  %v21805_v54 = vld [vmem:[#allocation321_spill] sm:$0xff] }
0x117b   :  { %8904 = vmatpush2.bf16.msra.mxu1 %v13690_v33  ;;  %v21780_v33 = vld [vmem:[#allocation283_spill] sm:$0xff] }
0x117c   :  { %8905 = vmatprep.subr.bf16.mxu1 %v13687_v39  ;;  %v13795_v44 = vcombine.high %v21781_v53, %v21780_v33  ;;  %v13794_v30 = vcombine.low %v21781_v53, %v21780_v33  ;;  %v21784_v39 = vld [vmem:[#allocation279_spill] sm:$0xff]  ;;  %v21807_v33 = vld [vmem:[#allocation194_spill] sm:$0xff] }
0x117d   :  { %8945 = vmatpush2.bf16.msra.mxu0 %v13754_v16  ;;  %v21783_v16 = vld [vmem:[#allocation154_spill] sm:$0xff] }
0x117e   :  { %8946 = vmatprep.subr.bf16.mxu0 %v13751_v12  ;;  %v13669_v17 = vcombine.high %v21783_v16, %v21782_v26  ;;  %v13668_v40 = vcombine.low %v21783_v16, %v21782_v26  ;;  %v21786_v12 = vld [vmem:[#allocation152_spill] sm:$0xff]  ;;  %v21809_v26 = vld [vmem:[#allocation317_spill] sm:$0xff] }
0x117f   :  { %8906 = vmatpush2.bf16.msra.mxu1 %v13686_v25  ;;  %v21785_v25 = vld [vmem:[#allocation277_spill] sm:$0xff] }
0x1180   :  { %8907 = vmatprep.subr.bf16.mxu1 %v13683_v38  ;;  %v13791_v57 = vcombine.high %v21785_v25, %v21784_v39  ;;  %v13790_v9 = vcombine.low %v21785_v25, %v21784_v39  ;;  %v21788_v38 = vld [vmem:[#allocation275_spill] sm:$0xff]  ;;  %v21811_v39 = vld [vmem:[#allocation190_spill] sm:$0xff] }
0x1181   :  { %8947 = vmatpush2.bf16.msra.mxu0 %v13750_v10  ;;  %v21787_v10 = vld [vmem:[#allocation150_spill] sm:$0xff] }
0x1182   :  { %8948 = vmatprep.subr.bf16.mxu0 %v13747_v51  ;;  %v13665_v8 = vcombine.high %v21787_v10, %v21786_v12  ;;  %v13664_v7 = vcombine.low %v21787_v10, %v21786_v12  ;;  %v21790_v51 = vld [vmem:[#allocation148_spill] sm:$0xff]  ;;  %v21813_v12 = vld [vmem:[#allocation313_spill] sm:$0xff] }
0x1183   :  { %8908 = vmatpush2.bf16.msra.mxu1 %v13682_v37  ;;  %v21789_v37 = vld [vmem:[#allocation273_spill] sm:$0xff] }
0x1184   :  { %8959 = vmatprep.subr.bf16.mxu1 %v13807_v29  ;;  %v13787_v41 = vcombine.high %v21789_v37, %v21788_v38  ;;  %v13786_v5 = vcombine.low %v21789_v37, %v21788_v38  ;;  %v21792_v29 = vld [vmem:[#allocation271_spill] sm:$0xff]  ;;  %v21815_v38 = vld [vmem:[#allocation186_spill] sm:$0xff] }
0x1185   :  { %8949 = vmatpush2.bf16.msra.mxu0 %v13746_v52  ;;  %v21791_v52 = vld [vmem:[#allocation146_spill] sm:$0xff]  ;;  %v13783_v27 = vcombine.high %v21793_v63, %v21792_v29 }
0x1186   :  { %9000 = vmatprep.subr.bf16.mxu0 %v13681_v6  ;;  %v13661_v4 = vcombine.high %v21791_v52, %v21790_v51  ;;  %v13660_v6 = vcombine.low %v21791_v52, %v21790_v51  ;;  %v21817_v51 = vld [vmem:[#allocation309_spill] sm:$0xff] }
0x1208   :  { %v7890_v43 = vpop.f32.mrf.mxu0 }
0x120a   :  { %v7892_v21 = vpop.f32.mrf.mxu0 }
0x120c   :  { %v7894_v35 = vpop.f32.mrf.mxu0 }
0x120d   :  { %v20383_v32 = vpack.c.bf16 %v7894_v35, %v7890_v43  ;;  %v21794_v43 = vld [vmem:[#allocation144_spill] sm:$0xff] }
0x120e   :  { %v7896_v20 = vpop.f32.mrf.mxu0 }
0x120f   :  { %v7908_v59 = vpack.c.bf16 %v7896_v20, %v7892_v21  ;;  %v20396_v0 = vrot.slane %v20383_v32, 4  ;;  %v21795_v21 = vld [vmem:[#allocation142_spill] sm:$0xff]  ;;  %v13782_v20 = vcombine.low %v21793_v63, %v21792_v29 }
0x1210   :  { %v20389_v3 = vpop.f32.mrf.mxu0  ;;  %v13657_v35 = vcombine.high %v21795_v21, %v21794_v43  ;;  %v13656_v13 = vcombine.low %v21795_v21, %v21794_v43  ;;  %v21819_v29 = vld [vmem:[#allocation182_spill] sm:$0xff]  ;;  %v21821_v43 = vld [vmem:[#allocation305_spill] sm:$0xff] }
0x1211   :  { %v20391_v62 = vrot.slane %v7908_v59, 4  ;;  %8909 = vmatprep.mubr.bf16.mxu1 %v7908_v59 }
0x1212   :  { %8910 = vmatmul.mubr.bf16.vlgmr.msra.gmra.mxu1 %v20383_v32  ;;  %v7902_v11 = vpop.f32.mrf.mxu0 }
0x1213   :  { %8960 = vmatpush1.bf16.msra.mxu1 %v13806_v36  ;;  %8950 = vmatprep.mubr.bf16.mxu0 %v20391_v62  ;;  %v20404_v50 = vpack.c.bf16 %v7902_v11, %v7902_v11  ;;  %v21797_v36 = vld [vmem:[#allocation265_spill] sm:$0xff] }
0x1214   :  { %8951 = vmatmul.mubr.bf16.vlgmr.msra.gmra.mxu0 %v20396_v0  ;;  %8961 = vmatprep.subr.bf16.mxu1 %v13803_v46  ;;  %v7904_v31 = vpop.f32.mrf.mxu0  ;;  %v21798_v46 = vld [vmem:[#allocation140_spill] sm:$0xff]  ;;  %v21801_v11 = vld [vmem:[#allocation325_spill] sm:$0xff] }
0x1215   :  { %9001 = vmatpush1.bf16.msra.mxu0 %v13680_v56  ;;  %9032 = vmatprep.mubr.bf16.mxu0 %v7908_v59  ;;  %v21796_v59 = vld [vmem:[#allocation267_spill] sm:$0xff]  ;;  %v21799_v56 = vld [vmem:[#allocation138_spill] sm:$0xff] }
0x1216   :  { %9002 = vmatprep.subr.bf16.mxu0 %v13677_v14  ;;  %v7905_v34 = vpop.f32.mrf.mxu0  ;;  %8991 = vmatprep.mubr.bf16.mxu1 %v20404_v50  ;;  %v13779_v58 = vcombine.high %v21797_v36, %v21796_v59  ;;  %v13653_v1 = vcombine.high %v21799_v56, %v21798_v46  ;;  %v13778_v49 = vcombine.low %v21797_v36, %v21796_v59  ;;  %v21800_v14 = vld [vmem:[#allocation327_spill] sm:$0xff]  ;;  %v21823_v59 = vld [vmem:[#allocation178_spill] sm:$0xff] }
0x1217   :  { %8962 = vmatpush1.bf16.msra.mxu1 %v13802_v23  ;;  %v13839_v23 = vcombine.high %v21801_v11, %v21800_v14  ;;  %v13652_v42 = vcombine.low %v21799_v56, %v21798_v46  ;;  %v21825_v46 = vld [vmem:[#allocation301_spill] sm:$0xff] }
0x1218   :  { %8963 = vmatprep.subr.bf16.mxu1 %v13799_v48  ;;  %v21803_v48 = vld [vmem:[#allocation198_spill] sm:$0xff] }
0x1219   :  { %9003 = vmatpush1.bf16.msra.mxu0 %v13676_v45  ;;  %v13713_v31 = vcombine.high %v21803_v48, %v21802_v22  ;;  %v13838_v45 = vcombine.low %v21801_v11, %v21800_v14  ;;  %v13712_v34 = vcombine.low %v21803_v48, %v21802_v22  ;;  %v21827_v14 = vld [vmem:[#allocation174_spill] sm:$0xff]  ;;  %v21829_v22 = vld [vmem:[#allocation297_spill] sm:$0xff] }
0x121a   :  { %9004 = vmatprep.subr.bf16.mxu0 %v13673_v2  ;;  %v13835_v2 = vcombine.high %v21805_v54, %v21804_v61 }
0x121b   :  { %8964 = vmatpush1.bf16.msra.mxu1 %v13798_v19  ;;  %v21806_v19 = vld [vmem:[#allocation196_spill] sm:$0xff] }
0x121c   :  { %8965 = vmatprep.subr.bf16.mxu1 %v13795_v44  ;;  %v13709_v53 = vcombine.high %v21807_v33, %v21806_v19  ;;  %v13834_v44 = vcombine.low %v21805_v54, %v21804_v61  ;;  %v21831_v61 = vld [vmem:[#allocation170_spill] sm:$0xff] }
0x121d   :  { %9005 = vmatpush1.bf16.msra.mxu0 %v13672_v24  ;;  %v21808_v24 = vld [vmem:[#allocation319_spill] sm:$0xff] }
0x121e   :  { %9006 = vmatprep.subr.bf16.mxu0 %v13669_v17  ;;  %v13831_v16 = vcombine.high %v21809_v26, %v21808_v24  ;;  %v13708_v17 = vcombine.low %v21807_v33, %v21806_v19  ;;  %v21833_v19 = vld [vmem:[#allocation230_spill] sm:$0xff] }
0x121f   :  { %8966 = vmatpush1.bf16.msra.mxu1 %v13794_v30  ;;  %v21810_v30 = vld [vmem:[#allocation192_spill] sm:$0xff] }
0x1220   :  { %8967 = vmatprep.subr.bf16.mxu1 %v13791_v57  ;;  %v13705_v25 = vcombine.high %v21811_v39, %v21810_v30  ;;  %v13830_v57 = vcombine.low %v21809_v26, %v21808_v24  ;;  %v21835_v24 = vld [vmem:[#allocation294_spill] sm:$0xff] }
0x1221   :  { %9007 = vmatpush1.bf16.msra.mxu0 %v13668_v40  ;;  %v21812_v40 = vld [vmem:[#allocation315_spill] sm:$0xff] }
0x1222   :  { %9008 = vmatprep.subr.bf16.mxu0 %v13665_v8  ;;  %v13827_v10 = vcombine.high %v21813_v12, %v21812_v40  ;;  %v13704_v8 = vcombine.low %v21811_v39, %v21810_v30  ;;  %v21836_v30 = vld [vmem:[#allocation228_spill] sm:$0xff]  ;;  %v21837_v39 = vld [vmem:[#allocation226_spill] sm:$0xff] }
0x1223   :  { %8968 = vmatpush1.bf16.msra.mxu1 %v13790_v9  ;;  %v21814_v9 = vld [vmem:[#allocation188_spill] sm:$0xff] }
0x1224   :  { %8969 = vmatprep.subr.bf16.mxu1 %v13787_v41  ;;  %v13701_v37 = vcombine.high %v21815_v38, %v21814_v9  ;;  %v13826_v41 = vcombine.low %v21813_v12, %v21812_v40  ;;  %v21838_v40 = vld [vmem:[#allocation292_spill] sm:$0xff]  ;;  %v21839_v12 = vld [vmem:[#allocation290_spill] sm:$0xff] }
0x1225   :  { %9009 = vmatpush1.bf16.msra.mxu0 %v13664_v7  ;;  %v21816_v7 = vld [vmem:[#allocation311_spill] sm:$0xff] }
0x1226   :  { %9010 = vmatprep.subr.bf16.mxu0 %v13661_v4  ;;  %v13823_v52 = vcombine.high %v21817_v51, %v21816_v7  ;;  %v13700_v4 = vcombine.low %v21815_v38, %v21814_v9  ;;  %v21841_v9 = vld [vmem:[#allocation222_spill] sm:$0xff] }
0x1227   :  { %8970 = vmatpush1.bf16.msra.mxu1 %v13786_v5  ;;  %v21818_v5 = vld [vmem:[#allocation184_spill] sm:$0xff] }
0x1228   :  { %8971 = vmatprep.subr.bf16.mxu1 %v13783_v27  ;;  %v13697_v63 = vcombine.high %v21819_v29, %v21818_v5  ;;  %v13822_v27 = vcombine.low %v21817_v51, %v21816_v7  ;;  %v21843_v7 = vld [vmem:[#allocation286_spill] sm:$0xff] }
0x1229   :  { %9011 = vmatpush1.bf16.msra.mxu0 %v13660_v6  ;;  %v21820_v6 = vld [vmem:[#allocation307_spill] sm:$0xff] }
0x122a   :  { %9012 = vmatprep.subr.bf16.mxu0 %v13657_v35  ;;  %v13819_v21 = vcombine.high %v21821_v43, %v21820_v6  ;;  %v13696_v35 = vcombine.low %v21819_v29, %v21818_v5 }
0x122b   :  { %8972 = vmatpush1.bf16.msra.mxu1 %v13782_v20  ;;  %v21822_v20 = vld [vmem:[#allocation180_spill] sm:$0xff] }
0x122c   :  { %8973 = vmatprep.subr.bf16.mxu1 %v13779_v58  ;;  %v13693_v36 = vcombine.high %v21823_v59, %v21822_v20  ;;  %v13818_v58 = vcombine.low %v21821_v43, %v21820_v6  ;;  %v21848_v43 = vld [vmem:[#allocation216_spill] sm:$0xff] }
0x122d   :  { %9013 = vmatpush1.bf16.msra.mxu0 %v13656_v13  ;;  %v21824_v13 = vld [vmem:[#allocation303_spill] sm:$0xff] }
0x122e   :  { %9014 = vmatprep.subr.bf16.mxu0 %v13653_v1  ;;  %v13815_v56 = vcombine.high %v21825_v46, %v21824_v13  ;;  %v13692_v1 = vcombine.low %v21823_v59, %v21822_v20  ;;  %v21850_v59 = vld [vmem:[#allocation280_spill] sm:$0xff] }
0x122f   :  { %8974 = vmatpush1.bf16.msra.mxu1 %v13778_v49  ;;  %v21826_v49 = vld [vmem:[#allocation176_spill] sm:$0xff] }
0x1230   :  { %8975 = vmatprep.subr.bf16.mxu1 %v13839_v23  ;;  %v13689_v11 = vcombine.high %v21827_v14, %v21826_v49  ;;  %v13814_v23 = vcombine.low %v21825_v46, %v21824_v13  ;;  %v21852_v46 = vld [vmem:[#allocation212_spill] sm:$0xff] }
0x1231   :  { %9015 = vmatpush1.bf16.msra.mxu0 %v13652_v42  ;;  %v21828_v42 = vld [vmem:[#allocation299_spill] sm:$0xff] }
0x1232   :  { %9016 = vmatprep.subr.bf16.mxu0 %v13713_v31  ;;  %v13811_v48 = vcombine.high %v21829_v22, %v21828_v42  ;;  %v13688_v31 = vcombine.low %v21827_v14, %v21826_v49  ;;  %v21854_v14 = vld [vmem:[#allocation276_spill] sm:$0xff] }
0x1233   :  { %8976 = vmatpush2.bf16.msra.mxu1 %v13838_v45  ;;  %v21830_v45 = vld [vmem:[#allocation172_spill] sm:$0xff] }
0x1234   :  { %8977 = vmatprep.subr.bf16.mxu1 %v13835_v2  ;;  %v13685_v54 = vcombine.high %v21831_v61, %v21830_v45  ;;  %v13810_v2 = vcombine.low %v21829_v22, %v21828_v42  ;;  %v21856_v22 = vld [vmem:[#allocation208_spill] sm:$0xff] }
0x1235   :  { %9017 = vmatpush2.bf16.msra.mxu0 %v13712_v34  ;;  %v21832_v34 = vld [vmem:[#allocation232_spill] sm:$0xff] }
0x1236   :  { %9018 = vmatprep.subr.bf16.mxu0 %v13709_v53  ;;  %v13745_v33 = vcombine.high %v21833_v19, %v21832_v34  ;;  %v13684_v53 = vcombine.low %v21831_v61, %v21830_v45  ;;  %v21858_v61 = vld [vmem:[#allocation272_spill] sm:$0xff] }
0x1237   :  { %8978 = vmatpush2.bf16.msra.mxu1 %v13834_v44  ;;  %v21834_v44 = vld [vmem:[#allocation296_spill] sm:$0xff] }
0x1238   :  { %8979 = vmatprep.subr.bf16.mxu1 %v13831_v16  ;;  %v13809_v26 = vcombine.high %v21835_v24, %v21834_v44  ;;  %v13744_v16 = vcombine.low %v21833_v19, %v21832_v34  ;;  %v21860_v19 = vld [vmem:[#allocation204_spill] sm:$0xff] }
0x1239   :  { %9019 = vmatpush2.bf16.msra.mxu0 %v13708_v17  ;;  %v20530_v17 = vpack.c.bf16 %v20389_v3, %v20389_v3  ;;  %v13740_v3 = vcombine.low %v21837_v39, %v21836_v30 }
0x123a   :  { %9020 = vmatprep.subr.bf16.mxu0 %v13705_v25  ;;  %v13741_v25 = vcombine.high %v21837_v39, %v21836_v30  ;;  %v21864_v39 = vld [vmem:[#allocation264_spill] sm:$0xff] }
0x123b   :  { %8980 = vmatpush2.bf16.msra.mxu1 %v13830_v57  ;;  %v13808_v57 = vcombine.low %v21835_v24, %v21834_v44  ;;  %v21862_v24 = vld [vmem:[#allocation268_spill] sm:$0xff] }
0x123c   :  { %8981 = vmatprep.subr.bf16.mxu1 %v13827_v10  ;;  %v13805_v10 = vcombine.high %v21839_v12, %v21838_v40 }
0x123d   :  { %9021 = vmatpush2.bf16.msra.mxu0 %v13704_v8  ;;  %v21840_v8 = vld [vmem:[#allocation224_spill] sm:$0xff] }
0x123e   :  { %9022 = vmatprep.subr.bf16.mxu0 %v13701_v37  ;;  %v13737_v38 = vcombine.high %v21841_v9, %v21840_v8  ;;  %v13804_v37 = vcombine.low %v21839_v12, %v21838_v40  ;;  %v21866_v12 = vld [vmem:[#allocation328_spill] sm:$0xff] }
0x123f   :  { %8982 = vmatpush2.bf16.msra.mxu1 %v13826_v41  ;;  %v21842_v41 = vld [vmem:[#allocation288_spill] sm:$0xff] }
0x1240   :  { %8983 = vmatprep.subr.bf16.mxu1 %v13823_v52  ;;  %v13801_v51 = vcombine.high %v21843_v7, %v21842_v41  ;;  %v13736_v52 = vcombine.low %v21841_v9, %v21840_v8  ;;  %v13800_v29 = vcombine.low %v21843_v7, %v21842_v41  ;;  %v21868_v9 = vld [vmem:[#allocation260_spill] sm:$0xff] }
0x1241   :  { %9023 = vmatpush2.bf16.msra.mxu0 %v13700_v4  ;;  %v21845_v4 = vld [vmem:[#allocation218_spill] sm:$0xff]  ;;  %v21870_v7 = vld [vmem:[#allocation324_spill] sm:$0xff] }
0x1242   :  { %9024 = vmatprep.subr.bf16.mxu0 %v13697_v63  ;;  %v21847_v63 = vld [vmem:[#allocation282_spill] sm:$0xff] }
0x1243   :  { %8984 = vmatpush2.bf16.msra.mxu1 %v13822_v27 }
0x1244   :  { %8985 = vmatprep.subr.bf16.mxu1 %v13819_v21  ;;  %v21849_v21 = vld [vmem:[#allocation214_spill] sm:$0xff] }
0x1245   :  { %9025 = vmatpush2.bf16.msra.mxu0 %v13696_v35  ;;  %v13729_v35 = vcombine.high %v21849_v21, %v21848_v43  ;;  %v13728_v13 = vcombine.low %v21849_v21, %v21848_v43  ;;  %v21876_v21 = vld [vmem:[#allocation252_spill] sm:$0xff] }
0x1246   :  { %9026 = vmatprep.subr.bf16.mxu0 %v13693_v36  ;;  %v21851_v36 = vld [vmem:[#allocation278_spill] sm:$0xff] }
0x1247   :  { %8986 = vmatpush2.bf16.msra.mxu1 %v13818_v58  ;;  %v13793_v58 = vcombine.high %v21851_v36, %v21850_v59  ;;  %v13792_v49 = vcombine.low %v21851_v36, %v21850_v59  ;;  %v21878_v36 = vld [vmem:[#allocation316_spill] sm:$0xff] }
0x1248   :  { %8987 = vmatprep.subr.bf16.mxu1 %v13815_v56  ;;  %v21853_v56 = vld [vmem:[#allocation210_spill] sm:$0xff] }
0x1249   :  { %9027 = vmatpush2.bf16.msra.mxu0 %v13692_v1  ;;  %v13725_v1 = vcombine.high %v21853_v56, %v21852_v46  ;;  %v13724_v42 = vcombine.low %v21853_v56, %v21852_v46  ;;  %v21880_v56 = vld [vmem:[#allocation248_spill] sm:$0xff] }
0x124a   :  { %9028 = vmatprep.subr.bf16.mxu0 %v13689_v11  ;;  %v21855_v11 = vld [vmem:[#allocation274_spill] sm:$0xff] }
0x124b   :  { %8988 = vmatpush2.bf16.msra.mxu1 %v13814_v23  ;;  %v13789_v23 = vcombine.high %v21855_v11, %v21854_v14  ;;  %v13788_v45 = vcombine.low %v21855_v11, %v21854_v14  ;;  %v21882_v11 = vld [vmem:[#allocation312_spill] sm:$0xff] }
0x124c   :  { %8989 = vmatprep.subr.bf16.mxu1 %v13811_v48  ;;  %v21857_v48 = vld [vmem:[#allocation206_spill] sm:$0xff] }
0x124d   :  { %9029 = vmatpush2.bf16.msra.mxu0 %v13688_v31  ;;  %v13721_v31 = vcombine.high %v21857_v48, %v21856_v22  ;;  %v13720_v34 = vcombine.low %v21857_v48, %v21856_v22  ;;  %v21884_v48 = vld [vmem:[#allocation244_spill] sm:$0xff] }
0x124e   :  { %9030 = vmatprep.subr.bf16.mxu0 %v13685_v54  ;;  %v21859_v54 = vld [vmem:[#allocation270_spill] sm:$0xff] }
0x124f   :  { %8990 = vmatpush2.bf16.msra.mxu1 %v13810_v2  ;;  %v13785_v2 = vcombine.high %v21859_v54, %v21858_v61  ;;  %v13784_v44 = vcombine.low %v21859_v54, %v21858_v61  ;;  %v21886_v54 = vld [vmem:[#allocation308_spill] sm:$0xff] }
0x1250   :  { %9041 = vmatprep.subr.bf16.mxu1 %v13745_v33  ;;  %v21861_v33 = vld [vmem:[#allocation202_spill] sm:$0xff] }
0x1251   :  { %9031 = vmatpush2.bf16.msra.mxu0 %v13684_v53  ;;  %v13717_v53 = vcombine.high %v21861_v33, %v21860_v19  ;;  %v13716_v30 = vcombine.low %v21861_v33, %v21860_v19  ;;  %v21888_v33 = vld [vmem:[#allocation240_spill] sm:$0xff] }
0x1252   :  { %8992 = vmatmul.mubr.bf16.vlgmr.msra.gmra.mxu1 %v20530_v17  ;;  %9082 = vmatprep.subr.bf16.mxu0 %v13809_v26  ;;  %v21863_v26 = vld [vmem:[#allocation266_spill] sm:$0xff] }
0x1253   :  { %9042 = vmatpush1.bf16.msra.mxu1 %v13744_v16  ;;  %9073 = vmatprep.mubr.bf16.mxu1 %v20391_v62  ;;  %v13781_v16 = vcombine.high %v21863_v26, %v21862_v24  ;;  %v13780_v40 = vcombine.low %v21863_v26, %v21862_v24  ;;  %v21890_v26 = vld [vmem:[#allocation304_spill] sm:$0xff] }
0x1254   :  { %9033 = vmatmul.mubr.bf16.vlgmr.msra.gmra.mxu0 %v20383_v32  ;;  %9043 = vmatprep.subr.bf16.mxu1 %v13741_v25  ;;  %v21844_v32 = vld [vmem:[#allocation220_spill] sm:$0xff]  ;;  %v21865_v25 = vld [vmem:[#allocation262_spill] sm:$0xff] }
0x1255   :  { %9083 = vmatpush1.bf16.msra.mxu0 %v13808_v57  ;;  %9114 = vmatprep.mubr.bf16.mxu0 %v20404_v50  ;;  %v13733_v5 = vcombine.high %v21845_v4, %v21844_v32  ;;  %v21846_v50 = vld [vmem:[#allocation284_spill] sm:$0xff]  ;;  %v13732_v6 = vcombine.low %v21845_v4, %v21844_v32  ;;  %v13777_v57 = vcombine.high %v21865_v25, %v21864_v39 }
0x1256   :  { %9084 = vmatprep.subr.bf16.mxu0 %v13805_v10  ;;  %v13797_v27 = vcombine.high %v21847_v63, %v21846_v50  ;;  %v13796_v20 = vcombine.low %v21847_v63, %v21846_v50  ;;  %v21867_v10 = vld [vmem:[#allocation326_spill] sm:$0xff]  ;;  %v13776_v8 = vcombine.low %v21865_v25, %v21864_v39  ;;  %v21872_v4 = vld [vmem:[#allocation256_spill] sm:$0xff] }
0x1257   :  { %9044 = vmatpush1.bf16.msra.mxu1 %v13740_v3  ;;  %v13841_v3 = vcombine.high %v21867_v10, %v21866_v12  ;;  %v13840_v41 = vcombine.low %v21867_v10, %v21866_v12  ;;  %v21874_v63 = vld [vmem:[#allocation320_spill] sm:$0xff] }
0x1258   :  { %9045 = vmatprep.subr.bf16.mxu1 %v13737_v38  ;;  %v21869_v38 = vld [vmem:[#allocation258_spill] sm:$0xff]  ;;  %v21892_v25 = vld [vmem:[#allocation236_spill] sm:$0xff] }
0x1259   :  { %9085 = vmatpush1.bf16.msra.mxu0 %v13804_v37  ;;  %v13773_v37 = vcombine.high %v21869_v38, %v21868_v9  ;;  %v13772_v32 = vcombine.low %v21869_v38, %v21868_v9  ;;  %v21894_v10 = vld [vmem:[#allocation300_spill] sm:$0xff] }
0x125a   :  { %9086 = vmatprep.subr.bf16.mxu0 %v13801_v51  ;;  %v21871_v51 = vld [vmem:[#allocation322_spill] sm:$0xff] }
0x125b   :  { %9046 = vmatpush1.bf16.msra.mxu1 %v13736_v52  ;;  %v13837_v52 = vcombine.high %v21871_v51, %v21870_v7  ;;  %v13836_v50 = vcombine.low %v21871_v51, %v21870_v7 }
0x125c   :  { %9047 = vmatprep.subr.bf16.mxu1 %v13733_v5  ;;  %v21873_v5 = vld [vmem:[#allocation254_spill] sm:$0xff] }
0x125d   :  { %9087 = vmatpush1.bf16.msra.mxu0 %v13800_v29  ;;  %v13769_v29 = vcombine.high %v21873_v5, %v21872_v4  ;;  %v13768_v43 = vcombine.low %v21873_v5, %v21872_v4 }
0x125e   :  { %9088 = vmatprep.subr.bf16.mxu0 %v13797_v27  ;;  %v21875_v27 = vld [vmem:[#allocation318_spill] sm:$0xff] }
0x125f   :  { %9048 = vmatpush1.bf16.msra.mxu1 %v13732_v6  ;;  %v13833_v6 = vcombine.high %v21875_v27, %v21874_v63  ;;  %v13832_v59 = vcombine.low %v21875_v27, %v21874_v63  ;;  %v15243_v27 = vld [vmem:[#allocation6 + $0xe4] ss:$16 sps:$4 sm:$0xff]  }
0x1260   :  { %9049 = vmatprep.subr.bf16.mxu1 %v13729_v35  ;;  %v21877_v35 = vld [vmem:[#allocation250_spill] sm:$0xff] }
0x1261   :  { %9089 = vmatpush1.bf16.msra.mxu0 %v13796_v20  ;;  %v13765_v20 = vcombine.high %v21877_v35, %v21876_v21  ;;  %v13764_v46 = vcombine.low %v21877_v35, %v21876_v21  ;;  %v15244_v21 = vld [vmem:[#allocation6 + $0x2e0] ss:$16 sps:$4 sm:$0xff]   ;;  %v15252_v35 = vld [vmem:[#allocation6 + $0x2c4] ss:$16 sps:$4 sm:$0xff]  }
0x1262   :  { %9090 = vmatprep.subr.bf16.mxu0 %v13793_v58  ;;  %v21879_v58 = vld [vmem:[#allocation314_spill] sm:$0xff] }
0x1263   :  { %9050 = vmatpush1.bf16.msra.mxu1 %v13728_v13  ;;  %v13829_v13 = vcombine.high %v21879_v58, %v21878_v36  ;;  %v13828_v14 = vcombine.low %v21879_v58, %v21878_v36  ;;  %v15255_v36 = vld [vmem:[#allocation6 + $0xa4] ss:$16 sps:$4 sm:$0xff]  }
0x1264   :  { %9051 = vmatprep.subr.bf16.mxu1 %v13725_v1  ;;  %v21881_v1 = vld [vmem:[#allocation246_spill] sm:$0xff]  ;;  %v15258_v58 = vld [vmem:[#allocation6 + $0x2a4] ss:$16 sps:$4 sm:$0xff]  }
0x1265   :  { %9091 = vmatpush1.bf16.msra.mxu0 %v13792_v49  ;;  %v13761_v49 = vcombine.high %v21881_v1, %v21880_v56  ;;  %v13760_v22 = vcombine.low %v21881_v1, %v21880_v56  ;;  %v15261_v56 = vld [vmem:[#allocation6 + $0x84] ss:$16 sps:$4 sm:$0xff]  }
0x1266   :  { %9092 = vmatprep.subr.bf16.mxu0 %v13789_v23  ;;  %v21883_v23 = vld [vmem:[#allocation310_spill] sm:$0xff]  ;;  %v15264_v1 = vld [vmem:[#allocation6 + $0x284] ss:$16 sps:$4 sm:$0xff]  }
0x1267   :  { %9052 = vmatpush1.bf16.msra.mxu1 %v13724_v42  ;;  %v13825_v42 = vcombine.high %v21883_v23, %v21882_v11  ;;  %v13824_v61 = vcombine.low %v21883_v23, %v21882_v11  ;;  %v15267_v11 = vld [vmem:[#allocation6 + $0x64] ss:$16 sps:$4 sm:$0xff]  }
0x1268   :  { %9053 = vmatprep.subr.bf16.mxu1 %v13721_v31  ;;  %v21885_v31 = vld [vmem:[#allocation242_spill] sm:$0xff]  ;;  %v15270_v23 = vld [vmem:[#allocation6 + $0x264] ss:$16 sps:$4 sm:$0xff]  }
0x1269   :  { %9093 = vmatpush1.bf16.msra.mxu0 %v13788_v45  ;;  %v13757_v45 = vcombine.high %v21885_v31, %v21884_v48  ;;  %v13756_v19 = vcombine.low %v21885_v31, %v21884_v48  ;;  %v15273_v48 = vld [vmem:[#allocation6 + $0x44] ss:$16 sps:$4 sm:$0xff]  }
0x126a   :  { %9094 = vmatprep.subr.bf16.mxu0 %v13785_v2  ;;  %v21887_v2 = vld [vmem:[#allocation306_spill] sm:$0xff]  ;;  %v15276_v31 = vld [vmem:[#allocation6 + $0x244] ss:$16 sps:$4 sm:$0xff]  }
0x126b   :  { %9054 = vmatpush1.bf16.msra.mxu1 %v13720_v34  ;;  %v13821_v34 = vcombine.high %v21887_v2, %v21886_v54  ;;  %v13820_v24 = vcombine.low %v21887_v2, %v21886_v54  ;;  %v15279_v54 = vld [vmem:[#allocation6 + $0x24] ss:$16 sps:$4 sm:$0xff]  }
0x126c   :  { %9055 = vmatprep.subr.bf16.mxu1 %v13717_v53  ;;  %v21889_v53 = vld [vmem:[#allocation238_spill] sm:$0xff]  ;;  %v15282_v2 = vld [vmem:[#allocation6 + $0x224] ss:$16 sps:$4 sm:$0xff]  }
0x126d   :  { %9095 = vmatpush1.bf16.msra.mxu0 %v13784_v44  ;;  %v13753_v44 = vcombine.high %v21889_v53, %v21888_v33  ;;  %v13752_v39 = vcombine.low %v21889_v53, %v21888_v33  ;;  %v15285_v33 = vld [vmem:[#allocation6 + $0x4] ss:$16 sps:$4 sm:$0xff]  }
0x126e   :  { %9096 = vmatprep.subr.bf16.mxu0 %v13781_v16  ;;  %v21891_v16 = vld [vmem:[#allocation302_spill] sm:$0xff]  ;;  %v15288_v53 = vld [vmem:[#allocation6 + $0x204] ss:$16 sps:$4 sm:$0xff]  }
0x126f   :  { %9056 = vmatpush1.bf16.msra.mxu1 %v13716_v30  ;;  %v13817_v30 = vcombine.high %v21891_v16, %v21890_v26  ;;  %v13816_v12 = vcombine.low %v21891_v16, %v21890_v26  ;;  %v15291_v26 = vld [vmem:[#allocation6 + $0x1e4] ss:$16 sps:$4 sm:$0xff]  }
0x1270   :  { %9057 = vmatprep.subr.bf16.mxu1 %v13777_v57  ;;  %v21893_v57 = vld [vmem:[#allocation234_spill] sm:$0xff]  ;;  %v15294_v16 = vld [vmem:[#allocation6 + $0x3e4] ss:$16 sps:$4 sm:$0xff]  }
0x1271   :  { %9097 = vmatpush1.bf16.msra.mxu0 %v13780_v40  ;;  %v13749_v40 = vcombine.high %v21893_v57, %v21892_v25  ;;  %v13748_v9 = vcombine.low %v21893_v57, %v21892_v25  ;;  %v15297_v25 = vld [vmem:[#allocation6 + $0x1c4] ss:$16 sps:$4 sm:$0xff]  }
0x1272   :  { %9098 = vmatprep.subr.bf16.mxu0 %v13841_v3  ;;  %v21895_v3 = vld [vmem:[#allocation298_spill] sm:$0xff]  ;;  %v15300_v57 = vld [vmem:[#allocation6 + $0x3c4] ss:$16 sps:$4 sm:$0xff]  }
0x1273   :  { %9058 = vmatpush2.bf16.msra.mxu1 %v13776_v8  ;;  %v13813_v8 = vcombine.high %v21895_v3, %v21894_v10  ;;  %v13812_v38 = vcombine.low %v21895_v3, %v21894_v10  ;;  %v15303_v10 = vld [vmem:[#allocation6 + $0x1a4] ss:$16 sps:$4 sm:$0xff]  }
0x1274   :  { %9059 = vmatprep.subr.bf16.mxu1 %v13773_v37  ;;  %v7840_v37 = vld [vmem:[%s20975_s24] sm:$0xf]  ;;  %v15306_v3 = vld [vmem:[#allocation6 + $0x3a4] ss:$16 sps:$4 sm:$0xff]   ;;  %s16338_s24 = smov [#allocation27]  }
0x1275   :  { %9099 = vmatpush2.bf16.msra.mxu0 %v13840_v41  ;;  %v9342_v41 = vunpack.c.l.bf16 %v7840_v37  ;;  %v15312_v37 = vld [vmem:[#allocation6 + $0x384] ss:$16 sps:$4 sm:$0xff]   ;;  %s13048_s8 = sshll.u32 %s16338_s24, 4  ;;  %s13049_s8 = int_to_ptr.vmem [resolvable:$true] %s13048_s8 }
0x1276   :  { %9100 = vmatprep.subr.bf16.mxu0 %v13837_v52  ;;  %s16269_s13 = scalar_lea.vmem %s13049_s8, 32  ;;  %p16274_p6 = scmp.lt.s32.totalorder %s13049_s8, %s13049_s8 }
0x1277   :  { %9060 = vmatpush2.bf16.msra.mxu1 %v13772_v32  ;;  %9345 = vperm.xlu0 %15237, %v9342_v41   ;;  %p16270_p5 = scmp.ne.s32.totalorder %s13049_s8, %s16269_s13  ;;  %p16275_p7 = scmp.lt.s32.totalorder %s16269_s13, %s16269_s13 }
0x1278   :  { %9061 = vmatprep.subr.bf16.mxu1 %v13769_v29 }
0x1279   :  { %9101 = vmatpush2.bf16.msra.mxu0 %v13836_v50  ;;  %p16276_p8 = por %p16275_p7, %p16274_p6 }
0x127a   :  { %9102 = vmatprep.subr.bf16.mxu0 %v13833_v6  ;;  %v15246_v6 = vld [vmem:[#allocation6 + $0x2e4] ss:$16 sps:$4 sm:$0xff]  }
0x127b   :  { %9062 = vmatpush2.bf16.msra.mxu1 %v13768_v43  ;;  %15238 = vset.pattern.permute.xlu0 %v21618_v47  ;;  %v15241_v43 = vld [vmem:[#allocation6 + $0xe0] ss:$16 sps:$4 sm:$0xff]   ;;  %v15249_v47 = vld [vmem:[#allocation6 + $0xc4] ss:$16 sps:$4 sm:$0xff]   ;;  %p16277_p9 = pnand %p16276_p8, %p16270_p5 }
0x127c   :  { %9063 = vmatprep.subr.bf16.mxu1 %v13765_v20  ;;  %9369 = vperm.xlu0 %15238, %v9342_v41   ;;  %v15247_v20 = vld [vmem:[#allocation6 + $0xc0] ss:$16 sps:$4 sm:$0xff]  }
0x127d   :  { %9103 = vmatpush2.bf16.msra.mxu0 %v13832_v59  ;;  %v15250_v59 = vld [vmem:[#allocation6 + $0x2c0] ss:$16 sps:$4 sm:$0xff]  }
0x127e   :  { %9104 = vmatprep.subr.bf16.mxu0 %v13829_v13  ;;  %v15253_v13 = vld [vmem:[#allocation6 + $0xa0] ss:$16 sps:$4 sm:$0xff]  }
0x127f   :  { %9064 = vmatpush2.bf16.msra.mxu1 %v13764_v46  ;;  %v15256_v46 = vld [vmem:[#allocation6 + $0x2a0] ss:$16 sps:$4 sm:$0xff]  }
0x1280   :  { %9065 = vmatprep.subr.bf16.mxu1 %v13761_v49  ;;  %v15259_v49 = vld [vmem:[#allocation6 + $0x80] ss:$16 sps:$4 sm:$0xff]  }
0x1281   :  { %9105 = vmatpush2.bf16.msra.mxu0 %v13828_v14  ;;  %v15262_v14 = vld [vmem:[#allocation6 + $0x280] ss:$16 sps:$4 sm:$0xff]  }
0x1282   :  { %9106 = vmatprep.subr.bf16.mxu0 %v13825_v42  ;;  %v15265_v42 = vld [vmem:[#allocation6 + $0x60] ss:$16 sps:$4 sm:$0xff]  }
0x1283   :  { %9066 = vmatpush2.bf16.msra.mxu1 %v13760_v22  ;;  %v15268_v22 = vld [vmem:[#allocation6 + $0x260] ss:$16 sps:$4 sm:$0xff]  }
0x1284   :  { %9067 = vmatprep.subr.bf16.mxu1 %v13757_v45  ;;  %v15271_v45 = vld [vmem:[#allocation6 + $0x40] ss:$16 sps:$4 sm:$0xff]  }
0x1285   :  { %9107 = vmatpush2.bf16.msra.mxu0 %v13824_v61  ;;  %v15274_v61 = vld [vmem:[#allocation6 + $0x240] ss:$16 sps:$4 sm:$0xff]  }
0x1286   :  { %9108 = vmatprep.subr.bf16.mxu0 %v13821_v34  ;;  %v15277_v34 = vld [vmem:[#allocation6 + $0x20] ss:$16 sps:$4 sm:$0xff]  }
0x1287   :  { %9068 = vmatpush2.bf16.msra.mxu1 %v13756_v19  ;;  %v15280_v19 = vld [vmem:[#allocation6 + $0x220] ss:$16 sps:$4 sm:$0xff]  }
0x1288   :  { %9069 = vmatprep.subr.bf16.mxu1 %v13753_v44  ;;  %v15283_v44 = vld [vmem:[#allocation6] ss:$16 sps:$4 sm:$0xff]  }
0x1289   :  { %9109 = vmatpush2.bf16.msra.mxu0 %v13820_v24  ;;  %v15286_v24 = vld [vmem:[#allocation6 + $0x200] ss:$16 sps:$4 sm:$0xff]  }
0x128a   :  { %9110 = vmatprep.subr.bf16.mxu0 %v13817_v30  ;;  %v15289_v30 = vld [vmem:[#allocation6 + $0x1e0] ss:$16 sps:$4 sm:$0xff]  }
0x128b   :  { %9070 = vmatpush2.bf16.msra.mxu1 %v13752_v39  ;;  %v15292_v39 = vld [vmem:[#allocation6 + $0x3e0] ss:$16 sps:$4 sm:$0xff]  }
0x128c   :  { %9071 = vmatprep.subr.bf16.mxu1 %v13749_v40  ;;  %v15295_v40 = vld [vmem:[#allocation6 + $0x1c0] ss:$16 sps:$4 sm:$0xff]  }
0x128d   :  { %9111 = vmatpush2.bf16.msra.mxu0 %v13816_v12  ;;  %v15298_v12 = vld [vmem:[#allocation6 + $0x3c0] ss:$16 sps:$4 sm:$0xff]  }
0x128e   :  { %9112 = vmatprep.subr.bf16.mxu0 %v13813_v8  ;;  %v15301_v8 = vld [vmem:[#allocation6 + $0x1a0] ss:$16 sps:$4 sm:$0xff]  }
0x128f   :  { %9072 = vmatpush2.bf16.msra.mxu1 %v13748_v9  ;;  %v15304_v9 = vld [vmem:[#allocation6 + $0x3a0] ss:$16 sps:$4 sm:$0xff]  }
0x1290   :  { %11300 = vmatprep.subr.bf16.mxu1 %v15243_v27  ;;  %v15307_v41 = vld [vmem:[#allocation6 + $0x180] ss:$16 sps:$4 sm:$0xff]  }
0x1291   :  { %9113 = vmatpush2.bf16.msra.mxu0 %v13812_v38  ;;  %v15309_v38 = vld [vmem:[#allocation6 + $0x184] ss:$16 sps:$4 sm:$0xff]   ;;  %v15319_v27 = vld [vmem:[#allocation6 + $0x140] ss:$16 sps:$4 sm:$0xff]  }
0x1292   :  { %9074 = vmatmul.mubr.bf16.vlgmr.msra.gmra.mxu1 %v20396_v0  ;;  %11341 = vmatprep.subr.bf16.mxu0 %v15246_v6  ;;  %v15322_v6 = vld [vmem:[#allocation6 + $0x340] ss:$16 sps:$4 sm:$0xff]  }
0x1293   :  { %11301 = vmatpush1.bf16.msra.mxu1 %v15241_v43 }
0x1294   :  { %9115 = vmatmul.mubr.bf16.vlgmr.msra.gmra.mxu0 %v20530_v17  ;;  %11302 = vmatprep.subr.bf16.mxu1 %v15249_v47 }
0x1295   :  { %11342 = vmatpush1.bf16.msra.mxu0 %v15244_v21 }
0x1296   :  { %11343 = vmatprep.subr.bf16.mxu0 %v15252_v35 }
0x1297   :  { %11303 = vmatpush1.bf16.msra.mxu1 %v15247_v20 }
0x1298   :  { %11304 = vmatprep.subr.bf16.mxu1 %v15255_v36 }
0x1299   :  { %11344 = vmatpush1.bf16.msra.mxu0 %v15250_v59 }
0x129a   :  { %11345 = vmatprep.subr.bf16.mxu0 %v15258_v58 }
0x129b   :  { %11305 = vmatpush1.bf16.msra.mxu1 %v15253_v13 }
0x129c   :  { %11306 = vmatprep.subr.bf16.mxu1 %v15261_v56 }
0x129d   :  { %11346 = vmatpush1.bf16.msra.mxu0 %v15256_v46 }
0x129e   :  { %11347 = vmatprep.subr.bf16.mxu0 %v15264_v1 }
0x129f   :  { %11307 = vmatpush1.bf16.msra.mxu1 %v15259_v49 }
0x12a0   :  { %11308 = vmatprep.subr.bf16.mxu1 %v15267_v11  ;;  %v15330_v11 = vld [vmem:[#allocation6 + $0x324] ss:$16 sps:$4 sm:$0xff]  }
0x12a1   :  { %11348 = vmatpush1.bf16.msra.mxu0 %v15262_v14  ;;  %v15327_v14 = vld [vmem:[#allocation6 + $0x124] ss:$16 sps:$4 sm:$0xff]  }
0x12a2   :  { %11349 = vmatprep.subr.bf16.mxu0 %v15270_v23 }
0x12a3   :  { %11309 = vmatpush1.bf16.msra.mxu1 %v15265_v42 }
0x12a4   :  { %11310 = vmatprep.subr.bf16.mxu1 %v15273_v48  ;;  %v15325_v48 = vld [vmem:[#allocation6 + $0x120] ss:$16 sps:$4 sm:$0xff]  }
0x12a5   :  { %11350 = vmatpush1.bf16.msra.mxu0 %v15268_v22 }
0x12a6   :  { %11351 = vmatprep.subr.bf16.mxu0 %v15276_v31  ;;  %v15328_v31 = vld [vmem:[#allocation6 + $0x320] ss:$16 sps:$4 sm:$0xff]  }
0x12a7   :  { %11311 = vmatpush1.bf16.msra.mxu1 %v15271_v45 }
0x12a8   :  { %11312 = vmatprep.subr.bf16.mxu1 %v15279_v54 }
0x12a9   :  { %11352 = vmatpush1.bf16.msra.mxu0 %v15274_v61 }
0x12aa   :  { %11353 = vmatprep.subr.bf16.mxu0 %v15282_v2 }
0x12ab   :  { %11313 = vmatpush1.bf16.msra.mxu1 %v15277_v34 }
0x12ac   :  { %11314 = vmatprep.subr.bf16.mxu1 %v15285_v33 }
0x12ad   :  { %11354 = vmatpush1.bf16.msra.mxu0 %v15280_v19 }
0x12ae   :  { %11355 = vmatprep.subr.bf16.mxu0 %v15288_v53 }
0x12af   :  { %11315 = vmatpush1.bf16.msra.mxu1 %v15283_v44 }
0x12b0   :  { %11316 = vmatprep.subr.bf16.mxu1 %v15291_v26  ;;  %v15336_v26 = vld [vmem:[#allocation6 + $0x304] ss:$16 sps:$4 sm:$0xff]  }
0x12b1   :  { %11356 = vmatpush1.bf16.msra.mxu0 %v15286_v24  ;;  %v15333_v24 = vld [vmem:[#allocation6 + $0x104] ss:$16 sps:$4 sm:$0xff]  }
0x12b2   :  { %11357 = vmatprep.subr.bf16.mxu0 %v15294_v16  ;;  %v15331_v16 = vld [vmem:[#allocation6 + $0x100] ss:$16 sps:$4 sm:$0xff]  }
0x12b3   :  { %11317 = vmatpush2.bf16.msra.mxu1 %v15289_v30  ;;  %v15334_v30 = vld [vmem:[#allocation6 + $0x300] ss:$16 sps:$4 sm:$0xff]  }
0x12b4   :  { %11318 = vmatprep.subr.bf16.mxu1 %v15297_v25 }
0x12b5   :  { %11358 = vmatpush2.bf16.msra.mxu0 %v15292_v39 }
0x12b6   :  { %11359 = vmatprep.subr.bf16.mxu0 %v15300_v57 }
0x12b7   :  { %11319 = vmatpush2.bf16.msra.mxu1 %v15295_v40 }
0x12b8   :  { %11320 = vmatprep.subr.bf16.mxu1 %v15303_v10 }
0x12b9   :  { %11360 = vmatpush2.bf16.msra.mxu0 %v15298_v12 }
0x12ba   :  { %11361 = vmatprep.subr.bf16.mxu0 %v15306_v3 }
0x12bb   :  { %11321 = vmatpush2.bf16.msra.mxu1 %v15301_v8 }
0x12bc   :  { %11322 = vmatprep.subr.bf16.mxu1 %v15309_v38  ;;  %v15342_v38 = vld [vmem:[#allocation6 + $0x6e4] ss:$16 sps:$4 sm:$0xff]  }
0x12bd   :  { %11362 = vmatpush2.bf16.msra.mxu0 %v15304_v9  ;;  %v15339_v9 = vld [vmem:[#allocation6 + $0x4e4] ss:$16 sps:$4 sm:$0xff]  }
0x12be   :  { %11363 = vmatprep.subr.bf16.mxu0 %v15312_v37 }
0x12bf   :  { %11323 = vmatpush2.bf16.msra.mxu1 %v15307_v41 }
0x12d2   :  { %v8911_v7 = vpop.f32.mrf.mxu1 }
0x12d4   :  { %v8913_v51 = vpop.f32.mrf.mxu1  ;;  %v8952_v52 = vpop.f32.mrf.mxu0 }
0x12d5   :  { %v20664_v32 = vadd.f32 %v8952_v52, %v8911_v7  ;;  %v15310_v7 = vld [vmem:[#allocation6 + $0x380] ss:$16 sps:$4 sm:$0xff]  }
0x12d6   :  { %v8915_v4 = vpop.f32.mrf.mxu1  ;;  %v8954_v5 = vpop.f32.mrf.mxu0  ;;  %11364 = vmatpush2.bf16.msra.mxu0 %v15310_v7  ;;  %v15313_v52 = vld [vmem:[#allocation6 + $0x160] ss:$16 sps:$4 sm:$0xff]  }
0x12d7   :  { %v20666_v29 = vadd.f32 %v8954_v5, %v8913_v51  ;;  %v15315_v51 = vld [vmem:[#allocation6 + $0x164] ss:$16 sps:$4 sm:$0xff]   ;;  %v15316_v4 = vld [vmem:[#allocation6 + $0x360] ss:$16 sps:$4 sm:$0xff]  }
0x12d8   :  { %v8916_v50 = vpop.f32.mrf.mxu1  ;;  %v8956_v17 = vpop.f32.mrf.mxu0  ;;  %v15318_v5 = vld [vmem:[#allocation6 + $0x364] ss:$16 sps:$4 sm:$0xff]   ;;  %11324 = vmatprep.subr.bf16.mxu1 %v15315_v51 }
0x12d9   :  { %v15321_v50 = vld [vmem:[#allocation6 + $0x144] ss:$16 sps:$4 sm:$0xff]   ;;  %11365 = vmatprep.subr.bf16.mxu0 %v15318_v5  ;;  %11325 = vmatpush2.bf16.msra.mxu1 %v15313_v52 }
0x12da   :  { %v8957_v63 = vpop.f32.mrf.mxu0  ;;  %v15324_v17 = vld [vmem:[#allocation6 + $0x344] ss:$16 sps:$4 sm:$0xff]   ;;  %11366 = vmatpush2.bf16.msra.mxu0 %v15316_v4  ;;  %11326 = vmatprep.subr.bf16.mxu1 %v15321_v50 }
0x12db   :  { %11367 = vmatprep.subr.bf16.mxu0 %v15324_v17 }
0x12dd   :  { %11327 = vmatpush2.bf16.msra.mxu1 %v15319_v27 }
0x12de   :  { %11368 = vmatpush2.bf16.msra.mxu0 %v15322_v6  ;;  %11328 = vmatprep.subr.bf16.mxu1 %v15327_v14 }
0x12df   :  { %11369 = vmatprep.subr.bf16.mxu0 %v15330_v11 }
0x12e1   :  { %11329 = vmatpush2.bf16.msra.mxu1 %v15325_v48 }
0x12e2   :  { %11370 = vmatpush2.bf16.msra.mxu0 %v15328_v31  ;;  %11330 = vmatprep.subr.bf16.mxu1 %v15333_v24 }
0x12e3   :  { %11371 = vmatprep.subr.bf16.mxu0 %v15336_v26 }
0x12e5   :  { %11331 = vmatpush2.bf16.msra.mxu1 %v15331_v16 }
0x12e6   :  { %11372 = vmatpush2.bf16.msra.mxu0 %v15334_v30  ;;  %11382 = vmatprep.subr.bf16.mxu1 %v15339_v9 }
0x12e7   :  { %11423 = vmatprep.subr.bf16.mxu0 %v15342_v38 }
0x1312   :  { %v8993_v63 = vpop.f32.mrf.mxu1 }
0x1313   :  { %v20669_v43 = vadd.f32 %v8993_v63, %v20664_v32 }
0x1314   :  { %v8995_v21 = vpop.f32.mrf.mxu1  ;;  %v20671_v47 = vpop.f32.mrf.mxu0 }
0x1315   :  { %v9123_v35 = vrot.slane %v20669_v43, 4  ;;  %v9152_v20 = vmul.f32 %v20669_v43, %v20669_v43  ;;  %v20677_v59 = vadd.f32 %v8995_v21, %v20666_v29 }
0x1316   :  { %v8997_v36 = vpop.f32.mrf.mxu1  ;;  %v20679_v58 = vpop.f32.mrf.mxu0 }
0x1317   :  { %v9124_v32 = vadd.f32 %v9123_v35, %v20669_v43  ;;  %v9156_v13 = vrot.slane %v9152_v20, 4  ;;  %v9129_v46 = vrot.slane %v20677_v59, 4  ;;  %v9153_v56 = vmul.f32 %v20677_v59, %v20677_v59 }
0x1318   :  { %v8998_v1 = vpop.f32.mrf.mxu1  ;;  %v9038_v49 = vpop.f32.mrf.mxu0 }
0x1319   :  { %v9125_v23 = vrot.slane %v9124_v32, 2  ;;  %v9157_v29 = vadd.f32 %v9156_v13, %v9152_v20  ;;  %v9130_v42 = vadd.f32 %v9129_v46, %v20677_v59  ;;  %v9162_v22 = vrot.slane %v9153_v56, 4 }
0x131a   :  { %v9039_v45 = vpop.f32.mrf.mxu0 }
0x131b   :  { %v9126_v61 = vadd.f32 %v9125_v23, %v9124_v32  ;;  %v9158_v54 = vrot.slane %v9157_v29, 2  ;;  %v9131_v2 = vrot.slane %v9130_v42, 2  ;;  %v9163_v34 = vadd.f32 %v9162_v22, %v9153_v56 }
0x131d   :  { %v9127_v19 = vrot.slane %v9126_v61, 1  ;;  %v9159_v33 = vadd.f32 %v9158_v54, %v9157_v29  ;;  %v9132_v53 = vadd.f32 %v9131_v2, %v9130_v42  ;;  %v9164_v44 = vrot.slane %v9163_v34, 2 }
0x131f   :  { %v9128_v39 = vadd.f32 %v9127_v19, %v9126_v61  ;;  %v9160_v25 = vrot.slane %v9159_v33, 1  ;;  %v9133_v57 = vrot.slane %v9132_v53, 1  ;;  %v9165_v40 = vadd.f32 %v9164_v44, %v9163_v34 }
0x1321   :  { %v20686_v12 = vmul.f32 0.125, %v9128_v39  ;;  %v9161_v10 = vadd.f32 %v9160_v25, %v9159_v33  ;;  %v9134_v3 = vadd.f32 %v9133_v57, %v9132_v53  ;;  %v9166_v8 = vrot.slane %v9165_v40, 1 }
0x1323   :  { %v9180_v37 = vmul.f32 0.125, %v9161_v10  ;;  %v9184_v41 = vmul.f32 %v20686_v12, %v20686_v12  ;;  %v20690_v7 = vmul.f32 0.125, %v9134_v3  ;;  %v9167_v51 = vadd.f32 %v9166_v8, %v9165_v40 }
0x1325   :  { %v9188_v52 = vsub.f32 %v9180_v37, %v9184_v41  ;;  %v9181_v4 = vmul.f32 0.125, %v9167_v51  ;;  %v9185_v5 = vmul.f32 %v20690_v7, %v20690_v7 }
0x1327   :  { %v9192_v50 = vmax.f32 %v9188_v52, 0.0  ;;  %v9189_v17 = vsub.f32 %v9181_v4, %v9185_v5 }
0x1329   :  { %v9196_v63 = vadd.f32 1e-05, %v9192_v50  ;;  %v9193_v27 = vmax.f32 %v9189_v17, 0.0 }
0x132b   :  { %v9197_v6 = vadd.f32 1e-05, %v9193_v27  ;;  %15945 = vrsqrt.f32 %v9196_v63 }
0x132d   :  { %15947 = vrsqrt.f32 %v9197_v6 }
0x1338   :  { %v15946_v21 = vpop.eup %15945 }
0x133a   :  { %v15948_v35 = vpop.eup %15947 }
0x133b   :  { %v9208_v20 = vcombine.low %v15946_v21, %v15948_v35 }
0x1352   :  { %v9075_v36 = vpop.f32.mrf.mxu1 }
0x1353   :  { %v9076_v32 = vadd.f32 %v9075_v36, %v20671_v47 }
0x1354   :  { %v9077_v13 = vpop.f32.mrf.mxu1  ;;  %v9116_v46 = vpop.f32.mrf.mxu0 }
0x1355   :  { %v9078_v56 = vadd.f32 %v9077_v13, %v20679_v58  ;;  %v20696_v1 = vadd.f32 %v9116_v46, %v9076_v32  ;;  %v9216_v32 = vrot.slane %v9208_v20, %v19982_v28 }
0x1356   :  { %v9079_v49 = vpop.f32.mrf.mxu1  ;;  %v9118_v14 = vpop.f32.mrf.mxu0 }
0x1357   :  { %v9135_v11 = vrot.slane %v20696_v1, 4  ;;  %v9154_v23 = vmul.f32 %v20696_v1, %v20696_v1  ;;  %v9119_v29 = vadd.f32 %v9118_v14, %v9078_v56  ;;  %v7831_v56 = vld [vmem:[#allocation12 + $0xd] sm:$0xf]  ;;  %v20706_v14 = vsub.s32 2, %v21641_v60 }
0x1358   :  { %v9080_v42 = vpop.f32.mrf.mxu1  ;;  %v9120_v22 = vpop.f32.mrf.mxu0 }
0x1359   :  { %v9136_v48 = vadd.f32 %v9135_v11, %v20696_v1  ;;  %v9168_v31 = vrot.slane %v9154_v23, 4  ;;  %v9141_v47 = vrot.slane %v9119_v29, 4  ;;  %v9155_v45 = vmul.f32 %v9119_v29, %v9119_v29 }
0x135a   :  { %v9121_v61 = vpop.f32.mrf.mxu0  ;;  %v20709_v11 = vsub.s32 3, %v21641_v60 }
0x135b   :  { %v9137_v54 = vrot.slane %v9136_v48, 2  ;;  %v9169_v58 = vadd.f32 %v9168_v31, %v9154_v23  ;;  %v9142_v2 = vadd.f32 %v9141_v47, %v9119_v29  ;;  %v9174_v34 = vrot.slane %v9155_v45, 4 }
0x135d   :  { %v9138_v19 = vadd.f32 %v9137_v54, %v9136_v48  ;;  %v9170_v33 = vrot.slane %v9169_v58, 2  ;;  %v9143_v53 = vrot.slane %v9142_v2, 2  ;;  %v9175_v44 = vadd.f32 %v9174_v34, %v9155_v45 }
0x135f   :  { %v9139_v24 = vrot.slane %v9138_v19, 1  ;;  %v9171_v26 = vadd.f32 %v9170_v33, %v9169_v58  ;;  %v9144_v16 = vadd.f32 %v9143_v53, %v9142_v2  ;;  %v9176_v30 = vrot.slane %v9175_v44, 2 }
0x1361   :  { %v9140_v39 = vadd.f32 %v9139_v24, %v9138_v19  ;;  %v9172_v25 = vrot.slane %v9171_v26, 1  ;;  %v9145_v57 = vrot.slane %v9144_v16, 1  ;;  %v9177_v40 = vadd.f32 %v9176_v30, %v9175_v44 }
0x1363   :  { %v9150_v10 = vmul.f32 0.125, %v9140_v39  ;;  %v9173_v3 = vadd.f32 %v9172_v25, %v9171_v26  ;;  %v9146_v8 = vadd.f32 %v9145_v57, %v9144_v16  ;;  %v9178_v9 = vrot.slane %v9177_v40, 1 }
0x1365   :  { %v9182_v38 = vmul.f32 0.125, %v9173_v3  ;;  %v9186_v37 = vmul.f32 %v9150_v10, %v9150_v10  ;;  %v9151_v41 = vmul.f32 0.125, %v9146_v8  ;;  %v9179_v51 = vadd.f32 %v9178_v9, %v9177_v40 }
0x1367   :  { %v9190_v52 = vsub.f32 %v9182_v38, %v9186_v37  ;;  %v9183_v4 = vmul.f32 0.125, %v9179_v51  ;;  %v9187_v5 = vmul.f32 %v9151_v41, %v9151_v41 }
0x1369   :  { %v9194_v50 = vmax.f32 %v9190_v52, 0.0  ;;  %v9191_v17 = vsub.f32 %v9183_v4, %v9187_v5 }
0x136b   :  { %v9198_v63 = vadd.f32 1e-05, %v9194_v50  ;;  %v9195_v27 = vmax.f32 %v9191_v17, 0.0 }
0x136d   :  { %v9199_v6 = vadd.f32 1e-05, %v9195_v27  ;;  %15949 = vrsqrt.f32 %v9198_v63 }
0x136f   :  { %15951 = vrsqrt.f32 %v9199_v6 }
0x137a   :  { %v15950_v21 = vpop.eup %15949 }
0x137c   :  { %v15952_v35 = vpop.eup %15951 }
0x137d   :  { %v9209_v36 = vcombine.low %v15950_v21, %v15952_v35  ;;  %v15337_v35 = vld [vmem:[#allocation6 + $0x4e0] ss:$16 sps:$4 sm:$0xff]  }
0x137f   :  { %v9223_v13 = vrot.slane %v9209_v36, %v19982_v28  ;;  %v15340_v36 = vld [vmem:[#allocation6 + $0x6e0] ss:$16 sps:$4 sm:$0xff]  }
0x1381   :  { %v9224_v46 = vcombine.low %v9216_v32, %v9223_v13  ;;  %v15345_v32 = vld [vmem:[#allocation6 + $0x4c4] ss:$16 sps:$4 sm:$0xff]  }
0x1382   :  { %v15348_v13 = vld [vmem:[#allocation6 + $0x6c4] ss:$16 sps:$4 sm:$0xff]  }
0x1383   :  { %v9231_v49 = vrot.slane %v9224_v46, %v19982_v28 }
0x1385   :  { %v9233_v23 = vmul.f32 %v9231_v49, %v7831_v56  ;;  %v15343_v49 = vld [vmem:[#allocation6 + $0x4c0] ss:$16 sps:$4 sm:$0xff]  }
0x1387   :  { %v9246_v42 = vrot.slane %v9233_v23, %v20706_v14  ;;  %v9250_v22 = vrot.slane %v9233_v23, %v20709_v11  ;;  %v9238_v48 = vrot.slane %v9233_v23, %v18164_v18  ;;  %v9242_v20 = vrot.slane %v9233_v23, %v19987_v15  ;;  %v15346_v23 = vld [vmem:[#allocation6 + $0x6c0] ss:$16 sps:$4 sm:$0xff]  }
0x1389   :  { %v9258_v31 = vmul.f32 %v9250_v22, %v9119_v29  ;;  %v9261_v47 = vmul.f32 %v9246_v42, %v9150_v10  ;;  %v9262_v45 = vmul.f32 %v9250_v22, %v9151_v41  ;;  %v9255_v61 = vmul.f32 %v9238_v48, %v20669_v43  ;;  %v7832_v29 = vld [vmem:[#allocation14 + $0xd] sm:$0xf]  ;;  %v9346_v43 = vpop.permute.xlu0 %9345  ;;  %v15354_v22 = vld [vmem:[#allocation6 + $0x6a4] ss:$16 sps:$4 sm:$0xff]  }
0x138a   :  { %v9257_v54 = vmul.f32 %v9246_v42, %v20696_v1  ;;  %v9259_v58 = vmul.f32 %v9238_v48, %v20686_v12  ;;  %v9260_v60 = vmul.f32 %v9242_v20, %v20690_v7  ;;  %v9256_v2 = vmul.f32 %v9242_v20, %v20677_v59  ;;  %v15351_v42 = vld [vmem:[#allocation6 + $0x4a4] ss:$16 sps:$4 sm:$0xff]   ;;  %v15349_v48 = vld [vmem:[#allocation6 + $0x4a0] ss:$16 sps:$4 sm:$0xff]  }
0x138b   :  { %v9268_v34 = vcombine.low %v9261_v47, %v9262_v45  ;;  %v15352_v20 = vld [vmem:[#allocation6 + $0x6a0] ss:$16 sps:$4 sm:$0xff]   ;;  %v15360_v47 = vld [vmem:[#allocation6 + $0x684] ss:$16 sps:$4 sm:$0xff]  }
0x138c   :  { %v9267_v19 = vcombine.low %v9259_v58, %v9260_v60  ;;  %v15355_v45 = vld [vmem:[#allocation6 + $0x480] ss:$16 sps:$4 sm:$0xff]   ;;  %v15366_v58 = vld [vmem:[#allocation6 + $0x664] ss:$16 sps:$4 sm:$0xff]  }
0x138d   :  { %v9282_v33 = vrot.slane %v9268_v34, %v19982_v28  ;;  %v20737_v38 = vpop.permute.xlu0 %9369  ;;  %v15361_v60 = vld [vmem:[#allocation6 + $0x460] ss:$16 sps:$4 sm:$0xff]   ;;  %v15369_v34 = vld [vmem:[#allocation6 + $0x444] ss:$16 sps:$4 sm:$0xff]  }
0x138e   :  { %v9275_v53 = vrot.slane %v9267_v19, %v19982_v28  ;;  %v15372_v19 = vld [vmem:[#allocation6 + $0x644] ss:$16 sps:$4 sm:$0xff]  }
0x1390   :  { %v9283_v44 = vcombine.low %v9275_v53, %v9282_v33  ;;  %v15367_v33 = vld [vmem:[#allocation6 + $0x440] ss:$16 sps:$4 sm:$0xff]  }
0x1391   :  { %v15370_v53 = vld [vmem:[#allocation6 + $0x640] ss:$16 sps:$4 sm:$0xff]  }
0x1392   :  { %v9290_v24 = vrot.slane %v9283_v44, %v19982_v28  ;;  %v15375_v44 = vld [vmem:[#allocation6 + $0x424] ss:$16 sps:$4 sm:$0xff]  }
0x1394   :  { %v9292_v26 = vsub.f32 %v7832_v29, %v9290_v24  ;;  %v15378_v29 = vld [vmem:[#allocation6 + $0x624] ss:$16 sps:$4 sm:$0xff]   ;;  %v15373_v24 = vld [vmem:[#allocation6 + $0x420] ss:$16 sps:$4 sm:$0xff]  }
0x1396   :  { %v9297_v1 = vrot.slane %v9292_v26, %v18164_v18  ;;  %v9305_v12 = vrot.slane %v9292_v26, %v20706_v14  ;;  %v9301_v7 = vrot.slane %v9292_v26, %v19987_v15  ;;  %v9309_v59 = vrot.slane %v9292_v26, %v20709_v11  ;;  %v15376_v26 = vld [vmem:[#allocation6 + $0x620] ss:$16 sps:$4 sm:$0xff]  }
0x1398   :  { %v9314_v16 = vadd.f32 %v9297_v1, %v9255_v61  ;;  %v9316_v30 = vadd.f32 %v9305_v12, %v9257_v54  ;;  %v9315_v39 = vadd.f32 %v9301_v7, %v9256_v2  ;;  %v9317_v25 = vadd.f32 %v9309_v59, %v9258_v31  ;;  %v15357_v31 = vld [vmem:[#allocation6 + $0x484] ss:$16 sps:$4 sm:$0xff]   ;;  %v15358_v61 = vld [vmem:[#allocation6 + $0x680] ss:$16 sps:$4 sm:$0xff]  }
0x1399   :  { %v15363_v54 = vld [vmem:[#allocation6 + $0x464] ss:$16 sps:$4 sm:$0xff]   ;;  %v15364_v2 = vld [vmem:[#allocation6 + $0x660] ss:$16 sps:$4 sm:$0xff]  }
0x139a   :  { %v20727_v57 = vmax.f32 %v9314_v16, 0.0  ;;  %v20729_v40 = vmax.f32 %v9316_v30, 0.0  ;;  %v20731_v10 = vmax.f32 %v9315_v39, 0.0  ;;  %v20733_v3 = vmax.f32 %v9317_v25, 0.0  ;;  %v15384_v1 = vld [vmem:[#allocation6 + $0x604] ss:$16 sps:$4 sm:$0xff]  }
0x139b   :  { %v15379_v12 = vld [vmem:[#allocation6 + $0x400] ss:$16 sps:$4 sm:$0xff]   ;;  %v15387_v59 = vld [vmem:[#allocation6 + $0x5e4] ss:$16 sps:$4 sm:$0xff]  }
0x139c   :  { %v9330_v8 = vrot.slane %v20727_v57, 7  ;;  %v9332_v9 = vrot.slane %v20729_v40, 7  ;;  %v9358_v37 = vrot.slane %v20729_v40, 1  ;;  %v9331_v41 = vrot.slane %v20731_v10, 7  ;;  %v15382_v7 = vld [vmem:[#allocation6 + $0x600] ss:$16 sps:$4 sm:$0xff]  }
0x139d   :  { %v9333_v51 = vrot.slane %v20733_v3, 7  ;;  %v20759_v46 = vpack.c.bf16 %v20731_v10, %v20731_v10  ;;  %v20763_v56 = vpack.c.bf16 %v20733_v3, %v20733_v3  ;;  %v15390_v16 = vld [vmem:[#allocation6 + $0x7e4] ss:$16 sps:$4 sm:$0xff]   ;;  %v15385_v30 = vld [vmem:[#allocation6 + $0x5e0] ss:$16 sps:$4 sm:$0xff]  }
0x139e   :  { %v9348_v52 = vmul.f32 %v9346_v43, %v9330_v8  ;;  %v9350_v4 = vmul.f32 %v9346_v43, %v9332_v9  ;;  %v20743_v5 = vmul.f32 %v20737_v38, %v9358_v37  ;;  %v9349_v50 = vmul.f32 %v9346_v43, %v9331_v41  ;;  %v15388_v39 = vld [vmem:[#allocation6 + $0x7e0] ss:$16 sps:$4 sm:$0xff]   ;;  %v15393_v25 = vld [vmem:[#allocation6 + $0x5c4] ss:$16 sps:$4 sm:$0xff]  }
0x139f   :  { %v9351_v17 = vmul.f32 %v9346_v43, %v9333_v51  ;;  %v15381_v43 = vld [vmem:[#allocation6 + $0x404] ss:$16 sps:$4 sm:$0xff]   ;;  %v15391_v9 = vld [vmem:[#allocation6 + $0x5c0] ss:$16 sps:$4 sm:$0xff]  }
0x13a0   :  { %v20745_v63 = vpack.c.bf16 %v9348_v52, %v9348_v52  ;;  %v20747_v27 = vpack.c.bf16 %v9350_v4, %v9350_v4  ;;  %v20749_v6 = vpack.c.bf16 %v9349_v50, %v9349_v50  ;;  %v15396_v8 = vld [vmem:[#allocation6 + $0x7c4] ss:$16 sps:$4 sm:$0xff]   ;;  %v15394_v37 = vld [vmem:[#allocation6 + $0x7c0] ss:$16 sps:$4 sm:$0xff]  }
0x13a1   :  { %v20751_v21 = vpack.c.bf16 %v9351_v17, %v9351_v17  ;;  %v15399_v41 = vld [vmem:[#allocation6 + $0x5a4] ss:$16 sps:$4 sm:$0xff]   ;;  %v15397_v52 = vld [vmem:[#allocation6 + $0x5a0] ss:$16 sps:$4 sm:$0xff]  }
0x13a2   :  { %11332 = vmatprep.mubr.bf16.mxu1 %v20749_v6  ;;  %v15402_v51 = vld [vmem:[#allocation6 + $0x7a4] ss:$16 sps:$4 sm:$0xff]   ;;  %v15400_v4 = vld [vmem:[#allocation6 + $0x7a0] ss:$16 sps:$4 sm:$0xff]  }
0x13a3   :  { %11373 = vmatprep.mubr.bf16.mxu0 %v20751_v21  ;;  %11333 = vmatmul.mubr.bf16.vlgmr.msra.gmra.mxu1 %v20745_v63  ;;  %v15405_v50 = vld [vmem:[#allocation6 + $0x584] ss:$16 sps:$4 sm:$0xff]  }
0x13a4   :  { %11374 = vmatmul.mubr.bf16.vlgmr.msra.gmra.mxu0 %v20747_v27  ;;  %11383 = vmatpush1.bf16.msra.mxu1 %v15337_v35  ;;  %v15408_v17 = vld [vmem:[#allocation6 + $0x784] ss:$16 sps:$4 sm:$0xff]   ;;  %v15403_v35 = vld [vmem:[#allocation6 + $0x580] ss:$16 sps:$4 sm:$0xff]  }
0x13a5   :  { %11424 = vmatpush1.bf16.msra.mxu0 %v15340_v36  ;;  %11414 = vmatprep.mubr.bf16.mxu1 %v20759_v46  ;;  %v15406_v36 = vld [vmem:[#allocation6 + $0x780] ss:$16 sps:$4 sm:$0xff]  }
0x13a6   :  { %11455 = vmatprep.mubr.bf16.mxu0 %v20763_v56  ;;  %11384 = vmatprep.subr.bf16.mxu1 %v15345_v32  ;;  %v15411_v32 = vld [vmem:[#allocation6 + $0x564] ss:$16 sps:$4 sm:$0xff]  }
0x13a7   :  { %11425 = vmatprep.subr.bf16.mxu0 %v15348_v13  ;;  %v15414_v13 = vld [vmem:[#allocation6 + $0x764] ss:$16 sps:$4 sm:$0xff]  }
0x13a8   :  { %11385 = vmatpush1.bf16.msra.mxu1 %v15343_v49  ;;  %v15409_v49 = vld [vmem:[#allocation6 + $0x560] ss:$16 sps:$4 sm:$0xff]  }
0x13a9   :  { %11426 = vmatpush1.bf16.msra.mxu0 %v15346_v23  ;;  %11386 = vmatprep.subr.bf16.mxu1 %v15351_v42  ;;  %v15412_v23 = vld [vmem:[#allocation6 + $0x760] ss:$16 sps:$4 sm:$0xff]   ;;  %v15417_v42 = vld [vmem:[#allocation6 + $0x544] ss:$16 sps:$4 sm:$0xff]  }
0x13aa   :  { %11427 = vmatprep.subr.bf16.mxu0 %v15354_v22  ;;  %v15420_v22 = vld [vmem:[#allocation6 + $0x744] ss:$16 sps:$4 sm:$0xff]  }
0x13ac   :  { %11387 = vmatpush1.bf16.msra.mxu1 %v15349_v48  ;;  %v15415_v48 = vld [vmem:[#allocation6 + $0x540] ss:$16 sps:$4 sm:$0xff]  }
0x13ad   :  { %11428 = vmatpush1.bf16.msra.mxu0 %v15352_v20  ;;  %11388 = vmatprep.subr.bf16.mxu1 %v15357_v31  ;;  %v15418_v20 = vld [vmem:[#allocation6 + $0x740] ss:$16 sps:$4 sm:$0xff]   ;;  %v15423_v31 = vld [vmem:[#allocation6 + $0x524] ss:$16 sps:$4 sm:$0xff]  }
0x13ae   :  { %11429 = vmatprep.subr.bf16.mxu0 %v15360_v47  ;;  %v15426_v47 = vld [vmem:[#allocation6 + $0x724] ss:$16 sps:$4 sm:$0xff]  }
0x13b0   :  { %11389 = vmatpush1.bf16.msra.mxu1 %v15355_v45  ;;  %v15421_v45 = vld [vmem:[#allocation6 + $0x520] ss:$16 sps:$4 sm:$0xff]  }
0x13b1   :  { %11430 = vmatpush1.bf16.msra.mxu0 %v15358_v61  ;;  %11390 = vmatprep.subr.bf16.mxu1 %v15363_v54  ;;  %v15424_v61 = vld [vmem:[#allocation6 + $0x720] ss:$16 sps:$4 sm:$0xff]   ;;  %v15429_v54 = vld [vmem:[#allocation6 + $0x504] ss:$16 sps:$4 sm:$0xff]  }
0x13b2   :  { %11431 = vmatprep.subr.bf16.mxu0 %v15366_v58  ;;  %v15432_v58 = vld [vmem:[#allocation6 + $0x704] ss:$16 sps:$4 sm:$0xff]  }
0x13b4   :  { %11391 = vmatpush1.bf16.msra.mxu1 %v15361_v60  ;;  %v9357_v60 = vrot.slane %v20731_v10, 1  ;;  %v20773_v10 = vpack.c.bf16 %v20727_v57, %v20727_v57 }
0x13b5   :  { %11432 = vmatpush1.bf16.msra.mxu0 %v15364_v2  ;;  %11392 = vmatprep.subr.bf16.mxu1 %v15369_v34  ;;  %v9359_v2 = vrot.slane %v20733_v3, 1  ;;  %v15427_v34 = vld [vmem:[#allocation6 + $0x500] ss:$16 sps:$4 sm:$0xff]   ;;  %v20777_v3 = vpack.c.bf16 %v20729_v40, %v20729_v40 }
0x13b6   :  { %11433 = vmatprep.subr.bf16.mxu0 %v15372_v19  ;;  %v15430_v19 = vld [vmem:[#allocation6 + $0x700] ss:$16 sps:$4 sm:$0xff]  }
0x13b7   :  { %v15442_v40 = vld [vmem:[#allocation6 + $0xac0] ss:$16 sps:$4 sm:$0xff]  }
0x13b8   :  { %11393 = vmatpush1.bf16.msra.mxu1 %v15367_v33  ;;  %v15435_v33 = vld [vmem:[#allocation6 + $0x8e4] ss:$16 sps:$4 sm:$0xff]  }
0x13b9   :  { %11434 = vmatpush1.bf16.msra.mxu0 %v15370_v53  ;;  %11394 = vmatprep.subr.bf16.mxu1 %v15375_v44  ;;  %v15438_v53 = vld [vmem:[#allocation6 + $0xae4] ss:$16 sps:$4 sm:$0xff]   ;;  %v9373_v44 = vmul.f32 %v20737_v38, %v9357_v60 }
0x13ba   :  { %11435 = vmatprep.subr.bf16.mxu0 %v15378_v29  ;;  %v9375_v29 = vmul.f32 %v20737_v38, %v9359_v2  ;;  %v15492_v60 = vld [vmem:[#allocation6 + $0xbc4] ss:$16 sps:$4 sm:$0xff]   ;;  %v15487_v2 = vld [vmem:[#allocation6 + $0x9c0] ss:$16 sps:$4 sm:$0xff]  }
0x13bc   :  { %11395 = vmatpush1.bf16.msra.mxu1 %v15373_v24  ;;  %v15433_v24 = vld [vmem:[#allocation6 + $0x8e0] ss:$16 sps:$4 sm:$0xff]  }
0x13bd   :  { %11436 = vmatpush1.bf16.msra.mxu0 %v15376_v26  ;;  %11396 = vmatprep.subr.bf16.mxu1 %v15381_v43  ;;  %v15436_v26 = vld [vmem:[#allocation6 + $0xae0] ss:$16 sps:$4 sm:$0xff]   ;;  %v20779_v43 = vpack.c.bf16 %v9373_v44, %v9373_v44 }
0x13be   :  { %11437 = vmatprep.subr.bf16.mxu0 %v15384_v1  ;;  %v15441_v1 = vld [vmem:[#allocation6 + $0x8c4] ss:$16 sps:$4 sm:$0xff]   ;;  %v15496_v44 = vld [vmem:[#allocation6 + $0xba0] ss:$16 sps:$4 sm:$0xff]  }
0x13c0   :  { %11397 = vmatpush1.bf16.msra.mxu1 %v15379_v12  ;;  %v15444_v12 = vld [vmem:[#allocation6 + $0xac4] ss:$16 sps:$4 sm:$0xff]  }
0x13c1   :  { %11438 = vmatpush1.bf16.msra.mxu0 %v15382_v7  ;;  %11398 = vmatprep.subr.bf16.mxu1 %v15387_v59  ;;  %v20783_v7 = vpack.c.bf16 %v9375_v29, %v9375_v29  ;;  %v15439_v59 = vld [vmem:[#allocation6 + $0x8c0] ss:$16 sps:$4 sm:$0xff]   ;;  %v15501_v29 = vld [vmem:[#allocation6 + $0x984] ss:$16 sps:$4 sm:$0xff]  }
0x13c2   :  { %11439 = vmatprep.subr.bf16.mxu0 %v15390_v16  ;;  %v15447_v16 = vld [vmem:[#allocation6 + $0x8a4] ss:$16 sps:$4 sm:$0xff]  }
0x13c4   :  { %11399 = vmatpush2.bf16.msra.mxu1 %v15385_v30  ;;  %v15450_v30 = vld [vmem:[#allocation6 + $0xaa4] ss:$16 sps:$4 sm:$0xff]  }
0x13c5   :  { %11440 = vmatpush2.bf16.msra.mxu0 %v15388_v39  ;;  %11400 = vmatprep.subr.bf16.mxu1 %v15393_v25  ;;  %v15445_v39 = vld [vmem:[#allocation6 + $0x8a0] ss:$16 sps:$4 sm:$0xff]  }
0x13c6   :  { %11441 = vmatprep.subr.bf16.mxu0 %v15396_v8  ;;  %v15448_v25 = vld [vmem:[#allocation6 + $0xaa0] ss:$16 sps:$4 sm:$0xff]   ;;  %v15453_v8 = vld [vmem:[#allocation6 + $0x884] ss:$16 sps:$4 sm:$0xff]  }
0x13c8   :  { %11401 = vmatpush2.bf16.msra.mxu1 %v15391_v9  ;;  %v15456_v9 = vld [vmem:[#allocation6 + $0xa84] ss:$16 sps:$4 sm:$0xff]  }
0x13c9   :  { %11442 = vmatpush2.bf16.msra.mxu0 %v15394_v37  ;;  %11402 = vmatprep.subr.bf16.mxu1 %v15399_v41  ;;  %v15451_v37 = vld [vmem:[#allocation6 + $0x880] ss:$16 sps:$4 sm:$0xff]  }
0x13ca   :  { %11443 = vmatprep.subr.bf16.mxu0 %v15402_v51  ;;  %v15454_v41 = vld [vmem:[#allocation6 + $0xa80] ss:$16 sps:$4 sm:$0xff]   ;;  %v15459_v51 = vld [vmem:[#allocation6 + $0x864] ss:$16 sps:$4 sm:$0xff]  }
0x13cc   :  { %11403 = vmatpush2.bf16.msra.mxu1 %v15397_v52  ;;  %v15462_v52 = vld [vmem:[#allocation6 + $0xa64] ss:$16 sps:$4 sm:$0xff]  }
0x13cd   :  { %11444 = vmatpush2.bf16.msra.mxu0 %v15400_v4  ;;  %11404 = vmatprep.subr.bf16.mxu1 %v15405_v50  ;;  %v15457_v4 = vld [vmem:[#allocation6 + $0x860] ss:$16 sps:$4 sm:$0xff]  }
0x13ce   :  { %11445 = vmatprep.subr.bf16.mxu0 %v15408_v17  ;;  %v15460_v50 = vld [vmem:[#allocation6 + $0xa60] ss:$16 sps:$4 sm:$0xff]   ;;  %v15465_v17 = vld [vmem:[#allocation6 + $0x844] ss:$16 sps:$4 sm:$0xff]  }
0x13d0   :  { %11405 = vmatpush2.bf16.msra.mxu1 %v15403_v35  ;;  %v15468_v35 = vld [vmem:[#allocation6 + $0xa44] ss:$16 sps:$4 sm:$0xff]  }
0x13d1   :  { %11446 = vmatpush2.bf16.msra.mxu0 %v15406_v36  ;;  %11406 = vmatprep.subr.bf16.mxu1 %v15411_v32  ;;  %v15463_v36 = vld [vmem:[#allocation6 + $0x840] ss:$16 sps:$4 sm:$0xff]  }
0x13d2   :  { %11447 = vmatprep.subr.bf16.mxu0 %v15414_v13  ;;  %v15466_v32 = vld [vmem:[#allocation6 + $0xa40] ss:$16 sps:$4 sm:$0xff]   ;;  %v15471_v13 = vld [vmem:[#allocation6 + $0x824] ss:$16 sps:$4 sm:$0xff]  }
0x13d4   :  { %11407 = vmatpush2.bf16.msra.mxu1 %v15409_v49  ;;  %v15474_v49 = vld [vmem:[#allocation6 + $0xa24] ss:$16 sps:$4 sm:$0xff]  }
0x13d5   :  { %11448 = vmatpush2.bf16.msra.mxu0 %v15412_v23  ;;  %11408 = vmatprep.subr.bf16.mxu1 %v15417_v42  ;;  %v15469_v23 = vld [vmem:[#allocation6 + $0x820] ss:$16 sps:$4 sm:$0xff]  }
0x13d6   :  { %11449 = vmatprep.subr.bf16.mxu0 %v15420_v22  ;;  %v15472_v42 = vld [vmem:[#allocation6 + $0xa20] ss:$16 sps:$4 sm:$0xff]   ;;  %v15477_v22 = vld [vmem:[#allocation6 + $0x804] ss:$16 sps:$4 sm:$0xff]  }
0x13d8   :  { %11409 = vmatpush2.bf16.msra.mxu1 %v15415_v48  ;;  %v15480_v48 = vld [vmem:[#allocation6 + $0xa04] ss:$16 sps:$4 sm:$0xff]  }
0x13d9   :  { %11450 = vmatpush2.bf16.msra.mxu0 %v15418_v20  ;;  %11410 = vmatprep.subr.bf16.mxu1 %v15423_v31  ;;  %v15475_v20 = vld [vmem:[#allocation6 + $0x800] ss:$16 sps:$4 sm:$0xff]  }
0x13da   :  { %11451 = vmatprep.subr.bf16.mxu0 %v15426_v47  ;;  %v15478_v31 = vld [vmem:[#allocation6 + $0xa00] ss:$16 sps:$4 sm:$0xff]   ;;  %v15483_v47 = vld [vmem:[#allocation6 + $0x9e4] ss:$16 sps:$4 sm:$0xff]  }
0x13dc   :  { %11411 = vmatpush2.bf16.msra.mxu1 %v15421_v45  ;;  %v15486_v45 = vld [vmem:[#allocation6 + $0xbe4] ss:$16 sps:$4 sm:$0xff]  }
0x13dd   :  { %11452 = vmatpush2.bf16.msra.mxu0 %v15424_v61  ;;  %11412 = vmatprep.subr.bf16.mxu1 %v15429_v54  ;;  %v15481_v61 = vld [vmem:[#allocation6 + $0x9e0] ss:$16 sps:$4 sm:$0xff]  }
0x13de   :  { %11453 = vmatprep.subr.bf16.mxu0 %v15432_v58  ;;  %v15484_v54 = vld [vmem:[#allocation6 + $0xbe0] ss:$16 sps:$4 sm:$0xff]   ;;  %v15489_v58 = vld [vmem:[#allocation6 + $0x9c4] ss:$16 sps:$4 sm:$0xff]  }
0x13e0   :  { %11413 = vmatpush2.bf16.msra.mxu1 %v15427_v34  ;;  %v15490_v34 = vld [vmem:[#allocation6 + $0xbc0] ss:$16 sps:$4 sm:$0xff]  }
0x13e1   :  { %11454 = vmatpush2.bf16.msra.mxu0 %v15430_v19  ;;  %11464 = vmatprep.subr.bf16.mxu1 %v15435_v33  ;;  %v15495_v19 = vld [vmem:[#allocation6 + $0x9a4] ss:$16 sps:$4 sm:$0xff]  }
0x13e2   :  { %11505 = vmatprep.subr.bf16.mxu0 %v15438_v53  ;;  %v15498_v33 = vld [vmem:[#allocation6 + $0xba4] ss:$16 sps:$4 sm:$0xff]   ;;  %v15493_v53 = vld [vmem:[#allocation6 + $0x9a0] ss:$16 sps:$4 sm:$0xff]  }
0x13e3   :  { %11415 = vmatmul.mubr.bf16.vlgmr.msra.gmra.mxu1 %v20773_v10 }
0x13e4   :  { %11456 = vmatmul.mubr.bf16.vlgmr.msra.gmra.mxu0 %v20777_v3  ;;  %11465 = vmatpush1.bf16.msra.mxu1 %v15433_v24  ;;  %v15504_v24 = vld [vmem:[#allocation6 + $0xb84] ss:$16 sps:$4 sm:$0xff]  }
0x13e5   :  { %11496 = vmatprep.mubr.bf16.mxu1 %v20779_v43  ;;  %11506 = vmatpush1.bf16.msra.mxu0 %v15436_v26  ;;  %v15499_v26 = vld [vmem:[#allocation6 + $0x980] ss:$16 sps:$4 sm:$0xff]  }
0x13e6   :  { %11537 = vmatprep.mubr.bf16.mxu0 %v20783_v7  ;;  %11466 = vmatprep.subr.bf16.mxu1 %v15441_v1  ;;  %v15502_v1 = vld [vmem:[#allocation6 + $0xb80] ss:$16 sps:$4 sm:$0xff]  }
0x13e7   :  { %11507 = vmatprep.subr.bf16.mxu0 %v15444_v12  ;;  %v15507_v12 = vld [vmem:[#allocation6 + $0x964] ss:$16 sps:$4 sm:$0xff]  }
0x13e8   :  { %11467 = vmatpush1.bf16.msra.mxu1 %v15439_v59  ;;  %v15510_v59 = vld [vmem:[#allocation6 + $0xb64] ss:$16 sps:$4 sm:$0xff]  }
0x13e9   :  { %11508 = vmatpush1.bf16.msra.mxu0 %v15442_v40  ;;  %11468 = vmatprep.subr.bf16.mxu1 %v15447_v16  ;;  %v15505_v40 = vld [vmem:[#allocation6 + $0x960] ss:$16 sps:$4 sm:$0xff]  }
0x13ea   :  { %11509 = vmatprep.subr.bf16.mxu0 %v15450_v30  ;;  %v15508_v16 = vld [vmem:[#allocation6 + $0xb60] ss:$16 sps:$4 sm:$0xff]   ;;  %v15513_v30 = vld [vmem:[#allocation6 + $0x944] ss:$16 sps:$4 sm:$0xff]  }
0x13ec   :  { %11469 = vmatpush1.bf16.msra.mxu1 %v15445_v39  ;;  %v15516_v39 = vld [vmem:[#allocation6 + $0xb44] ss:$16 sps:$4 sm:$0xff]  }
0x13ed   :  { %11510 = vmatpush1.bf16.msra.mxu0 %v15448_v25  ;;  %11470 = vmatprep.subr.bf16.mxu1 %v15453_v8  ;;  %v15511_v25 = vld [vmem:[#allocation6 + $0x940] ss:$16 sps:$4 sm:$0xff]  }
0x13ee   :  { %11511 = vmatprep.subr.bf16.mxu0 %v15456_v9  ;;  %v15514_v8 = vld [vmem:[#allocation6 + $0xb40] ss:$16 sps:$4 sm:$0xff]   ;;  %v15519_v9 = vld [vmem:[#allocation6 + $0x924] ss:$16 sps:$4 sm:$0xff]  }
0x13f0   :  { %11471 = vmatpush1.bf16.msra.mxu1 %v15451_v37  ;;  %v15522_v37 = vld [vmem:[#allocation6 + $0xb24] ss:$16 sps:$4 sm:$0xff]  }
0x13f1   :  { %11512 = vmatpush1.bf16.msra.mxu0 %v15454_v41  ;;  %11472 = vmatprep.subr.bf16.mxu1 %v15459_v51  ;;  %v15517_v41 = vld [vmem:[#allocation6 + $0x920] ss:$16 sps:$4 sm:$0xff]   ;;  %v9356_v51 = vrot.slane %v20727_v57, 1  ;;  %v15532_v57 = vld [vmem:[#allocation6 + $0x2e8] ss:$16 sps:$4 sm:$0xff]  }
0x13f2   :  { %11513 = vmatprep.subr.bf16.mxu0 %v15462_v52  ;;  %v15520_v52 = vld [vmem:[#allocation6 + $0xb20] ss:$16 sps:$4 sm:$0xff]  }
0x13f4   :  { %11473 = vmatpush1.bf16.msra.mxu1 %v15457_v4  ;;  %v15525_v4 = vld [vmem:[#allocation6 + $0x904] ss:$16 sps:$4 sm:$0xff]  }
0x13f5   :  { %11514 = vmatpush1.bf16.msra.mxu0 %v15460_v50  ;;  %11474 = vmatprep.subr.bf16.mxu1 %v15465_v17  ;;  %v15528_v50 = vld [vmem:[#allocation6 + $0xb04] ss:$16 sps:$4 sm:$0xff]   ;;  %v15523_v17 = vld [vmem:[#allocation6 + $0x900] ss:$16 sps:$4 sm:$0xff]  }
0x13f6   :  { %11515 = vmatprep.subr.bf16.mxu0 %v15468_v35  ;;  %v9372_v35 = vmul.f32 %v20737_v38, %v9356_v51  ;;  %v15540_v38 = vld [vmem:[#allocation6 + $0x2cc] ss:$16 sps:$4 sm:$0xff]   ;;  %v15586_v51 = vld [vmem:[#allocation6 + $0x3c8] ss:$16 sps:$4 sm:$0xff]  }
0x13f8   :  { %11475 = vmatpush1.bf16.msra.mxu1 %v15463_v36  ;;  %v15526_v36 = vld [vmem:[#allocation6 + $0xb00] ss:$16 sps:$4 sm:$0xff]  }
0x13f9   :  { %11516 = vmatpush1.bf16.msra.mxu0 %v15466_v32  ;;  %11476 = vmatprep.subr.bf16.mxu1 %v15471_v13  ;;  %v15531_v32 = vld [vmem:[#allocation6 + $0xec] ss:$16 sps:$4 sm:$0xff]  }
0x13fa   :  { %11517 = vmatprep.subr.bf16.mxu0 %v15474_v49  ;;  %v15534_v13 = vld [vmem:[#allocation6 + $0x2ec] ss:$16 sps:$4 sm:$0xff]   ;;  %v15529_v49 = vld [vmem:[#allocation6 + $0xe8] ss:$16 sps:$4 sm:$0xff]  }
0x13fc   :  { %11477 = vmatpush1.bf16.msra.mxu1 %v15469_v23  ;;  %v20789_v23 = vpack.c.bf16 %v9372_v35, %v9372_v35  ;;  %v15597_v35 = vld [vmem:[#allocation6 + $0x18c] ss:$16 sps:$4 sm:$0xff]  }
0x13fd   :  { %11518 = vmatpush1.bf16.msra.mxu0 %v15472_v42  ;;  %11478 = vmatprep.subr.bf16.mxu1 %v15477_v22  ;;  %v20793_v42 = vpack.c.bf16 %v20743_v5, %v20743_v5  ;;  %v15537_v22 = vld [vmem:[#allocation6 + $0xcc] ss:$16 sps:$4 sm:$0xff]   ;;  %v15541_v5 = vld [vmem:[#allocation6 + $0xa8] ss:$16 sps:$4 sm:$0xff]  }
0x13fe   :  { %11519 = vmatprep.subr.bf16.mxu0 %v15480_v48  ;;  %v15535_v48 = vld [vmem:[#allocation6 + $0xc8] ss:$16 sps:$4 sm:$0xff]  }
0x1400   :  { %11479 = vmatpush1.bf16.msra.mxu1 %v15475_v20  ;;  %v15538_v20 = vld [vmem:[#allocation6 + $0x2c8] ss:$16 sps:$4 sm:$0xff]  }
0x1401   :  { %11520 = vmatpush1.bf16.msra.mxu0 %v15478_v31  ;;  %11480 = vmatprep.subr.bf16.mxu1 %v15483_v47  ;;  %v15543_v31 = vld [vmem:[#allocation6 + $0xac] ss:$16 sps:$4 sm:$0xff]  }
0x1402   :  { %11521 = vmatprep.subr.bf16.mxu0 %v15486_v45  ;;  %v15546_v47 = vld [vmem:[#allocation6 + $0x2ac] ss:$16 sps:$4 sm:$0xff]   ;;  %v15544_v45 = vld [vmem:[#allocation6 + $0x2a8] ss:$16 sps:$4 sm:$0xff]  }
0x1404   :  { %11481 = vmatpush2.bf16.msra.mxu1 %v15481_v61  ;;  %v15549_v61 = vld [vmem:[#allocation6 + $0x8c] ss:$16 sps:$4 sm:$0xff]  }
0x1405   :  { %11522 = vmatpush2.bf16.msra.mxu0 %v15484_v54  ;;  %11482 = vmatprep.subr.bf16.mxu1 %v15489_v58  ;;  %v15552_v54 = vld [vmem:[#allocation6 + $0x28c] ss:$16 sps:$4 sm:$0xff]   ;;  %v15547_v58 = vld [vmem:[#allocation6 + $0x88] ss:$16 sps:$4 sm:$0xff]  }
0x1406   :  { %11523 = vmatprep.subr.bf16.mxu0 %v15492_v60  ;;  %v15555_v60 = vld [vmem:[#allocation6 + $0x6c] ss:$16 sps:$4 sm:$0xff]  }
0x1408   :  { %11483 = vmatpush2.bf16.msra.mxu1 %v15487_v2  ;;  %v15558_v2 = vld [vmem:[#allocation6 + $0x26c] ss:$16 sps:$4 sm:$0xff]  }
0x1409   :  { %11524 = vmatpush2.bf16.msra.mxu0 %v15490_v34  ;;  %11484 = vmatprep.subr.bf16.mxu1 %v15495_v19  ;;  %v15556_v34 = vld [vmem:[#allocation6 + $0x268] ss:$16 sps:$4 sm:$0xff]   ;;  %v15561_v19 = vld [vmem:[#allocation6 + $0x4c] ss:$16 sps:$4 sm:$0xff]  }
0x140a   :  { %11525 = vmatprep.subr.bf16.mxu0 %v15498_v33  ;;  %v15564_v33 = vld [vmem:[#allocation6 + $0x24c] ss:$16 sps:$4 sm:$0xff]  }
0x140c   :  { %11485 = vmatpush2.bf16.msra.mxu1 %v15493_v53  ;;  %v15559_v53 = vld [vmem:[#allocation6 + $0x48] ss:$16 sps:$4 sm:$0xff]  }
0x140d   :  { %11526 = vmatpush2.bf16.msra.mxu0 %v15496_v44  ;;  %11486 = vmatprep.subr.bf16.mxu1 %v15501_v29  ;;  %v15562_v44 = vld [vmem:[#allocation6 + $0x248] ss:$16 sps:$4 sm:$0xff]   ;;  %v15567_v29 = vld [vmem:[#allocation6 + $0x2c] ss:$16 sps:$4 sm:$0xff]  }
0x140e   :  { %11527 = vmatprep.subr.bf16.mxu0 %v15504_v24  ;;  %v15570_v24 = vld [vmem:[#allocation6 + $0x22c] ss:$16 sps:$4 sm:$0xff]  }
0x1410   :  { %11487 = vmatpush2.bf16.msra.mxu1 %v15499_v26  ;;  %v15565_v26 = vld [vmem:[#allocation6 + $0x28] ss:$16 sps:$4 sm:$0xff]  }
0x1411   :  { %11528 = vmatpush2.bf16.msra.mxu0 %v15502_v1  ;;  %11488 = vmatprep.subr.bf16.mxu1 %v15507_v12  ;;  %v15568_v1 = vld [vmem:[#allocation6 + $0x228] ss:$16 sps:$4 sm:$0xff]   ;;  %v15573_v12 = vld [vmem:[#allocation6 + $0xc] ss:$16 sps:$4 sm:$0xff]  }
0x1412   :  { %11529 = vmatprep.subr.bf16.mxu0 %v15510_v59  ;;  %v15576_v59 = vld [vmem:[#allocation6 + $0x20c] ss:$16 sps:$4 sm:$0xff]  }
0x1414   :  { %11489 = vmatpush2.bf16.msra.mxu1 %v15505_v40  ;;  %v15571_v40 = vld [vmem:[#allocation6 + $0x8] ss:$16 sps:$4 sm:$0xff]  }
0x1415   :  { %11530 = vmatpush2.bf16.msra.mxu0 %v15508_v16  ;;  %11490 = vmatprep.subr.bf16.mxu1 %v15513_v30  ;;  %v15574_v16 = vld [vmem:[#allocation6 + $0x208] ss:$16 sps:$4 sm:$0xff]   ;;  %v15579_v30 = vld [vmem:[#allocation6 + $0x1ec] ss:$16 sps:$4 sm:$0xff]  }
0x1416   :  { %11531 = vmatprep.subr.bf16.mxu0 %v15516_v39  ;;  %v15582_v39 = vld [vmem:[#allocation6 + $0x3ec] ss:$16 sps:$4 sm:$0xff]  }
0x1418   :  { %11491 = vmatpush2.bf16.msra.mxu1 %v15511_v25  ;;  %v15577_v25 = vld [vmem:[#allocation6 + $0x1e8] ss:$16 sps:$4 sm:$0xff]  }
0x1419   :  { %11532 = vmatpush2.bf16.msra.mxu0 %v15514_v8  ;;  %11492 = vmatprep.subr.bf16.mxu1 %v15519_v9  ;;  %v15580_v8 = vld [vmem:[#allocation6 + $0x3e8] ss:$16 sps:$4 sm:$0xff]   ;;  %v15585_v9 = vld [vmem:[#allocation6 + $0x1cc] ss:$16 sps:$4 sm:$0xff]  }
0x141a   :  { %11533 = vmatprep.subr.bf16.mxu0 %v15522_v37  ;;  %v15588_v37 = vld [vmem:[#allocation6 + $0x3cc] ss:$16 sps:$4 sm:$0xff]  }
0x141c   :  { %11493 = vmatpush2.bf16.msra.mxu1 %v15517_v41  ;;  %v15583_v41 = vld [vmem:[#allocation6 + $0x1c8] ss:$16 sps:$4 sm:$0xff]  }
0x141d   :  { %11534 = vmatpush2.bf16.msra.mxu0 %v15520_v52  ;;  %11494 = vmatprep.subr.bf16.mxu1 %v15525_v4  ;;  %v15591_v52 = vld [vmem:[#allocation6 + $0x1ac] ss:$16 sps:$4 sm:$0xff]  }
0x141e   :  { %11535 = vmatprep.subr.bf16.mxu0 %v15528_v50  ;;  %v15594_v4 = vld [vmem:[#allocation6 + $0x3ac] ss:$16 sps:$4 sm:$0xff]   ;;  %v15589_v50 = vld [vmem:[#allocation6 + $0x1a8] ss:$16 sps:$4 sm:$0xff]  }
0x1420   :  { %11495 = vmatpush2.bf16.msra.mxu1 %v15523_v17  ;;  %v15592_v17 = vld [vmem:[#allocation6 + $0x3a8] ss:$16 sps:$4 sm:$0xff]  }
0x1421   :  { %11536 = vmatpush2.bf16.msra.mxu0 %v15526_v36  ;;  %11546 = vmatprep.subr.bf16.mxu1 %v15531_v32  ;;  %v15600_v36 = vld [vmem:[#allocation6 + $0x38c] ss:$16 sps:$4 sm:$0xff]   ;;  %v15595_v32 = vld [vmem:[#allocation6 + $0x188] ss:$16 sps:$4 sm:$0xff]  }
0x1422   :  { %11587 = vmatprep.subr.bf16.mxu0 %v15534_v13  ;;  %v15598_v13 = vld [vmem:[#allocation6 + $0x388] ss:$16 sps:$4 sm:$0xff]  }
0x1423   :  { %11497 = vmatmul.mubr.bf16.vlgmr.msra.gmra.mxu1 %v20789_v23 }
0x1424   :  { %11538 = vmatmul.mubr.bf16.vlgmr.msra.gmra.mxu0 %v20793_v42  ;;  %11547 = vmatpush1.bf16.msra.mxu1 %v15529_v49  ;;  %v15603_v49 = vld [vmem:[#allocation6 + $0x16c] ss:$16 sps:$4 sm:$0xff]  }
0x1425   :  { %11578 = vmatprep.mubr.bf16.mxu1 %v20749_v6  ;;  %11588 = vmatpush1.bf16.msra.mxu0 %v15532_v57  ;;  %v15550_v6 = vld [vmem:[#allocation6 + $0x288] ss:$16 sps:$4 sm:$0xff]   ;;  %v15606_v57 = vld [vmem:[#allocation6 + $0x36c] ss:$16 sps:$4 sm:$0xff]  }
0x1426   :  { %11619 = vmatprep.mubr.bf16.mxu0 %v20751_v21  ;;  %11548 = vmatprep.subr.bf16.mxu1 %v15537_v22  ;;  %v15553_v21 = vld [vmem:[#allocation6 + $0x68] ss:$16 sps:$4 sm:$0xff]  }
0x1427   :  { %11589 = vmatprep.subr.bf16.mxu0 %v15540_v38  ;;  %v15601_v22 = vld [vmem:[#allocation6 + $0x168] ss:$16 sps:$4 sm:$0xff]  }
0x1428   :  { %11549 = vmatpush1.bf16.msra.mxu1 %v15535_v48  ;;  %v15604_v38 = vld [vmem:[#allocation6 + $0x368] ss:$16 sps:$4 sm:$0xff]   ;;  %v15609_v48 = vld [vmem:[#allocation6 + $0x14c] ss:$16 sps:$4 sm:$0xff]  }
0x1429   :  { %11590 = vmatpush1.bf16.msra.mxu0 %v15538_v20  ;;  %11550 = vmatprep.subr.bf16.mxu1 %v15543_v31  ;;  %v15612_v20 = vld [vmem:[#allocation6 + $0x34c] ss:$16 sps:$4 sm:$0xff]   ;;  %v15607_v31 = vld [vmem:[#allocation6 + $0x148] ss:$16 sps:$4 sm:$0xff]  }
0x142a   :  { %11591 = vmatprep.subr.bf16.mxu0 %v15546_v47  ;;  %v15610_v47 = vld [vmem:[#allocation6 + $0x348] ss:$16 sps:$4 sm:$0xff]  }
0x142c   :  { %11551 = vmatpush1.bf16.msra.mxu1 %v15541_v5  ;;  %v15615_v5 = vld [vmem:[#allocation6 + $0x12c] ss:$16 sps:$4 sm:$0xff]  }
0x142d   :  { %11592 = vmatpush1.bf16.msra.mxu0 %v15544_v45  ;;  %11552 = vmatprep.subr.bf16.mxu1 %v15549_v61  ;;  %v15618_v45 = vld [vmem:[#allocation6 + $0x32c] ss:$16 sps:$4 sm:$0xff]   ;;  %v15613_v61 = vld [vmem:[#allocation6 + $0x128] ss:$16 sps:$4 sm:$0xff]  }
0x142e   :  { %11593 = vmatprep.subr.bf16.mxu0 %v15552_v54  ;;  %v15616_v54 = vld [vmem:[#allocation6 + $0x328] ss:$16 sps:$4 sm:$0xff]  }
0x1430   :  { %11553 = vmatpush1.bf16.msra.mxu1 %v15547_v58  ;;  %v15621_v58 = vld [vmem:[#allocation6 + $0x10c] ss:$16 sps:$4 sm:$0xff]  }
0x1431   :  { %11594 = vmatpush1.bf16.msra.mxu0 %v15550_v6  ;;  %11554 = vmatprep.subr.bf16.mxu1 %v15555_v60  ;;  %v15624_v6 = vld [vmem:[#allocation6 + $0x30c] ss:$16 sps:$4 sm:$0xff]   ;;  %v15619_v60 = vld [vmem:[#allocation6 + $0x108] ss:$16 sps:$4 sm:$0xff]  }
0x1432   :  { %11595 = vmatprep.subr.bf16.mxu0 %v15558_v2  ;;  %v15622_v2 = vld [vmem:[#allocation6 + $0x308] ss:$16 sps:$4 sm:$0xff]  }
0x1434   :  { %11555 = vmatpush1.bf16.msra.mxu1 %v15553_v21  ;;  %v15627_v21 = vld [vmem:[#allocation6 + $0x4ec] ss:$16 sps:$4 sm:$0xff]  }
0x1435   :  { %11596 = vmatpush1.bf16.msra.mxu0 %v15556_v34  ;;  %11556 = vmatprep.subr.bf16.mxu1 %v15561_v19  ;;  %v15630_v34 = vld [vmem:[#allocation6 + $0x6ec] ss:$16 sps:$4 sm:$0xff]   ;;  %v15625_v19 = vld [vmem:[#allocation6 + $0x4e8] ss:$16 sps:$4 sm:$0xff]  }
0x1436   :  { %11597 = vmatprep.subr.bf16.mxu0 %v15564_v33  ;;  %v15628_v33 = vld [vmem:[#allocation6 + $0x6e8] ss:$16 sps:$4 sm:$0xff]  }
0x1438   :  { %11557 = vmatpush1.bf16.msra.mxu1 %v15559_v53  ;;  %v15633_v53 = vld [vmem:[#allocation6 + $0x4cc] ss:$16 sps:$4 sm:$0xff]  }
0x1439   :  { %11598 = vmatpush1.bf16.msra.mxu0 %v15562_v44  ;;  %11558 = vmatprep.subr.bf16.mxu1 %v15567_v29 }
0x143a   :  { %11599 = vmatprep.subr.bf16.mxu0 %v15570_v24  ;;  %v15636_v24 = vld [vmem:[#allocation6 + $0x6cc] ss:$16 sps:$4 sm:$0xff]  }
0x143c   :  { %11559 = vmatpush1.bf16.msra.mxu1 %v15565_v26 }
0x143d   :  { %11600 = vmatpush1.bf16.msra.mxu0 %v15568_v1  ;;  %11560 = vmatprep.subr.bf16.mxu1 %v15573_v12  ;;  %v15631_v1 = vld [vmem:[#allocation6 + $0x4c8] ss:$16 sps:$4 sm:$0xff]  }
0x143e   :  { %11601 = vmatprep.subr.bf16.mxu0 %v15576_v59 }
0x1440   :  { %11561 = vmatpush1.bf16.msra.mxu1 %v15571_v40  ;;  %v15634_v40 = vld [vmem:[#allocation6 + $0x6c8] ss:$16 sps:$4 sm:$0xff]  }
0x1441   :  { %11602 = vmatpush1.bf16.msra.mxu0 %v15574_v16  ;;  %11562 = vmatprep.subr.bf16.mxu1 %v15579_v30  ;;  %v15639_v16 = vld [vmem:[#allocation6 + $0x4ac] ss:$16 sps:$4 sm:$0xff]  }
0x1442   :  { %11603 = vmatprep.subr.bf16.mxu0 %v15582_v39 }
0x1444   :  { %11563 = vmatpush2.bf16.msra.mxu1 %v15577_v25  ;;  %v15637_v25 = vld [vmem:[#allocation6 + $0x4a8] ss:$16 sps:$4 sm:$0xff]  }
0x1445   :  { %11604 = vmatpush2.bf16.msra.mxu0 %v15580_v8  ;;  %11564 = vmatprep.subr.bf16.mxu1 %v15585_v9 }
0x1446   :  { %11605 = vmatprep.subr.bf16.mxu0 %v15588_v37  ;;  %v15645_v37 = vld [vmem:[#allocation6 + $0x48c] ss:$16 sps:$4 sm:$0xff]  }
0x1448   :  { %11565 = vmatpush2.bf16.msra.mxu1 %v15583_v41  ;;  %v15648_v41 = vld [vmem:[#allocation6 + $0x68c] ss:$16 sps:$4 sm:$0xff]  }
0x1449   :  { %11606 = vmatpush2.bf16.msra.mxu0 %v15586_v51  ;;  %11566 = vmatprep.subr.bf16.mxu1 %v15591_v52  ;;  %v15643_v51 = vld [vmem:[#allocation6 + $0x488] ss:$16 sps:$4 sm:$0xff]   ;;  %v15651_v52 = vld [vmem:[#allocation6 + $0x46c] ss:$16 sps:$4 sm:$0xff]  }
0x144a   :  { %11607 = vmatprep.subr.bf16.mxu0 %v15594_v4  ;;  %v15654_v4 = vld [vmem:[#allocation6 + $0x66c] ss:$16 sps:$4 sm:$0xff]  }
0x144c   :  { %11567 = vmatpush2.bf16.msra.mxu1 %v15589_v50  ;;  %v15649_v50 = vld [vmem:[#allocation6 + $0x468] ss:$16 sps:$4 sm:$0xff]  }
0x144d   :  { %11608 = vmatpush2.bf16.msra.mxu0 %v15592_v17  ;;  %11568 = vmatprep.subr.bf16.mxu1 %v15597_v35  ;;  %v15652_v17 = vld [vmem:[#allocation6 + $0x668] ss:$16 sps:$4 sm:$0xff]   ;;  %v15657_v35 = vld [vmem:[#allocation6 + $0x44c] ss:$16 sps:$4 sm:$0xff]  }
0x144e   :  { %11609 = vmatprep.subr.bf16.mxu0 %v15600_v36  ;;  %v15660_v36 = vld [vmem:[#allocation6 + $0x64c] ss:$16 sps:$4 sm:$0xff]  }
0x1450   :  { %11569 = vmatpush2.bf16.msra.mxu1 %v15595_v32  ;;  %v15655_v32 = vld [vmem:[#allocation6 + $0x448] ss:$16 sps:$4 sm:$0xff]  }
0x1451   :  { %11610 = vmatpush2.bf16.msra.mxu0 %v15598_v13  ;;  %11570 = vmatprep.subr.bf16.mxu1 %v15603_v49  ;;  %v15658_v13 = vld [vmem:[#allocation6 + $0x648] ss:$16 sps:$4 sm:$0xff]   ;;  %v15663_v49 = vld [vmem:[#allocation6 + $0x42c] ss:$16 sps:$4 sm:$0xff]  }
0x1452   :  { %11611 = vmatprep.subr.bf16.mxu0 %v15606_v57  ;;  %v15666_v57 = vld [vmem:[#allocation6 + $0x62c] ss:$16 sps:$4 sm:$0xff]  }
0x1454   :  { %11571 = vmatpush2.bf16.msra.mxu1 %v15601_v22  ;;  %v15661_v22 = vld [vmem:[#allocation6 + $0x428] ss:$16 sps:$4 sm:$0xff]  }
0x1455   :  { %11612 = vmatpush2.bf16.msra.mxu0 %v15604_v38  ;;  %11572 = vmatprep.subr.bf16.mxu1 %v15609_v48  ;;  %v15664_v38 = vld [vmem:[#allocation6 + $0x628] ss:$16 sps:$4 sm:$0xff]   ;;  %v15669_v48 = vld [vmem:[#allocation6 + $0x40c] ss:$16 sps:$4 sm:$0xff]  }
0x1456   :  { %11613 = vmatprep.subr.bf16.mxu0 %v15612_v20  ;;  %v15672_v20 = vld [vmem:[#allocation6 + $0x60c] ss:$16 sps:$4 sm:$0xff]  }
0x1458   :  { %11573 = vmatpush2.bf16.msra.mxu1 %v15607_v31  ;;  %v15667_v31 = vld [vmem:[#allocation6 + $0x408] ss:$16 sps:$4 sm:$0xff]  }
0x1459   :  { %11614 = vmatpush2.bf16.msra.mxu0 %v15610_v47  ;;  %11574 = vmatprep.subr.bf16.mxu1 %v15615_v5  ;;  %v15670_v47 = vld [vmem:[#allocation6 + $0x608] ss:$16 sps:$4 sm:$0xff]   ;;  %v15675_v5 = vld [vmem:[#allocation6 + $0x5ec] ss:$16 sps:$4 sm:$0xff]  }
0x145a   :  { %11615 = vmatprep.subr.bf16.mxu0 %v15618_v45  ;;  %v15678_v45 = vld [vmem:[#allocation6 + $0x7ec] ss:$16 sps:$4 sm:$0xff]  }
0x145c   :  { %11575 = vmatpush2.bf16.msra.mxu1 %v15613_v61  ;;  %v15673_v61 = vld [vmem:[#allocation6 + $0x5e8] ss:$16 sps:$4 sm:$0xff]  }
0x145d   :  { %11616 = vmatpush2.bf16.msra.mxu0 %v15616_v54  ;;  %11576 = vmatprep.subr.bf16.mxu1 %v15621_v58  ;;  %v15676_v54 = vld [vmem:[#allocation6 + $0x7e8] ss:$16 sps:$4 sm:$0xff]   ;;  %v15681_v58 = vld [vmem:[#allocation6 + $0x5cc] ss:$16 sps:$4 sm:$0xff]  }
0x145e   :  { %11617 = vmatprep.subr.bf16.mxu0 %v15624_v6  ;;  %v15684_v6 = vld [vmem:[#allocation6 + $0x7cc] ss:$16 sps:$4 sm:$0xff]  }
0x1460   :  { %11577 = vmatpush2.bf16.msra.mxu1 %v15619_v60  ;;  %v15679_v60 = vld [vmem:[#allocation6 + $0x5c8] ss:$16 sps:$4 sm:$0xff]  }
0x1461   :  { %11618 = vmatpush2.bf16.msra.mxu0 %v15622_v2  ;;  %11628 = vmatprep.subr.bf16.mxu1 %v15627_v21  ;;  %v15682_v2 = vld [vmem:[#allocation6 + $0x7c8] ss:$16 sps:$4 sm:$0xff]   ;;  %v15687_v21 = vld [vmem:[#allocation6 + $0x5ac] ss:$16 sps:$4 sm:$0xff]  }
0x1462   :  { %11669 = vmatprep.subr.bf16.mxu0 %v15630_v34  ;;  %v15690_v34 = vld [vmem:[#allocation6 + $0x7ac] ss:$16 sps:$4 sm:$0xff]  }
0x1463   :  { %11579 = vmatmul.mubr.bf16.vlgmr.msra.gmra.mxu1 %v20745_v63  ;;  %v11334_v44 = vpop.f32.mrf.mxu1  ;;  %v15642_v63 = vld [vmem:[#allocation6 + $0x6ac] ss:$16 sps:$4 sm:$0xff]  }
0x1464   :  { %v11375_v29 = vpop.f32.mrf.mxu0  ;;  %11620 = vmatmul.mubr.bf16.vlgmr.msra.gmra.mxu0 %v20747_v27  ;;  %11629 = vmatpush1.bf16.msra.mxu1 %v15625_v19  ;;  %v15685_v19 = vld [vmem:[#allocation6 + $0x5a8] ss:$16 sps:$4 sm:$0xff]  }
0x1465   :  { %v20801_v26 = vadd.f32 %v11375_v29, %v11334_v44  ;;  %11660 = vmatprep.mubr.bf16.mxu1 %v20759_v46  ;;  %11670 = vmatpush1.bf16.msra.mxu0 %v15628_v33  ;;  %v11336_v12 = vpop.f32.mrf.mxu1  ;;  %v15640_v46 = vld [vmem:[#allocation6 + $0x6a8] ss:$16 sps:$4 sm:$0xff]   ;;  %v15696_v44 = vld [vmem:[#allocation6 + $0x78c] ss:$16 sps:$4 sm:$0xff]  }
0x1466   :  { %v11377_v59 = vpop.f32.mrf.mxu0  ;;  %11701 = vmatprep.mubr.bf16.mxu0 %v20763_v56  ;;  %11630 = vmatprep.subr.bf16.mxu1 %v15633_v53  ;;  %v15646_v56 = vld [vmem:[#allocation6 + $0x688] ss:$16 sps:$4 sm:$0xff]   ;;  %v15693_v53 = vld [vmem:[#allocation6 + $0x58c] ss:$16 sps:$4 sm:$0xff]  }
0x1467   :  { %v20805_v30 = vadd.f32 %v11377_v59, %v11336_v12  ;;  %11671 = vmatprep.subr.bf16.mxu0 %v15636_v24  ;;  %v11338_v39 = vpop.f32.mrf.mxu1  ;;  %v15688_v33 = vld [vmem:[#allocation6 + $0x7a8] ss:$16 sps:$4 sm:$0xff]   ;;  %v15702_v12 = vld [vmem:[#allocation6 + $0x76c] ss:$16 sps:$4 sm:$0xff]  }
0x1468   :  { %v11379_v27 = vpop.f32.mrf.mxu0  ;;  %11631 = vmatpush1.bf16.msra.mxu1 %v15631_v1  ;;  %v15691_v29 = vld [vmem:[#allocation6 + $0x588] ss:$16 sps:$4 sm:$0xff]   ;;  %v15699_v1 = vld [vmem:[#allocation6 + $0x56c] ss:$16 sps:$4 sm:$0xff]  }
0x1469   :  { %11672 = vmatpush1.bf16.msra.mxu0 %v15634_v40  ;;  %v11339_v8 = vpop.f32.mrf.mxu1  ;;  %11632 = vmatprep.subr.bf16.mxu1 %v15639_v16  ;;  %v15694_v24 = vld [vmem:[#allocation6 + $0x788] ss:$16 sps:$4 sm:$0xff]   ;;  %v15705_v16 = vld [vmem:[#allocation6 + $0x54c] ss:$16 sps:$4 sm:$0xff]  }
0x146a   :  { %v11380_v9 = vpop.f32.mrf.mxu0  ;;  %11673 = vmatprep.subr.bf16.mxu0 %v15642_v63  ;;  %v15697_v59 = vld [vmem:[#allocation6 + $0x568] ss:$16 sps:$4 sm:$0xff]   ;;  %v15708_v63 = vld [vmem:[#allocation6 + $0x74c] ss:$16 sps:$4 sm:$0xff]  }
0x146b   :  { %v15700_v40 = vld [vmem:[#allocation6 + $0x768] ss:$16 sps:$4 sm:$0xff]   ;;  %v15714_v8 = vld [vmem:[#allocation6 + $0x72c] ss:$16 sps:$4 sm:$0xff]  }
0x146c   :  { %11633 = vmatpush1.bf16.msra.mxu1 %v15637_v25  ;;  %v15703_v39 = vld [vmem:[#allocation6 + $0x548] ss:$16 sps:$4 sm:$0xff]   ;;  %v15711_v25 = vld [vmem:[#allocation6 + $0x52c] ss:$16 sps:$4 sm:$0xff]  }
0x146d   :  { %11674 = vmatpush1.bf16.msra.mxu0 %v15640_v46  ;;  %11634 = vmatprep.subr.bf16.mxu1 %v15645_v37  ;;  %v15706_v27 = vld [vmem:[#allocation6 + $0x748] ss:$16 sps:$4 sm:$0xff]   ;;  %v15717_v37 = vld [vmem:[#allocation6 + $0x50c] ss:$16 sps:$4 sm:$0xff]  }
0x146e   :  { %11675 = vmatprep.subr.bf16.mxu0 %v15648_v41  ;;  %v15709_v9 = vld [vmem:[#allocation6 + $0x528] ss:$16 sps:$4 sm:$0xff]   ;;  %v15720_v41 = vld [vmem:[#allocation6 + $0x70c] ss:$16 sps:$4 sm:$0xff]  }
0x146f   :  { %v15712_v46 = vld [vmem:[#allocation6 + $0x728] ss:$16 sps:$4 sm:$0xff]  }
0x1470   :  { %11635 = vmatpush1.bf16.msra.mxu1 %v15643_v51  ;;  %v15715_v51 = vld [vmem:[#allocation6 + $0x508] ss:$16 sps:$4 sm:$0xff]  }
0x1471   :  { %11676 = vmatpush1.bf16.msra.mxu0 %v15646_v56  ;;  %11636 = vmatprep.subr.bf16.mxu1 %v15651_v52  ;;  %v15718_v56 = vld [vmem:[#allocation6 + $0x708] ss:$16 sps:$4 sm:$0xff]   ;;  %v15723_v52 = vld [vmem:[#allocation6 + $0x8ec] ss:$16 sps:$4 sm:$0xff]  }
0x1472   :  { %11677 = vmatprep.subr.bf16.mxu0 %v15654_v4  ;;  %v15726_v4 = vld [vmem:[#allocation6 + $0xaec] ss:$16 sps:$4 sm:$0xff]  }
0x1474   :  { %11637 = vmatpush1.bf16.msra.mxu1 %v15649_v50  ;;  %v15721_v50 = vld [vmem:[#allocation6 + $0x8e8] ss:$16 sps:$4 sm:$0xff]  }
0x1475   :  { %11678 = vmatpush1.bf16.msra.mxu0 %v15652_v17  ;;  %11638 = vmatprep.subr.bf16.mxu1 %v15657_v35  ;;  %v15724_v17 = vld [vmem:[#allocation6 + $0xae8] ss:$16 sps:$4 sm:$0xff]   ;;  %v15729_v35 = vld [vmem:[#allocation6 + $0x8cc] ss:$16 sps:$4 sm:$0xff]  }
0x1476   :  { %11679 = vmatprep.subr.bf16.mxu0 %v15660_v36 }
0x1478   :  { %11639 = vmatpush1.bf16.msra.mxu1 %v15655_v32 }
0x1479   :  { %11680 = vmatpush1.bf16.msra.mxu0 %v15658_v13  ;;  %11640 = vmatprep.subr.bf16.mxu1 %v15663_v49  ;;  %v15732_v13 = vld [vmem:[#allocation6 + $0xacc] ss:$16 sps:$4 sm:$0xff]  }
0x147a   :  { %11681 = vmatprep.subr.bf16.mxu0 %v15666_v57  ;;  %v15727_v57 = vld [vmem:[#allocation6 + $0x8c8] ss:$16 sps:$4 sm:$0xff]  }
0x147c   :  { %11641 = vmatpush1.bf16.msra.mxu1 %v15661_v22 }
0x147d   :  { %11682 = vmatpush1.bf16.msra.mxu0 %v15664_v38  ;;  %11642 = vmatprep.subr.bf16.mxu1 %v15669_v48  ;;  %v15730_v48 = vld [vmem:[#allocation6 + $0xac8] ss:$16 sps:$4 sm:$0xff]  }
0x147e   :  { %11683 = vmatprep.subr.bf16.mxu0 %v15672_v20  ;;  %v15735_v20 = vld [vmem:[#allocation6 + $0x8ac] ss:$16 sps:$4 sm:$0xff]  }
0x1480   :  { %11643 = vmatpush1.bf16.msra.mxu1 %v15667_v31 }
0x1481   :  { %11684 = vmatpush1.bf16.msra.mxu0 %v15670_v47  ;;  %11644 = vmatprep.subr.bf16.mxu1 %v15675_v5  ;;  %v15738_v47 = vld [vmem:[#allocation6 + $0xaac] ss:$16 sps:$4 sm:$0xff]  }
0x1482   :  { %11685 = vmatprep.subr.bf16.mxu0 %v15678_v45 }
0x1484   :  { %11645 = vmatpush2.bf16.msra.mxu1 %v15673_v61 }
0x1485   :  { %11686 = vmatpush2.bf16.msra.mxu0 %v15676_v54  ;;  %11646 = vmatprep.subr.bf16.mxu1 %v15681_v58  ;;  %v15736_v54 = vld [vmem:[#allocation6 + $0xaa8] ss:$16 sps:$4 sm:$0xff]   ;;  %v15741_v58 = vld [vmem:[#allocation6 + $0x88c] ss:$16 sps:$4 sm:$0xff]  }
0x1486   :  { %11687 = vmatprep.subr.bf16.mxu0 %v15684_v6  ;;  %v15744_v6 = vld [vmem:[#allocation6 + $0xa8c] ss:$16 sps:$4 sm:$0xff]  }
0x1488   :  { %11647 = vmatpush2.bf16.msra.mxu1 %v15679_v60  ;;  %v15747_v60 = vld [vmem:[#allocation6 + $0x86c] ss:$16 sps:$4 sm:$0xff]  }
0x1489   :  { %11688 = vmatpush2.bf16.msra.mxu0 %v15682_v2  ;;  %11648 = vmatprep.subr.bf16.mxu1 %v15687_v21  ;;  %v15750_v2 = vld [vmem:[#allocation6 + $0xa6c] ss:$16 sps:$4 sm:$0xff]   ;;  %v15745_v21 = vld [vmem:[#allocation6 + $0x868] ss:$16 sps:$4 sm:$0xff]  }
0x148a   :  { %11689 = vmatprep.subr.bf16.mxu0 %v15690_v34  ;;  %v15748_v34 = vld [vmem:[#allocation6 + $0xa68] ss:$16 sps:$4 sm:$0xff]  }
0x148c   :  { %11649 = vmatpush2.bf16.msra.mxu1 %v15685_v19  ;;  %v15753_v19 = vld [vmem:[#allocation6 + $0x84c] ss:$16 sps:$4 sm:$0xff]  }
0x148d   :  { %11690 = vmatpush2.bf16.msra.mxu0 %v15688_v33  ;;  %11650 = vmatprep.subr.bf16.mxu1 %v15693_v53  ;;  %v15756_v33 = vld [vmem:[#allocation6 + $0xa4c] ss:$16 sps:$4 sm:$0xff]   ;;  %v15751_v53 = vld [vmem:[#allocation6 + $0x848] ss:$16 sps:$4 sm:$0xff]  }
0x148e   :  { %11691 = vmatprep.subr.bf16.mxu0 %v15696_v44  ;;  %v15754_v44 = vld [vmem:[#allocation6 + $0xa48] ss:$16 sps:$4 sm:$0xff]  }
0x1490   :  { %11651 = vmatpush2.bf16.msra.mxu1 %v15691_v29  ;;  %v15759_v29 = vld [vmem:[#allocation6 + $0x82c] ss:$16 sps:$4 sm:$0xff]  }
0x1491   :  { %11692 = vmatpush2.bf16.msra.mxu0 %v15694_v24  ;;  %11652 = vmatprep.subr.bf16.mxu1 %v15699_v1  ;;  %v15762_v24 = vld [vmem:[#allocation6 + $0xa2c] ss:$16 sps:$4 sm:$0xff]   ;;  %v15757_v1 = vld [vmem:[#allocation6 + $0x828] ss:$16 sps:$4 sm:$0xff]  }
0x1492   :  { %11693 = vmatprep.subr.bf16.mxu0 %v15702_v12  ;;  %v15760_v12 = vld [vmem:[#allocation6 + $0xa28] ss:$16 sps:$4 sm:$0xff]  }
0x1494   :  { %11653 = vmatpush2.bf16.msra.mxu1 %v15697_v59  ;;  %v15765_v59 = vld [vmem:[#allocation6 + $0x80c] ss:$16 sps:$4 sm:$0xff]  }
0x1495   :  { %11694 = vmatpush2.bf16.msra.mxu0 %v15700_v40  ;;  %11654 = vmatprep.subr.bf16.mxu1 %v15705_v16  ;;  %v15768_v40 = vld [vmem:[#allocation6 + $0xa0c] ss:$16 sps:$4 sm:$0xff]   ;;  %v15763_v16 = vld [vmem:[#allocation6 + $0x808] ss:$16 sps:$4 sm:$0xff]  }
0x1496   :  { %11695 = vmatprep.subr.bf16.mxu0 %v15708_v63  ;;  %v15766_v63 = vld [vmem:[#allocation6 + $0xa08] ss:$16 sps:$4 sm:$0xff]  }
0x1498   :  { %11655 = vmatpush2.bf16.msra.mxu1 %v15703_v39  ;;  %v15771_v39 = vld [vmem:[#allocation6 + $0x9ec] ss:$16 sps:$4 sm:$0xff]  }
0x1499   :  { %11696 = vmatpush2.bf16.msra.mxu0 %v15706_v27  ;;  %11656 = vmatprep.subr.bf16.mxu1 %v15711_v25  ;;  %v15774_v27 = vld [vmem:[#allocation6 + $0xbec] ss:$16 sps:$4 sm:$0xff]   ;;  %v15769_v25 = vld [vmem:[#allocation6 + $0x9e8] ss:$16 sps:$4 sm:$0xff]  }
0x149a   :  { %11697 = vmatprep.subr.bf16.mxu0 %v15714_v8  ;;  %v15772_v8 = vld [vmem:[#allocation6 + $0xbe8] ss:$16 sps:$4 sm:$0xff]  }
0x149c   :  { %11657 = vmatpush2.bf16.msra.mxu1 %v15709_v9  ;;  %v15777_v9 = vld [vmem:[#allocation6 + $0x9cc] ss:$16 sps:$4 sm:$0xff]  }
0x149d   :  { %11698 = vmatpush2.bf16.msra.mxu0 %v15712_v46  ;;  %11658 = vmatprep.subr.bf16.mxu1 %v15717_v37  ;;  %v15780_v46 = vld [vmem:[#allocation6 + $0xbcc] ss:$16 sps:$4 sm:$0xff]   ;;  %v15775_v37 = vld [vmem:[#allocation6 + $0x9c8] ss:$16 sps:$4 sm:$0xff]  }
0x149e   :  { %11699 = vmatprep.subr.bf16.mxu0 %v15720_v41  ;;  %v15778_v41 = vld [vmem:[#allocation6 + $0xbc8] ss:$16 sps:$4 sm:$0xff]  }
0x14a0   :  { %11659 = vmatpush2.bf16.msra.mxu1 %v15715_v51  ;;  %v15783_v51 = vld [vmem:[#allocation6 + $0x9ac] ss:$16 sps:$4 sm:$0xff]  }
0x14a1   :  { %11700 = vmatpush2.bf16.msra.mxu0 %v15718_v56  ;;  %11710 = vmatprep.subr.bf16.mxu1 %v15723_v52  ;;  %v15786_v56 = vld [vmem:[#allocation6 + $0xbac] ss:$16 sps:$4 sm:$0xff]   ;;  %v15781_v52 = vld [vmem:[#allocation6 + $0x9a8] ss:$16 sps:$4 sm:$0xff]  }
0x14a2   :  { %11751 = vmatprep.subr.bf16.mxu0 %v15726_v4  ;;  %v15784_v4 = vld [vmem:[#allocation6 + $0xba8] ss:$16 sps:$4 sm:$0xff]  }
0x14a3   :  { %v11416_v36 = vpop.f32.mrf.mxu1  ;;  %11661 = vmatmul.mubr.bf16.vlgmr.msra.gmra.mxu1 %v20773_v10 }
0x14a4   :  { %v11457_v32 = vpop.f32.mrf.mxu0  ;;  %v11417_v49 = vadd.f32 %v11416_v36, %v20801_v26  ;;  %11702 = vmatmul.mubr.bf16.vlgmr.msra.gmra.mxu0 %v20777_v3  ;;  %11711 = vmatpush1.bf16.msra.mxu1 %v15721_v50  ;;  %v15789_v50 = vld [vmem:[#allocation6 + $0x98c] ss:$16 sps:$4 sm:$0xff]   ;;  %v15790_v36 = vld [vmem:[#allocation6 + $0xb88] ss:$16 sps:$4 sm:$0xff]  }
0x14a5   :  { %11742 = vmatprep.mubr.bf16.mxu1 %v20779_v43  ;;  %11752 = vmatpush1.bf16.msra.mxu0 %v15724_v17  ;;  %v11418_v22 = vpop.f32.mrf.mxu1  ;;  %v15733_v43 = vld [vmem:[#allocation6 + $0x8a8] ss:$16 sps:$4 sm:$0xff]   ;;  %v15792_v17 = vld [vmem:[#allocation6 + $0xb8c] ss:$16 sps:$4 sm:$0xff]  }
0x14a6   :  { %v11459_v38 = vpop.f32.mrf.mxu0  ;;  %v20811_v31 = vadd.f32 %v11457_v32, %v11417_v49  ;;  %11783 = vmatprep.mubr.bf16.mxu0 %v20783_v7  ;;  %v11419_v10 = vadd.f32 %v11418_v22, %v20805_v30  ;;  %11712 = vmatprep.subr.bf16.mxu1 %v15729_v35  ;;  %v15739_v7 = vld [vmem:[#allocation6 + $0x888] ss:$16 sps:$4 sm:$0xff]   ;;  %v15795_v32 = vld [vmem:[#allocation6 + $0x96c] ss:$16 sps:$4 sm:$0xff]  }
0x14a7   :  { %v11420_v26 = vpop.f32.mrf.mxu1  ;;  %11753 = vmatprep.subr.bf16.mxu0 %v15732_v13  ;;  %v15742_v30 = vld [vmem:[#allocation6 + $0xa88] ss:$16 sps:$4 sm:$0xff]   ;;  %v15798_v13 = vld [vmem:[#allocation6 + $0xb6c] ss:$16 sps:$4 sm:$0xff]  }
0x14a8   :  { %v11461_v5 = vpop.f32.mrf.mxu0  ;;  %v20815_v3 = vadd.f32 %v11459_v38, %v11419_v10  ;;  %11713 = vmatpush1.bf16.msra.mxu1 %v15727_v57  ;;  %v15787_v35 = vld [vmem:[#allocation6 + $0x988] ss:$16 sps:$4 sm:$0xff]   ;;  %v15801_v22 = vld [vmem:[#allocation6 + $0x94c] ss:$16 sps:$4 sm:$0xff]  }
0x14a9   :  { %11754 = vmatpush1.bf16.msra.mxu0 %v15730_v48  ;;  %v11421_v45 = vpop.f32.mrf.mxu1  ;;  %11714 = vmatprep.subr.bf16.mxu1 %v15735_v20  ;;  %v15793_v49 = vld [vmem:[#allocation6 + $0x968] ss:$16 sps:$4 sm:$0xff]   ;;  %v15804_v38 = vld [vmem:[#allocation6 + $0xb4c] ss:$16 sps:$4 sm:$0xff]  }
0x14aa   :  { %v11462_v61 = vpop.f32.mrf.mxu0  ;;  %11755 = vmatprep.subr.bf16.mxu0 %v15738_v47  ;;  %v15796_v57 = vld [vmem:[#allocation6 + $0xb68] ss:$16 sps:$4 sm:$0xff]   ;;  %v15807_v10 = vld [vmem:[#allocation6 + $0x92c] ss:$16 sps:$4 sm:$0xff]  }
0x14ab   :  { %v15799_v48 = vld [vmem:[#allocation6 + $0x948] ss:$16 sps:$4 sm:$0xff]   ;;  %v15810_v47 = vld [vmem:[#allocation6 + $0xb2c] ss:$16 sps:$4 sm:$0xff]  }
0x14ac   :  { %11715 = vmatpush1.bf16.msra.mxu1 %v15733_v43  ;;  %v15802_v20 = vld [vmem:[#allocation6 + $0xb48] ss:$16 sps:$4 sm:$0xff]   ;;  %v15813_v43 = vld [vmem:[#allocation6 + $0x90c] ss:$16 sps:$4 sm:$0xff]  }
0x14ad   :  { %11756 = vmatpush1.bf16.msra.mxu0 %v15736_v54  ;;  %11716 = vmatprep.subr.bf16.mxu1 %v15741_v58  ;;  %v15805_v26 = vld [vmem:[#allocation6 + $0x928] ss:$16 sps:$4 sm:$0xff]   ;;  %v15816_v45 = vld [vmem:[#allocation6 + $0xb0c] ss:$16 sps:$4 sm:$0xff]   ;;  %v15819_v58 = vld [vmem:[#allocation7 + $0xe4] ss:$16 sps:$4 sm:$0xff]  }
0x14ae   :  { %11757 = vmatprep.subr.bf16.mxu0 %v15744_v6  ;;  %v15808_v5 = vld [vmem:[#allocation6 + $0xb28] ss:$16 sps:$4 sm:$0xff]   ;;  %v15822_v6 = vld [vmem:[#allocation7 + $0xec] ss:$16 sps:$4 sm:$0xff]  }
0x14af   :  { %v15811_v61 = vld [vmem:[#allocation6 + $0x908] ss:$16 sps:$4 sm:$0xff]  }
0x14b0   :  { %11717 = vmatpush1.bf16.msra.mxu1 %v15739_v7  ;;  %v15814_v54 = vld [vmem:[#allocation6 + $0xb08] ss:$16 sps:$4 sm:$0xff]   ;;  %v15817_v7 = vld [vmem:[#allocation7 + $0xe0] ss:$16 sps:$4 sm:$0xff]  }
0x14b1   :  { %11758 = vmatpush1.bf16.msra.mxu0 %v15742_v30  ;;  %11718 = vmatprep.subr.bf16.mxu1 %v15747_v60  ;;  %v15820_v30 = vld [vmem:[#allocation7 + $0xe8] ss:$16 sps:$4 sm:$0xff]   ;;  %v15825_v60 = vld [vmem:[#allocation7 + $0xc4] ss:$16 sps:$4 sm:$0xff]  }
0x14b2   :  { %11759 = vmatprep.subr.bf16.mxu0 %v15750_v2 }
0x14b4   :  { %11719 = vmatpush1.bf16.msra.mxu1 %v15745_v21  ;;  %v15828_v21 = vld [vmem:[#allocation7 + $0xcc] ss:$16 sps:$4 sm:$0xff]  }
0x14b5   :  { %11760 = vmatpush1.bf16.msra.mxu0 %v15748_v34  ;;  %11720 = vmatprep.subr.bf16.mxu1 %v15753_v19 }
0x14b6   :  { %11761 = vmatprep.subr.bf16.mxu0 %v15756_v33  ;;  %v15823_v33 = vld [vmem:[#allocation7 + $0xc0] ss:$16 sps:$4 sm:$0xff]  }
0x14b8   :  { %11721 = vmatpush1.bf16.msra.mxu1 %v15751_v53 }
0x14b9   :  { %11762 = vmatpush1.bf16.msra.mxu0 %v15754_v44  ;;  %11722 = vmatprep.subr.bf16.mxu1 %v15759_v29  ;;  %v15826_v44 = vld [vmem:[#allocation7 + $0xc8] ss:$16 sps:$4 sm:$0xff]   ;;  %v15831_v29 = vld [vmem:[#allocation7 + $0xa4] ss:$16 sps:$4 sm:$0xff]  }
0x14ba   :  { %11763 = vmatprep.subr.bf16.mxu0 %v15762_v24 }
0x14bc   :  { %11723 = vmatpush1.bf16.msra.mxu1 %v15757_v1 }
0x14bd   :  { %11764 = vmatpush1.bf16.msra.mxu0 %v15760_v12  ;;  %11724 = vmatprep.subr.bf16.mxu1 %v15765_v59 }
0x14be   :  { %11765 = vmatprep.subr.bf16.mxu0 %v15768_v40 }
0x14c0   :  { %11725 = vmatpush1.bf16.msra.mxu1 %v15763_v16 }
0x14c1   :  { %11766 = vmatpush1.bf16.msra.mxu0 %v15766_v63  ;;  %11726 = vmatprep.subr.bf16.mxu1 %v15771_v39  ;;  %v15829_v63 = vld [vmem:[#allocation7 + $0xa0] ss:$16 sps:$4 sm:$0xff]  }
0x14c2   :  { %11767 = vmatprep.subr.bf16.mxu0 %v15774_v27 }
0x14c4   :  { %11727 = vmatpush2.bf16.msra.mxu1 %v15769_v25 }
0x14c5   :  { %11768 = vmatpush2.bf16.msra.mxu0 %v15772_v8  ;;  %11728 = vmatprep.subr.bf16.mxu1 %v15777_v9 }
0x14c6   :  { %11769 = vmatprep.subr.bf16.mxu0 %v15780_v46 }
0x14c8   :  { %11729 = vmatpush2.bf16.msra.mxu1 %v15775_v37  ;;  %v15840_v37 = vld [vmem:[#allocation7 + $0x8c] ss:$16 sps:$4 sm:$0xff]  }
0x14c9   :  { %11770 = vmatpush2.bf16.msra.mxu0 %v15778_v41  ;;  %11730 = vmatprep.subr.bf16.mxu1 %v15783_v51 }
0x14ca   :  { %11771 = vmatprep.subr.bf16.mxu0 %v15786_v56 }
0x14cc   :  { %11731 = vmatpush2.bf16.msra.mxu1 %v15781_v52 }
0x14cd   :  { %11772 = vmatpush2.bf16.msra.mxu0 %v15784_v4  ;;  %11732 = vmatprep.subr.bf16.mxu1 %v15789_v50  ;;  %v15835_v4 = vld [vmem:[#allocation7 + $0x80] ss:$16 sps:$4 sm:$0xff]   ;;  %v15838_v50 = vld [vmem:[#allocation7 + $0x88] ss:$16 sps:$4 sm:$0xff]  }
0x14ce   :  { %11773 = vmatprep.subr.bf16.mxu0 %v15792_v17  ;;  %v15843_v17 = vld [vmem:[#allocation7 + $0x64] ss:$16 sps:$4 sm:$0xff]  }
0x14d0   :  { %11733 = vmatpush2.bf16.msra.mxu1 %v15787_v35 }
0x14d1   :  { %11774 = vmatpush2.bf16.msra.mxu0 %v15790_v36  ;;  %11734 = vmatprep.subr.bf16.mxu1 %v15795_v32 }
0x14d2   :  { %11775 = vmatprep.subr.bf16.mxu0 %v15798_v13 }
0x14d4   :  { %11735 = vmatpush2.bf16.msra.mxu1 %v15793_v49  ;;  %v15846_v49 = vld [vmem:[#allocation7 + $0x6c] ss:$16 sps:$4 sm:$0xff]  }
0x14d5   :  { %11776 = vmatpush2.bf16.msra.mxu0 %v15796_v57  ;;  %11736 = vmatprep.subr.bf16.mxu1 %v15801_v22 }
0x14d6   :  { %11777 = vmatprep.subr.bf16.mxu0 %v15804_v38 }
0x14d8   :  { %11737 = vmatpush2.bf16.msra.mxu1 %v15799_v48 }
0x14d9   :  { %11778 = vmatpush2.bf16.msra.mxu0 %v15802_v20  ;;  %11738 = vmatprep.subr.bf16.mxu1 %v15807_v10  ;;  %v15841_v20 = vld [vmem:[#allocation7 + $0x60] ss:$16 sps:$4 sm:$0xff]   ;;  %v15844_v10 = vld [vmem:[#allocation7 + $0x68] ss:$16 sps:$4 sm:$0xff]  }
0x14da   :  { %11779 = vmatprep.subr.bf16.mxu0 %v15810_v47  ;;  %v15849_v47 = vld [vmem:[#allocation7 + $0x44] ss:$16 sps:$4 sm:$0xff]  }
0x14dc   :  { %11739 = vmatpush2.bf16.msra.mxu1 %v15805_v26 }
0x14dd   :  { %11780 = vmatpush2.bf16.msra.mxu0 %v15808_v5  ;;  %11740 = vmatprep.subr.bf16.mxu1 %v15813_v43 }
0x14de   :  { %11781 = vmatprep.subr.bf16.mxu0 %v15816_v45 }
0x14e0   :  { %11741 = vmatpush2.bf16.msra.mxu1 %v15811_v61  ;;  %v15852_v61 = vld [vmem:[#allocation7 + $0x4c] ss:$16 sps:$4 sm:$0xff]  }
0x14e1   :  { %11782 = vmatpush2.bf16.msra.mxu0 %v15814_v54  ;;  %12306 = vmatprep.subr.bf16.mxu1 %v15819_v58 }
0x14e2   :  { %12347 = vmatprep.subr.bf16.mxu0 %v15822_v6 }
0x14e3   :  { %v11498_v2 = vpop.f32.mrf.mxu1  ;;  %11743 = vmatmul.mubr.bf16.vlgmr.msra.gmra.mxu1 %v20789_v23 }
0x14e4   :  { %v11499_v34 = vadd.f32 %v11498_v2, %v20811_v31  ;;  %v11539_v19 = vpop.f32.mrf.mxu0  ;;  %11784 = vmatmul.mubr.bf16.vlgmr.msra.gmra.mxu0 %v20793_v42  ;;  %12307 = vmatpush1.bf16.msra.mxu1 %v15817_v7  ;;  %v15834_v31 = vld [vmem:[#allocation7 + $0xac] ss:$16 sps:$4 sm:$0xff]   ;;  %v15855_v2 = vld [vmem:[#allocation7 + $0x24] ss:$16 sps:$4 sm:$0xff]  }
0x14e5   :  { %12338 = vmatprep.mubr.bf16.mxu1 %v20391_v62  ;;  %12348 = vmatpush1.bf16.msra.mxu0 %v15820_v30  ;;  %v11500_v53 = vpop.f32.mrf.mxu1  ;;  %v15847_v30 = vld [vmem:[#allocation7 + $0x40] ss:$16 sps:$4 sm:$0xff]  }
0x14e6   :  { %v20821_v24 = vadd.f32 %v11539_v19, %v11499_v34  ;;  %12379 = vmatprep.mubr.bf16.mxu0 %v20391_v62  ;;  %v11501_v23 = vadd.f32 %v11500_v53, %v20815_v3  ;;  %v11541_v1 = vpop.f32.mrf.mxu0  ;;  %12308 = vmatprep.subr.bf16.mxu1 %v15825_v60  ;;  %v15832_v62 = vld [vmem:[#allocation7 + $0xa8] ss:$16 sps:$4 sm:$0xff]   ;;  %v15837_v3 = vld [vmem:[#allocation7 + $0x84] ss:$16 sps:$4 sm:$0xff]   ;;  %v15858_v53 = vld [vmem:[#allocation7 + $0x2c] ss:$16 sps:$4 sm:$0xff]  }
0x14e7   :  { %v11502_v12 = vpop.f32.mrf.mxu1  ;;  %12349 = vmatprep.subr.bf16.mxu0 %v15828_v21  ;;  %v15850_v60 = vld [vmem:[#allocation7 + $0x48] ss:$16 sps:$4 sm:$0xff]  }
0x14e8   :  { %v11792_v42 = vrot.slane %v20821_v24, 4  ;;  %v11820_v59 = vmul.f32 %v20821_v24, %v20821_v24  ;;  %v20828_v40 = vadd.f32 %v11541_v1, %v11501_v23  ;;  %v11543_v16 = vpop.f32.mrf.mxu0  ;;  %12309 = vmatpush1.bf16.msra.mxu1 %v15823_v33  ;;  %v15853_v1 = vld [vmem:[#allocation7 + $0x20] ss:$16 sps:$4 sm:$0xff]   ;;  %v15861_v12 = vld [vmem:[#allocation7 + $0x4] ss:$16 sps:$4 sm:$0xff]  }
0x14e9   :  { %12350 = vmatpush1.bf16.msra.mxu0 %v15826_v44  ;;  %v11503_v39 = vpop.f32.mrf.mxu1  ;;  %12310 = vmatprep.subr.bf16.mxu1 %v15831_v29  ;;  %v15864_v16 = vld [vmem:[#allocation7 + $0xc] ss:$16 sps:$4 sm:$0xff]  }
0x14ea   :  { %v11793_v27 = vadd.f32 %v11792_v42, %v20821_v24  ;;  %v11824_v25 = vrot.slane %v11820_v59, 4  ;;  %v11798_v8 = vrot.slane %v20828_v40, 4  ;;  %v11821_v9 = vmul.f32 %v20828_v40, %v20828_v40  ;;  %v11544_v46 = vpop.f32.mrf.mxu0  ;;  %12351 = vmatprep.subr.bf16.mxu0 %v15834_v31  ;;  %v15856_v31 = vld [vmem:[#allocation7 + $0x28] ss:$16 sps:$4 sm:$0xff]  }
0x14eb   :  { %v15868_v46 = vld [vmem:[#allocation7 + $0x1e8] ss:$16 sps:$4 sm:$0xff]  }
0x14ec   :  { %v11794_v41 = vrot.slane %v11793_v27, 2  ;;  %v11825_v51 = vadd.f32 %v11824_v25, %v11820_v59  ;;  %v11799_v56 = vadd.f32 %v11798_v8, %v20828_v40  ;;  %v11830_v52 = vrot.slane %v11821_v9, 4  ;;  %12311 = vmatpush1.bf16.msra.mxu1 %v15829_v63  ;;  %v15870_v8 = vld [vmem:[#allocation7 + $0x1ec] ss:$16 sps:$4 sm:$0xff]  }
0x14ed   :  { %12352 = vmatpush1.bf16.msra.mxu0 %v15832_v62  ;;  %12312 = vmatprep.subr.bf16.mxu1 %v15837_v3  ;;  %v15859_v62 = vld [vmem:[#allocation7] ss:$16 sps:$4 sm:$0xff]   ;;  %v15862_v3 = vld [vmem:[#allocation7 + $0x8] ss:$16 sps:$4 sm:$0xff]  }
0x14ee   :  { %v11795_v35 = vadd.f32 %v11794_v41, %v11793_v27  ;;  %v11826_v36 = vrot.slane %v11825_v51, 2  ;;  %v11800_v32 = vrot.slane %v11799_v56, 2  ;;  %v11831_v13 = vadd.f32 %v11830_v52, %v11821_v9  ;;  %12353 = vmatprep.subr.bf16.mxu0 %v15840_v37  ;;  %v15867_v27 = vld [vmem:[#allocation7 + $0x1e4] ss:$16 sps:$4 sm:$0xff]   ;;  %v15865_v9 = vld [vmem:[#allocation7 + $0x1e0] ss:$16 sps:$4 sm:$0xff]  }
0x14ef   :  { %v15873_v37 = vld [vmem:[#allocation7 + $0x1c4] ss:$16 sps:$4 sm:$0xff]   ;;  %v15876_v41 = vld [vmem:[#allocation7 + $0x1cc] ss:$16 sps:$4 sm:$0xff]  }
0x14f0   :  { %v11796_v57 = vrot.slane %v11795_v35, 1  ;;  %v11827_v22 = vadd.f32 %v11826_v36, %v11825_v51  ;;  %v11801_v38 = vadd.f32 %v11800_v32, %v11799_v56  ;;  %v11832_v48 = vrot.slane %v11831_v13, 2  ;;  %12313 = vmatpush1.bf16.msra.mxu1 %v15835_v4  ;;  %v15871_v51 = vld [vmem:[#allocation7 + $0x1c0] ss:$16 sps:$4 sm:$0xff]   ;;  %v15874_v56 = vld [vmem:[#allocation7 + $0x1c8] ss:$16 sps:$4 sm:$0xff]  }
0x14f1   :  { %12354 = vmatpush1.bf16.msra.mxu0 %v15838_v50  ;;  %12314 = vmatprep.subr.bf16.mxu1 %v15843_v17  ;;  %v15879_v52 = vld [vmem:[#allocation7 + $0x1a4] ss:$16 sps:$4 sm:$0xff]   ;;  %v15882_v4 = vld [vmem:[#allocation7 + $0x1ac] ss:$16 sps:$4 sm:$0xff]   ;;  %v15877_v50 = vld [vmem:[#allocation7 + $0x1a0] ss:$16 sps:$4 sm:$0xff]  }
0x14f2   :  { %v11797_v26 = vadd.f32 %v11796_v57, %v11795_v35  ;;  %v11828_v5 = vrot.slane %v11827_v22, 1  ;;  %v11802_v43 = vrot.slane %v11801_v38, 1  ;;  %v11833_v45 = vadd.f32 %v11832_v48, %v11831_v13  ;;  %12355 = vmatprep.subr.bf16.mxu0 %v15846_v49  ;;  %v15880_v17 = vld [vmem:[#allocation7 + $0x1a8] ss:$16 sps:$4 sm:$0xff]   ;;  %v15885_v35 = vld [vmem:[#allocation7 + $0x184] ss:$16 sps:$4 sm:$0xff]  }
0x14f3   :  { %v15888_v36 = vld [vmem:[#allocation7 + $0x18c] ss:$16 sps:$4 sm:$0xff]   ;;  %v15883_v13 = vld [vmem:[#allocation7 + $0x180] ss:$16 sps:$4 sm:$0xff]   ;;  %v15886_v57 = vld [vmem:[#allocation7 + $0x188] ss:$16 sps:$4 sm:$0xff]  }
0x14f4   :  { %v20835_v54 = vmul.f32 0.125, %v11797_v26  ;;  %v11829_v58 = vadd.f32 %v11828_v5, %v11827_v22  ;;  %v11803_v6 = vadd.f32 %v11802_v43, %v11801_v38  ;;  %v11834_v7 = vrot.slane %v11833_v45, 1  ;;  %12315 = vmatpush1.bf16.msra.mxu1 %v15841_v20  ;;  %v15891_v22 = vld [vmem:[#allocation7 + $0x164] ss:$16 sps:$4 sm:$0xff]   ;;  %v15894_v38 = vld [vmem:[#allocation7 + $0x16c] ss:$16 sps:$4 sm:$0xff]  }
0x14f5   :  { %12356 = vmatpush1.bf16.msra.mxu0 %v15844_v10  ;;  %12316 = vmatprep.subr.bf16.mxu1 %v15849_v47  ;;  %v15889_v20 = vld [vmem:[#allocation7 + $0x160] ss:$16 sps:$4 sm:$0xff]   ;;  %v15892_v10 = vld [vmem:[#allocation7 + $0x168] ss:$16 sps:$4 sm:$0xff]   ;;  %v15897_v47 = vld [vmem:[#allocation7 + $0x144] ss:$16 sps:$4 sm:$0xff]  }
0x14f6   :  { %v11848_v21 = vmul.f32 0.125, %v11829_v58  ;;  %v11852_v34 = vmul.f32 %v20835_v54, %v20835_v54  ;;  %v20839_v19 = vmul.f32 0.125, %v11803_v6  ;;  %v11835_v33 = vadd.f32 %v11834_v7, %v11833_v45  ;;  %12357 = vmatprep.subr.bf16.mxu0 %v15852_v61  ;;  %v15900_v26 = vld [vmem:[#allocation7 + $0x14c] ss:$16 sps:$4 sm:$0xff]   ;;  %v15895_v5 = vld [vmem:[#allocation7 + $0x140] ss:$16 sps:$4 sm:$0xff]  }
0x14f7   :  { %v15898_v43 = vld [vmem:[#allocation7 + $0x148] ss:$16 sps:$4 sm:$0xff]   ;;  %v15903_v45 = vld [vmem:[#allocation7 + $0x124] ss:$16 sps:$4 sm:$0xff]   ;;  %v15906_v61 = vld [vmem:[#allocation7 + $0x12c] ss:$16 sps:$4 sm:$0xff]  }
0x14f8   :  { %v11856_v44 = vsub.f32 %v11848_v21, %v11852_v34  ;;  %v11849_v29 = vmul.f32 0.125, %v11835_v33  ;;  %v11853_v23 = vmul.f32 %v20839_v19, %v20839_v19  ;;  %12317 = vmatpush1.bf16.msra.mxu1 %v15847_v30  ;;  %v15901_v58 = vld [vmem:[#allocation7 + $0x120] ss:$16 sps:$4 sm:$0xff]   ;;  %v15904_v6 = vld [vmem:[#allocation7 + $0x128] ss:$16 sps:$4 sm:$0xff]  }
0x14f9   :  { %12358 = vmatpush1.bf16.msra.mxu0 %v15850_v60  ;;  %12318 = vmatprep.subr.bf16.mxu1 %v15855_v2  ;;  %v15909_v7 = vld [vmem:[#allocation7 + $0x104] ss:$16 sps:$4 sm:$0xff]   ;;  %v15912_v30 = vld [vmem:[#allocation7 + $0x10c] ss:$16 sps:$4 sm:$0xff]   ;;  %v15907_v60 = vld [vmem:[#allocation7 + $0x100] ss:$16 sps:$4 sm:$0xff]  }
0x14fa   :  { %v11860_v42 = vmax.f32 %v11856_v44, 0.0  ;;  %v11857_v59 = vsub.f32 %v11849_v29, %v11853_v23  ;;  %12359 = vmatprep.subr.bf16.mxu0 %v15858_v53  ;;  %v15910_v2 = vld [vmem:[#allocation7 + $0x108] ss:$16 sps:$4 sm:$0xff]  }
0x14fc   :  { %v11864_v63 = vadd.f32 1e-05, %v11860_v42  ;;  %v11861_v39 = vmax.f32 %v11857_v59, 0.0  ;;  %12319 = vmatpush1.bf16.msra.mxu1 %v15853_v1 }
0x14fd   :  { %12360 = vmatpush1.bf16.msra.mxu0 %v15856_v31  ;;  %12320 = vmatprep.subr.bf16.mxu1 %v15861_v12 }
0x14fe   :  { %v11865_v25 = vadd.f32 1e-05, %v11861_v39  ;;  %12361 = vmatprep.subr.bf16.mxu0 %v15864_v16  ;;  %15953 = vrsqrt.f32 %v11864_v63 }
0x1500   :  { %15955 = vrsqrt.f32 %v11865_v25  ;;  %12321 = vmatpush1.bf16.msra.mxu1 %v15859_v62 }
0x1501   :  { %12362 = vmatpush1.bf16.msra.mxu0 %v15862_v3  ;;  %12322 = vmatprep.subr.bf16.mxu1 %v15867_v27 }
0x1502   :  { %12363 = vmatprep.subr.bf16.mxu0 %v15870_v8 }
0x1504   :  { %12323 = vmatpush2.bf16.msra.mxu1 %v15865_v9 }
0x1505   :  { %12364 = vmatpush2.bf16.msra.mxu0 %v15868_v46  ;;  %12324 = vmatprep.subr.bf16.mxu1 %v15873_v37 }
0x1506   :  { %12365 = vmatprep.subr.bf16.mxu0 %v15876_v41 }
0x1508   :  { %12325 = vmatpush2.bf16.msra.mxu1 %v15871_v51 }
0x1509   :  { %12366 = vmatpush2.bf16.msra.mxu0 %v15874_v56  ;;  %12326 = vmatprep.subr.bf16.mxu1 %v15879_v52 }
0x150a   :  { %12367 = vmatprep.subr.bf16.mxu0 %v15882_v4 }
0x150b   :  { %v20843_v32 = vpop.eup %15953 }
0x150c   :  { %12327 = vmatpush2.bf16.msra.mxu1 %v15877_v50 }
0x150d   :  { %v20845_v49 = vpop.eup %15955  ;;  %12368 = vmatpush2.bf16.msra.mxu0 %v15880_v17  ;;  %12328 = vmatprep.subr.bf16.mxu1 %v15885_v35 }
0x150e   :  { %12369 = vmatprep.subr.bf16.mxu0 %v15888_v36  ;;  %v11876_v48 = vcombine.low %v20843_v32, %v20845_v49 }
0x1510   :  { %12329 = vmatpush2.bf16.msra.mxu1 %v15883_v13 }
0x1511   :  { %12370 = vmatpush2.bf16.msra.mxu0 %v15886_v57  ;;  %12330 = vmatprep.subr.bf16.mxu1 %v15891_v22 }
0x1512   :  { %12371 = vmatprep.subr.bf16.mxu0 %v15894_v38 }
0x1514   :  { %12331 = vmatpush2.bf16.msra.mxu1 %v15889_v20 }
0x1515   :  { %12372 = vmatpush2.bf16.msra.mxu0 %v15892_v10  ;;  %12332 = vmatprep.subr.bf16.mxu1 %v15897_v47 }
0x1516   :  { %12373 = vmatprep.subr.bf16.mxu0 %v15900_v26 }
0x1518   :  { %12333 = vmatpush2.bf16.msra.mxu1 %v15895_v5 }
0x1519   :  { %12374 = vmatpush2.bf16.msra.mxu0 %v15898_v43  ;;  %12334 = vmatprep.subr.bf16.mxu1 %v15903_v45 }
0x151a   :  { %12375 = vmatprep.subr.bf16.mxu0 %v15906_v61 }
0x151c   :  { %12335 = vmatpush2.bf16.msra.mxu1 %v15901_v58 }
0x151d   :  { %12376 = vmatpush2.bf16.msra.mxu0 %v15904_v6  ;;  %12336 = vmatprep.subr.bf16.mxu1 %v15909_v7 }
0x151e   :  { %12377 = vmatprep.subr.bf16.mxu0 %v15912_v30 }
0x1520   :  { %12337 = vmatpush2.bf16.msra.mxu1 %v15907_v60 }
0x1521   :  { %12378 = vmatpush2.bf16.msra.mxu0 %v15910_v2 }
0x1523   :  { %v11580_v21 = vpop.f32.mrf.mxu1  ;;  %12339 = vmatmul.mubr.bf16.vlgmr.msra.gmra.mxu1 %v20396_v0 }
0x1524   :  { %v11621_v34 = vpop.f32.mrf.mxu0  ;;  %12380 = vmatmul.mubr.bf16.vlgmr.msra.gmra.mxu0 %v20396_v0  ;;  %12644 = vmatprep.mubr.bf16.mxu1 %v21567_v55 }
0x1525   :  { %v11622_v33 = vadd.f32 %v11621_v34, %v11580_v21  ;;  %v11582_v53 = vpop.f32.mrf.mxu1 }
0x1526   :  { %v11623_v44 = vpop.f32.mrf.mxu0 }
0x1527   :  { %v11624_v29 = vadd.f32 %v11623_v44, %v11582_v53  ;;  %v11584_v23 = vpop.f32.mrf.mxu1 }
0x1528   :  { %v11625_v1 = vpop.f32.mrf.mxu0 }
0x1529   :  { %v11585_v31 = vpop.f32.mrf.mxu1 }
0x152a   :  { %v11626_v12 = vpop.f32.mrf.mxu0 }
0x1563   :  { %v11662_v42 = vpop.f32.mrf.mxu1 }
0x1564   :  { %v11663_v59 = vadd.f32 %v11662_v42, %v11622_v33  ;;  %v11703_v16 = vpop.f32.mrf.mxu0 }
0x1565   :  { %v11664_v63 = vpop.f32.mrf.mxu1 }
0x1566   :  { %v11704_v39 = vadd.f32 %v11703_v16, %v11663_v59  ;;  %v11665_v62 = vadd.f32 %v11664_v63, %v11624_v29  ;;  %v11705_v3 = vpop.f32.mrf.mxu0 }
0x1567   :  { %v11666_v27 = vpop.f32.mrf.mxu1 }
0x1568   :  { %v11706_v25 = vadd.f32 %v11705_v3, %v11665_v62  ;;  %v11707_v0 = vpop.f32.mrf.mxu0 }
0x1569   :  { %v11667_v8 = vpop.f32.mrf.mxu1 }
0x156a   :  { %v11708_v9 = vpop.f32.mrf.mxu0 }
0x156b   :  { %v15918_v9 = vld [vmem:[#allocation17 + $0xf8] sm:$0xff]  }
0x156c   :  { %14493 = vmatprep.subr.bf16.mxu0 %v15918_v9 }
0x15a3   :  { %v11744_v46 = vpop.f32.mrf.mxu1 }
0x15a4   :  { %v11745_v37 = vadd.f32 %v11744_v46, %v11704_v39  ;;  %v11785_v41 = vpop.f32.mrf.mxu0  ;;  %v15920_v46 = vld [vmem:[#allocation17 + $0xb8] sm:$0xff]  }
0x15a5   :  { %v11746_v51 = vpop.f32.mrf.mxu1  ;;  %14494 = vmatpush3.bf16.msra.mxu0 %v15920_v46 }
0x15a6   :  { %v20852_v56 = vadd.f32 %v11785_v41, %v11745_v37  ;;  %v11747_v52 = vadd.f32 %v11746_v51, %v11706_v25  ;;  %v11787_v4 = vpop.f32.mrf.mxu0  ;;  %v15922_v37 = vld [vmem:[#allocation17 + $0xf0] sm:$0xff]   ;;  %v15926_v51 = vld [vmem:[#allocation17 + $0xe8] sm:$0xff]  }
0x15a7   :  { %v11748_v50 = vpop.f32.mrf.mxu1  ;;  %14495 = vmatprep.subr.bf16.mxu0 %v15922_v37  ;;  %v15924_v41 = vld [vmem:[#allocation17 + $0xb0] sm:$0xff]  }
0x15a8   :  { %v11804_v17 = vrot.slane %v20852_v56, 4  ;;  %v11822_v35 = vmul.f32 %v20852_v56, %v20852_v56  ;;  %v20857_v36 = vadd.f32 %v11787_v4, %v11747_v52  ;;  %v11789_v13 = vpop.f32.mrf.mxu0  ;;  %v15928_v52 = vld [vmem:[#allocation17 + $0xa8] sm:$0xff]   ;;  %v15930_v50 = vld [vmem:[#allocation17 + $0xe0] sm:$0xff]  }
0x15a9   :  { %v11749_v57 = vpop.f32.mrf.mxu1  ;;  %14496 = vmatpush3.bf16.msra.mxu0 %v15924_v41  ;;  %v15932_v13 = vld [vmem:[#allocation17 + $0xa0] sm:$0xff]  }
0x15aa   :  { %v11805_v22 = vadd.f32 %v11804_v17, %v20852_v56  ;;  %v11836_v38 = vrot.slane %v11822_v35, 4  ;;  %v11810_v20 = vrot.slane %v20857_v36, 4  ;;  %v11823_v10 = vmul.f32 %v20857_v36, %v20857_v36  ;;  %v11790_v47 = vpop.f32.mrf.mxu0  ;;  %14497 = vmatprep.subr.bf16.mxu0 %v15926_v51 }
0x15ab   :  { %v11884_v57 = vrot.slane %v11876_v48, %v19982_v28  ;;  %v15936_v47 = vld [vmem:[#allocation17 + $0x98] sm:$0xff]  }
0x15ac   :  { %v11806_v26 = vrot.slane %v11805_v22, 2  ;;  %v11837_v5 = vadd.f32 %v11836_v38, %v11822_v35  ;;  %v11811_v43 = vadd.f32 %v11810_v20, %v20857_v36  ;;  %v11842_v45 = vrot.slane %v11823_v10, 4  ;;  %v15934_v38 = vld [vmem:[#allocation17 + $0xd8] sm:$0xff]  }
0x15ad   :  { %14498 = vmatpush3.bf16.msra.mxu0 %v15928_v52 }
0x15ae   :  { %v11807_v61 = vadd.f32 %v11806_v26, %v11805_v22  ;;  %v11838_v58 = vrot.slane %v11837_v5, 2  ;;  %v11812_v6 = vrot.slane %v11811_v43, 2  ;;  %v11843_v7 = vadd.f32 %v11842_v45, %v11823_v10  ;;  %14499 = vmatprep.subr.bf16.mxu0 %v15930_v50  ;;  %v7833_v10 = vld [vmem:[#allocation12 + $0x11] sm:$0xf] }
0x15b0   :  { %v11808_v30 = vrot.slane %v11807_v61, 1  ;;  %v11839_v60 = vadd.f32 %v11838_v58, %v11837_v5  ;;  %v11813_v2 = vadd.f32 %v11812_v6, %v11811_v43  ;;  %v11844_v21 = vrot.slane %v11843_v7, 2 }
0x15b1   :  { %14500 = vmatpush3.bf16.msra.mxu0 %v15932_v13 }
0x15b2   :  { %v11809_v34 = vadd.f32 %v11808_v30, %v11807_v61  ;;  %v11840_v33 = vrot.slane %v11839_v60, 1  ;;  %v11814_v53 = vrot.slane %v11813_v2, 1  ;;  %v11845_v44 = vadd.f32 %v11844_v21, %v11843_v7  ;;  %14501 = vmatprep.subr.bf16.mxu0 %v15934_v38 }
0x15b4   :  { %v11818_v29 = vmul.f32 0.125, %v11809_v34  ;;  %v11841_v23 = vadd.f32 %v11840_v33, %v11839_v60  ;;  %v11815_v1 = vadd.f32 %v11814_v53, %v11813_v2  ;;  %v11846_v31 = vrot.slane %v11845_v44, 1 }
0x15b5   :  { %14502 = vmatpush3.bf16.msra.mxu0 %v15936_v47 }
0x15b6   :  { %v11850_v12 = vmul.f32 0.125, %v11841_v23  ;;  %v11854_v42 = vmul.f32 %v11818_v29, %v11818_v29  ;;  %v11819_v59 = vmul.f32 0.125, %v11815_v1  ;;  %v11847_v16 = vadd.f32 %v11846_v31, %v11845_v44  ;;  %v7834_v44 = vld [vmem:[#allocation14 + $0x11] sm:$0xf] }
0x15b8   :  { %v11858_v63 = vsub.f32 %v11850_v12, %v11854_v42  ;;  %v11851_v39 = vmul.f32 0.125, %v11847_v16  ;;  %v11855_v62 = vmul.f32 %v11819_v59, %v11819_v59 }
0x15ba   :  { %v11862_v3 = vmax.f32 %v11858_v63, 0.0  ;;  %v11859_v27 = vsub.f32 %v11851_v39, %v11855_v62 }
0x15bc   :  { %v11866_v25 = vadd.f32 1e-05, %v11862_v3  ;;  %v11863_v0 = vmax.f32 %v11859_v27, 0.0 }
0x15be   :  { %v11867_v8 = vadd.f32 1e-05, %v11863_v0  ;;  %15957 = vrsqrt.f32 %v11866_v25 }
0x15c0   :  { %15959 = vrsqrt.f32 %v11867_v8 }
0x15cb   :  { %v15958_v4 = vpop.eup %15957 }
0x15cd   :  { %v15960_v17 = vpop.eup %15959 }
0x15ce   :  { %v11877_v35 = vcombine.low %v15958_v4, %v15960_v17 }
0x15d0   :  { %v11891_v22 = vrot.slane %v11877_v35, %v19982_v28 }
0x15d2   :  { %v11892_v20 = vcombine.low %v11884_v57, %v11891_v22 }
0x15d4   :  { %v11899_v26 = vrot.slane %v11892_v20, %v19982_v28 }
0x15d6   :  { %v11901_v5 = vmul.f32 %v11899_v26, %v7833_v10 }
0x15d8   :  { %v11914_v43 = vrot.slane %v11901_v5, %v20706_v14  ;;  %v11918_v45 = vrot.slane %v11901_v5, %v20709_v11  ;;  %v11906_v61 = vrot.slane %v11901_v5, %v18164_v18  ;;  %v11910_v32 = vrot.slane %v11901_v5, %v19987_v15 }
0x15da   :  { %v20875_v49 = vmul.f32 %v11918_v45, %v20857_v36  ;;  %v11929_v48 = vmul.f32 %v11914_v43, %v11818_v29  ;;  %v11930_v58 = vmul.f32 %v11918_v45, %v11819_v59  ;;  %v20878_v6 = vmul.f32 %v11910_v32, %v20828_v40 }
0x15db   :  { %v11927_v7 = vmul.f32 %v11906_v61, %v20835_v54  ;;  %v11928_v30 = vmul.f32 %v11910_v32, %v20839_v19  ;;  %v20883_v60 = vmul.f32 %v11906_v61, %v20821_v24  ;;  %v20886_v2 = vmul.f32 %v11914_v43, %v20852_v56 }
0x15dc   :  { %v11936_v21 = vcombine.low %v11929_v48, %v11930_v58 }
0x15dd   :  { %v11935_v34 = vcombine.low %v11927_v7, %v11928_v30 }
0x15de   :  { %v11950_v36 = vrot.slane %v11936_v21, %v19982_v28 }
0x15df   :  { %v11943_v33 = vrot.slane %v11935_v34, %v19982_v28 }
0x15e1   :  { %v11951_v53 = vcombine.low %v11943_v33, %v11950_v36 }
0x15e3   :  { %v20890_v40 = vpop.f32.mrf.mxu1  ;;  %v11958_v54 = vrot.slane %v11951_v53, %v19982_v28 }
0x15e4   :  { %v12388_v19 = vrot.slane %v20890_v40, 4  ;;  %v12416_v24 = vmul.f32 %v20890_v40, %v20890_v40  ;;  %v20896_v29 = vpop.f32.mrf.mxu0 }
0x15e5   :  { %v12400_v56 = vrot.slane %v20896_v29, 4  ;;  %v12418_v23 = vmul.f32 %v20896_v29, %v20896_v29  ;;  %v20901_v1 = vpop.f32.mrf.mxu1  ;;  %v20903_v31 = vsub.f32 %v7834_v44, %v11958_v54 }
0x15e6   :  { %v12389_v12 = vadd.f32 %v12388_v19, %v20890_v40  ;;  %v12420_v42 = vrot.slane %v12416_v24, 4  ;;  %v12394_v59 = vrot.slane %v20901_v1, 4  ;;  %v12417_v16 = vmul.f32 %v20901_v1, %v20901_v1  ;;  %v20909_v63 = vpop.f32.mrf.mxu0 }
0x15e7   :  { %v12401_v39 = vadd.f32 %v12400_v56, %v20896_v29  ;;  %v12432_v62 = vrot.slane %v12418_v23, 4  ;;  %v12406_v3 = vrot.slane %v20909_v63, 4  ;;  %v12419_v27 = vmul.f32 %v20909_v63, %v20909_v63  ;;  %v12344_v25 = vpop.f32.mrf.mxu1 }
0x15e8   :  { %v12390_v0 = vrot.slane %v12389_v12, 2  ;;  %v12421_v8 = vadd.f32 %v12420_v42, %v12416_v24  ;;  %v12395_v9 = vadd.f32 %v12394_v59, %v20901_v1  ;;  %v12426_v46 = vrot.slane %v12417_v16, 4  ;;  %v12385_v37 = vpop.f32.mrf.mxu0 }
0x15e9   :  { %v12402_v41 = vrot.slane %v12401_v39, 2  ;;  %v12433_v51 = vadd.f32 %v12432_v62, %v12418_v23  ;;  %v12407_v52 = vadd.f32 %v12406_v3, %v20909_v63  ;;  %v12438_v4 = vrot.slane %v12419_v27, 4  ;;  %v12345_v50 = vpop.f32.mrf.mxu1 }
0x15ea   :  { %v12391_v17 = vadd.f32 %v12390_v0, %v12389_v12  ;;  %v12422_v35 = vrot.slane %v12421_v8, 2  ;;  %v12396_v13 = vrot.slane %v12395_v9, 2  ;;  %v12427_v57 = vadd.f32 %v12426_v46, %v12417_v16  ;;  %v12386_v22 = vpop.f32.mrf.mxu0 }
0x15eb   :  { %v12403_v38 = vadd.f32 %v12402_v41, %v12401_v39  ;;  %v12434_v20 = vrot.slane %v12433_v51, 2  ;;  %v12408_v10 = vrot.slane %v12407_v52, 2  ;;  %v12439_v47 = vadd.f32 %v12438_v4, %v12419_v27 }
0x15ec   :  { %v12392_v26 = vrot.slane %v12391_v17, 1  ;;  %v12423_v5 = vadd.f32 %v12422_v35, %v12421_v8  ;;  %v12397_v43 = vadd.f32 %v12396_v13, %v12395_v9  ;;  %v12428_v45 = vrot.slane %v12427_v57, 2 }
0x15ed   :  { %v12404_v61 = vrot.slane %v12403_v38, 1  ;;  %v12435_v32 = vadd.f32 %v12434_v20, %v12433_v51  ;;  %v12409_v48 = vadd.f32 %v12408_v10, %v12407_v52  ;;  %v12440_v58 = vrot.slane %v12439_v47, 2 }
0x15ee   :  { %v12393_v7 = vadd.f32 %v12392_v26, %v12391_v17  ;;  %v12424_v30 = vrot.slane %v12423_v5, 1  ;;  %v12398_v21 = vrot.slane %v12397_v43, 1  ;;  %v12429_v34 = vadd.f32 %v12428_v45, %v12427_v57 }
0x15ef   :  { %v12405_v36 = vadd.f32 %v12404_v61, %v12403_v38  ;;  %v12436_v33 = vrot.slane %v12435_v32, 1  ;;  %v12410_v53 = vrot.slane %v12409_v48, 1  ;;  %v12441_v44 = vadd.f32 %v12440_v58, %v12439_v47 }
0x15f0   :  { %v12412_v54 = vmul.f32 0.125, %v12393_v7  ;;  %v12425_v19 = vadd.f32 %v12424_v30, %v12423_v5  ;;  %v12399_v24 = vadd.f32 %v12398_v21, %v12397_v43  ;;  %v12430_v56 = vrot.slane %v12429_v34, 1 }
0x15f1   :  { %v12414_v23 = vmul.f32 0.125, %v12405_v36  ;;  %v12437_v12 = vadd.f32 %v12436_v33, %v12435_v32  ;;  %v12411_v42 = vadd.f32 %v12410_v53, %v12409_v48  ;;  %v12442_v59 = vrot.slane %v12441_v44, 1  ;;  %v7835_v36 = vld [vmem:[#allocation12 + $0x15] sm:$0xf] }
0x15f2   :  { %v12444_v16 = vmul.f32 0.125, %v12425_v19  ;;  %v12448_v39 = vmul.f32 %v12412_v54, %v12412_v54  ;;  %v12413_v62 = vmul.f32 0.125, %v12399_v24  ;;  %v12431_v3 = vadd.f32 %v12430_v56, %v12429_v34 }
0x15f3   :  { %v12446_v27 = vmul.f32 0.125, %v12437_v12  ;;  %v12450_v25 = vmul.f32 %v12414_v23, %v12414_v23  ;;  %v12415_v0 = vmul.f32 0.125, %v12411_v42  ;;  %v12443_v8 = vadd.f32 %v12442_v59, %v12441_v44 }
0x15f4   :  { %v12452_v9 = vsub.f32 %v12444_v16, %v12448_v39  ;;  %v12445_v46 = vmul.f32 0.125, %v12431_v3  ;;  %v12449_v37 = vmul.f32 %v12413_v62, %v12413_v62  ;;  %v11969_v41 = vrot.slane %v20903_v31, %v19987_v15 }
0x15f5   :  { %v12454_v51 = vsub.f32 %v12446_v27, %v12450_v25  ;;  %v12447_v52 = vmul.f32 0.125, %v12443_v8  ;;  %v12451_v4 = vmul.f32 %v12415_v0, %v12415_v0  ;;  %v11965_v50 = vrot.slane %v20903_v31, %v18164_v18  ;;  %v7836_v8 = vld [vmem:[#allocation14 + $0x15] sm:$0xf] }
0x15f6   :  { %v12456_v17 = vmax.f32 %v12452_v9, 0.0  ;;  %v12453_v35 = vsub.f32 %v12445_v46, %v12449_v37  ;;  %v11983_v13 = vadd.f32 %v11969_v41, %v20878_v6  ;;  %v11977_v57 = vrot.slane %v20903_v31, %v20709_v11 }
0x15f7   :  { %v12458_v22 = vmax.f32 %v12454_v51, 0.0  ;;  %v12455_v38 = vsub.f32 %v12447_v52, %v12451_v4  ;;  %v11982_v20 = vadd.f32 %v11965_v50, %v20883_v60  ;;  %v11973_v10 = vrot.slane %v20903_v31, %v20706_v14 }
0x15f8   :  { %v12460_v47 = vadd.f32 1e-05, %v12456_v17  ;;  %v12457_v26 = vmax.f32 %v12453_v35, 0.0  ;;  %v11985_v5 = vadd.f32 %v11977_v57, %v20875_v49 }
0x15f9   :  { %v12462_v43 = vadd.f32 1e-05, %v12458_v22  ;;  %v12459_v45 = vmax.f32 %v12455_v38, 0.0  ;;  %v11984_v61 = vadd.f32 %v11973_v10, %v20886_v2 }
0x15fa   :  { %15961 = vrsqrt.f32 %v12460_v47  ;;  %v12461_v6 = vadd.f32 1e-05, %v12457_v26  ;;  %v15913_v26 = vld [vmem:[#allocation17 + $0x78] sm:$0xff]  }
0x15fb   :  { %15963 = vrsqrt.f32 %v12462_v43  ;;  %v12463_v32 = vadd.f32 1e-05, %v12459_v45  ;;  %v15916_v43 = vld [vmem:[#allocation17 + $0x30] sm:$0xff]   ;;  %v15917_v45 = vld [vmem:[#allocation17 + $0x68] sm:$0xff]  }
0x15fc   :  { %15965 = vrsqrt.f32 %v12461_v6  ;;  %v15921_v6 = vld [vmem:[#allocation17 + $0x60] sm:$0xff]  }
0x15fd   :  { %15967 = vrsqrt.f32 %v12463_v32  ;;  %v15923_v32 = vld [vmem:[#allocation17 + $0x20] sm:$0xff]  }
0x1607   :  { %v15962_v48 = vpop.eup %15961 }
0x1608   :  { %v15964_v58 = vpop.eup %15963 }
0x1609   :  { %v15966_v60 = vpop.eup %15965 }
0x160a   :  { %v15968_v7 = vpop.eup %15967  ;;  %v12472_v30 = vcombine.low %v15962_v48, %v15966_v60  ;;  %v15925_v48 = vld [vmem:[#allocation17 + $0x58] sm:$0xff]   ;;  %v15931_v60 = vld [vmem:[#allocation17 + $0x10] sm:$0xff]  }
0x160b   :  { %v12473_v31 = vcombine.low %v15964_v58, %v15968_v7  ;;  %v15927_v58 = vld [vmem:[#allocation17 + $0x18] sm:$0xff]   ;;  %v15933_v7 = vld [vmem:[#allocation17 + $0x48] sm:$0xff]  }
0x160c   :  { %v12480_v21 = vrot.slane %v12472_v30, %v19982_v28  ;;  %v15935_v30 = vld [vmem:[#allocation17 + $0x8] sm:$0xff]  }
0x160d   :  { %v12487_v49 = vrot.slane %v12473_v31, %v19982_v28  ;;  %v15937_v31 = vld [vmem:[#allocation17 + $0x40] sm:$0xff]  }
0x160f   :  { %v12488_v34 = vcombine.low %v12480_v21, %v12487_v49  ;;  %v15938_v21 = vld [vmem:[#allocation17 + $0xd0] sm:$0xff]   ;;  %v15939_v49 = vld [vmem:[#allocation17] sm:$0xff]  }
0x1610   :  { %14503 = vmatprep.subr.bf16.mxu0 %v15938_v21 }
0x1611   :  { %v12495_v2 = vrot.slane %v12488_v34, %v19982_v28  ;;  %v15940_v34 = vld [vmem:[#allocation17 + $0x90] sm:$0xff]  }
0x1612   :  { %14504 = vmatpush3.bf16.msra.mxu0 %v15940_v34 }
0x1613   :  { %v12497_v33 = vmul.f32 %v12495_v2, %v7835_v36  ;;  %v15941_v36 = vld [vmem:[#allocation17 + $0xc8] sm:$0xff]  }
0x1614   :  { %v15942_v2 = vld [vmem:[#allocation17 + $0x88] sm:$0xff]   ;;  %14505 = vmatprep.subr.bf16.mxu0 %v15941_v36 }
0x1615   :  { %v12502_v53 = vrot.slane %v12497_v33, %v18164_v18  ;;  %v12506_v44 = vrot.slane %v12497_v33, %v19987_v15  ;;  %v12510_v19 = vrot.slane %v12497_v33, %v20706_v14  ;;  %v12514_v24 = vrot.slane %v12497_v33, %v20709_v11  ;;  %v15943_v33 = vld [vmem:[#allocation17 + $0xc0] sm:$0xff]  }
0x1616   :  { %14506 = vmatpush3.bf16.msra.mxu0 %v15942_v2 }
0x1617   :  { %v12523_v56 = vmul.f32 %v12502_v53, %v12412_v54  ;;  %v12524_v12 = vmul.f32 %v12506_v44, %v12413_v62  ;;  %v12525_v42 = vmul.f32 %v12510_v19, %v12414_v23  ;;  %v12526_v59 = vmul.f32 %v12514_v24, %v12415_v0  ;;  %14507 = vmatprep.subr.bf16.mxu0 %v15943_v33 }
0x1618   :  { %v12522_v37 = vmul.f32 %v12514_v24, %v20909_v63  ;;  %v12520_v41 = vmul.f32 %v12506_v44, %v20901_v1  ;;  %v12519_v54 = vmul.f32 %v12502_v53, %v20890_v40  ;;  %v12521_v23 = vmul.f32 %v12510_v19, %v20896_v29  ;;  %v15944_v53 = vld [vmem:[#allocation17 + $0x80] sm:$0xff]  }
0x1619   :  { %v12531_v16 = vcombine.low %v12523_v56, %v12524_v12  ;;  %v12532_v39 = vcombine.low %v12525_v42, %v12526_v59 }
0x161a   :  { %14508 = vmatpush3.bf16.msra.mxu0 %v15944_v53 }
0x161b   :  { %v12539_v3 = vrot.slane %v12531_v16, %v19982_v28  ;;  %v12546_v27 = vrot.slane %v12532_v39, %v19982_v28 }
0x161d   :  { %v12547_v25 = vcombine.low %v12539_v3, %v12546_v27 }
0x161f   :  { %v12554_v9 = vrot.slane %v12547_v25, %v19982_v28 }
0x1621   :  { %v12556_v46 = vsub.f32 %v7836_v8, %v12554_v9 }
0x1623   :  { %v12573_v62 = vrot.slane %v12556_v46, %v20709_v11  ;;  %v12565_v0 = vrot.slane %v12556_v46, %v19987_v15  ;;  %v12561_v51 = vrot.slane %v12556_v46, %v18164_v18  ;;  %v12569_v52 = vrot.slane %v12556_v46, %v20706_v14  ;;  %v12594_v14 = vld [vmem:[#allocation15] sm:$0x1] }
0x1625   :  { %v12581_v4 = vadd.f32 %v12573_v62, %v12522_v37  ;;  %v12579_v50 = vadd.f32 %v12565_v0, %v12520_v41  ;;  %v12578_v28 = vadd.f32 %v12561_v51, %v12519_v54  ;;  %v12580_v17 = vadd.f32 %v12569_v52, %v12521_v23  ;;  %v14294_v54 = vld [vmem:[#allocation18] ss:$0 sm:$0xff] }
0x1627   :  { %v12583_v35 = vadd.f32 %v12579_v50, %v11983_v13  ;;  %v12582_v63 = vadd.f32 %v12578_v28, %v11982_v20  ;;  %v12585_v57 = vadd.f32 %v12581_v4, %v11985_v5  ;;  %v12584_v1 = vadd.f32 %v12580_v17, %v11984_v61  ;;  %v15914_v20 = vld [vmem:[#allocation17 + $0x38] sm:$0xff]   ;;  %v15915_v5 = vld [vmem:[#allocation17 + $0x70] sm:$0xff]   ;;  %v15919_v61 = vld [vmem:[#allocation17 + $0x28] sm:$0xff]  }
0x1629   :  { %v12587_v22 = vmax.f32 %v12583_v35, 0.0  ;;  %v12586_v40 = vmax.f32 %v12582_v63, 0.0  ;;  %v12589_v38 = vmax.f32 %v12585_v57, 0.0  ;;  %v12588_v29 = vmax.f32 %v12584_v1, 0.0 }
0x162b   :  { %v12591_v11 = vpack.c.bf16 %v12587_v22, %v12587_v22  ;;  %v12590_v10 = vpack.c.bf16 %v12586_v40, %v12586_v40  ;;  %v12593_v18 = vpack.c.bf16 %v12589_v38, %v12589_v38  ;;  %v12592_v47 = vpack.c.bf16 %v12588_v29, %v12588_v29 }
0x162d   :  { %14290 = vmatprep.subr.msk.bf16.mxu1 %vm12599_vm11, %v12591_v11  ;;  %v12601_v15 = vsel %vm12599_vm11, %v12590_v10, 0  ;;  %v12607_v13 = vsel %vm12599_vm11, %v12592_v47, 0 }
0x162e   :  { %12627 = vmatpush1.bf16.msra.mxu1 %v12601_v15 }
0x162f   :  { %14292 = vmatprep.subr.msk.bf16.mxu1 %vm12599_vm11, %v12593_v18 }
0x1631   :  { %14291 = vmatmul.mubr.msk.bf16.vlgmr.msra.gmra.mxu1 %vm12595_vm12, %v12594_v14 }
0x1632   :  { %12668 = vmatpush1.bf16.msra.mxu1 %v12607_v13  ;;  %12685 = vmatprep.mubr.bf16.mxu1 %v21567_v55  ;;  %v15929_v55 = vld [vmem:[#allocation17 + $0x50] sm:$0xff]  }
0x1633   :  { %14471 = vmatprep.subr.bf16.mxu1 %v15913_v26 }
0x1639   :  { %14293 = vmatmul.mubr.msk.bf16.vlgmr.msra.gmra.mxu1 %vm12595_vm12, %v12594_v14 }
0x163a   :  { %14472 = vmatpush3.bf16.msra.mxu1 %v15914_v20 }
0x163b   :  { %14473 = vmatprep.subr.bf16.mxu1 %v15915_v5 }
0x163e   :  { %14474 = vmatpush3.bf16.msra.mxu1 %v15916_v43 }
0x163f   :  { %14475 = vmatprep.subr.bf16.mxu1 %v15917_v45 }
0x1642   :  { %14476 = vmatpush3.bf16.msra.mxu1 %v15919_v61 }
0x1643   :  { %14477 = vmatprep.subr.bf16.mxu1 %v15921_v6 }
0x1646   :  { %14478 = vmatpush3.bf16.msra.mxu1 %v15923_v32 }
0x1647   :  { %14479 = vmatprep.subr.bf16.mxu1 %v15925_v48 }
0x164a   :  { %14480 = vmatpush3.bf16.msra.mxu1 %v15927_v58 }
0x164b   :  { %14481 = vmatprep.subr.bf16.mxu1 %v15929_v55 }
0x164e   :  { %14482 = vmatpush3.bf16.msra.mxu1 %v15931_v60 }
0x164f   :  { %14483 = vmatprep.subr.bf16.mxu1 %v15933_v7 }
0x1652   :  { %14484 = vmatpush3.bf16.msra.mxu1 %v15935_v30 }
0x1653   :  { %14485 = vmatprep.subr.bf16.mxu1 %v15937_v31 }
0x1656   :  { %14486 = vmatpush3.bf16.msra.mxu1 %v15939_v49 }
0x16f1   :  { %v12646_v44 = vpop.f32.mrf.mxu1 }
0x16f2   :  { %v12694_v56 = vpack.c.bf16 %v12646_v44, %v12646_v44 }
0x16f3   :  { %v12648_v19 = vpop.f32.mrf.mxu1 }
0x16f4   :  { %v12695_v24 = vpack.c.bf16 %v12648_v19, %v12648_v19 }
0x16f5   :  { %v12650_v12 = vpop.f32.mrf.mxu1 }
0x16f6   :  { %12993 = vmatprep.mubr.bf16.mxu1 %v12695_v24 }
0x16f7   :  { %v12651_v42 = vpop.f32.mrf.mxu1  ;;  %12994 = vmatmul.mubr.bf16.vlgmr.msra.gmra.mxu1 %v12694_v56 }
0x16f9   :  { %v12687_v59 = vpop.f32.mrf.mxu1 }
0x16fa   :  { %v12696_v3 = vpack.c.bf16 %v12687_v59, %v12687_v59 }
0x16fb   :  { %v12689_v16 = vpop.f32.mrf.mxu1 }
0x16fc   :  { %v12697_v39 = vpack.c.bf16 %v12689_v16, %v12689_v16 }
0x16fd   :  { %v12691_v27 = vpop.f32.mrf.mxu1 }
0x16fe   :  { %13033 = vmatprep.mubr.bf16.mxu0 %v12697_v39 }
0x16ff   :  { %v12692_v25 = vpop.f32.mrf.mxu1  ;;  %13034 = vmatmul.mubr.bf16.vlgmr.msra.gmra.mxu0 %v12696_v3 }
0x17b7   :  { %v14487_v8 = vpop.f32.mrf.mxu1 }
0x17b9   :  { %v14488_v9 = vpop.f32.mrf.mxu1 }
0x17ba   :  { %v14489_v41 = vadd.f32 %v14488_v9, %v14487_v8 }
0x17bb   :  { %v14490_v46 = vpop.f32.mrf.mxu1 }
0x17bc   :  { %v12996_v0 = vadd.f32 %v14489_v41, %v14294_v54 }
0x17bd   :  { %v14491_v37 = vpop.f32.mrf.mxu1 }
0x17bf   :  { %v14509_v23 = vpop.f32.mrf.mxu0 }
0x17c1   :  { %v14510_v62 = vpop.f32.mrf.mxu0 }
0x17c2   :  { %v14511_v51 = vadd.f32 %v14510_v62, %v14509_v23 }
0x17c3   :  { %v14512_v52 = vpop.f32.mrf.mxu0 }
0x17c4   :  { %v13036_v4 = vadd.f32 %v14511_v51, %v12996_v0 }
0x17c5   :  { %v14513_v50 = vpop.f32.mrf.mxu0 }
0x17c6   :  { %13041 = vst [vmem:[#allocation27] sm:$0x3] %v13036_v4 }
0x17c7   :  { %16280 = shalt.err (!%p16277_p9)
}
0x17c8   :  { %13051 = dma.vmem_to_hbm [thread:$0]  %s13049_s8, 32, %s20979_s28, [#allocation11]  }
0x17c9   :  { %16313 = dma.done.wait [#allocation11], 32  }
0x17ca   :  { %16314 = vsyncadd [#allocation11], 4294967264 }
0x17cb   :  { %13055 = vsyncpa [#allocation10], 1 }
0x17cc   :  { %13056 = vsyncpa [#allocation13], 1 }
0x17cd   :  { %13057 = vsyncpa [#allocation16], 1 }
0x17ce   :  { %13058 = vsyncpa [#allocation19], 1 }
0x17cf   :  { %13059 = vsyncpa [#allocation22], 1 }
0x17d0   :  { %13060 = vsyncpa [#allocation25], 1 }
0x17d1   :  { %13061 = vsyncpa [#allocation11], 1 }
0x17d2   :  { %13062 = vsyncmov [#allocation8] }
0x17d5   :  { %s13063_s3 = vpop.sfrf %13062 }
0x17d6   :  { %p14327_p10 = scmp.ne.s32.totalorder %s13063_s3, 0 }
0x17d8   :  { %13067 = shalt.err (%p14327_p10)  }
0x17d9   :  { %13069 = vsyncmov [#allocation8 + $0x1] }
0x17dc   :  { %s13070_s14 = vpop.sfrf %13069 }
0x17dd   :  { %p14328_p11 = scmp.ne.s32.totalorder %s13070_s14, 0 }
0x17df   :  { %13074 = shalt.err (%p14328_p11)  }
0x17e0   :  { %13076 = vsyncmov [#allocation8 + $0x2] }
0x17e3   :  { %s13077_s7 = vpop.sfrf %13076 }
0x17e4   :  { %p14329_p12 = scmp.ne.s32.totalorder %s13077_s7, 0 }
0x17e6   :  { %13081 = shalt.err (%p14329_p12)  }
0x17e7   :  { %13083 = vsyncmov [#allocation8 + $0x3] }
0x17ea   :  { %s13084_s28 = vpop.sfrf %13083 }
0x17eb   :  { %p14330_p13 = scmp.ne.s32.totalorder %s13084_s28, 0 }
0x17ed   :  { %13088 = shalt.err (%p14330_p13)  }
0x17ee   :  { %13090 = vsyncmov [#allocation8 + $0x4] }
0x17f1   :  { %s13091_s6 = vpop.sfrf %13090 }
0x17f2   :  { %p14331_p0 = scmp.ne.s32.totalorder %s13091_s6, 0 }
0x17f4   :  { %13095 = shalt.err (%p14331_p0)  }
0x17f5   :  { %13097 = vsyncmov [#allocation8 + $0x5] }
0x17f8   :  { %s13098_s22 = vpop.sfrf %13097 }
0x17f9   :  { %p14332_p1 = scmp.ne.s32.totalorder %s13098_s22, 0 }
0x17fb   :  { %13102 = shalt.err (%p14332_p1)  }

</bundles_post_ra>
